<compile_context>
chip_gen: v7x
topology: tpu7x:2x2x1
jax: 0.10.0
libtpu: 0.0.40
codegen_flags: <defaults>
</compile_context>

<pallas_src>
import functools

import jax
import jax.numpy as jnp
from jax import lax
from jax.experimental import pallas as pl
from jax.experimental.pallas import tpu as pltpu


# ------------------------------ small helpers ------------------------------ #

def _elu(x):
    return jnp.where(x > 0, x, jnp.exp(jnp.minimum(x, 0.0)) - 1.0)


def _sigmoid_kernel(x):
    # exp runs on the EUP; the divide becomes an (approx) EUP reciprocal too,
    # keeping VALU slots free.  Error << 1e-2 test tolerance.
    return pl.reciprocal(1.0 + jnp.exp(-x), approx=True)


# ------------------------------ fused Pallas kernel ------------------------------ #

def _fused_head_kernel(feat_ref, h0_ref,
                       convw_ref, convb_ref,
                       fc1w_ref, fc1b_ref,
                       wih_ref, bih_ref,
                       whhf_ref, bhhf_ref,
                       whhb_ref, bhhb_ref,
                       fc2w_ref, fc2b_ref,
                       fc3w_ref, fc3b_ref,
                       raw_ref, hid_ref,
                       y_scratch, flat_scratch,
                       *, B, HW, C_mid, hidden_size):
    """(BN+Conv1x1+BN folded) -> Flatten -> Linear+ELU -> biGRU (seq_len=1)
    -> plan_head_tip, all resident in VMEM."""
    # ---- 1x1 conv (BN1/BN2 pre-folded) as one batch-wide matmul ----
    # feat_ref: (B*HW, C_in)  ->  y_scratch: (B*HW, C_mid)
    y_scratch[...] = (
        jnp.dot(feat_ref[...], convw_ref[...], preferred_element_type=jnp.float32)
        + convb_ref[...])

    # ---- Flatten to (B, HW*C_mid) in hw-major order (fc1 rows pre-permuted). ----
    # Tiny (8 KiB) in-VMEM relayout via unrolled sliced stores; never touches HBM.
    for b in range(B):
        base = b * HW
        for hw in range(HW):
            flat_scratch[b:b + 1, hw * C_mid:(hw + 1) * C_mid] = (
                y_scratch[base + hw:base + hw + 1, :])

    # ---- Linear(1024, 512) + ELU ----
    flat = flat_scratch[...]                                   # (B, HW*C_mid)
    h1 = _elu(jnp.dot(flat, fc1w_ref[...], preferred_element_type=jnp.float32)
              + fc1b_ref[...])                                 # (B, 512)

    # ---- bidirectional GRU, seq_len = 1 (PyTorch gate order [r, z, n]) ----
    H = hidden_size
    # merged forward/backward input projection: one (B,512) @ (512,1536) matmul
    gi = jnp.dot(h1, wih_ref[...], preferred_element_type=jnp.float32) + bih_ref[...]
    h0_f = h0_ref[0]                                           # (B, H)
    h0_b = h0_ref[1]
    gh_f = jnp.dot(h0_f, whhf_ref[...], preferred_element_type=jnp.float32) + bhhf_ref[...]
    gh_b = jnp.dot(h0_b, whhb_ref[...], preferred_element_type=jnp.float32) + bhhb_ref[...]

    def gru_gates(gi_d, gh_d, h0):
        r = _sigmoid_kernel(gi_d[:, 0:H] + gh_d[:, 0:H])
        z = _sigmoid_kernel(gi_d[:, H:2 * H] + gh_d[:, H:2 * H])
        n = jnp.tanh(gi_d[:, 2 * H:3 * H] + r * gh_d[:, 2 * H:3 * H])
        return (1.0 - z) * n + z * h0

    hf = gru_gates(gi[:, 0:3 * H], gh_f, h0_f)
    hb = gru_gates(gi[:, 3 * H:6 * H], gh_b, h0_b)
    hid_ref[0] = hf
    hid_ref[1] = hb
    gru_out = jnp.concatenate([hf, hb], axis=-1)               # (B, 2H)

    # ---- plan_head_tip: ELU -> Linear -> ReLU -> Linear (output padded to 128) ----
    t = _elu(gru_out)
    t = jnp.maximum(
        jnp.dot(t, fc2w_ref[...], preferred_element_type=jnp.float32) + fc2b_ref[...],
        0.0)
    raw_ref[...] = (jnp.dot(t, fc3w_ref[...], preferred_element_type=jnp.float32)
                    + fc3b_ref[...])                           # (B, out_pad) lane-dense


# ------------------------------ wrapper ------------------------------ #

@functools.partial(jax.jit, static_argnums=(3, 4))
def sequence_planning_forward(features_nhwc, hidden, kp, M, num_pts):
    """features_nhwc: (B, H, W, 1408) channels-last backbone feature map."""
    B, H, W, C_in = features_nhwc.shape
    HW = H * W
    C_mid = kp["conv_w"].shape[1]
    hidden_size = hidden.shape[-1]
    out_dim = M * (num_pts * 3 + 1)
    out_pad = kp["fc3_w"].shape[1]

    # Free metadata reshape (contiguous): (B, H, W, C) -> (B*HW, C).
    feat2d = features_nhwc.reshape(B * HW, C_in)

    kernel = functools.partial(_fused_head_kernel, B=B, HW=HW, C_mid=C_mid,
                               hidden_size=hidden_size)
    vmem = pl.BlockSpec(memory_space=pltpu.MemorySpace.VMEM)

    raw_pad, hidden_out = pl.pallas_call(
        kernel,
        in_specs=[vmem] * 16,
        out_specs=(vmem, vmem),
        out_shape=(
            jax.ShapeDtypeStruct((B, out_pad), jnp.float32),
            jax.ShapeDtypeStruct((2, B, hidden_size), jnp.float32),
        ),
        scratch_shapes=[
            pltpu.VMEM((B * HW, C_mid), jnp.float32),     # conv result
            pltpu.VMEM((B, HW * C_mid), jnp.float32),     # flattened conv result
        ],
        compiler_params=pltpu.CompilerParams(vmem_limit_bytes=24 * 1024 * 1024),
    )(feat2d, hidden,
      kp["conv_w"], kp["conv_b"], kp["fc1_w"], kp["fc1_b"],
      kp["wih"], kp["bih"], kp["whh_f"], kp["bhh_f"], kp["whh_b"], kp["bhh_b"],
      kp["fc2_w"], kp["fc2_b"], kp["fc3_w"], kp["fc3_b"])

    # Split + coordinate transform on tiny tensors in the wrapper (XLA glue).
    raw = raw_pad[:, :out_dim]
    pred_cls = raw[:, :M]
    traj = raw[:, M:].reshape(B, M, num_pts, 3)
    pred_trajectory = jnp.concatenate(
        [jnp.exp(traj[..., 0:1]), jnp.sinh(traj[..., 1:2]), traj[..., 2:3]], axis=3)
    return pred_cls, pred_trajectory, hidden_out


# ------------------------------ host-side param prep ------------------------------ #

def prepare_params(p, HW):
    """One-time transform of PyTorch-style params into kernel-ready params:
    fold BN1/BN2 into the 1x1 conv, permute fc1 rows to hw-major flatten order,
    merge GRU input projections, pad fc3 output to a multiple of 128 lanes."""
    C_in, C_mid = p["conv_w"].shape
    D1 = p["fc1_w"].shape[1]
    out_dim = p["fc3_w"].shape[1]

    s1, b1 = p["bn1_s"], p["bn1_b"]
    s2, b2 = p["bn2_s"], p["bn2_b"]
    conv_w = (s1[:, None] * p["conv_w"]) * s2[None, :]
    conv_b = (b1 @ p["conv_w"] + p["conv_b"]) * s2 + b2

    # PyTorch NCHW flatten index is c*HW + hw; kernel flatten is hw*C_mid + c.
    fc1_w = (p["fc1_w"].reshape(C_mid, HW, D1)
             .transpose(1, 0, 2).reshape(HW * C_mid, D1))

    wih = jnp.concatenate([p["wih_f"], p["wih_b"]], axis=1)          # (512, 6H)
    bih = jnp.concatenate([p["bih_f"], p["bih_b"]], axis=0)          # (6H,)

    out_pad = ((out_dim + 127) // 128) * 128
    fc3_w = jnp.pad(p["fc3_w"], ((0, 0), (0, out_pad - out_dim)))
    fc3_b = jnp.pad(p["fc3_b"], (0, out_pad - out_dim))

    row = lambda v: v.reshape(1, -1)
    return dict(
        conv_w=conv_w, conv_b=row(conv_b),
        fc1_w=fc1_w, fc1_b=row(p["fc1_b"]),
        wih=wih, bih=row(bih),
        whh_f=p["whh_f"], bhh_f=row(p["bhh_f"]),
        whh_b=p["whh_b"], bhh_b=row(p["bhh_b"]),
        fc2_w=p["fc2_w"], fc2_b=row(p["fc2_b"]),
        fc3_w=fc3_w, fc3_b=row(fc3_b),
    )


# ------------------------------ reference (pure JAX) ------------------------------ #

def reference_forward(features_nhwc, hidden, p, M, num_pts):
    B, H, W, C_in = features_nhwc.shape
    HW = H * W
    C_mid = p["conv_w"].shape[1]
    hi = lax.Precision.HIGHEST

    x = features_nhwc.reshape(B, HW, C_in)
    x = x * p["bn1_s"] + p["bn1_b"]                                   # BN1 (eval)
    y = jnp.einsum("bsc,cd->bsd", x, p["conv_w"], precision=hi) + p["conv_b"]
    y = y * p["bn2_s"] + p["bn2_b"]                                   # BN2 (eval)
    # PyTorch nn.Flatten on NCHW: (B, C_mid, HW) -> (B, C_mid*HW)
    flat = jnp.transpose(y, (0, 2, 1)).reshape(B, C_mid * HW)

    h1 = _elu(jnp.dot(flat, p["fc1_w"], precision=hi) + p["fc1_b"])

    Hh = hidden.shape[-1]

    def gru_cell(inp, h0, wih, whh, bih, bhh):
        gi = jnp.dot(inp, wih, precision=hi) + bih
        gh = jnp.dot(h0, whh, precision=hi) + bhh
        r = jax.nn.sigmoid(gi[:, :Hh] + gh[:, :Hh])
        z = jax.nn.sigmoid(gi[:, Hh:2 * Hh] + gh[:, Hh:2 * Hh])
        n = jnp.tanh(gi[:, 2 * Hh:] + r * gh[:, 2 * Hh:])
        return (1.0 - z) * n + z * h0

    hf = gru_cell(h1, hidden[0], p["wih_f"], p["whh_f"], p["bih_f"], p["bhh_f"])
    hb = gru_cell(h1, hidden[1], p["wih_b"], p["whh_b"], p["bih_b"], p["bhh_b"])
    hid_out = jnp.stack([hf, hb], axis=0)
    gru_out = jnp.concatenate([hf, hb], axis=-1)

    t = _elu(gru_out)
    t = jnp.maximum(jnp.dot(t, p["fc2_w"], precision=hi) + p["fc2_b"], 0.0)
    raw = jnp.dot(t, p["fc3_w"], precision=hi) + p["fc3_b"]

    cls = raw[:, :M]
    traj = raw[:, M:].reshape(B, M, num_pts, 3)
    xs = jnp.exp(traj[..., 0:1])
    ys = jnp.sinh(traj[..., 1:2])
    zs = traj[..., 2:3]
    return cls, jnp.concatenate([xs, ys, zs], axis=3), hid_out


# ------------------------------ deterministic params ------------------------------ #

def init_params(key, M, num_pts, HW):
    C_in, C_mid = 1408, 32
    gru_in, gru_h = 512, 256
    out_dim = M * (num_pts * 3 + 1)
    ks = iter(jax.random.split(key, 32))

    def nrm(shape, scale):
        return scale * jax.random.normal(next(ks), shape, jnp.float32)

    eps = 1e-5

    def folded_bn(c):
        gamma = 1.0 + nrm((c,), 0.1)
        beta = nrm((c,), 0.1)
        mean = nrm((c,), 0.1)
        var = 0.5 + jax.random.uniform(next(ks), (c,), jnp.float32)
        s = gamma / jnp.sqrt(var + eps)
        b = beta - mean * s
        return s, b

    bn1_s, bn1_b = folded_bn(C_in)
    bn2_s, bn2_b = folded_bn(C_mid)
    return dict(
        bn1_s=bn1_s, bn1_b=bn1_b,
        conv_w=nrm((C_in, C_mid), 0.02), conv_b=nrm((C_mid,), 0.02),
        bn2_s=bn2_s, bn2_b=bn2_b,
        fc1_w=nrm((C_mid * HW, 512), 0.02), fc1_b=nrm((512,), 0.02),
        wih_f=nrm((gru_in, 3 * gru_h), 0.05), whh_f=nrm((gru_h, 3 * gru_h), 0.05),
        bih_f=nrm((3 * gru_h,), 0.05), bhh_f=nrm((3 * gru_h,), 0.05),
        wih_b=nrm((gru_in, 3 * gru_h), 0.05), whh_b=nrm((gru_h, 3 * gru_h), 0.05),
        bih_b=nrm((3 * gru_h,), 0.05), bhh_b=nrm((3 * gru_h,), 0.05),
        fc2_w=nrm((512, 512), 0.05), fc2_b=nrm((512,), 0.05),
        fc3_w=nrm((512, out_dim), 0.05), fc3_b=nrm((out_dim,), 0.05),
    )


# ------------------------------ main ------------------------------ #

if __name__ == "__main__":
    M, num_pts = 3, 8
    B, C_in, Hs, Ws = 2, 1408, 8, 4          # H*W = 32 so Flatten gives 32*32 = 1024
    HW = Hs * Ws

    key = jax.random.PRNGKey(0)
    k_feat, k_hid, k_par = jax.random.split(key, 3)
    # Backbone feature map, emitted channels-last (see TODO at top of file).
    features = jax.random.normal(k_feat, (B, Hs, Ws, C_in), jnp.float32)
    hidden = 0.1 * jax.random.normal(k_hid, (2, B, 256), jnp.float32)
    params = init_params(k_par, M, num_pts, HW)
    kparams = prepare_params(params, HW)

    pred_cls, pred_traj, hid_out = jax.block_until_ready(
        sequence_planning_forward(features, hidden, kparams, M, num_pts))

    ref_cls, ref_traj, ref_hid = reference_forward(features, hidden, params, M, num_pts)

    assert pred_cls.shape == (B, M)
    assert pred_traj.shape == (B, M, num_pts, 3)
    assert hid_out.shape == (2, B, 256)
    assert jnp.allclose(pred_cls, ref_cls, rtol=1e-2, atol=1e-2)
    assert jnp.allclose(pred_traj, ref_traj, rtol=1e-2, atol=1e-2)
    assert jnp.allclose(hid_out, ref_hid, rtol=1e-2, atol=1e-2)

    print("KERNEL_OK")
</pallas_src>

<mosaic_0001>
module attributes {stable_mosaic.version = 11 : i64} {
  func.func @_fused_head_kernel(%arg0: memref<64x1408xf32, #tpu.memory_space<vmem>>, %arg1: memref<2x2x256xf32, #tpu.memory_space<vmem>>, %arg2: memref<1408x32xf32, #tpu.memory_space<vmem>>, %arg3: memref<1x32xf32, #tpu.memory_space<vmem>>, %arg4: memref<1024x512xf32, #tpu.memory_space<vmem>>, %arg5: memref<1x512xf32, #tpu.memory_space<vmem>>, %arg6: memref<512x1536xf32, #tpu.memory_space<vmem>>, %arg7: memref<1x1536xf32, #tpu.memory_space<vmem>>, %arg8: memref<256x768xf32, #tpu.memory_space<vmem>>, %arg9: memref<1x768xf32, #tpu.memory_space<vmem>>, %arg10: memref<256x768xf32, #tpu.memory_space<vmem>>, %arg11: memref<1x768xf32, #tpu.memory_space<vmem>>, %arg12: memref<512x512xf32, #tpu.memory_space<vmem>>, %arg13: memref<1x512xf32, #tpu.memory_space<vmem>>, %arg14: memref<512x128xf32, #tpu.memory_space<vmem>>, %arg15: memref<1x128xf32, #tpu.memory_space<vmem>>, %arg16: memref<2x128xf32, #tpu.memory_space<vmem>>, %arg17: memref<2x2x256xf32, #tpu.memory_space<vmem>>, %arg18: memref<64x32xf32, #tpu.memory_space<vmem>>, %arg19: memref<2x1024xf32, #tpu.memory_space<vmem>>) attributes {dimension_semantics = [], scalar_prefetch = 0 : i64, scratch_operands = 2 : i64, tpu.core_type = #tpu.core_type<tc>} {
    %c0 = arith.constant 0 : index
    %c0_0 = arith.constant 0 : index
    %0 = vector.load %arg0[%c0, %c0_0] : memref<64x1408xf32, #tpu.memory_space<vmem>>, vector<64x1408xf32>
    %c0_1 = arith.constant 0 : index
    %c0_2 = arith.constant 0 : index
    %1 = vector.load %arg2[%c0_1, %c0_2] : memref<1408x32xf32, #tpu.memory_space<vmem>>, vector<1408x32xf32>
    %cst = arith.constant dense<0.000000e+00> : vector<64x32xf32>
    %2 = tpu.matmul %0, %1, %cst {dimension_numbers = #tpu.dot_dimension_numbers<[1], [0], [0], [1], [0, 0, 1, 1], [], []>} : vector<64x1408xf32>, vector<1408x32xf32>, vector<64x32xf32> -> vector<64x32xf32>
    %c0_3 = arith.constant 0 : index
    %c0_4 = arith.constant 0 : index
    %3 = vector.load %arg3[%c0_3, %c0_4] : memref<1x32xf32, #tpu.memory_space<vmem>>, vector<1x32xf32>
    %4 = vector.broadcast %3 : vector<1x32xf32> to vector<64x32xf32>
    %5 = arith.addf %2, %4 : vector<64x32xf32>
    %c0_5 = arith.constant 0 : index
    %c0_6 = arith.constant 0 : index
    %6 = vector.load %arg18[%c0_5, %c0_6] : memref<64x32xf32, #tpu.memory_space<vmem>>, vector<64x32xf32>
    tpu.vector_store %arg18[%c0_5, %c0_6], %5 {strides = array<i32>} : memref<64x32xf32, #tpu.memory_space<vmem>>, vector<64x32xf32>,
    %c0_7 = arith.constant 0 : index
    %c0_8 = arith.constant 0 : index
    %7 = vector.load %arg18[%c0_7, %c0_8] : memref<64x32xf32, #tpu.memory_space<vmem>>, vector<1x32xf32>
    %c0_9 = arith.constant 0 : index
    %c0_10 = arith.constant 0 : index
    %8 = vector.load %arg19[%c0_9, %c0_10] : memref<2x1024xf32, #tpu.memory_space<vmem>>, vector<1x32xf32>
    tpu.vector_store %arg19[%c0_9, %c0_10], %7 {strides = array<i32>} : memref<2x1024xf32, #tpu.memory_space<vmem>>, vector<1x32xf32>,
    %c1 = arith.constant 1 : index
    %c0_11 = arith.constant 0 : index
    %9 = vector.load %arg18[%c1, %c0_11] : memref<64x32xf32, #tpu.memory_space<vmem>>, vector<1x32xf32>
    %c0_12 = arith.constant 0 : index
    %c32 = arith.constant 32 : index
    %10 = vector.load %arg19[%c0_12, %c32] : memref<2x1024xf32, #tpu.memory_space<vmem>>, vector<1x32xf32>
    tpu.vector_store %arg19[%c0_12, %c32], %9 {strides = array<i32>} : memref<2x1024xf32, #tpu.memory_space<vmem>>, vector<1x32xf32>,
    %c2 = arith.constant 2 : index
    %c0_13 = arith.constant 0 : index
    %11 = vector.load %arg18[%c2, %c0_13] : memref<64x32xf32, #tpu.memory_space<vmem>>, vector<1x32xf32>
    %c0_14 = arith.constant 0 : index
    %c64 = arith.constant 64 : index
    %12 = vector.load %arg19[%c0_14, %c64] : memref<2x1024xf32, #tpu.memory_space<vmem>>, vector<1x32xf32>
    tpu.vector_store %arg19[%c0_14, %c64], %11 {strides = array<i32>} : memref<2x1024xf32, #tpu.memory_space<vmem>>, vector<1x32xf32>,
    %c3 = arith.constant 3 : index
    %c0_15 = arith.constant 0 : index
    %13 = vector.load %arg18[%c3, %c0_15] : memref<64x32xf32, #tpu.memory_space<vmem>>, vector<1x32xf32>
    %c0_16 = arith.constant 0 : index
    %c96 = arith.constant 96 : index
    %14 = vector.load %arg19[%c0_16, %c96] : memref<2x1024xf32, #tpu.memory_space<vmem>>, vector<1x32xf32>
    tpu.vector_store %arg19[%c0_16, %c96], %13 {strides = array<i32>} : memref<2x1024xf32, #tpu.memory_space<vmem>>, vector<1x32xf32>,
    %c4 = arith.constant 4 : index
    %c0_17 = arith.constant 0 : index
    %15 = vector.load %arg18[%c4, %c0_17] : memref<64x32xf32, #tpu.memory_space<vmem>>, vector<1x32xf32>
    %c0_18 = arith.constant 0 : index
    %c128 = arith.constant 128 : index
    %16 = vector.load %arg19[%c0_18, %c128] : memref<2x1024xf32, #tpu.memory_space<vmem>>, vector<1x32xf32>
    tpu.vector_store %arg19[%c0_18, %c128], %15 {strides = array<i32>} : memref<2x1024xf32, #tpu.memory_space<vmem>>, vector<1x32xf32>,
    %c5 = arith.constant 5 : index
    %c0_19 = arith.constant 0 : index
    %17 = vector.load %arg18[%c5, %c0_19] : memref<64x32xf32, #tpu.memory_space<vmem>>, vector<1x32xf32>
    %c0_20 = arith.constant 0 : index
    %c160 = arith.constant 160 : index
    %18 = vector.load %arg19[%c0_20, %c160] : memref<2x1024xf32, #tpu.memory_space<vmem>>, vector<1x32xf32>
    tpu.vector_store %arg19[%c0_20, %c160], %17 {strides = array<i32>} : memref<2x1024xf32, #tpu.memory_space<vmem>>, vector<1x32xf32>,
    %c6 = arith.constant 6 : index
    %c0_21 = arith.constant 0 : index
    %19 = vector.load %arg18[%c6, %c0_21] : memref<64x32xf32, #tpu.memory_space<vmem>>, vector<1x32xf32>
    %c0_22 = arith.constant 0 : index
    %c192 = arith.constant 192 : index
    %20 = vector.load %arg19[%c0_22, %c192] : memref<2x1024xf32, #tpu.memory_space<vmem>>, vector<1x32xf32>
    tpu.vector_store %arg19[%c0_22, %c192], %19 {strides = array<i32>} : memref<2x1024xf32, #tpu.memory_space<vmem>>, vector<1x32xf32>,
    %c7 = arith.constant 7 : index
    %c0_23 = arith.constant 0 : index
    %21 = vector.load %arg18[%c7, %c0_23] : memref<64x32xf32, #tpu.memory_space<vmem>>, vector<1x32xf32>
    %c0_24 = arith.constant 0 : index
    %c224 = arith.constant 224 : index
    %22 = vector.load %arg19[%c0_24, %c224] : memref<2x1024xf32, #tpu.memory_space<vmem>>, vector<1x32xf32>
    tpu.vector_store %arg19[%c0_24, %c224], %21 {strides = array<i32>} : memref<2x1024xf32, #tpu.memory_space<vmem>>, vector<1x32xf32>,
    %c8 = arith.constant 8 : index
    %c0_25 = arith.constant 0 : index
    %23 = vector.load %arg18[%c8, %c0_25] : memref<64x32xf32, #tpu.memory_space<vmem>>, vector<1x32xf32>
    %c0_26 = arith.constant 0 : index
    %c256 = arith.constant 256 : index
    %24 = vector.load %arg19[%c0_26, %c256] : memref<2x1024xf32, #tpu.memory_space<vmem>>, vector<1x32xf32>
    tpu.vector_store %arg19[%c0_26, %c256], %23 {strides = array<i32>} : memref<2x1024xf32, #tpu.memory_space<vmem>>, vector<1x32xf32>,
    %c9 = arith.constant 9 : index
    %c0_27 = arith.constant 0 : index
    %25 = vector.load %arg18[%c9, %c0_27] : memref<64x32xf32, #tpu.memory_space<vmem>>, vector<1x32xf32>
    %c0_28 = arith.constant 0 : index
    %c288 = arith.constant 288 : index
    %26 = vector.load %arg19[%c0_28, %c288] : memref<2x1024xf32, #tpu.memory_space<vmem>>, vector<1x32xf32>
    tpu.vector_store %arg19[%c0_28, %c288], %25 {strides = array<i32>} : memref<2x1024xf32, #tpu.memory_space<vmem>>, vector<1x32xf32>,
    %c10 = arith.constant 10 : index
    %c0_29 = arith.constant 0 : index
    %27 = vector.load %arg18[%c10, %c0_29] : memref<64x32xf32, #tpu.memory_space<vmem>>, vector<1x32xf32>
    %c0_30 = arith.constant 0 : index
    %c320 = arith.constant 320 : index
    %28 = vector.load %arg19[%c0_30, %c320] : memref<2x1024xf32, #tpu.memory_space<vmem>>, vector<1x32xf32>
    tpu.vector_store %arg19[%c0_30, %c320], %27 {strides = array<i32>} : memref<2x1024xf32, #tpu.memory_space<vmem>>, vector<1x32xf32>,
    %c11 = arith.constant 11 : index
    %c0_31 = arith.constant 0 : index
    %29 = vector.load %arg18[%c11, %c0_31] : memref<64x32xf32, #tpu.memory_space<vmem>>, vector<1x32xf32>
    %c0_32 = arith.constant 0 : index
    %c352 = arith.constant 352 : index
    %30 = vector.load %arg19[%c0_32, %c352] : memref<2x1024xf32, #tpu.memory_space<vmem>>, vector<1x32xf32>
    tpu.vector_store %arg19[%c0_32, %c352], %29 {strides = array<i32>} : memref<2x1024xf32, #tpu.memory_space<vmem>>, vector<1x32xf32>,
    %c12 = arith.constant 12 : index
    %c0_33 = arith.constant 0 : index
    %31 = vector.load %arg18[%c12, %c0_33] : memref<64x32xf32, #tpu.memory_space<vmem>>, vector<1x32xf32>
    %c0_34 = arith.constant 0 : index
    %c384 = arith.constant 384 : index
    %32 = vector.load %arg19[%c0_34, %c384] : memref<2x1024xf32, #tpu.memory_space<vmem>>, vector<1x32xf32>
    tpu.vector_store %arg19[%c0_34, %c384], %31 {strides = array<i32>} : memref<2x1024xf32, #tpu.memory_space<vmem>>, vector<1x32xf32>,
    %c13 = arith.constant 13 : index
    %c0_35 = arith.constant 0 : index
    %33 = vector.load %arg18[%c13, %c0_35] : memref<64x32xf32, #tpu.memory_space<vmem>>, vector<1x32xf32>
    %c0_36 = arith.constant 0 : index
    %c416 = arith.constant 416 : index
    %34 = vector.load %arg19[%c0_36, %c416] : memref<2x1024xf32, #tpu.memory_space<vmem>>, vector<1x32xf32>
    tpu.vector_store %arg19[%c0_36, %c416], %33 {strides = array<i32>} : memref<2x1024xf32, #tpu.memory_space<vmem>>, vector<1x32xf32>,
    %c14 = arith.constant 14 : index
    %c0_37 = arith.constant 0 : index
    %35 = vector.load %arg18[%c14, %c0_37] : memref<64x32xf32, #tpu.memory_space<vmem>>, vector<1x32xf32>
    %c0_38 = arith.constant 0 : index
    %c448 = arith.constant 448 : index
    %36 = vector.load %arg19[%c0_38, %c448] : memref<2x1024xf32, #tpu.memory_space<vmem>>, vector<1x32xf32>
    tpu.vector_store %arg19[%c0_38, %c448], %35 {strides = array<i32>} : memref<2x1024xf32, #tpu.memory_space<vmem>>, vector<1x32xf32>,
    %c15 = arith.constant 15 : index
    %c0_39 = arith.constant 0 : index
    %37 = vector.load %arg18[%c15, %c0_39] : memref<64x32xf32, #tpu.memory_space<vmem>>, vector<1x32xf32>
    %c0_40 = arith.constant 0 : index
    %c480 = arith.constant 480 : index
    %38 = vector.load %arg19[%c0_40, %c480] : memref<2x1024xf32, #tpu.memory_space<vmem>>, vector<1x32xf32>
    tpu.vector_store %arg19[%c0_40, %c480], %37 {strides = array<i32>} : memref<2x1024xf32, #tpu.memory_space<vmem>>, vector<1x32xf32>,
    %c16 = arith.constant 16 : index
    %c0_41 = arith.constant 0 : index
    %39 = vector.load %arg18[%c16, %c0_41] : memref<64x32xf32, #tpu.memory_space<vmem>>, vector<1x32xf32>
    %c0_42 = arith.constant 0 : index
    %c512 = arith.constant 512 : index
    %40 = vector.load %arg19[%c0_42, %c512] : memref<2x1024xf32, #tpu.memory_space<vmem>>, vector<1x32xf32>
    tpu.vector_store %arg19[%c0_42, %c512], %39 {strides = array<i32>} : memref<2x1024xf32, #tpu.memory_space<vmem>>, vector<1x32xf32>,
    %c17 = arith.constant 17 : index
    %c0_43 = arith.constant 0 : index
    %41 = vector.load %arg18[%c17, %c0_43] : memref<64x32xf32, #tpu.memory_space<vmem>>, vector<1x32xf32>
    %c0_44 = arith.constant 0 : index
    %c544 = arith.constant 544 : index
    %42 = vector.load %arg19[%c0_44, %c544] : memref<2x1024xf32, #tpu.memory_space<vmem>>, vector<1x32xf32>
    tpu.vector_store %arg19[%c0_44, %c544], %41 {strides = array<i32>} : memref<2x1024xf32, #tpu.memory_space<vmem>>, vector<1x32xf32>,
    %c18 = arith.constant 18 : index
    %c0_45 = arith.constant 0 : index
    %43 = vector.load %arg18[%c18, %c0_45] : memref<64x32xf32, #tpu.memory_space<vmem>>, vector<1x32xf32>
    %c0_46 = arith.constant 0 : index
    %c576 = arith.constant 576 : index
    %44 = vector.load %arg19[%c0_46, %c576] : memref<2x1024xf32, #tpu.memory_space<vmem>>, vector<1x32xf32>
    tpu.vector_store %arg19[%c0_46, %c576], %43 {strides = array<i32>} : memref<2x1024xf32, #tpu.memory_space<vmem>>, vector<1x32xf32>,
    %c19 = arith.constant 19 : index
    %c0_47 = arith.constant 0 : index
    %45 = vector.load %arg18[%c19, %c0_47] : memref<64x32xf32, #tpu.memory_space<vmem>>, vector<1x32xf32>
    %c0_48 = arith.constant 0 : index
    %c608 = arith.constant 608 : index
    %46 = vector.load %arg19[%c0_48, %c608] : memref<2x1024xf32, #tpu.memory_space<vmem>>, vector<1x32xf32>
    tpu.vector_store %arg19[%c0_48, %c608], %45 {strides = array<i32>} : memref<2x1024xf32, #tpu.memory_space<vmem>>, vector<1x32xf32>,
    %c20 = arith.constant 20 : index
    %c0_49 = arith.constant 0 : index
    %47 = vector.load %arg18[%c20, %c0_49] : memref<64x32xf32, #tpu.memory_space<vmem>>, vector<1x32xf32>
    %c0_50 = arith.constant 0 : index
    %c640 = arith.constant 640 : index
    %48 = vector.load %arg19[%c0_50, %c640] : memref<2x1024xf32, #tpu.memory_space<vmem>>, vector<1x32xf32>
    tpu.vector_store %arg19[%c0_50, %c640], %47 {strides = array<i32>} : memref<2x1024xf32, #tpu.memory_space<vmem>>, vector<1x32xf32>,
    %c21 = arith.constant 21 : index
    %c0_51 = arith.constant 0 : index
    %49 = vector.load %arg18[%c21, %c0_51] : memref<64x32xf32, #tpu.memory_space<vmem>>, vector<1x32xf32>
    %c0_52 = arith.constant 0 : index
    %c672 = arith.constant 672 : index
    %50 = vector.load %arg19[%c0_52, %c672] : memref<2x1024xf32, #tpu.memory_space<vmem>>, vector<1x32xf32>
    tpu.vector_store %arg19[%c0_52, %c672], %49 {strides = array<i32>} : memref<2x1024xf32, #tpu.memory_space<vmem>>, vector<1x32xf32>,
    %c22 = arith.constant 22 : index
    %c0_53 = arith.constant 0 : index
    %51 = vector.load %arg18[%c22, %c0_53] : memref<64x32xf32, #tpu.memory_space<vmem>>, vector<1x32xf32>
    %c0_54 = arith.constant 0 : index
    %c704 = arith.constant 704 : index
    %52 = vector.load %arg19[%c0_54, %c704] : memref<2x1024xf32, #tpu.memory_space<vmem>>, vector<1x32xf32>
    tpu.vector_store %arg19[%c0_54, %c704], %51 {strides = array<i32>} : memref<2x1024xf32, #tpu.memory_space<vmem>>, vector<1x32xf32>,
    %c23 = arith.constant 23 : index
    %c0_55 = arith.constant 0 : index
    %53 = vector.load %arg18[%c23, %c0_55] : memref<64x32xf32, #tpu.memory_space<vmem>>, vector<1x32xf32>
    %c0_56 = arith.constant 0 : index
    %c736 = arith.constant 736 : index
    %54 = vector.load %arg19[%c0_56, %c736] : memref<2x1024xf32, #tpu.memory_space<vmem>>, vector<1x32xf32>
    tpu.vector_store %arg19[%c0_56, %c736], %53 {strides = array<i32>} : memref<2x1024xf32, #tpu.memory_space<vmem>>, vector<1x32xf32>,
    %c24 = arith.constant 24 : index
    %c0_57 = arith.constant 0 : index
    %55 = vector.load %arg18[%c24, %c0_57] : memref<64x32xf32, #tpu.memory_space<vmem>>, vector<1x32xf32>
    %c0_58 = arith.constant 0 : index
    %c768 = arith.constant 768 : index
    %56 = vector.load %arg19[%c0_58, %c768] : memref<2x1024xf32, #tpu.memory_space<vmem>>, vector<1x32xf32>
    tpu.vector_store %arg19[%c0_58, %c768], %55 {strides = array<i32>} : memref<2x1024xf32, #tpu.memory_space<vmem>>, vector<1x32xf32>,
    %c25 = arith.constant 25 : index
    %c0_59 = arith.constant 0 : index
    %57 = vector.load %arg18[%c25, %c0_59] : memref<64x32xf32, #tpu.memory_space<vmem>>, vector<1x32xf32>
    %c0_60 = arith.constant 0 : index
    %c800 = arith.constant 800 : index
    %58 = vector.load %arg19[%c0_60, %c800] : memref<2x1024xf32, #tpu.memory_space<vmem>>, vector<1x32xf32>
    tpu.vector_store %arg19[%c0_60, %c800], %57 {strides = array<i32>} : memref<2x1024xf32, #tpu.memory_space<vmem>>, vector<1x32xf32>,
    %c26 = arith.constant 26 : index
    %c0_61 = arith.constant 0 : index
    %59 = vector.load %arg18[%c26, %c0_61] : memref<64x32xf32, #tpu.memory_space<vmem>>, vector<1x32xf32>
    %c0_62 = arith.constant 0 : index
    %c832 = arith.constant 832 : index
    %60 = vector.load %arg19[%c0_62, %c832] : memref<2x1024xf32, #tpu.memory_space<vmem>>, vector<1x32xf32>
    tpu.vector_store %arg19[%c0_62, %c832], %59 {strides = array<i32>} : memref<2x1024xf32, #tpu.memory_space<vmem>>, vector<1x32xf32>,
    %c27 = arith.constant 27 : index
    %c0_63 = arith.constant 0 : index
    %61 = vector.load %arg18[%c27, %c0_63] : memref<64x32xf32, #tpu.memory_space<vmem>>, vector<1x32xf32>
    %c0_64 = arith.constant 0 : index
    %c864 = arith.constant 864 : index
    %62 = vector.load %arg19[%c0_64, %c864] : memref<2x1024xf32, #tpu.memory_space<vmem>>, vector<1x32xf32>
    tpu.vector_store %arg19[%c0_64, %c864], %61 {strides = array<i32>} : memref<2x1024xf32, #tpu.memory_space<vmem>>, vector<1x32xf32>,
    %c28 = arith.constant 28 : index
    %c0_65 = arith.constant 0 : index
    %63 = vector.load %arg18[%c28, %c0_65] : memref<64x32xf32, #tpu.memory_space<vmem>>, vector<1x32xf32>
    %c0_66 = arith.constant 0 : index
    %c896 = arith.constant 896 : index
    %64 = vector.load %arg19[%c0_66, %c896] : memref<2x1024xf32, #tpu.memory_space<vmem>>, vector<1x32xf32>
    tpu.vector_store %arg19[%c0_66, %c896], %63 {strides = array<i32>} : memref<2x1024xf32, #tpu.memory_space<vmem>>, vector<1x32xf32>,
    %c29 = arith.constant 29 : index
    %c0_67 = arith.constant 0 : index
    %65 = vector.load %arg18[%c29, %c0_67] : memref<64x32xf32, #tpu.memory_space<vmem>>, vector<1x32xf32>
    %c0_68 = arith.constant 0 : index
    %c928 = arith.constant 928 : index
    %66 = vector.load %arg19[%c0_68, %c928] : memref<2x1024xf32, #tpu.memory_space<vmem>>, vector<1x32xf32>
    tpu.vector_store %arg19[%c0_68, %c928], %65 {strides = array<i32>} : memref<2x1024xf32, #tpu.memory_space<vmem>>, vector<1x32xf32>,
    %c30 = arith.constant 30 : index
    %c0_69 = arith.constant 0 : index
    %67 = vector.load %arg18[%c30, %c0_69] : memref<64x32xf32, #tpu.memory_space<vmem>>, vector<1x32xf32>
    %c0_70 = arith.constant 0 : index
    %c960 = arith.constant 960 : index
    %68 = vector.load %arg19[%c0_70, %c960] : memref<2x1024xf32, #tpu.memory_space<vmem>>, vector<1x32xf32>
    tpu.vector_store %arg19[%c0_70, %c960], %67 {strides = array<i32>} : memref<2x1024xf32, #tpu.memory_space<vmem>>, vector<1x32xf32>,
    %c31 = arith.constant 31 : index
    %c0_71 = arith.constant 0 : index
    %69 = vector.load %arg18[%c31, %c0_71] : memref<64x32xf32, #tpu.memory_space<vmem>>, vector<1x32xf32>
    %c0_72 = arith.constant 0 : index
    %c992 = arith.constant 992 : index
    %70 = vector.load %arg19[%c0_72, %c992] : memref<2x1024xf32, #tpu.memory_space<vmem>>, vector<1x32xf32>
    tpu.vector_store %arg19[%c0_72, %c992], %69 {strides = array<i32>} : memref<2x1024xf32, #tpu.memory_space<vmem>>, vector<1x32xf32>,
    %c32_73 = arith.constant 32 : index
    %c0_74 = arith.constant 0 : index
    %71 = vector.load %arg18[%c32_73, %c0_74] : memref<64x32xf32, #tpu.memory_space<vmem>>, vector<1x32xf32>
    %c1_75 = arith.constant 1 : index
    %c0_76 = arith.constant 0 : index
    %72 = vector.load %arg19[%c1_75, %c0_76] : memref<2x1024xf32, #tpu.memory_space<vmem>>, vector<1x32xf32>
    tpu.vector_store %arg19[%c1_75, %c0_76], %71 {strides = array<i32>} : memref<2x1024xf32, #tpu.memory_space<vmem>>, vector<1x32xf32>,
    %c33 = arith.constant 33 : index
    %c0_77 = arith.constant 0 : index
    %73 = vector.load %arg18[%c33, %c0_77] : memref<64x32xf32, #tpu.memory_space<vmem>>, vector<1x32xf32>
    %c1_78 = arith.constant 1 : index
    %c32_79 = arith.constant 32 : index
    %74 = vector.load %arg19[%c1_78, %c32_79] : memref<2x1024xf32, #tpu.memory_space<vmem>>, vector<1x32xf32>
    tpu.vector_store %arg19[%c1_78, %c32_79], %73 {strides = array<i32>} : memref<2x1024xf32, #tpu.memory_space<vmem>>, vector<1x32xf32>,
    %c34 = arith.constant 34 : index
    %c0_80 = arith.constant 0 : index
    %75 = vector.load %arg18[%c34, %c0_80] : memref<64x32xf32, #tpu.memory_space<vmem>>, vector<1x32xf32>
    %c1_81 = arith.constant 1 : index
    %c64_82 = arith.constant 64 : index
    %76 = vector.load %arg19[%c1_81, %c64_82] : memref<2x1024xf32, #tpu.memory_space<vmem>>, vector<1x32xf32>
    tpu.vector_store %arg19[%c1_81, %c64_82], %75 {strides = array<i32>} : memref<2x1024xf32, #tpu.memory_space<vmem>>, vector<1x32xf32>,
    %c35 = arith.constant 35 : index
    %c0_83 = arith.constant 0 : index
    %77 = vector.load %arg18[%c35, %c0_83] : memref<64x32xf32, #tpu.memory_space<vmem>>, vector<1x32xf32>
    %c1_84 = arith.constant 1 : index
    %c96_85 = arith.constant 96 : index
    %78 = vector.load %arg19[%c1_84, %c96_85] : memref<2x1024xf32, #tpu.memory_space<vmem>>, vector<1x32xf32>
    tpu.vector_store %arg19[%c1_84, %c96_85], %77 {strides = array<i32>} : memref<2x1024xf32, #tpu.memory_space<vmem>>, vector<1x32xf32>,
    %c36 = arith.constant 36 : index
    %c0_86 = arith.constant 0 : index
    %79 = vector.load %arg18[%c36, %c0_86] : memref<64x32xf32, #tpu.memory_space<vmem>>, vector<1x32xf32>
    %c1_87 = arith.constant 1 : index
    %c128_88 = arith.constant 128 : index
    %80 = vector.load %arg19[%c1_87, %c128_88] : memref<2x1024xf32, #tpu.memory_space<vmem>>, vector<1x32xf32>
    tpu.vector_store %arg19[%c1_87, %c128_88], %79 {strides = array<i32>} : memref<2x1024xf32, #tpu.memory_space<vmem>>, vector<1x32xf32>,
    %c37 = arith.constant 37 : index
    %c0_89 = arith.constant 0 : index
    %81 = vector.load %arg18[%c37, %c0_89] : memref<64x32xf32, #tpu.memory_space<vmem>>, vector<1x32xf32>
    %c1_90 = arith.constant 1 : index
    %c160_91 = arith.constant 160 : index
    %82 = vector.load %arg19[%c1_90, %c160_91] : memref<2x1024xf32, #tpu.memory_space<vmem>>, vector<1x32xf32>
    tpu.vector_store %arg19[%c1_90, %c160_91], %81 {strides = array<i32>} : memref<2x1024xf32, #tpu.memory_space<vmem>>, vector<1x32xf32>,
    %c38 = arith.constant 38 : index
    %c0_92 = arith.constant 0 : index
    %83 = vector.load %arg18[%c38, %c0_92] : memref<64x32xf32, #tpu.memory_space<vmem>>, vector<1x32xf32>
    %c1_93 = arith.constant 1 : index
    %c192_94 = arith.constant 192 : index
    %84 = vector.load %arg19[%c1_93, %c192_94] : memref<2x1024xf32, #tpu.memory_space<vmem>>, vector<1x32xf32>
    tpu.vector_store %arg19[%c1_93, %c192_94], %83 {strides = array<i32>} : memref<2x1024xf32, #tpu.memory_space<vmem>>, vector<1x32xf32>,
    %c39 = arith.constant 39 : index
    %c0_95 = arith.constant 0 : index
    %85 = vector.load %arg18[%c39, %c0_95] : memref<64x32xf32, #tpu.memory_space<vmem>>, vector<1x32xf32>
    %c1_96 = arith.constant 1 : index
    %c224_97 = arith.constant 224 : index
    %86 = vector.load %arg19[%c1_96, %c224_97] : memref<2x1024xf32, #tpu.memory_space<vmem>>, vector<1x32xf32>
    tpu.vector_store %arg19[%c1_96, %c224_97], %85 {strides = array<i32>} : memref<2x1024xf32, #tpu.memory_space<vmem>>, vector<1x32xf32>,
    %c40 = arith.constant 40 : index
    %c0_98 = arith.constant 0 : index
    %87 = vector.load %arg18[%c40, %c0_98] : memref<64x32xf32, #tpu.memory_space<vmem>>, vector<1x32xf32>
    %c1_99 = arith.constant 1 : index
    %c256_100 = arith.constant 256 : index
    %88 = vector.load %arg19[%c1_99, %c256_100] : memref<2x1024xf32, #tpu.memory_space<vmem>>, vector<1x32xf32>
    tpu.vector_store %arg19[%c1_99, %c256_100], %87 {strides = array<i32>} : memref<2x1024xf32, #tpu.memory_space<vmem>>, vector<1x32xf32>,
    %c41 = arith.constant 41 : index
    %c0_101 = arith.constant 0 : index
    %89 = vector.load %arg18[%c41, %c0_101] : memref<64x32xf32, #tpu.memory_space<vmem>>, vector<1x32xf32>
    %c1_102 = arith.constant 1 : index
    %c288_103 = arith.constant 288 : index
    %90 = vector.load %arg19[%c1_102, %c288_103] : memref<2x1024xf32, #tpu.memory_space<vmem>>, vector<1x32xf32>
    tpu.vector_store %arg19[%c1_102, %c288_103], %89 {strides = array<i32>} : memref<2x1024xf32, #tpu.memory_space<vmem>>, vector<1x32xf32>,
    %c42 = arith.constant 42 : index
    %c0_104 = arith.constant 0 : index
    %91 = vector.load %arg18[%c42, %c0_104] : memref<64x32xf32, #tpu.memory_space<vmem>>, vector<1x32xf32>
    %c1_105 = arith.constant 1 : index
    %c320_106 = arith.constant 320 : index
    %92 = vector.load %arg19[%c1_105, %c320_106] : memref<2x1024xf32, #tpu.memory_space<vmem>>, vector<1x32xf32>
    tpu.vector_store %arg19[%c1_105, %c320_106], %91 {strides = array<i32>} : memref<2x1024xf32, #tpu.memory_space<vmem>>, vector<1x32xf32>,
    %c43 = arith.constant 43 : index
    %c0_107 = arith.constant 0 : index
    %93 = vector.load %arg18[%c43, %c0_107] : memref<64x32xf32, #tpu.memory_space<vmem>>, vector<1x32xf32>
    %c1_108 = arith.constant 1 : index
    %c352_109 = arith.constant 352 : index
    %94 = vector.load %arg19[%c1_108, %c352_109] : memref<2x1024xf32, #tpu.memory_space<vmem>>, vector<1x32xf32>
    tpu.vector_store %arg19[%c1_108, %c352_109], %93 {strides = array<i32>} : memref<2x1024xf32, #tpu.memory_space<vmem>>, vector<1x32xf32>,
    %c44 = arith.constant 44 : index
    %c0_110 = arith.constant 0 : index
    %95 = vector.load %arg18[%c44, %c0_110] : memref<64x32xf32, #tpu.memory_space<vmem>>, vector<1x32xf32>
    %c1_111 = arith.constant 1 : index
    %c384_112 = arith.constant 384 : index
    %96 = vector.load %arg19[%c1_111, %c384_112] : memref<2x1024xf32, #tpu.memory_space<vmem>>, vector<1x32xf32>
    tpu.vector_store %arg19[%c1_111, %c384_112], %95 {strides = array<i32>} : memref<2x1024xf32, #tpu.memory_space<vmem>>, vector<1x32xf32>,
    %c45 = arith.constant 45 : index
    %c0_113 = arith.constant 0 : index
    %97 = vector.load %arg18[%c45, %c0_113] : memref<64x32xf32, #tpu.memory_space<vmem>>, vector<1x32xf32>
    %c1_114 = arith.constant 1 : index
    %c416_115 = arith.constant 416 : index
    %98 = vector.load %arg19[%c1_114, %c416_115] : memref<2x1024xf32, #tpu.memory_space<vmem>>, vector<1x32xf32>
    tpu.vector_store %arg19[%c1_114, %c416_115], %97 {strides = array<i32>} : memref<2x1024xf32, #tpu.memory_space<vmem>>, vector<1x32xf32>,
    %c46 = arith.constant 46 : index
    %c0_116 = arith.constant 0 : index
    %99 = vector.load %arg18[%c46, %c0_116] : memref<64x32xf32, #tpu.memory_space<vmem>>, vector<1x32xf32>
    %c1_117 = arith.constant 1 : index
    %c448_118 = arith.constant 448 : index
    %100 = vector.load %arg19[%c1_117, %c448_118] : memref<2x1024xf32, #tpu.memory_space<vmem>>, vector<1x32xf32>
    tpu.vector_store %arg19[%c1_117, %c448_118], %99 {strides = array<i32>} : memref<2x1024xf32, #tpu.memory_space<vmem>>, vector<1x32xf32>,
    %c47 = arith.constant 47 : index
    %c0_119 = arith.constant 0 : index
    %101 = vector.load %arg18[%c47, %c0_119] : memref<64x32xf32, #tpu.memory_space<vmem>>, vector<1x32xf32>
    %c1_120 = arith.constant 1 : index
    %c480_121 = arith.constant 480 : index
    %102 = vector.load %arg19[%c1_120, %c480_121] : memref<2x1024xf32, #tpu.memory_space<vmem>>, vector<1x32xf32>
    tpu.vector_store %arg19[%c1_120, %c480_121], %101 {strides = array<i32>} : memref<2x1024xf32, #tpu.memory_space<vmem>>, vector<1x32xf32>,
    %c48 = arith.constant 48 : index
    %c0_122 = arith.constant 0 : index
    %103 = vector.load %arg18[%c48, %c0_122] : memref<64x32xf32, #tpu.memory_space<vmem>>, vector<1x32xf32>
    %c1_123 = arith.constant 1 : index
    %c512_124 = arith.constant 512 : index
    %104 = vector.load %arg19[%c1_123, %c512_124] : memref<2x1024xf32, #tpu.memory_space<vmem>>, vector<1x32xf32>
    tpu.vector_store %arg19[%c1_123, %c512_124], %103 {strides = array<i32>} : memref<2x1024xf32, #tpu.memory_space<vmem>>, vector<1x32xf32>,
    %c49 = arith.constant 49 : index
    %c0_125 = arith.constant 0 : index
    %105 = vector.load %arg18[%c49, %c0_125] : memref<64x32xf32, #tpu.memory_space<vmem>>, vector<1x32xf32>
    %c1_126 = arith.constant 1 : index
    %c544_127 = arith.constant 544 : index
    %106 = vector.load %arg19[%c1_126, %c544_127] : memref<2x1024xf32, #tpu.memory_space<vmem>>, vector<1x32xf32>
    tpu.vector_store %arg19[%c1_126, %c544_127], %105 {strides = array<i32>} : memref<2x1024xf32, #tpu.memory_space<vmem>>, vector<1x32xf32>,
    %c50 = arith.constant 50 : index
    %c0_128 = arith.constant 0 : index
    %107 = vector.load %arg18[%c50, %c0_128] : memref<64x32xf32, #tpu.memory_space<vmem>>, vector<1x32xf32>
    %c1_129 = arith.constant 1 : index
    %c576_130 = arith.constant 576 : index
    %108 = vector.load %arg19[%c1_129, %c576_130] : memref<2x1024xf32, #tpu.memory_space<vmem>>, vector<1x32xf32>
    tpu.vector_store %arg19[%c1_129, %c576_130], %107 {strides = array<i32>} : memref<2x1024xf32, #tpu.memory_space<vmem>>, vector<1x32xf32>,
    %c51 = arith.constant 51 : index
    %c0_131 = arith.constant 0 : index
    %109 = vector.load %arg18[%c51, %c0_131] : memref<64x32xf32, #tpu.memory_space<vmem>>, vector<1x32xf32>
    %c1_132 = arith.constant 1 : index
    %c608_133 = arith.constant 608 : index
    %110 = vector.load %arg19[%c1_132, %c608_133] : memref<2x1024xf32, #tpu.memory_space<vmem>>, vector<1x32xf32>
    tpu.vector_store %arg19[%c1_132, %c608_133], %109 {strides = array<i32>} : memref<2x1024xf32, #tpu.memory_space<vmem>>, vector<1x32xf32>,
    %c52 = arith.constant 52 : index
    %c0_134 = arith.constant 0 : index
    %111 = vector.load %arg18[%c52, %c0_134] : memref<64x32xf32, #tpu.memory_space<vmem>>, vector<1x32xf32>
    %c1_135 = arith.constant 1 : index
    %c640_136 = arith.constant 640 : index
    %112 = vector.load %arg19[%c1_135, %c640_136] : memref<2x1024xf32, #tpu.memory_space<vmem>>, vector<1x32xf32>
    tpu.vector_store %arg19[%c1_135, %c640_136], %111 {strides = array<i32>} : memref<2x1024xf32, #tpu.memory_space<vmem>>, vector<1x32xf32>,
    %c53 = arith.constant 53 : index
    %c0_137 = arith.constant 0 : index
    %113 = vector.load %arg18[%c53, %c0_137] : memref<64x32xf32, #tpu.memory_space<vmem>>, vector<1x32xf32>
    %c1_138 = arith.constant 1 : index
    %c672_139 = arith.constant 672 : index
    %114 = vector.load %arg19[%c1_138, %c672_139] : memref<2x1024xf32, #tpu.memory_space<vmem>>, vector<1x32xf32>
    tpu.vector_store %arg19[%c1_138, %c672_139], %113 {strides = array<i32>} : memref<2x1024xf32, #tpu.memory_space<vmem>>, vector<1x32xf32>,
    %c54 = arith.constant 54 : index
    %c0_140 = arith.constant 0 : index
    %115 = vector.load %arg18[%c54, %c0_140] : memref<64x32xf32, #tpu.memory_space<vmem>>, vector<1x32xf32>
    %c1_141 = arith.constant 1 : index
    %c704_142 = arith.constant 704 : index
    %116 = vector.load %arg19[%c1_141, %c704_142] : memref<2x1024xf32, #tpu.memory_space<vmem>>, vector<1x32xf32>
    tpu.vector_store %arg19[%c1_141, %c704_142], %115 {strides = array<i32>} : memref<2x1024xf32, #tpu.memory_space<vmem>>, vector<1x32xf32>,
    %c55 = arith.constant 55 : index
    %c0_143 = arith.constant 0 : index
    %117 = vector.load %arg18[%c55, %c0_143] : memref<64x32xf32, #tpu.memory_space<vmem>>, vector<1x32xf32>
    %c1_144 = arith.constant 1 : index
    %c736_145 = arith.constant 736 : index
    %118 = vector.load %arg19[%c1_144, %c736_145] : memref<2x1024xf32, #tpu.memory_space<vmem>>, vector<1x32xf32>
    tpu.vector_store %arg19[%c1_144, %c736_145], %117 {strides = array<i32>} : memref<2x1024xf32, #tpu.memory_space<vmem>>, vector<1x32xf32>,
    %c56 = arith.constant 56 : index
    %c0_146 = arith.constant 0 : index
    %119 = vector.load %arg18[%c56, %c0_146] : memref<64x32xf32, #tpu.memory_space<vmem>>, vector<1x32xf32>
    %c1_147 = arith.constant 1 : index
    %c768_148 = arith.constant 768 : index
    %120 = vector.load %arg19[%c1_147, %c768_148] : memref<2x1024xf32, #tpu.memory_space<vmem>>, vector<1x32xf32>
    tpu.vector_store %arg19[%c1_147, %c768_148], %119 {strides = array<i32>} : memref<2x1024xf32, #tpu.memory_space<vmem>>, vector<1x32xf32>,
    %c57 = arith.constant 57 : index
    %c0_149 = arith.constant 0 : index
    %121 = vector.load %arg18[%c57, %c0_149] : memref<64x32xf32, #tpu.memory_space<vmem>>, vector<1x32xf32>
    %c1_150 = arith.constant 1 : index
    %c800_151 = arith.constant 800 : index
    %122 = vector.load %arg19[%c1_150, %c800_151] : memref<2x1024xf32, #tpu.memory_space<vmem>>, vector<1x32xf32>
    tpu.vector_store %arg19[%c1_150, %c800_151], %121 {strides = array<i32>} : memref<2x1024xf32, #tpu.memory_space<vmem>>, vector<1x32xf32>,
    %c58 = arith.constant 58 : index
    %c0_152 = arith.constant 0 : index
    %123 = vector.load %arg18[%c58, %c0_152] : memref<64x32xf32, #tpu.memory_space<vmem>>, vector<1x32xf32>
    %c1_153 = arith.constant 1 : index
    %c832_154 = arith.constant 832 : index
    %124 = vector.load %arg19[%c1_153, %c832_154] : memref<2x1024xf32, #tpu.memory_space<vmem>>, vector<1x32xf32>
    tpu.vector_store %arg19[%c1_153, %c832_154], %123 {strides = array<i32>} : memref<2x1024xf32, #tpu.memory_space<vmem>>, vector<1x32xf32>,
    %c59 = arith.constant 59 : index
    %c0_155 = arith.constant 0 : index
    %125 = vector.load %arg18[%c59, %c0_155] : memref<64x32xf32, #tpu.memory_space<vmem>>, vector<1x32xf32>
    %c1_156 = arith.constant 1 : index
    %c864_157 = arith.constant 864 : index
    %126 = vector.load %arg19[%c1_156, %c864_157] : memref<2x1024xf32, #tpu.memory_space<vmem>>, vector<1x32xf32>
    tpu.vector_store %arg19[%c1_156, %c864_157], %125 {strides = array<i32>} : memref<2x1024xf32, #tpu.memory_space<vmem>>, vector<1x32xf32>,
    %c60 = arith.constant 60 : index
    %c0_158 = arith.constant 0 : index
    %127 = vector.load %arg18[%c60, %c0_158] : memref<64x32xf32, #tpu.memory_space<vmem>>, vector<1x32xf32>
    %c1_159 = arith.constant 1 : index
    %c896_160 = arith.constant 896 : index
    %128 = vector.load %arg19[%c1_159, %c896_160] : memref<2x1024xf32, #tpu.memory_space<vmem>>, vector<1x32xf32>
    tpu.vector_store %arg19[%c1_159, %c896_160], %127 {strides = array<i32>} : memref<2x1024xf32, #tpu.memory_space<vmem>>, vector<1x32xf32>,
    %c61 = arith.constant 61 : index
    %c0_161 = arith.constant 0 : index
    %129 = vector.load %arg18[%c61, %c0_161] : memref<64x32xf32, #tpu.memory_space<vmem>>, vector<1x32xf32>
    %c1_162 = arith.constant 1 : index
    %c928_163 = arith.constant 928 : index
    %130 = vector.load %arg19[%c1_162, %c928_163] : memref<2x1024xf32, #tpu.memory_space<vmem>>, vector<1x32xf32>
    tpu.vector_store %arg19[%c1_162, %c928_163], %129 {strides = array<i32>} : memref<2x1024xf32, #tpu.memory_space<vmem>>, vector<1x32xf32>,
    %c62 = arith.constant 62 : index
    %c0_164 = arith.constant 0 : index
    %131 = vector.load %arg18[%c62, %c0_164] : memref<64x32xf32, #tpu.memory_space<vmem>>, vector<1x32xf32>
    %c1_165 = arith.constant 1 : index
    %c960_166 = arith.constant 960 : index
    %132 = vector.load %arg19[%c1_165, %c960_166] : memref<2x1024xf32, #tpu.memory_space<vmem>>, vector<1x32xf32>
    tpu.vector_store %arg19[%c1_165, %c960_166], %131 {strides = array<i32>} : memref<2x1024xf32, #tpu.memory_space<vmem>>, vector<1x32xf32>,
    %c63 = arith.constant 63 : index
    %c0_167 = arith.constant 0 : index
    %133 = vector.load %arg18[%c63, %c0_167] : memref<64x32xf32, #tpu.memory_space<vmem>>, vector<1x32xf32>
    %c1_168 = arith.constant 1 : index
    %c992_169 = arith.constant 992 : index
    %134 = vector.load %arg19[%c1_168, %c992_169] : memref<2x1024xf32, #tpu.memory_space<vmem>>, vector<1x32xf32>
    tpu.vector_store %arg19[%c1_168, %c992_169], %133 {strides = array<i32>} : memref<2x1024xf32, #tpu.memory_space<vmem>>, vector<1x32xf32>,
    %c0_170 = arith.constant 0 : index
    %c0_171 = arith.constant 0 : index
    %135 = vector.load %arg19[%c0_170, %c0_171] : memref<2x1024xf32, #tpu.memory_space<vmem>>, vector<2x1024xf32>
    %c0_172 = arith.constant 0 : index
    %c0_173 = arith.constant 0 : index
    %136 = vector.load %arg4[%c0_172, %c0_173] : memref<1024x512xf32, #tpu.memory_space<vmem>>, vector<1024x512xf32>
    %cst_174 = arith.constant dense<0.000000e+00> : vector<2x512xf32>
    %137 = tpu.matmul %135, %136, %cst_174 {dimension_numbers = #tpu.dot_dimension_numbers<[1], [0], [0], [1], [0, 0, 1, 1], [], []>} : vector<2x1024xf32>, vector<1024x512xf32>, vector<2x512xf32> -> vector<2x512xf32>
    %c0_175 = arith.constant 0 : index
    %c0_176 = arith.constant 0 : index
    %138 = vector.load %arg5[%c0_175, %c0_176] : memref<1x512xf32, #tpu.memory_space<vmem>>, vector<1x512xf32>
    %139 = vector.broadcast %138 : vector<1x512xf32> to vector<2x512xf32>
    %140 = arith.addf %137, %139 : vector<2x512xf32>
    %cst_177 = arith.constant 0.000000e+00 : f32
    %141 = vector.broadcast %cst_177 : f32 to vector<2x512xf32>
    %142 = arith.cmpf ogt, %140, %141 : vector<2x512xf32>
    %cst_178 = arith.constant 0.000000e+00 : f32
    %143 = vector.broadcast %cst_178 : f32 to vector<2x512xf32>
    %144 = arith.minimumf %140, %143 : vector<2x512xf32>
    %145 = math.exp %144 : vector<2x512xf32>
    %cst_179 = arith.constant 1.000000e+00 : f32
    %146 = vector.broadcast %cst_179 : f32 to vector<2x512xf32>
    %147 = arith.subf %145, %146 : vector<2x512xf32>
    %148 = arith.select %142, %140, %147 : vector<2x512xi1>, vector<2x512xf32>
    %c0_180 = arith.constant 0 : index
    %c0_181 = arith.constant 0 : index
    %149 = vector.load %arg6[%c0_180, %c0_181] : memref<512x1536xf32, #tpu.memory_space<vmem>>, vector<512x1536xf32>
    %cst_182 = arith.constant dense<0.000000e+00> : vector<2x1536xf32>
    %150 = tpu.matmul %148, %149, %cst_182 {dimension_numbers = #tpu.dot_dimension_numbers<[1], [0], [0], [1], [0, 0, 1, 1], [], []>} : vector<2x512xf32>, vector<512x1536xf32>, vector<2x1536xf32> -> vector<2x1536xf32>
    %c0_183 = arith.constant 0 : index
    %c0_184 = arith.constant 0 : index
    %151 = vector.load %arg7[%c0_183, %c0_184] : memref<1x1536xf32, #tpu.memory_space<vmem>>, vector<1x1536xf32>
    %152 = vector.broadcast %151 : vector<1x1536xf32> to vector<2x1536xf32>
    %153 = arith.addf %150, %152 : vector<2x1536xf32>
    %c0_185 = arith.constant 0 : index
    %c0_186 = arith.constant 0 : index
    %c0_187 = arith.constant 0 : index
    %154 = vector.load %arg1[%c0_185, %c0_186, %c0_187] : memref<2x2x256xf32, #tpu.memory_space<vmem>>, vector<1x2x256xf32>
    %155 = vector.shape_cast %154 : vector<1x2x256xf32> to vector<2x256xf32>
    %c1_188 = arith.constant 1 : index
    %c0_189 = arith.constant 0 : index
    %c0_190 = arith.constant 0 : index
    %156 = vector.load %arg1[%c1_188, %c0_189, %c0_190] : memref<2x2x256xf32, #tpu.memory_space<vmem>>, vector<1x2x256xf32>
    %157 = vector.shape_cast %156 : vector<1x2x256xf32> to vector<2x256xf32>
    %c0_191 = arith.constant 0 : index
    %c0_192 = arith.constant 0 : index
    %158 = vector.load %arg8[%c0_191, %c0_192] : memref<256x768xf32, #tpu.memory_space<vmem>>, vector<256x768xf32>
    %cst_193 = arith.constant dense<0.000000e+00> : vector<2x768xf32>
    %159 = tpu.matmul %155, %158, %cst_193 {dimension_numbers = #tpu.dot_dimension_numbers<[1], [0], [0], [1], [0, 0, 1, 1], [], []>} : vector<2x256xf32>, vector<256x768xf32>, vector<2x768xf32> -> vector<2x768xf32>
    %c0_194 = arith.constant 0 : index
    %c0_195 = arith.constant 0 : index
    %160 = vector.load %arg9[%c0_194, %c0_195] : memref<1x768xf32, #tpu.memory_space<vmem>>, vector<1x768xf32>
    %161 = vector.broadcast %160 : vector<1x768xf32> to vector<2x768xf32>
    %162 = arith.addf %159, %161 : vector<2x768xf32>
    %c0_196 = arith.constant 0 : index
    %c0_197 = arith.constant 0 : index
    %163 = vector.load %arg10[%c0_196, %c0_197] : memref<256x768xf32, #tpu.memory_space<vmem>>, vector<256x768xf32>
    %cst_198 = arith.constant dense<0.000000e+00> : vector<2x768xf32>
    %164 = tpu.matmul %157, %163, %cst_198 {dimension_numbers = #tpu.dot_dimension_numbers<[1], [0], [0], [1], [0, 0, 1, 1], [], []>} : vector<2x256xf32>, vector<256x768xf32>, vector<2x768xf32> -> vector<2x768xf32>
    %c0_199 = arith.constant 0 : index
    %c0_200 = arith.constant 0 : index
    %165 = vector.load %arg11[%c0_199, %c0_200] : memref<1x768xf32, #tpu.memory_space<vmem>>, vector<1x768xf32>
    %166 = vector.broadcast %165 : vector<1x768xf32> to vector<2x768xf32>
    %167 = arith.addf %164, %166 : vector<2x768xf32>
    %168 = vector.extract_strided_slice %153 {offsets = [0, 0], sizes = [2, 768], strides = [1, 1]} : vector<2x1536xf32> to vector<2x768xf32>
    %169 = vector.extract_strided_slice %168 {offsets = [0, 0], sizes = [2, 256], strides = [1, 1]} : vector<2x768xf32> to vector<2x256xf32>
    %170 = vector.extract_strided_slice %162 {offsets = [0, 0], sizes = [2, 256], strides = [1, 1]} : vector<2x768xf32> to vector<2x256xf32>
    %171 = arith.addf %169, %170 : vector<2x256xf32>
    %cst_201 = arith.constant 0.000000e+00 : f32
    %172 = vector.broadcast %cst_201 : f32 to vector<2x256xf32>
    %173 = arith.subf %172, %171 : vector<2x256xf32>
    %174 = math.exp %173 : vector<2x256xf32>
    %cst_202 = arith.constant 1.000000e+00 : f32
    %175 = vector.broadcast %cst_202 : f32 to vector<2x256xf32>
    %176 = arith.addf %175, %174 : vector<2x256xf32>
    %177 = tpu.reciprocal %176 {approx = true} : vector<2x256xf32> -> vector<2x256xf32>
    %178 = vector.extract_strided_slice %168 {offsets = [0, 256], sizes = [2, 256], strides = [1, 1]} : vector<2x768xf32> to vector<2x256xf32>
    %179 = vector.extract_strided_slice %162 {offsets = [0, 256], sizes = [2, 256], strides = [1, 1]} : vector<2x768xf32> to vector<2x256xf32>
    %180 = arith.addf %178, %179 : vector<2x256xf32>
    %cst_203 = arith.constant 0.000000e+00 : f32
    %181 = vector.broadcast %cst_203 : f32 to vector<2x256xf32>
    %182 = arith.subf %181, %180 : vector<2x256xf32>
    %183 = math.exp %182 : vector<2x256xf32>
    %cst_204 = arith.constant 1.000000e+00 : f32
    %184 = vector.broadcast %cst_204 : f32 to vector<2x256xf32>
    %185 = arith.addf %184, %183 : vector<2x256xf32>
    %186 = tpu.reciprocal %185 {approx = true} : vector<2x256xf32> -> vector<2x256xf32>
    %187 = vector.extract_strided_slice %168 {offsets = [0, 512], sizes = [2, 256], strides = [1, 1]} : vector<2x768xf32> to vector<2x256xf32>
    %188 = vector.extract_strided_slice %162 {offsets = [0, 512], sizes = [2, 256], strides = [1, 1]} : vector<2x768xf32> to vector<2x256xf32>
    %189 = arith.mulf %177, %188 : vector<2x256xf32>
    %190 = arith.addf %187, %189 : vector<2x256xf32>
    %191 = math.tanh %190 : vector<2x256xf32>
    %cst_205 = arith.constant 1.000000e+00 : f32
    %192 = vector.broadcast %cst_205 : f32 to vector<2x256xf32>
    %193 = arith.subf %192, %186 : vector<2x256xf32>
    %194 = arith.mulf %193, %191 : vector<2x256xf32>
    %195 = arith.mulf %186, %155 : vector<2x256xf32>
    %196 = arith.addf %194, %195 : vector<2x256xf32>
    %197 = vector.extract_strided_slice %153 {offsets = [0, 768], sizes = [2, 768], strides = [1, 1]} : vector<2x1536xf32> to vector<2x768xf32>
    %198 = vector.extract_strided_slice %197 {offsets = [0, 0], sizes = [2, 256], strides = [1, 1]} : vector<2x768xf32> to vector<2x256xf32>
    %199 = vector.extract_strided_slice %167 {offsets = [0, 0], sizes = [2, 256], strides = [1, 1]} : vector<2x768xf32> to vector<2x256xf32>
    %200 = arith.addf %198, %199 : vector<2x256xf32>
    %cst_206 = arith.constant 0.000000e+00 : f32
    %201 = vector.broadcast %cst_206 : f32 to vector<2x256xf32>
    %202 = arith.subf %201, %200 : vector<2x256xf32>
    %203 = math.exp %202 : vector<2x256xf32>
    %cst_207 = arith.constant 1.000000e+00 : f32
    %204 = vector.broadcast %cst_207 : f32 to vector<2x256xf32>
    %205 = arith.addf %204, %203 : vector<2x256xf32>
    %206 = tpu.reciprocal %205 {approx = true} : vector<2x256xf32> -> vector<2x256xf32>
    %207 = vector.extract_strided_slice %197 {offsets = [0, 256], sizes = [2, 256], strides = [1, 1]} : vector<2x768xf32> to vector<2x256xf32>
    %208 = vector.extract_strided_slice %167 {offsets = [0, 256], sizes = [2, 256], strides = [1, 1]} : vector<2x768xf32> to vector<2x256xf32>
    %209 = arith.addf %207, %208 : vector<2x256xf32>
    %cst_208 = arith.constant 0.000000e+00 : f32
    %210 = vector.broadcast %cst_208 : f32 to vector<2x256xf32>
    %211 = arith.subf %210, %209 : vector<2x256xf32>
    %212 = math.exp %211 : vector<2x256xf32>
    %cst_209 = arith.constant 1.000000e+00 : f32
    %213 = vector.broadcast %cst_209 : f32 to vector<2x256xf32>
    %214 = arith.addf %213, %212 : vector<2x256xf32>
    %215 = tpu.reciprocal %214 {approx = true} : vector<2x256xf32> -> vector<2x256xf32>
    %216 = vector.extract_strided_slice %197 {offsets = [0, 512], sizes = [2, 256], strides = [1, 1]} : vector<2x768xf32> to vector<2x256xf32>
    %217 = vector.extract_strided_slice %167 {offsets = [0, 512], sizes = [2, 256], strides = [1, 1]} : vector<2x768xf32> to vector<2x256xf32>
    %218 = arith.mulf %206, %217 : vector<2x256xf32>
    %219 = arith.addf %216, %218 : vector<2x256xf32>
    %220 = math.tanh %219 : vector<2x256xf32>
    %cst_210 = arith.constant 1.000000e+00 : f32
    %221 = vector.broadcast %cst_210 : f32 to vector<2x256xf32>
    %222 = arith.subf %221, %215 : vector<2x256xf32>
    %223 = arith.mulf %222, %220 : vector<2x256xf32>
    %224 = arith.mulf %215, %157 : vector<2x256xf32>
    %225 = arith.addf %223, %224 : vector<2x256xf32>
    %c0_211 = arith.constant 0 : index
    %c0_212 = arith.constant 0 : index
    %c0_213 = arith.constant 0 : index
    %226 = vector.load %arg17[%c0_211, %c0_212, %c0_213] : memref<2x2x256xf32, #tpu.memory_space<vmem>>, vector<1x2x256xf32>
    %227 = vector.shape_cast %226 : vector<1x2x256xf32> to vector<2x256xf32>
    %228 = vector.shape_cast %196 : vector<2x256xf32> to vector<1x2x256xf32>
    tpu.vector_store %arg17[%c0_211, %c0_212, %c0_213], %228 {strides = array<i32>} : memref<2x2x256xf32, #tpu.memory_space<vmem>>, vector<1x2x256xf32>,
    %c1_214 = arith.constant 1 : index
    %c0_215 = arith.constant 0 : index
    %c0_216 = arith.constant 0 : index
    %229 = vector.load %arg17[%c1_214, %c0_215, %c0_216] : memref<2x2x256xf32, #tpu.memory_space<vmem>>, vector<1x2x256xf32>
    %230 = vector.shape_cast %229 : vector<1x2x256xf32> to vector<2x256xf32>
    %231 = vector.shape_cast %225 : vector<2x256xf32> to vector<1x2x256xf32>
    tpu.vector_store %arg17[%c1_214, %c0_215, %c0_216], %231 {strides = array<i32>} : memref<2x2x256xf32, #tpu.memory_space<vmem>>, vector<1x2x256xf32>,
    %232 = tpu.concatenate %196, %225 in 1 : vector<2x256xf32>, vector<2x256xf32> -> vector<2x512xf32>
    %cst_217 = arith.constant 0.000000e+00 : f32
    %233 = vector.broadcast %cst_217 : f32 to vector<2x512xf32>
    %234 = arith.cmpf ogt, %232, %233 : vector<2x512xf32>
    %cst_218 = arith.constant 0.000000e+00 : f32
    %235 = vector.broadcast %cst_218 : f32 to vector<2x512xf32>
    %236 = arith.minimumf %232, %235 : vector<2x512xf32>
    %237 = math.exp %236 : vector<2x512xf32>
    %cst_219 = arith.constant 1.000000e+00 : f32
    %238 = vector.broadcast %cst_219 : f32 to vector<2x512xf32>
    %239 = arith.subf %237, %238 : vector<2x512xf32>
    %240 = arith.select %234, %232, %239 : vector<2x512xi1>, vector<2x512xf32>
    %c0_220 = arith.constant 0 : index
    %c0_221 = arith.constant 0 : index
    %241 = vector.load %arg12[%c0_220, %c0_221] : memref<512x512xf32, #tpu.memory_space<vmem>>, vector<512x512xf32>
    %cst_222 = arith.constant dense<0.000000e+00> : vector<2x512xf32>
    %242 = tpu.matmul %240, %241, %cst_222 {dimension_numbers = #tpu.dot_dimension_numbers<[1], [0], [0], [1], [0, 0, 1, 1], [], []>} : vector<2x512xf32>, vector<512x512xf32>, vector<2x512xf32> -> vector<2x512xf32>
    %c0_223 = arith.constant 0 : index
    %c0_224 = arith.constant 0 : index
    %243 = vector.load %arg13[%c0_223, %c0_224] : memref<1x512xf32, #tpu.memory_space<vmem>>, vector<1x512xf32>
    %244 = vector.broadcast %243 : vector<1x512xf32> to vector<2x512xf32>
    %245 = arith.addf %242, %244 : vector<2x512xf32>
    %cst_225 = arith.constant 0.000000e+00 : f32
    %246 = vector.broadcast %cst_225 : f32 to vector<2x512xf32>
    %247 = arith.maximumf %245, %246 : vector<2x512xf32>
    %c0_226 = arith.constant 0 : index
    %c0_227 = arith.constant 0 : index
    %248 = vector.load %arg14[%c0_226, %c0_227] : memref<512x128xf32, #tpu.memory_space<vmem>>, vector<512x128xf32>
    %cst_228 = arith.constant dense<0.000000e+00> : vector<2x128xf32>
    %249 = tpu.matmul %247, %248, %cst_228 {dimension_numbers = #tpu.dot_dimension_numbers<[1], [0], [0], [1], [0, 0, 1, 1], [], []>} : vector<2x512xf32>, vector<512x128xf32>, vector<2x128xf32> -> vector<2x128xf32>
    %c0_229 = arith.constant 0 : index
    %c0_230 = arith.constant 0 : index
    %250 = vector.load %arg15[%c0_229, %c0_230] : memref<1x128xf32, #tpu.memory_space<vmem>>, vector<1x128xf32>
    %251 = vector.broadcast %250 : vector<1x128xf32> to vector<2x128xf32>
    %252 = arith.addf %249, %251 : vector<2x128xf32>
    %c0_231 = arith.constant 0 : index
    %c0_232 = arith.constant 0 : index
    %253 = vector.load %arg16[%c0_231, %c0_232] : memref<2x128xf32, #tpu.memory_space<vmem>>, vector<2x128xf32>
    tpu.vector_store %arg16[%c0_231, %c0_232], %252 {strides = array<i32>} : memref<2x128xf32, #tpu.memory_space<vmem>>, vector<2x128xf32>,
    return
  }
}

</mosaic_0001>

<bundles_post_ra>
// kernel: sequence_planning_forward.1
= control target key start
LH: loop header
LB: loop body
LE: loop exit
PB: predicated region body
PF: predicated region fallthrough
CT: control target
= control target key end

     0   :  { %s11122_s0 = inlined_call_operand.vmem [shape: f32[64,1408], index: 0, kind: input, shape index: {}]   ;;  %s11123_s1 = inlined_call_operand.hbm [shape: f32[2,2,256], index: 1, kind: input, shape index: {}]   ;;  %s11124_s2 = inlined_call_operand.vmem [shape: f32[1408,32], index: 2, kind: input, shape index: {}]   ;;  %s11125_s3 = inlined_call_operand.hbm [shape: f32[1,32], index: 3, kind: input, shape index: {}]   ;;  %s11126_s4 = inlined_call_operand.hbm [shape: f32[1024,512], index: 4, kind: input, shape index: {}]   ;;  %s11127_s5 = inlined_call_operand.hbm [shape: f32[1,512], index: 5, kind: input, shape index: {}]   ;;  %s11128_s6 = inlined_call_operand.hbm [shape: f32[512,1536], index: 6, kind: input, shape index: {}]   ;;  %s11129_s7 = inlined_call_operand.hbm [shape: f32[1,1536], index: 7, kind: input, shape index: {}]   ;;  %s11130_s8 = inlined_call_operand.hbm [shape: f32[256,768], index: 8, kind: input, shape index: {}]   ;;  %s11131_s9 = inlined_call_operand.hbm [shape: f32[1,768], index: 9, kind: input, shape index: {}]   ;;  %s11132_s10 = inlined_call_operand.hbm [shape: f32[256,768], index: 10, kind: input, shape index: {}]   ;;  %s11133_s11 = inlined_call_operand.hbm [shape: f32[1,768], index: 11, kind: input, shape index: {}]   ;;  %s11134_s12 = inlined_call_operand.hbm [shape: f32[512,512], index: 12, kind: input, shape index: {}]   ;;  %s11135_s13 = inlined_call_operand.hbm [shape: f32[1,512], index: 13, kind: input, shape index: {}]   ;;  %s11136_s14 = inlined_call_operand.hbm [shape: f32[512,128], index: 14, kind: input, shape index: {}]   ;;  %s11137_s15 = inlined_call_operand.hbm [shape: f32[1,128], index: 15, kind: input, shape index: {}]   ;;  %s11138_s16 = inlined_call_operand.vmem [shape: f32[2,128], index: 16, kind: output, shape index: {0}]   ;;  %s11139_s17 = inlined_call_operand.hbm [shape: f32[2,2,256], index: 17, kind: output, shape index: {1}]  }
   0x1   :  { %11142 = sst [smem:[#allocation37_spill]] %s11122_s0 }
   0x2   :  { %11143 = sst [smem:[#allocation38_spill]] %s11123_s1 }
   0x3   :  { %23 = vsyncpa [#allocation5], 0 }
   0x4   :  { %24 = vsyncpa [#allocation8], 0 }
   0x5   :  { %25 = vsyncpa [#allocation11], 0 }
   0x6   :  { %26 = vsyncpa [#allocation14], 0 }
   0x7   :  { %27 = vsyncpa [#allocation17], 0 }
   0x8   :  { %28 = vsyncpa [#allocation20], 0 }
   0x9   :  { %29 = vsyncpa [#allocation23], 0 }
   0xa   :  { %30 = vsyncpa [#allocation26], 0 }
   0xb   :  { %31 = vsyncpa [#allocation6], 0  ;;  %s9644_s24 = smov [#allocation7]   ;;  %s9645_s26 = smov [#allocation10]  }
   0xc   :  { %s54_s25 = sshll.u32 %s9644_s24, 4  ;;  %s76_s27 = sshll.u32 %s9645_s26, 4  ;;  %s55_s25 = int_to_ptr.vmem [resolvable:$true] %s54_s25  ;;  %s77_s27 = int_to_ptr.vmem [resolvable:$true] %s76_s27 }
   0xd   :  { %s9296_s0 = scalar_lea.hbm %s11125_s3, 16 }
   0xe   :  { %p9297_p0 = scmp.ne.s32.totalorder %s11125_s3, %s9296_s0  ;;  %p9300_p1 = scmp.lt.u32.totalorder %s9296_s0, %s11125_s3 }
  0x10   :  { %p9302_p2 = pnand %p9300_p1, %p9297_p0 }
  0x12   :  { %9305 = shalt.err (!%p9302_p2)
}
  0x13   :  { %s9306_s20 = scalar_lea.vmem %s55_s25, 16  ;;  %s9310_s21 = scalar_lea.vmem %s55_s25, 32 }
  0x14   :  { %p9307_p3 = scmp.ne.s32.totalorder %s55_s25, %s9306_s20  ;;  %p9311_p4 = scmp.lt.s32.totalorder %s55_s25, %s55_s25 }
  0x15   :  { %p9312_p5 = scmp.lt.s32.totalorder %s9310_s21, %s9306_s20 }
  0x17   :  { %p9313_p6 = por %p9312_p5, %p9311_p4 }
  0x19   :  { %p9314_p7 = pnand %p9313_p6, %p9307_p3 }
  0x1b   :  { %9317 = shalt.err (!%p9314_p7)
}
  0x1c   :  { %57 = dma.hbm_to_vmem [thread:$0]  %s11125_s3, 16, %s55_s25, [#allocation8]  }
  0x1d   :  { %s9318_s28 = scalar_lea.hbm %s11127_s5, 64 }
  0x1e   :  { %p9319_p8 = scmp.ne.s32.totalorder %s11127_s5, %s9318_s28  ;;  %p9322_p9 = scmp.lt.u32.totalorder %s9318_s28, %s11127_s5 }
  0x20   :  { %p9324_p10 = pnand %p9322_p9, %p9319_p8 }
  0x22   :  { %9327 = shalt.err (!%p9324_p10)
}
  0x23   :  { %s9328_s19 = scalar_lea.vmem %s77_s27, 64  ;;  %p9333_p12 = scmp.lt.s32.totalorder %s77_s27, %s77_s27 }
  0x24   :  { %p9329_p11 = scmp.ne.s32.totalorder %s77_s27, %s9328_s19  ;;  %p9334_p13 = scmp.lt.s32.totalorder %s9328_s19, %s9328_s19 }
  0x26   :  { %p9335_p0 = por %p9334_p13, %p9333_p12 }
  0x28   :  { %p9336_p1 = pnand %p9335_p0, %p9329_p11 }
  0x2a   :  { %9339 = shalt.err (!%p9336_p1)
}
  0x2b   :  { %79 = dma.hbm_to_vmem [thread:$0]  %s11127_s5, 64, %s77_s27, [#allocation11]  }
  0x2c   :  { %s9646_s1 = smov [#allocation13]   ;;  %s9647_s21 = smov [#allocation16]  }
  0x2d   :  { %s98_s20 = sshll.u32 %s9646_s1, 4  ;;  %s120_s22 = sshll.u32 %s9647_s21, 4  ;;  %s99_s20 = int_to_ptr.vmem [resolvable:$true] %s98_s20  ;;  %s121_s22 = int_to_ptr.vmem [resolvable:$true] %s120_s22 }
  0x2e   :  { %s9340_s26 = scalar_lea.hbm %s11129_s7, 192 }
  0x2f   :  { %p9341_p2 = scmp.ne.s32.totalorder %s11129_s7, %s9340_s26  ;;  %p9344_p3 = scmp.lt.u32.totalorder %s9340_s26, %s11129_s7 }
  0x31   :  { %p9346_p4 = pnand %p9344_p3, %p9341_p2 }
  0x33   :  { %9349 = shalt.err (!%p9346_p4)
}
  0x34   :  { %s9350_s5 = scalar_lea.vmem %s99_s20, 192  ;;  %p9355_p6 = scmp.lt.s32.totalorder %s99_s20, %s99_s20 }
  0x35   :  { %p9351_p5 = scmp.ne.s32.totalorder %s99_s20, %s9350_s5  ;;  %p9356_p7 = scmp.lt.s32.totalorder %s9350_s5, %s9350_s5 }
  0x37   :  { %p9357_p8 = por %p9356_p7, %p9355_p6 }
  0x39   :  { %p9358_p9 = pnand %p9357_p8, %p9351_p5 }
  0x3b   :  { %9361 = shalt.err (!%p9358_p9)
}
  0x3c   :  { %101 = dma.hbm_to_vmem [thread:$0]  %s11129_s7, 192, %s99_s20, [#allocation14]  }
  0x3d   :  { %s9362_s25 = scalar_lea.hbm %s11131_s9, 96 }
  0x3e   :  { %p9363_p10 = scmp.ne.s32.totalorder %s11131_s9, %s9362_s25  ;;  %p9366_p11 = scmp.lt.u32.totalorder %s9362_s25, %s11131_s9 }
  0x40   :  { %p9368_p12 = pnand %p9366_p11, %p9363_p10 }
  0x42   :  { %9371 = shalt.err (!%p9368_p12)
}
  0x43   :  { %s9372_s26 = scalar_lea.vmem %s121_s22, 96  ;;  %p9377_p0 = scmp.lt.s32.totalorder %s121_s22, %s121_s22 }
  0x44   :  { %p9373_p13 = scmp.ne.s32.totalorder %s121_s22, %s9372_s26  ;;  %p9378_p1 = scmp.lt.s32.totalorder %s9372_s26, %s9372_s26 }
  0x46   :  { %p9379_p2 = por %p9378_p1, %p9377_p0 }
  0x48   :  { %p9380_p3 = pnand %p9379_p2, %p9373_p13 }
  0x4a   :  { %9383 = shalt.err (!%p9380_p3)
}
  0x4b   :  { %123 = dma.hbm_to_vmem [thread:$0]  %s11131_s9, 96, %s121_s22, [#allocation17]  }
  0x4c   :  { %s9648_s28 = smov [#allocation19]   ;;  %s9649_s0 = smov [#allocation22]  }
  0x4d   :  { %s142_s29 = sshll.u32 %s9648_s28, 4  ;;  %s164_s30 = sshll.u32 %s9649_s0, 4  ;;  %s143_s29 = int_to_ptr.vmem [resolvable:$true] %s142_s29  ;;  %s165_s30 = int_to_ptr.vmem [resolvable:$true] %s164_s30 }
  0x4e   :  { %s9384_s18 = scalar_lea.hbm %s11133_s11, 96 }
  0x4f   :  { %p9385_p4 = scmp.ne.s32.totalorder %s11133_s11, %s9384_s18  ;;  %p9388_p5 = scmp.lt.u32.totalorder %s9384_s18, %s11133_s11 }
  0x51   :  { %p9390_p6 = pnand %p9388_p5, %p9385_p4 }
  0x53   :  { %9393 = shalt.err (!%p9390_p6)
}
  0x54   :  { %s9394_s9 = scalar_lea.vmem %s143_s29, 96  ;;  %p9399_p8 = scmp.lt.s32.totalorder %s143_s29, %s143_s29 }
  0x55   :  { %p9395_p7 = scmp.ne.s32.totalorder %s143_s29, %s9394_s9  ;;  %p9400_p9 = scmp.lt.s32.totalorder %s9394_s9, %s9394_s9 }
  0x57   :  { %p9401_p10 = por %p9400_p9, %p9399_p8 }
  0x59   :  { %p9402_p11 = pnand %p9401_p10, %p9395_p7 }
  0x5b   :  { %9405 = shalt.err (!%p9402_p11)
}
  0x5c   :  { %145 = dma.hbm_to_vmem [thread:$0]  %s11133_s11, 96, %s143_s29, [#allocation20]  }
  0x5d   :  { %s9406_s26 = scalar_lea.hbm %s11135_s13, 64 }
  0x5e   :  { %p9407_p12 = scmp.ne.s32.totalorder %s11135_s13, %s9406_s26  ;;  %p9410_p13 = scmp.lt.u32.totalorder %s9406_s26, %s11135_s13 }
  0x60   :  { %p9412_p0 = pnand %p9410_p13, %p9407_p12 }
  0x62   :  { %9415 = shalt.err (!%p9412_p0)
}
  0x63   :  { %s9416_s5 = scalar_lea.vmem %s165_s30, 64  ;;  %p9421_p2 = scmp.lt.s32.totalorder %s165_s30, %s165_s30 }
  0x64   :  { %p9417_p1 = scmp.ne.s32.totalorder %s165_s30, %s9416_s5  ;;  %p9422_p3 = scmp.lt.s32.totalorder %s9416_s5, %s9416_s5 }
  0x66   :  { %p9423_p4 = por %p9422_p3, %p9421_p2 }
  0x68   :  { %p9424_p5 = pnand %p9423_p4, %p9417_p1 }
  0x6a   :  { %9427 = shalt.err (!%p9424_p5)
}
  0x6b   :  { %167 = dma.hbm_to_vmem [thread:$0]  %s11135_s13, 64, %s165_s30, [#allocation23]  }
  0x6c   :  { %s9650_s27 = smov [#allocation4]   ;;  %s11144_s25 = sld [smem:[#allocation38_spill]] }
  0x6d   :  { %s39_s18 = sshll.u32 %s9650_s27, 4  ;;  %s40_s18 = int_to_ptr.vmem [resolvable:$true] %s39_s18 }
  0x72   :  { %s9428_s1 = scalar_lea.hbm %s11144_s25, 128 }
  0x73   :  { %p9429_p6 = scmp.ne.s32.totalorder %s11144_s25, %s9428_s1  ;;  %p9432_p7 = scmp.lt.u32.totalorder %s9428_s1, %s11144_s25 }
  0x75   :  { %p9434_p8 = pnand %p9432_p7, %p9429_p6 }
  0x77   :  { %9437 = shalt.err (!%p9434_p8)
}
  0x78   :  { %s9438_s24 = scalar_lea.vmem %s40_s18, 128  ;;  %p9443_p10 = scmp.lt.s32.totalorder %s40_s18, %s40_s18 }
  0x79   :  { %p9439_p9 = scmp.ne.s32.totalorder %s40_s18, %s9438_s24  ;;  %p9444_p11 = scmp.lt.s32.totalorder %s9438_s24, %s9438_s24 }
  0x7b   :  { %p9445_p12 = por %p9444_p11, %p9443_p10 }
  0x7d   :  { %p9446_p13 = pnand %p9445_p12, %p9439_p9 }
  0x7f   :  { %9449 = shalt.err (!%p9446_p13)
}
  0x80   :  { %s9651_s13 = smov 64   ;;  %s9652_s30 = smov 4  }
  0x81   :  { %45 = dma.hbm_to_vmem [thread:$0]  %s11144_s25, 128, %s40_s18, [#allocation5], %s9651_s13, %s9651_s13, %s9652_s30  }
  0x82   :  { %s9653_s20 = smov [#allocation9]   ;;  %s9450_s11 = scalar_lea.hbm %s11126_s4, 65536 }
  0x83   :  { %s63_s28 = sshll.u32 %s9653_s20, 4  ;;  %p9451_p0 = scmp.ne.s32.totalorder %s11126_s4, %s9450_s11  ;;  %s64_s28 = int_to_ptr.vmem [resolvable:$true] %s63_s28 }
  0x84   :  { %p9454_p1 = scmp.lt.u32.totalorder %s9450_s11, %s11126_s4 }
  0x86   :  { %p9456_p2 = pnand %p9454_p1, %p9451_p0 }
  0x88   :  { %9459 = shalt.err (!%p9456_p2)
}
  0x89   :  { %s9460_s1 = scalar_lea.vmem %s64_s28, 65536  ;;  %p9465_p4 = scmp.lt.s32.totalorder %s64_s28, %s64_s28 }
  0x8a   :  { %p9461_p3 = scmp.ne.s32.totalorder %s64_s28, %s9460_s1  ;;  %p9466_p5 = scmp.lt.s32.totalorder %s9460_s1, %s9460_s1 }
  0x8c   :  { %p9467_p6 = por %p9466_p5, %p9465_p4 }
  0x8e   :  { %p9468_p7 = pnand %p9467_p6, %p9461_p3 }
  0x90   :  { %9471 = shalt.err (!%p9468_p7)
}
  0x91   :  { %s9654_s18 = smov 512   ;;  %s9655_s25 = smov 32  }
  0x92   :  { %69 = dma.hbm_to_vmem [thread:$0]  %s11126_s4, 65536, %s64_s28, [#allocation8], %s9654_s18, %s9654_s18, %s9655_s25  }
  0x93   :  { %s9656_s21 = smov [#allocation12]   ;;  %s9472_s7 = scalar_lea.hbm %s11128_s6, 98304 }
  0x94   :  { %s85_s23 = sshll.u32 %s9656_s21, 4  ;;  %p9473_p8 = scmp.ne.s32.totalorder %s11128_s6, %s9472_s7  ;;  %s86_s23 = int_to_ptr.vmem [resolvable:$true] %s85_s23 }
  0x95   :  { %p9476_p9 = scmp.lt.u32.totalorder %s9472_s7, %s11128_s6 }
  0x97   :  { %p9478_p10 = pnand %p9476_p9, %p9473_p8 }
  0x99   :  { %9481 = shalt.err (!%p9478_p10)
}
  0x9a   :  { %s9482_s29 = scalar_lea.vmem %s86_s23, 98304  ;;  %p9487_p12 = scmp.lt.s32.totalorder %s86_s23, %s86_s23 }
  0x9b   :  { %p9483_p11 = scmp.ne.s32.totalorder %s86_s23, %s9482_s29  ;;  %p9488_p13 = scmp.lt.s32.totalorder %s9482_s29, %s9482_s29 }
  0x9d   :  { %p9489_p0 = por %p9488_p13, %p9487_p12 }
  0x9f   :  { %p9490_p1 = pnand %p9489_p0, %p9483_p11 }
  0xa1   :  { %9493 = shalt.err (!%p9490_p1)
}
  0xa2   :  { %s9657_s4 = smov 1536   ;;  %s9658_s28 = smov 96  }
  0xa3   :  { %91 = dma.hbm_to_vmem [thread:$0]  %s11128_s6, 98304, %s86_s23, [#allocation11], %s9657_s4, %s9657_s4, %s9658_s28  }
  0xa4   :  { %s9659_s3 = smov [#allocation15]   ;;  %s9494_s21 = scalar_lea.hbm %s11130_s8, 24576 }
  0xa5   :  { %s107_s1 = sshll.u32 %s9659_s3, 4  ;;  %p9495_p2 = scmp.ne.s32.totalorder %s11130_s8, %s9494_s21  ;;  %s108_s1 = int_to_ptr.vmem [resolvable:$true] %s107_s1 }
  0xa6   :  { %p9498_p3 = scmp.lt.u32.totalorder %s9494_s21, %s11130_s8 }
  0xa8   :  { %p9500_p4 = pnand %p9498_p3, %p9495_p2 }
  0xaa   :  { %9503 = shalt.err (!%p9500_p4)
}
  0xab   :  { %s9504_s0 = scalar_lea.vmem %s108_s1, 24576  ;;  %p9509_p6 = scmp.lt.s32.totalorder %s108_s1, %s108_s1 }
  0xac   :  { %p9505_p5 = scmp.ne.s32.totalorder %s108_s1, %s9504_s0  ;;  %p9510_p7 = scmp.lt.s32.totalorder %s9504_s0, %s9504_s0 }
  0xae   :  { %p9511_p8 = por %p9510_p7, %p9509_p6 }
  0xb0   :  { %p9512_p9 = pnand %p9511_p8, %p9505_p5 }
  0xb2   :  { %9515 = shalt.err (!%p9512_p9)
}
  0xb3   :  { %s9660_s6 = smov 768   ;;  %s9661_s23 = smov 48  }
  0xb4   :  { %113 = dma.hbm_to_vmem [thread:$0]  %s11130_s8, 24576, %s108_s1, [#allocation14], %s9660_s6, %s9660_s6, %s9661_s23  }
  0xb5   :  { %s9662_s29 = smov [#allocation18]   ;;  %s9663_s27 = smov [#allocation21]  }
  0xb6   :  { %s129_s4 = sshll.u32 %s9662_s29, 4  ;;  %s151_s19 = sshll.u32 %s9663_s27, 4  ;;  %s130_s4 = int_to_ptr.vmem [resolvable:$true] %s129_s4  ;;  %s9887_s19 = int_to_ptr.vmem [resolvable:$true] %s151_s19 }
  0xb7   :  { %s9516_s22 = scalar_lea.hbm %s11132_s10, 24576 }
  0xb8   :  { %p9517_p10 = scmp.ne.s32.totalorder %s11132_s10, %s9516_s22  ;;  %p9520_p11 = scmp.lt.u32.totalorder %s9516_s22, %s11132_s10 }
  0xba   :  { %p9522_p12 = pnand %p9520_p11, %p9517_p10 }
  0xbc   :  { %9525 = shalt.err (!%p9522_p12)
}
  0xbd   :  { %s9526_s8 = scalar_lea.vmem %s130_s4, 24576  ;;  %p9531_p0 = scmp.lt.s32.totalorder %s130_s4, %s130_s4 }
  0xbe   :  { %p9527_p13 = scmp.ne.s32.totalorder %s130_s4, %s9526_s8  ;;  %p9532_p1 = scmp.lt.s32.totalorder %s9526_s8, %s9526_s8 }
  0xc0   :  { %p9533_p2 = por %p9532_p1, %p9531_p0 }
  0xc2   :  { %p9534_p3 = pnand %p9533_p2, %p9527_p13 }
  0xc4   :  { %9537 = shalt.err (!%p9534_p3)
}
  0xc5   :  { %135 = dma.hbm_to_vmem [thread:$0]  %s11132_s10, 24576, %s130_s4, [#allocation17], %s9660_s6, %s9660_s6, %s9661_s23  }
  0xc6   :  { %s9538_s11 = scalar_lea.hbm %s11134_s12, 32768 }
  0xc7   :  { %p9539_p4 = scmp.ne.s32.totalorder %s11134_s12, %s9538_s11  ;;  %p9542_p5 = scmp.lt.u32.totalorder %s9538_s11, %s11134_s12 }
  0xc9   :  { %p9544_p6 = pnand %p9542_p5, %p9539_p4 }
  0xcb   :  { %9547 = shalt.err (!%p9544_p6)
}
  0xcc   :  { %s9548_s22 = scalar_lea.vmem %s9887_s19, 32768  ;;  %p9553_p8 = scmp.lt.s32.totalorder %s9887_s19, %s9887_s19 }
  0xcd   :  { %p9549_p7 = scmp.ne.s32.totalorder %s9887_s19, %s9548_s22  ;;  %p9554_p9 = scmp.lt.s32.totalorder %s9548_s22, %s9548_s22 }
  0xcf   :  { %p9555_p10 = por %p9554_p9, %p9553_p8 }
  0xd1   :  { %p9556_p11 = pnand %p9555_p10, %p9549_p7 }
  0xd3   :  { %9559 = shalt.err (!%p9556_p11)
}
  0xd4   :  { %157 = dma.hbm_to_vmem [thread:$0]  %s11134_s12, 32768, %s9887_s19, [#allocation20], %s9654_s18, %s9654_s18, %s9655_s25  }
  0xd5   :  { %s9664_s23 = smov [#allocation24]   ;;  %s9560_s26 = scalar_lea.hbm %s11136_s14, 8192 }
  0xd6   :  { %s173_s4 = sshll.u32 %s9664_s23, 4  ;;  %p9561_p12 = scmp.ne.s32.totalorder %s11136_s14, %s9560_s26  ;;  %s174_s4 = int_to_ptr.vmem [resolvable:$true] %s173_s4 }
  0xd7   :  { %p9564_p13 = scmp.lt.u32.totalorder %s9560_s26, %s11136_s14 }
  0xd9   :  { %p9566_p0 = pnand %p9564_p13, %p9561_p12 }
  0xdb   :  { %9569 = shalt.err (!%p9566_p0)
}
  0xdc   :  { %s9570_s0 = scalar_lea.vmem %s174_s4, 8192  ;;  %p9575_p2 = scmp.lt.s32.totalorder %s174_s4, %s174_s4 }
  0xdd   :  { %p9571_p1 = scmp.ne.s32.totalorder %s174_s4, %s9570_s0  ;;  %p9576_p3 = scmp.lt.s32.totalorder %s9570_s0, %s9570_s0 }
  0xdf   :  { %p9577_p4 = por %p9576_p3, %p9575_p2 }
  0xe1   :  { %p9578_p5 = pnand %p9577_p4, %p9571_p1 }
  0xe3   :  { %9581 = shalt.err (!%p9578_p5)
}
  0xe4   :  { %s9665_s12 = smov 128   ;;  %s9666_s18 = smov 8  }
  0xe5   :  { %179 = dma.hbm_to_vmem [thread:$0]  %s11136_s14, 8192, %s174_s4, [#allocation23], %s9665_s12, %s9665_s12, %s9666_s18  }
  0xe6   :  { %s9667_s11 = smov [#allocation25]   ;;  %s9582_s9 = scalar_lea.hbm %s11137_s15, 16 }
  0xe7   :  { %s186_s29 = sshll.u32 %s9667_s11, 4  ;;  %p9583_p6 = scmp.ne.s32.totalorder %s11137_s15, %s9582_s9  ;;  %s187_s29 = int_to_ptr.vmem [resolvable:$true] %s186_s29 }
  0xe8   :  { %p9586_p7 = scmp.lt.u32.totalorder %s9582_s9, %s11137_s15 }
  0xea   :  { %p9588_p8 = pnand %p9586_p7, %p9583_p6 }
  0xec   :  { %9591 = shalt.err (!%p9588_p8)
}
  0xed   :  { %s9592_s21 = scalar_lea.vmem %s187_s29, 16  ;;  %s9596_s14 = scalar_lea.vmem %s187_s29, 32 }
  0xee   :  { %p9593_p9 = scmp.ne.s32.totalorder %s187_s29, %s9592_s21  ;;  %p9597_p10 = scmp.lt.s32.totalorder %s187_s29, %s187_s29 }
  0xef   :  { %p9598_p11 = scmp.lt.s32.totalorder %s9596_s14, %s9592_s21 }
  0xf1   :  { %p9599_p12 = por %p9598_p11, %p9597_p10 }
  0xf3   :  { %p9600_p13 = pnand %p9599_p12, %p9593_p9 }
  0xf5   :  { %9603 = shalt.err (!%p9600_p13)
}
  0xf6   :  { %189 = dma.hbm_to_vmem [thread:$0]  %s11137_s15, 16, %s187_s29, [#allocation26]  }
  0xf7   :  { %9626 = dma.done.wait [#allocation5], 128  }
  0xf8   :  { %9627 = vsyncadd [#allocation5], 4294967168 }
  0xf9   :  { %9628 = dma.done.wait [#allocation8], 65552  }
  0xfa   :  { %9629 = vsyncadd [#allocation8], 4294901744 }
  0xfb   :  { %9630 = dma.done.wait [#allocation11], 98368  }
  0xfc   :  { %9631 = vsyncadd [#allocation11], 4294868928 }
  0xfd   :  { %9632 = dma.done.wait [#allocation14], 24768  }
  0xfe   :  { %9633 = vsyncadd [#allocation14], 4294942528 }
  0xff   :  { %9634 = dma.done.wait [#allocation17], 24672  }
 0x100   :  { %9635 = vsyncadd [#allocation17], 4294942624 }
 0x101   :  { %9636 = dma.done.wait [#allocation20], 32864  }
 0x102   :  { %9637 = vsyncadd [#allocation20], 4294934432 }
 0x103   :  { %9638 = dma.done.wait [#allocation23], 8256  }
 0x104   :  { %9639 = vsyncadd [#allocation23], 4294959040 }
 0x105   :  { %9640 = dma.done.wait [#allocation26], 16  }
 0x106   :  { %9641 = vsyncadd [#allocation26], 4294967280  ;;  %v336_v0 = vld [vmem:[%s11124_s2 + $0x80] sm:$0xff]  ;;  %v337_v1 = vld [vmem:[%s11124_s2 + $0x88] sm:$0xff]  ;;  %s11145_s29 = sld [smem:[#allocation37_spill]]  ;;  %vm1133_vm0 = vcmask 261120  }
 0x107   :  { %v320_v2 = vld [vmem:[%s11124_s2] sm:$0xff]  ;;  %v6968_v3 = vpack.c.bf16 %v337_v1, %v336_v0  ;;  %v321_v4 = vld [vmem:[%s11124_s2 + $0x8] sm:$0xff]  ;;  %v338_v11 = vld [vmem:[%s11124_s2 + $0x90] sm:$0xff]  ;;  %vm1143_vm1 = vcmask 253952   ;;  %vm1157_vm2 = vcmask 516352   ;;  %vm1171_vm3 = vcmask 778752  }
 0x108   :  { %v368_v5 = vld [vmem:[%s11124_s2 + $0x180] sm:$0xff]  ;;  %v369_v6 = vld [vmem:[%s11124_s2 + $0x188] sm:$0xff]  ;;  %v6970_v7 = vpack.c.bf16 %v321_v4, %v320_v2  ;;  %v339_v13 = vld [vmem:[%s11124_s2 + $0x98] sm:$0xff]  ;;  %vm1185_vm4 = vcmask 1041152  }
 0x109   :  { %v7000_v8 = vpack.c.bf16 %v369_v6, %v368_v5  ;;  %v352_v9 = vld [vmem:[%s11124_s2 + $0x100] sm:$0xff]  ;;  %v353_v10 = vld [vmem:[%s11124_s2 + $0x108] sm:$0xff]  ;;  %6969 = vmatprep.subr.bf16.mxu0 %v6968_v3  ;;  %v322_v14 = vld [vmem:[%s11124_s2 + $0x10] sm:$0xff]  ;;  %v6972_v16 = vpack.c.bf16 %v339_v13, %v338_v11 }
 0x10a   :  { %v7002_v12 = vpack.c.bf16 %v353_v10, %v352_v9  ;;  %v323_v15 = vld [vmem:[%s11124_s2 + $0x18] sm:$0xff]  ;;  %6971 = vmatpush3.bf16.msra.mxu0 %v6970_v7  ;;  %v370_v18 = vld [vmem:[%s11124_s2 + $0x190] sm:$0xff]  ;;  %v340_v23 = vld [vmem:[%s11124_s2 + $0xa0] sm:$0xff] }
 0x10b   :  { %7001 = vmatprep.subr.bf16.mxu1 %v7000_v8  ;;  %v6974_v17 = vpack.c.bf16 %v323_v15, %v322_v14  ;;  %v371_v19 = vld [vmem:[%s11124_s2 + $0x198] sm:$0xff]  ;;  %v354_v20 = vld [vmem:[%s11124_s2 + $0x110] sm:$0xff]  ;;  %v341_v24 = vld [vmem:[%s11124_s2 + $0xa8] sm:$0xff]  ;;  %6973 = vmatprep.subr.bf16.mxu0 %v6972_v16 }
 0x10c   :  { %7003 = vmatpush3.bf16.msra.mxu1 %v7002_v12  ;;  %v7004_v21 = vpack.c.bf16 %v371_v19, %v370_v18  ;;  %v355_v22 = vld [vmem:[%s11124_s2 + $0x118] sm:$0xff]  ;;  %v6976_v26 = vpack.c.bf16 %v341_v24, %v340_v23  ;;  %v324_v27 = vld [vmem:[%s11124_s2 + $0x20] sm:$0xff]  ;;  %v325_v28 = vld [vmem:[%s11124_s2 + $0x28] sm:$0xff] }
 0x10d   :  { %v7006_v25 = vpack.c.bf16 %v355_v22, %v354_v20  ;;  %v372_v29 = vld [vmem:[%s11124_s2 + $0x1a0] sm:$0xff]  ;;  %v373_v30 = vld [vmem:[%s11124_s2 + $0x1a8] sm:$0xff]  ;;  %v6978_v33 = vpack.c.bf16 %v325_v28, %v324_v27  ;;  %v342_v35 = vld [vmem:[%s11124_s2 + $0xb0] sm:$0xff] }
 0x10e   :  { %7005 = vmatprep.subr.bf16.mxu1 %v7004_v21  ;;  %v356_v31 = vld [vmem:[%s11124_s2 + $0x120] sm:$0xff]  ;;  %v357_v32 = vld [vmem:[%s11124_s2 + $0x128] sm:$0xff]  ;;  %6975 = vmatpush3.bf16.msra.mxu0 %v6974_v17  ;;  %v7008_v34 = vpack.c.bf16 %v373_v30, %v372_v29  ;;  %v343_v36 = vld [vmem:[%s11124_s2 + $0xb8] sm:$0xff] }
 0x10f   :  { %v326_v37 = vld [vmem:[%s11124_s2 + $0x30] sm:$0xff]  ;;  %6977 = vmatprep.subr.bf16.mxu0 %v6976_v26  ;;  %v7010_v38 = vpack.c.bf16 %v357_v32, %v356_v31  ;;  %v6980_v39 = vpack.c.bf16 %v343_v36, %v342_v35  ;;  %v327_v40 = vld [vmem:[%s11124_s2 + $0x38] sm:$0xff]  ;;  %v344_v46 = vld [vmem:[%s11124_s2 + $0xc0] sm:$0xff] }
 0x110   :  { %7007 = vmatpush3.bf16.msra.mxu1 %v7006_v25  ;;  %v374_v41 = vld [vmem:[%s11124_s2 + $0x1b0] sm:$0xff]  ;;  %v375_v42 = vld [vmem:[%s11124_s2 + $0x1b8] sm:$0xff]  ;;  %v345_v47 = vld [vmem:[%s11124_s2 + $0xc8] sm:$0xff]  ;;  %v6982_v48 = vpack.c.bf16 %v327_v40, %v326_v37 }
 0x111   :  { %7009 = vmatprep.subr.bf16.mxu1 %v7008_v34  ;;  %v7012_v43 = vpack.c.bf16 %v375_v42, %v374_v41  ;;  %v358_v44 = vld [vmem:[%s11124_s2 + $0x130] sm:$0xff]  ;;  %v359_v45 = vld [vmem:[%s11124_s2 + $0x138] sm:$0xff]  ;;  %v376_v49 = vld [vmem:[%s11124_s2 + $0x1c0] sm:$0xff]  ;;  %v6984_v52 = vpack.c.bf16 %v345_v47, %v344_v46 }
 0x112   :  { %6979 = vmatpush3.bf16.msra.mxu0 %v6978_v33  ;;  %v377_v50 = vld [vmem:[%s11124_s2 + $0x1c8] sm:$0xff]  ;;  %v7014_v51 = vpack.c.bf16 %v359_v45, %v358_v44  ;;  %v328_v53 = vld [vmem:[%s11124_s2 + $0x40] sm:$0xff]  ;;  %v346_v58 = vld [vmem:[%s11124_s2 + $0xd0] sm:$0xff] }
 0x113   :  { %6981 = vmatprep.subr.bf16.mxu0 %v6980_v39  ;;  %v329_v54 = vld [vmem:[%s11124_s2 + $0x48] sm:$0xff]  ;;  %v360_v55 = vld [vmem:[%s11124_s2 + $0x140] sm:$0xff]  ;;  %v7016_v56 = vpack.c.bf16 %v377_v50, %v376_v49  ;;  %v347_v59 = vld [vmem:[%s11124_s2 + $0xd8] sm:$0xff] }
 0x114   :  { %7011 = vmatpush3.bf16.msra.mxu1 %v7010_v38  ;;  %v361_v57 = vld [vmem:[%s11124_s2 + $0x148] sm:$0xff]  ;;  %v378_v60 = vld [vmem:[%s11124_s2 + $0x1d0] sm:$0xff]  ;;  %v379_v61 = vld [vmem:[%s11124_s2 + $0x1d8] sm:$0xff]  ;;  %v6986_v62 = vpack.c.bf16 %v329_v54, %v328_v53  ;;  %v6988_v0 = vpack.c.bf16 %v347_v59, %v346_v58 }
 0x115   :  { %7013 = vmatprep.subr.bf16.mxu1 %v7012_v43  ;;  %v7018_v63 = vpack.c.bf16 %v361_v57, %v360_v55  ;;  %v330_v1 = vld [vmem:[%s11124_s2 + $0x50] sm:$0xff]  ;;  %v331_v2 = vld [vmem:[%s11124_s2 + $0x58] sm:$0xff]  ;;  %v7020_v4 = vpack.c.bf16 %v379_v61, %v378_v60  ;;  %v348_v6 = vld [vmem:[%s11124_s2 + $0xe0] sm:$0xff] }
 0x116   :  { %6983 = vmatpush3.bf16.msra.mxu0 %v6982_v48  ;;  %v362_v3 = vld [vmem:[%s11124_s2 + $0x150] sm:$0xff]  ;;  %v363_v5 = vld [vmem:[%s11124_s2 + $0x158] sm:$0xff]  ;;  %v349_v7 = vld [vmem:[%s11124_s2 + $0xe8] sm:$0xff]  ;;  %v6990_v10 = vpack.c.bf16 %v331_v2, %v330_v1 }
 0x117   :  { %6985 = vmatprep.subr.bf16.mxu0 %v6984_v52  ;;  %v380_v8 = vld [vmem:[%s11124_s2 + $0x1e0] sm:$0xff]  ;;  %v381_v9 = vld [vmem:[%s11124_s2 + $0x1e8] sm:$0xff]  ;;  %v7022_v13 = vpack.c.bf16 %v363_v5, %v362_v3  ;;  %v6992_v14 = vpack.c.bf16 %v349_v7, %v348_v6  ;;  %v350_v19 = vld [vmem:[%s11124_s2 + $0xf0] sm:$0xff] }
 0x118   :  { %7015 = vmatpush3.bf16.msra.mxu1 %v7014_v51  ;;  %v332_v11 = vld [vmem:[%s11124_s2 + $0x60] sm:$0xff]  ;;  %v233_v12 = vld [vmem:[%s11145_s29 + $0x8] sm:$0xff]  ;;  %v7024_v18 = vpack.c.bf16 %v381_v9, %v380_v8  ;;  %v351_v20 = vld [vmem:[%s11124_s2 + $0xf8] sm:$0xff] }
 0x119   :  { %7017 = vmatprep.subr.bf16.mxu1 %v7016_v56  ;;  %v333_v15 = vld [vmem:[%s11124_s2 + $0x68] sm:$0xff]  ;;  %v364_v16 = vld [vmem:[%s11124_s2 + $0x160] sm:$0xff]  ;;  %567 = vmatprep.mubr.f32.mxu0 %v233_v12  ;;  %v235_v21 = vld [vmem:[%s11145_s29 + $0x18] sm:$0xff]  ;;  %v6996_v26 = vpack.c.bf16 %v351_v20, %v350_v19 }
 0x11a   :  { %6987 = vmatpush3.bf16.msra.mxu0 %v6986_v62  ;;  %v365_v17 = vld [vmem:[%s11124_s2 + $0x168] sm:$0xff]  ;;  %v382_v22 = vld [vmem:[%s11124_s2 + $0x1f0] sm:$0xff]  ;;  %v383_v23 = vld [vmem:[%s11124_s2 + $0x1f8] sm:$0xff]  ;;  %672 = vmatprep.mubr.f32.mxu1 %v235_v21  ;;  %v6994_v24 = vpack.c.bf16 %v333_v15, %v332_v11 }
 0x11b   :  { %6989 = vmatprep.subr.bf16.mxu0 %v6988_v0  ;;  %v7026_v25 = vpack.c.bf16 %v365_v17, %v364_v16  ;;  %v334_v27 = vld [vmem:[%s11124_s2 + $0x70] sm:$0xff]  ;;  %v335_v28 = vld [vmem:[%s11124_s2 + $0x78] sm:$0xff]  ;;  %v7028_v30 = vpack.c.bf16 %v383_v23, %v382_v22  ;;  %v400_v32 = vld [vmem:[%s11124_s2 + $0x280] sm:$0xff] }
 0x11c   :  { %7019 = vmatpush3.bf16.msra.mxu1 %v7018_v63  ;;  %v366_v29 = vld [vmem:[%s11124_s2 + $0x170] sm:$0xff]  ;;  %v367_v31 = vld [vmem:[%s11124_s2 + $0x178] sm:$0xff]  ;;  %v401_v33 = vld [vmem:[%s11124_s2 + $0x288] sm:$0xff]  ;;  %v6998_v36 = vpack.c.bf16 %v335_v28, %v334_v27 }
 0x11d   :  { %7021 = vmatprep.subr.bf16.mxu1 %v7020_v4  ;;  %v432_v34 = vld [vmem:[%s11124_s2 + $0x380] sm:$0xff]  ;;  %v433_v35 = vld [vmem:[%s11124_s2 + $0x388] sm:$0xff]  ;;  %v7030_v37 = vpack.c.bf16 %v367_v31, %v366_v29  ;;  %v7032_v38 = vpack.c.bf16 %v401_v33, %v400_v32  ;;  %v402_v44 = vld [vmem:[%s11124_s2 + $0x290] sm:$0xff] }
 0x11e   :  { %6991 = vmatpush3.bf16.msra.mxu0 %v6990_v10  ;;  %v384_v39 = vld [vmem:[%s11124_s2 + $0x200] sm:$0xff]  ;;  %v385_v40 = vld [vmem:[%s11124_s2 + $0x208] sm:$0xff]  ;;  %v7064_v41 = vpack.c.bf16 %v433_v35, %v432_v34  ;;  %v403_v45 = vld [vmem:[%s11124_s2 + $0x298] sm:$0xff] }
 0x11f   :  { %6993 = vmatprep.subr.bf16.mxu0 %v6992_v14  ;;  %v416_v42 = vld [vmem:[%s11124_s2 + $0x300] sm:$0xff]  ;;  %v417_v43 = vld [vmem:[%s11124_s2 + $0x308] sm:$0xff]  ;;  %v7034_v47 = vpack.c.bf16 %v385_v40, %v384_v39  ;;  %v434_v48 = vld [vmem:[%s11124_s2 + $0x390] sm:$0xff]  ;;  %v7036_v55 = vpack.c.bf16 %v403_v45, %v402_v44 }
 0x120   :  { %7023 = vmatpush3.bf16.msra.mxu1 %v7022_v13  ;;  %v232_v46 = vld [vmem:[%s11145_s29] sm:$0xff]  ;;  %v435_v49 = vld [vmem:[%s11124_s2 + $0x398] sm:$0xff]  ;;  %v234_v50 = vld [vmem:[%s11145_s29 + $0x10] sm:$0xff]  ;;  %v7066_v51 = vpack.c.bf16 %v417_v43, %v416_v42 }
 0x121   :  { %7025 = vmatprep.subr.bf16.mxu1 %v7024_v18  ;;  %v386_v52 = vld [vmem:[%s11124_s2 + $0x210] sm:$0xff]  ;;  %v387_v53 = vld [vmem:[%s11124_s2 + $0x218] sm:$0xff]  ;;  %v244_v54 = vld [vmem:[%s11145_s29 + $0x60] sm:$0xff]  ;;  %v7068_v59 = vpack.c.bf16 %v435_v49, %v434_v48 }
 0x122   :  { %6995 = vmatpush3.bf16.msra.mxu0 %v6994_v24  ;;  %v418_v56 = vld [vmem:[%s11124_s2 + $0x310] sm:$0xff]  ;;  %v419_v57 = vld [vmem:[%s11124_s2 + $0x318] sm:$0xff]  ;;  %v404_v60 = vld [vmem:[%s11124_s2 + $0x2a0] sm:$0xff]  ;;  %v7038_v63 = vpack.c.bf16 %v387_v53, %v386_v52 }
 0x123   :  { %6997 = vmatprep.subr.bf16.mxu0 %v6996_v26  ;;  %v246_v58 = vld [vmem:[%s11145_s29 + $0x70] sm:$0xff]  ;;  %v405_v61 = vld [vmem:[%s11124_s2 + $0x2a8] sm:$0xff]  ;;  %v243_v62 = vld [vmem:[%s11145_s29 + $0x58] sm:$0xff]  ;;  %v7070_v3 = vpack.c.bf16 %v419_v57, %v418_v56 }
 0x124   :  { %7027 = vmatpush3.bf16.msra.mxu1 %v7026_v25  ;;  %v436_v0 = vld [vmem:[%s11124_s2 + $0x3a0] sm:$0xff]  ;;  %v437_v1 = vld [vmem:[%s11124_s2 + $0x3a8] sm:$0xff]  ;;  %v255_v6 = vld [vmem:[%s11145_s29 + $0xb8] sm:$0xff]  ;;  %v7040_v7 = vpack.c.bf16 %v405_v61, %v404_v60 }
 0x125   :  { %7029 = vmatprep.subr.bf16.mxu1 %v7028_v30  ;;  %v245_v2 = vld [vmem:[%s11145_s29 + $0x68] sm:$0xff]  ;;  %v388_v4 = vld [vmem:[%s11124_s2 + $0x220] sm:$0xff]  ;;  %v7072_v11 = vpack.c.bf16 %v437_v1, %v436_v0  ;;  %v406_v12 = vld [vmem:[%s11124_s2 + $0x2b0] sm:$0xff] }
 0x126   :  { %6999 = vmatpush3.bf16.msra.mxu0 %v6998_v36  ;;  %v389_v5 = vld [vmem:[%s11124_s2 + $0x228] sm:$0xff]  ;;  %v420_v8 = vld [vmem:[%s11124_s2 + $0x320] sm:$0xff]  ;;  %v407_v13 = vld [vmem:[%s11124_s2 + $0x2b8] sm:$0xff] }
 0x127   :  { %7033 = vmatprep.subr.bf16.mxu0 %v7032_v38  ;;  %v421_v9 = vld [vmem:[%s11124_s2 + $0x328] sm:$0xff]  ;;  %v254_v14 = vld [vmem:[%s11145_s29 + $0xb0] sm:$0xff]  ;;  %v7042_v15 = vpack.c.bf16 %v389_v5, %v388_v4  ;;  %v439_v17 = vld [vmem:[%s11124_s2 + $0x3b8] sm:$0xff]  ;;  %v7044_v23 = vpack.c.bf16 %v407_v13, %v406_v12 }
 0x128   :  { %7031 = vmatpush3.bf16.msra.mxu1 %v7030_v37  ;;  %v257_v10 = vld [vmem:[%s11145_s29 + $0xc8] sm:$0xff]  ;;  %v438_v16 = vld [vmem:[%s11124_s2 + $0x3b0] sm:$0xff]  ;;  %v256_v18 = vld [vmem:[%s11145_s29 + $0xc0] sm:$0xff]  ;;  %v7074_v19 = vpack.c.bf16 %v421_v9, %v420_v8 }
 0x129   :  { %7065 = vmatprep.subr.bf16.mxu1 %v7064_v41  ;;  %568 = vmatmul.mubr.f32.vlgmr.msra.gmra.mrb[0].mxu0 %v232_v46  ;;  %v390_v20 = vld [vmem:[%s11124_s2 + $0x230] sm:$0xff]  ;;  %v391_v21 = vld [vmem:[%s11124_s2 + $0x238] sm:$0xff]  ;;  %v268_v26 = vld [vmem:[%s11145_s29 + $0x120] sm:$0xff]  ;;  %v7076_v27 = vpack.c.bf16 %v439_v17, %v438_v16 }
 0x12a   :  { %7035 = vmatpush3.bf16.msra.mxu0 %v7034_v47  ;;  %572 = vmatprep.mubr.f32.mxu0 %v244_v54  ;;  %v266_v22 = vld [vmem:[%s11145_s29 + $0x110] sm:$0xff]  ;;  %v423_v25 = vld [vmem:[%s11124_s2 + $0x338] sm:$0xff]  ;;  %v408_v28 = vld [vmem:[%s11124_s2 + $0x2c0] sm:$0xff]  ;;  %v7046_v31 = vpack.c.bf16 %v391_v21, %v390_v20 }
 0x12b   :  { %673 = vmatmul.mubr.f32.vlgmr.msra.gmra.mrb[0].mxu1 %v234_v50  ;;  %7037 = vmatprep.subr.bf16.mxu0 %v7036_v55  ;;  %v422_v24 = vld [vmem:[%s11124_s2 + $0x330] sm:$0xff]  ;;  %v409_v29 = vld [vmem:[%s11124_s2 + $0x2c8] sm:$0xff]  ;;  %v440_v32 = vld [vmem:[%s11124_s2 + $0x3c0] sm:$0xff] }
 0x12c   :  { %7067 = vmatpush3.bf16.msra.mxu1 %v7066_v51  ;;  %677 = vmatprep.mubr.f32.mxu1 %v246_v58  ;;  %v265_v30 = vld [vmem:[%s11145_s29 + $0x108] sm:$0xff]  ;;  %v267_v34 = vld [vmem:[%s11145_s29 + $0x118] sm:$0xff]  ;;  %v7078_v35 = vpack.c.bf16 %v423_v25, %v422_v24  ;;  %v392_v36 = vld [vmem:[%s11124_s2 + $0x240] sm:$0xff]  ;;  %v7048_v39 = vpack.c.bf16 %v409_v29, %v408_v28 }
 0x12d   :  { %573 = vmatmul.mubr.f32.gmra.mrb[2].mxu0 %v243_v62  ;;  %7069 = vmatprep.subr.bf16.mxu1 %v7068_v59  ;;  %v441_v33 = vld [vmem:[%s11124_s2 + $0x3c8] sm:$0xff]  ;;  %v424_v40 = vld [vmem:[%s11124_s2 + $0x340] sm:$0xff]  ;;  %v279_v42 = vld [vmem:[%s11145_s29 + $0x178] sm:$0xff] }
 0x12e   :  { %7039 = vmatpush3.bf16.msra.mxu0 %v7038_v63  ;;  %577 = vmatprep.mubr.f32.mxu0 %v255_v6  ;;  %v393_v37 = vld [vmem:[%s11124_s2 + $0x248] sm:$0xff]  ;;  %v7080_v43 = vpack.c.bf16 %v441_v33, %v440_v32  ;;  %v410_v44 = vld [vmem:[%s11124_s2 + $0x2d0] sm:$0xff]  ;;  %v411_v45 = vld [vmem:[%s11124_s2 + $0x2d8] sm:$0xff] }
 0x12f   :  { %678 = vmatmul.mubr.f32.gmra.mrb[2].mxu1 %v245_v2  ;;  %7041 = vmatprep.subr.bf16.mxu0 %v7040_v7  ;;  %v277_v38 = vld [vmem:[%s11145_s29 + $0x168] sm:$0xff]  ;;  %v276_v46 = vld [vmem:[%s11145_s29 + $0x160] sm:$0xff]  ;;  %v7050_v47 = vpack.c.bf16 %v393_v37, %v392_v36  ;;  %v442_v48 = vld [vmem:[%s11124_s2 + $0x3d0] sm:$0xff]  ;;  %v7052_v55 = vpack.c.bf16 %v411_v45, %v410_v44 }
 0x130   :  { %7071 = vmatpush3.bf16.msra.mxu1 %v7070_v3  ;;  %682 = vmatprep.mubr.f32.mxu1 %v257_v10  ;;  %v425_v41 = vld [vmem:[%s11124_s2 + $0x348] sm:$0xff]  ;;  %v443_v49 = vld [vmem:[%s11124_s2 + $0x3d8] sm:$0xff]  ;;  %v278_v50 = vld [vmem:[%s11145_s29 + $0x170] sm:$0xff] }
 0x131   :  { %578 = vmatmul.mubr.f32.gmra.mrb[4].mxu0 %v254_v14  ;;  %7073 = vmatprep.subr.bf16.mxu1 %v7072_v11  ;;  %v7082_v51 = vpack.c.bf16 %v425_v41, %v424_v40  ;;  %v394_v52 = vld [vmem:[%s11124_s2 + $0x250] sm:$0xff]  ;;  %v395_v53 = vld [vmem:[%s11124_s2 + $0x258] sm:$0xff]  ;;  %v288_v54 = vld [vmem:[%s11145_s29 + $0x1c0] sm:$0xff]  ;;  %v7084_v59 = vpack.c.bf16 %v443_v49, %v442_v48 }
 0x132   :  { %7043 = vmatpush3.bf16.msra.mxu0 %v7042_v15  ;;  %582 = vmatprep.mubr.f32.mxu0 %v266_v22  ;;  %v426_v56 = vld [vmem:[%s11124_s2 + $0x350] sm:$0xff]  ;;  %v427_v57 = vld [vmem:[%s11124_s2 + $0x358] sm:$0xff]  ;;  %v412_v60 = vld [vmem:[%s11124_s2 + $0x2e0] sm:$0xff]  ;;  %v7054_v63 = vpack.c.bf16 %v395_v53, %v394_v52 }
 0x133   :  { %683 = vmatmul.mubr.f32.gmra.mrb[4].mxu1 %v256_v18  ;;  %7045 = vmatprep.subr.bf16.mxu0 %v7044_v23  ;;  %v290_v58 = vld [vmem:[%s11145_s29 + $0x1d0] sm:$0xff]  ;;  %v413_v61 = vld [vmem:[%s11124_s2 + $0x2e8] sm:$0xff]  ;;  %v287_v62 = vld [vmem:[%s11145_s29 + $0x1b8] sm:$0xff]  ;;  %v7086_v3 = vpack.c.bf16 %v427_v57, %v426_v56 }
 0x134   :  { %7075 = vmatpush3.bf16.msra.mxu1 %v7074_v19  ;;  %687 = vmatprep.mubr.f32.mxu1 %v268_v26  ;;  %v444_v0 = vld [vmem:[%s11124_s2 + $0x3e0] sm:$0xff]  ;;  %v445_v1 = vld [vmem:[%s11124_s2 + $0x3e8] sm:$0xff]  ;;  %v299_v6 = vld [vmem:[%s11145_s29 + $0x218] sm:$0xff]  ;;  %v7056_v7 = vpack.c.bf16 %v413_v61, %v412_v60 }
 0x135   :  { %583 = vmatmul.mubr.f32.gmra.mrb[6].mxu0 %v265_v30  ;;  %7077 = vmatprep.subr.bf16.mxu1 %v7076_v27  ;;  %v289_v2 = vld [vmem:[%s11145_s29 + $0x1c8] sm:$0xff]  ;;  %v396_v4 = vld [vmem:[%s11124_s2 + $0x260] sm:$0xff]  ;;  %v7088_v11 = vpack.c.bf16 %v445_v1, %v444_v0  ;;  %v414_v12 = vld [vmem:[%s11124_s2 + $0x2f0] sm:$0xff] }
 0x136   :  { %7047 = vmatpush3.bf16.msra.mxu0 %v7046_v31  ;;  %587 = vmatprep.mubr.f32.mxu0 %v277_v38  ;;  %v397_v5 = vld [vmem:[%s11124_s2 + $0x268] sm:$0xff]  ;;  %v428_v8 = vld [vmem:[%s11124_s2 + $0x360] sm:$0xff]  ;;  %v415_v13 = vld [vmem:[%s11124_s2 + $0x2f8] sm:$0xff] }
 0x137   :  { %688 = vmatmul.mubr.f32.gmra.mrb[6].mxu1 %v267_v34  ;;  %7049 = vmatprep.subr.bf16.mxu0 %v7048_v39  ;;  %v429_v9 = vld [vmem:[%s11124_s2 + $0x368] sm:$0xff]  ;;  %v298_v14 = vld [vmem:[%s11145_s29 + $0x210] sm:$0xff]  ;;  %v7058_v15 = vpack.c.bf16 %v397_v5, %v396_v4  ;;  %v447_v17 = vld [vmem:[%s11124_s2 + $0x3f8] sm:$0xff]  ;;  %v7060_v23 = vpack.c.bf16 %v415_v13, %v414_v12 }
 0x138   :  { %7079 = vmatpush3.bf16.msra.mxu1 %v7078_v35  ;;  %692 = vmatprep.mubr.f32.mxu1 %v279_v42  ;;  %v301_v10 = vld [vmem:[%s11145_s29 + $0x228] sm:$0xff]  ;;  %v446_v16 = vld [vmem:[%s11124_s2 + $0x3f0] sm:$0xff]  ;;  %v300_v18 = vld [vmem:[%s11145_s29 + $0x220] sm:$0xff]  ;;  %v7090_v19 = vpack.c.bf16 %v429_v9, %v428_v8 }
 0x139   :  { %588 = vmatmul.mubr.f32.gmra.mrb[8].mxu0 %v276_v46  ;;  %7081 = vmatprep.subr.bf16.mxu1 %v7080_v43  ;;  %v398_v20 = vld [vmem:[%s11124_s2 + $0x270] sm:$0xff]  ;;  %v399_v21 = vld [vmem:[%s11124_s2 + $0x278] sm:$0xff]  ;;  %v312_v26 = vld [vmem:[%s11145_s29 + $0x280] sm:$0xff]  ;;  %v7092_v27 = vpack.c.bf16 %v447_v17, %v446_v16 }
 0x13a   :  { %7051 = vmatpush3.bf16.msra.mxu0 %v7050_v47  ;;  %592 = vmatprep.mubr.f32.mxu0 %v288_v54  ;;  %v310_v22 = vld [vmem:[%s11145_s29 + $0x270] sm:$0xff]  ;;  %v431_v25 = vld [vmem:[%s11124_s2 + $0x378] sm:$0xff]  ;;  %v464_v28 = vld [vmem:[%s11124_s2 + $0x480] sm:$0xff]  ;;  %v7062_v31 = vpack.c.bf16 %v399_v21, %v398_v20 }
 0x13b   :  { %693 = vmatmul.mubr.f32.gmra.mrb[8].mxu1 %v278_v50  ;;  %7053 = vmatprep.subr.bf16.mxu0 %v7052_v55  ;;  %v430_v24 = vld [vmem:[%s11124_s2 + $0x370] sm:$0xff]  ;;  %v465_v29 = vld [vmem:[%s11124_s2 + $0x488] sm:$0xff]  ;;  %v480_v32 = vld [vmem:[%s11124_s2 + $0x500] sm:$0xff] }
 0x13c   :  { %7083 = vmatpush3.bf16.msra.mxu1 %v7082_v51  ;;  %697 = vmatprep.mubr.f32.mxu1 %v290_v58  ;;  %v309_v30 = vld [vmem:[%s11145_s29 + $0x268] sm:$0xff]  ;;  %v311_v34 = vld [vmem:[%s11145_s29 + $0x278] sm:$0xff]  ;;  %v7094_v35 = vpack.c.bf16 %v431_v25, %v430_v24  ;;  %v448_v36 = vld [vmem:[%s11124_s2 + $0x400] sm:$0xff]  ;;  %v7096_v39 = vpack.c.bf16 %v465_v29, %v464_v28 }
 0x13d   :  { %593 = vmatmul.mubr.f32.gmra.mrb[10].mxu0 %v287_v62  ;;  %7085 = vmatprep.subr.bf16.mxu1 %v7084_v59  ;;  %v481_v33 = vld [vmem:[%s11124_s2 + $0x508] sm:$0xff]  ;;  %v466_v40 = vld [vmem:[%s11124_s2 + $0x490] sm:$0xff]  ;;  %v467_v41 = vld [vmem:[%s11124_s2 + $0x498] sm:$0xff] }
 0x13e   :  { %7055 = vmatpush3.bf16.msra.mxu0 %v7054_v63  ;;  %597 = vmatprep.mubr.f32.mxu0 %v299_v6  ;;  %v449_v37 = vld [vmem:[%s11124_s2 + $0x408] sm:$0xff]  ;;  %v239_v42 = vld [vmem:[%s11145_s29 + $0x38] sm:$0xff]  ;;  %v7128_v43 = vpack.c.bf16 %v481_v33, %v480_v32  ;;  %v236_v44 = vld [vmem:[%s11145_s29 + $0x20] sm:$0xff]  ;;  %v7100_v49 = vpack.c.bf16 %v467_v41, %v466_v40 }
 0x13f   :  { %698 = vmatmul.mubr.f32.gmra.mrb[10].mxu1 %v289_v2  ;;  %7057 = vmatprep.subr.bf16.mxu0 %v7056_v7  ;;  %v237_v38 = vld [vmem:[%s11145_s29 + $0x28] sm:$0xff]  ;;  %v7098_v45 = vpack.c.bf16 %v449_v37, %v448_v36  ;;  %v482_v46 = vld [vmem:[%s11124_s2 + $0x510] sm:$0xff]  ;;  %v483_v47 = vld [vmem:[%s11124_s2 + $0x518] sm:$0xff] }
 0x140   :  { %7087 = vmatpush3.bf16.msra.mxu1 %v7086_v3  ;;  %702 = vmatprep.mubr.f32.mxu1 %v301_v10  ;;  %v238_v48 = vld [vmem:[%s11145_s29 + $0x30] sm:$0xff]  ;;  %v451_v51 = vld [vmem:[%s11124_s2 + $0x418] sm:$0xff]  ;;  %v248_v52 = vld [vmem:[%s11145_s29 + $0x80] sm:$0xff]  ;;  %v7132_v56 = vpack.c.bf16 %v483_v47, %v482_v46 }
 0x141   :  { %598 = vmatmul.mubr.f32.gmra.mrb[12].mxu0 %v298_v14  ;;  %7089 = vmatprep.subr.bf16.mxu1 %v7088_v11  ;;  %v450_v50 = vld [vmem:[%s11124_s2 + $0x410] sm:$0xff]  ;;  %v468_v53 = vld [vmem:[%s11124_s2 + $0x4a0] sm:$0xff]  ;;  %v469_v54 = vld [vmem:[%s11124_s2 + $0x4a8] sm:$0xff] }
 0x142   :  { %7059 = vmatpush3.bf16.msra.mxu0 %v7058_v15  ;;  %602 = vmatprep.mubr.f32.mxu0 %v310_v22  ;;  %v250_v55 = vld [vmem:[%s11145_s29 + $0x90] sm:$0xff]  ;;  %v247_v57 = vld [vmem:[%s11145_s29 + $0x78] sm:$0xff]  ;;  %v7102_v58 = vpack.c.bf16 %v451_v51, %v450_v50  ;;  %v484_v59 = vld [vmem:[%s11124_s2 + $0x520] sm:$0xff]  ;;  %v7104_v62 = vpack.c.bf16 %v469_v54, %v468_v53 }
 0x143   :  { %703 = vmatmul.mubr.f32.gmra.mrb[12].mxu1 %v300_v18  ;;  %7061 = vmatprep.subr.bf16.mxu0 %v7060_v23  ;;  %v485_v60 = vld [vmem:[%s11124_s2 + $0x528] sm:$0xff]  ;;  %v452_v63 = vld [vmem:[%s11124_s2 + $0x420] sm:$0xff]  ;;  %v259_v1 = vld [vmem:[%s11145_s29 + $0xd8] sm:$0xff] }
 0x144   :  { %7091 = vmatpush3.bf16.msra.mxu1 %v7090_v19  ;;  %707 = vmatprep.mubr.f32.mxu1 %v312_v26  ;;  %v249_v61 = vld [vmem:[%s11145_s29 + $0x88] sm:$0xff]  ;;  %v470_v2 = vld [vmem:[%s11124_s2 + $0x4b0] sm:$0xff]  ;;  %v471_v3 = vld [vmem:[%s11124_s2 + $0x4b8] sm:$0xff]  ;;  %v7136_v5 = vpack.c.bf16 %v485_v60, %v484_v59 }
 0x145   :  { %603 = vmatmul.mubr.f32.gmra.mrb[14].mxu0 %v309_v30  ;;  %7093 = vmatprep.subr.bf16.mxu1 %v7092_v27  ;;  %v453_v0 = vld [vmem:[%s11124_s2 + $0x428] sm:$0xff]  ;;  %v258_v6 = vld [vmem:[%s11145_s29 + $0xd0] sm:$0xff]  ;;  %v487_v9 = vld [vmem:[%s11124_s2 + $0x538] sm:$0xff]  ;;  %v7108_v11 = vpack.c.bf16 %v471_v3, %v470_v2 }
 0x146   :  { %7063 = vmatpush3.bf16.msra.mxu0 %v7062_v31  ;;  %777 = vmatprep.mubr.f32.mxu0 %v237_v38  ;;  %v261_v4 = vld [vmem:[%s11145_s29 + $0xe8] sm:$0xff]  ;;  %v7106_v7 = vpack.c.bf16 %v453_v0, %v452_v63  ;;  %v486_v8 = vld [vmem:[%s11124_s2 + $0x530] sm:$0xff]  ;;  %v260_v10 = vld [vmem:[%s11145_s29 + $0xe0] sm:$0xff] }
 0x147   :  { %708 = vmatmul.mubr.f32.gmra.mrb[14].mxu1 %v311_v34  ;;  %7097 = vmatprep.subr.bf16.mxu0 %v7096_v39  ;;  %v454_v12 = vld [vmem:[%s11124_s2 + $0x430] sm:$0xff]  ;;  %v455_v13 = vld [vmem:[%s11124_s2 + $0x438] sm:$0xff]  ;;  %v472_v15 = vld [vmem:[%s11124_s2 + $0x4c0] sm:$0xff]  ;;  %v7140_v18 = vpack.c.bf16 %v487_v9, %v486_v8 }
 0x148   :  { %7095 = vmatpush3.bf16.msra.mxu1 %v7094_v35  ;;  %882 = vmatprep.mubr.f32.mxu1 %v239_v42  ;;  %v270_v14 = vld [vmem:[%s11145_s29 + $0x130] sm:$0xff]  ;;  %v473_v16 = vld [vmem:[%s11124_s2 + $0x4c8] sm:$0xff]  ;;  %v272_v17 = vld [vmem:[%s11145_s29 + $0x140] sm:$0xff]  ;;  %v7110_v20 = vpack.c.bf16 %v455_v13, %v454_v12 }
 0x149   :  { %778 = vmatmul.mubr.f32.vlgmr.msra.gmra.mrb[16].mxu0 %v236_v44  ;;  %7129 = vmatprep.subr.bf16.mxu1 %v7128_v43  ;;  %v269_v19 = vld [vmem:[%s11145_s29 + $0x128] sm:$0xff]  ;;  %v488_v21 = vld [vmem:[%s11124_s2 + $0x540] sm:$0xff]  ;;  %v271_v23 = vld [vmem:[%s11145_s29 + $0x138] sm:$0xff]  ;;  %v7112_v24 = vpack.c.bf16 %v473_v16, %v472_v15 }
 0x14a   :  { %7099 = vmatpush3.bf16.msra.mxu0 %v7098_v45  ;;  %782 = vmatprep.mubr.f32.mxu0 %v248_v52  ;;  %v489_v22 = vld [vmem:[%s11124_s2 + $0x548] sm:$0xff]  ;;  %v456_v25 = vld [vmem:[%s11124_s2 + $0x440] sm:$0xff]  ;;  %v474_v28 = vld [vmem:[%s11124_s2 + $0x4d0] sm:$0xff] }
 0x14b   :  { %883 = vmatmul.mubr.f32.vlgmr.msra.gmra.mrb[16].mxu1 %v238_v48  ;;  %7101 = vmatprep.subr.bf16.mxu0 %v7100_v49  ;;  %v457_v26 = vld [vmem:[%s11124_s2 + $0x448] sm:$0xff]  ;;  %v475_v29 = vld [vmem:[%s11124_s2 + $0x4d8] sm:$0xff]  ;;  %v7144_v31 = vpack.c.bf16 %v489_v22, %v488_v21  ;;  %v280_v32 = vld [vmem:[%s11145_s29 + $0x180] sm:$0xff] }
 0x14c   :  { %887 = vmatprep.mubr.f32.mxu1 %v250_v55  ;;  %7131 = vmatpush3.bf16.msra.mxu1 %v7128_v43  ;;  %v281_v27 = vld [vmem:[%s11145_s29 + $0x188] sm:$0xff]  ;;  %v283_v30 = vld [vmem:[%s11145_s29 + $0x198] sm:$0xff]  ;;  %v7114_v33 = vpack.c.bf16 %v457_v26, %v456_v25  ;;  %v490_v34 = vld [vmem:[%s11124_s2 + $0x550] sm:$0xff]  ;;  %v7116_v37 = vpack.c.bf16 %v475_v29, %v474_v28 }
 0x14d   :  { %783 = vmatmul.mubr.f32.gmra.mrb[18].mxu0 %v247_v57  ;;  %7133 = vmatprep.subr.bf16.mxu1 %v7132_v56  ;;  %v491_v35 = vld [vmem:[%s11124_s2 + $0x558] sm:$0xff]  ;;  %v282_v36 = vld [vmem:[%s11145_s29 + $0x190] sm:$0xff]  ;;  %v292_v40 = vld [vmem:[%s11145_s29 + $0x1e0] sm:$0xff] }
 0x14e   :  { %7103 = vmatpush3.bf16.msra.mxu0 %v7102_v58  ;;  %787 = vmatprep.mubr.f32.mxu0 %v259_v1  ;;  %v458_v38 = vld [vmem:[%s11124_s2 + $0x450] sm:$0xff]  ;;  %v459_v39 = vld [vmem:[%s11124_s2 + $0x458] sm:$0xff]  ;;  %v476_v41 = vld [vmem:[%s11124_s2 + $0x4e0] sm:$0xff]  ;;  %v7148_v44 = vpack.c.bf16 %v491_v35, %v490_v34 }
 0x14f   :  { %888 = vmatmul.mubr.f32.gmra.mrb[18].mxu1 %v249_v61  ;;  %7105 = vmatprep.subr.bf16.mxu0 %v7104_v62  ;;  %v477_v42 = vld [vmem:[%s11124_s2 + $0x4e8] sm:$0xff]  ;;  %v294_v43 = vld [vmem:[%s11145_s29 + $0x1f0] sm:$0xff]  ;;  %v291_v45 = vld [vmem:[%s11145_s29 + $0x1d8] sm:$0xff]  ;;  %v7118_v46 = vpack.c.bf16 %v459_v39, %v458_v38 }
 0x150   :  { %892 = vmatprep.mubr.f32.mxu1 %v261_v4  ;;  %7135 = vmatpush3.bf16.msra.mxu1 %v7132_v56  ;;  %v492_v47 = vld [vmem:[%s11124_s2 + $0x560] sm:$0xff]  ;;  %v493_v48 = vld [vmem:[%s11124_s2 + $0x568] sm:$0xff]  ;;  %v7120_v50 = vpack.c.bf16 %v477_v42, %v476_v41  ;;  %v303_v53 = vld [vmem:[%s11145_s29 + $0x238] sm:$0xff] }
 0x151   :  { %788 = vmatmul.mubr.f32.gmra.mrb[20].mxu0 %v258_v6  ;;  %7137 = vmatprep.subr.bf16.mxu1 %v7136_v5  ;;  %v293_v49 = vld [vmem:[%s11145_s29 + $0x1e8] sm:$0xff]  ;;  %v460_v51 = vld [vmem:[%s11124_s2 + $0x460] sm:$0xff]  ;;  %v478_v54 = vld [vmem:[%s11124_s2 + $0x4f0] sm:$0xff]  ;;  %v7152_v57 = vpack.c.bf16 %v493_v48, %v492_v47 }
 0x152   :  { %7107 = vmatpush3.bf16.msra.mxu0 %v7106_v7  ;;  %792 = vmatprep.mubr.f32.mxu0 %v270_v14  ;;  %v461_v52 = vld [vmem:[%s11124_s2 + $0x468] sm:$0xff]  ;;  %v479_v55 = vld [vmem:[%s11124_s2 + $0x4f8] sm:$0xff]  ;;  %v302_v58 = vld [vmem:[%s11145_s29 + $0x230] sm:$0xff] }
 0x153   :  { %893 = vmatmul.mubr.f32.gmra.mrb[20].mxu1 %v260_v10  ;;  %7109 = vmatprep.subr.bf16.mxu0 %v7108_v11  ;;  %v305_v56 = vld [vmem:[%s11145_s29 + $0x248] sm:$0xff]  ;;  %v7122_v59 = vpack.c.bf16 %v461_v52, %v460_v51  ;;  %v494_v60 = vld [vmem:[%s11124_s2 + $0x570] sm:$0xff]  ;;  %v495_v61 = vld [vmem:[%s11124_s2 + $0x578] sm:$0xff]  ;;  %v7124_v63 = vpack.c.bf16 %v479_v55, %v478_v54 }
 0x154   :  { %897 = vmatprep.mubr.f32.mxu1 %v272_v17  ;;  %7139 = vmatpush3.bf16.msra.mxu1 %v7136_v5  ;;  %v304_v62 = vld [vmem:[%s11145_s29 + $0x240] sm:$0xff]  ;;  %v462_v0 = vld [vmem:[%s11124_s2 + $0x470] sm:$0xff]  ;;  %v463_v1 = vld [vmem:[%s11124_s2 + $0x478] sm:$0xff]  ;;  %v7156_v4 = vpack.c.bf16 %v495_v61, %v494_v60 }
 0x155   :  { %793 = vmatmul.mubr.f32.gmra.mrb[22].mxu0 %v269_v19  ;;  %7141 = vmatprep.subr.bf16.mxu1 %v7140_v18  ;;  %v314_v2 = vld [vmem:[%s11145_s29 + $0x290] sm:$0xff]  ;;  %v316_v3 = vld [vmem:[%s11145_s29 + $0x2a0] sm:$0xff]  ;;  %v313_v5 = vld [vmem:[%s11145_s29 + $0x288] sm:$0xff]  ;;  %v7126_v6 = vpack.c.bf16 %v463_v1, %v462_v0 }
 0x156   :  { %7111 = vmatpush3.bf16.msra.mxu0 %v7110_v20  ;;  %797 = vmatprep.mubr.f32.mxu0 %v281_v27  ;;  %v315_v7 = vld [vmem:[%s11145_s29 + $0x298] sm:$0xff]  ;;  %v241_v8 = vld [vmem:[%s11145_s29 + $0x48] sm:$0xff]  ;;  %v242_v9 = vld [vmem:[%s11145_s29 + $0x50] sm:$0xff] }
 0x157   :  { %898 = vmatmul.mubr.f32.gmra.mrb[22].mxu1 %v271_v23  ;;  %7113 = vmatprep.subr.bf16.mxu0 %v7112_v24  ;;  %v240_v10 = vld [vmem:[%s11145_s29 + $0x40] sm:$0xff]  ;;  %v253_v12 = vld [vmem:[%s11145_s29 + $0xa8] sm:$0xff]  ;;  %v251_v14 = vld [vmem:[%s11145_s29 + $0x98] sm:$0xff] }
 0x158   :  { %902 = vmatprep.mubr.f32.mxu1 %v283_v30  ;;  %7143 = vmatpush3.bf16.msra.mxu1 %v7140_v18  ;;  %v252_v11 = vld [vmem:[%s11145_s29 + $0xa0] sm:$0xff]  ;;  %v263_v15 = vld [vmem:[%s11145_s29 + $0xf8] sm:$0xff]  ;;  %v286_v17 = vld [vmem:[%s11145_s29 + $0x1b0] sm:$0xff] }
 0x159   :  { %798 = vmatmul.mubr.f32.gmra.mrb[24].mxu0 %v280_v32  ;;  %7145 = vmatprep.subr.bf16.mxu1 %v7144_v31  ;;  %v264_v13 = vld [vmem:[%s11145_s29 + $0x100] sm:$0xff]  ;;  %v275_v16 = vld [vmem:[%s11145_s29 + $0x158] sm:$0xff]  ;;  %v262_v18 = vld [vmem:[%s11145_s29 + $0xf0] sm:$0xff] }
 0x15a   :  { %7115 = vmatpush3.bf16.msra.mxu0 %v7114_v33  ;;  %802 = vmatprep.mubr.f32.mxu0 %v292_v40  ;;  %v274_v19 = vld [vmem:[%s11145_s29 + $0x150] sm:$0xff]  ;;  %v297_v20 = vld [vmem:[%s11145_s29 + $0x208] sm:$0xff]  ;;  %v308_v21 = vld [vmem:[%s11145_s29 + $0x260] sm:$0xff] }
 0x15b   :  { %903 = vmatmul.mubr.f32.gmra.mrb[24].mxu1 %v282_v36  ;;  %7117 = vmatprep.subr.bf16.mxu0 %v7116_v37  ;;  %v273_v22 = vld [vmem:[%s11145_s29 + $0x148] sm:$0xff]  ;;  %v319_v24 = vld [vmem:[%s11145_s29 + $0x2b8] sm:$0xff]  ;;  %v284_v25 = vld [vmem:[%s11145_s29 + $0x1a0] sm:$0xff] }
 0x15c   :  { %907 = vmatprep.mubr.f32.mxu1 %v294_v43  ;;  %7147 = vmatpush3.bf16.msra.mxu1 %v7144_v31  ;;  %v285_v23 = vld [vmem:[%s11145_s29 + $0x1a8] sm:$0xff]  ;;  %v296_v26 = vld [vmem:[%s11145_s29 + $0x200] sm:$0xff]  ;;  %v295_v27 = vld [vmem:[%s11145_s29 + $0x1f8] sm:$0xff] }
 0x15d   :  { %803 = vmatmul.mubr.f32.gmra.mrb[26].mxu0 %v291_v45  ;;  %7149 = vmatprep.subr.bf16.mxu1 %v7148_v44  ;;  %v307_v28 = vld [vmem:[%s11145_s29 + $0x258] sm:$0xff]  ;;  %v306_v29 = vld [vmem:[%s11145_s29 + $0x250] sm:$0xff]  ;;  %v317_v31 = vld [vmem:[%s11145_s29 + $0x2a8] sm:$0xff] }
 0x15e   :  { %7119 = vmatpush3.bf16.msra.mxu0 %v7118_v46  ;;  %807 = vmatprep.mubr.f32.mxu0 %v303_v53  ;;  %v318_v30 = vld [vmem:[%s11145_s29 + $0x2b0] sm:$0xff]  ;;  %v6488_v33 = vld [vmem:[#allocation7] ss:$0 sm:$0xff] }
 0x15f   :  { %908 = vmatmul.mubr.f32.gmra.mrb[26].mxu1 %v293_v49  ;;  %7121 = vmatprep.subr.bf16.mxu0 %v7120_v50 }
 0x160   :  { %912 = vmatprep.mubr.f32.mxu1 %v305_v56  ;;  %7151 = vmatpush3.bf16.msra.mxu1 %v7148_v44 }
 0x161   :  { %808 = vmatmul.mubr.f32.gmra.mrb[28].mxu0 %v302_v58  ;;  %7153 = vmatprep.subr.bf16.mxu1 %v7152_v57 }
 0x162   :  { %7123 = vmatpush3.bf16.msra.mxu0 %v7122_v59  ;;  %812 = vmatprep.mubr.f32.mxu0 %v314_v2 }
 0x163   :  { %913 = vmatmul.mubr.f32.gmra.mrb[28].mxu1 %v304_v62  ;;  %7125 = vmatprep.subr.bf16.mxu0 %v7124_v63 }
 0x164   :  { %917 = vmatprep.mubr.f32.mxu1 %v316_v3  ;;  %7155 = vmatpush3.bf16.msra.mxu1 %v7152_v57 }
 0x165   :  { %813 = vmatmul.mubr.f32.gmra.mrb[30].mxu0 %v313_v5  ;;  %7157 = vmatprep.subr.bf16.mxu1 %v7156_v4 }
 0x166   :  { %7127 = vmatpush3.bf16.msra.mxu0 %v7126_v6  ;;  %987 = vmatprep.mubr.f32.mxu0 %v241_v8 }
 0x167   :  { %918 = vmatmul.mubr.f32.gmra.mrb[30].mxu1 %v315_v7 }
 0x168   :  { %6956 = vmatprep.mubr.f32.mxu1 %v242_v9  ;;  %7159 = vmatpush3.bf16.msra.mxu1 %v7156_v4 }
 0x169   :  { %988 = vmatmul.mubr.f32.vlgmr.msra.gmra.mrb[32].mxu0 %v240_v10 }
 0x16a   :  { %992 = vmatprep.mubr.f32.mxu0 %v252_v11 }
 0x16b   :  { %6957 = vmatmul.mubr.f32.vlgmr.msra.gmra.mrb[32].mxu1 %v253_v12 }
 0x16c   :  { %6959 = vmatprep.mubr.f32.mxu1 %v264_v13 }
 0x16d   :  { %993 = vmatmul.mubr.f32.gmra.mrb[34].mxu0 %v251_v14 }
 0x16e   :  { %997 = vmatprep.mubr.f32.mxu0 %v263_v15 }
 0x16f   :  { %6960 = vmatmul.mubr.f32.gmra.mrb[34].mxu1 %v275_v16 }
 0x170   :  { %6962 = vmatprep.mubr.f32.mxu1 %v286_v17 }
 0x171   :  { %998 = vmatmul.mubr.f32.gmra.mrb[36].mxu0 %v262_v18 }
 0x172   :  { %1002 = vmatprep.mubr.f32.mxu0 %v274_v19 }
 0x173   :  { %6963 = vmatmul.mubr.f32.gmra.mrb[36].mxu1 %v297_v20 }
 0x174   :  { %6965 = vmatprep.mubr.f32.mxu1 %v308_v21 }
 0x175   :  { %1003 = vmatmul.mubr.f32.gmra.mrb[38].mxu0 %v273_v22 }
 0x176   :  { %1007 = vmatprep.mubr.f32.mxu0 %v285_v23 }
 0x177   :  { %6966 = vmatmul.mubr.f32.gmra.mrb[38].mxu1 %v319_v24 }
 0x179   :  { %1008 = vmatmul.mubr.f32.gmra.mrb[40].mxu0 %v284_v25 }
 0x17a   :  { %1012 = vmatprep.mubr.f32.mxu0 %v296_v26 }
 0x17d   :  { %1013 = vmatmul.mubr.f32.gmra.mrb[42].mxu0 %v295_v27 }
 0x17e   :  { %1017 = vmatprep.mubr.f32.mxu0 %v307_v28 }
 0x181   :  { %1018 = vmatmul.mubr.f32.gmra.mrb[44].mxu0 %v306_v29 }
 0x182   :  { %1022 = vmatprep.mubr.f32.mxu0 %v318_v30 }
 0x185   :  { %1023 = vmatmul.mubr.f32.gmra.mrb[46].mxu0 %v317_v31 }
 0x1fc   :  { %v6582_v32 = vpop.f32.mrb[0].mxu0 }
 0x1fd   :  { %v6583_v34 = vpop.f32.mrb[1].mxu0 }
 0x1fe   :  { %v6638_v35 = vpop.f32.mrb[0].mxu1  ;;  %v6584_v36 = vadd.f32 %v6583_v34, %v6582_v32 }
 0x1ff   :  { %v6639_v37 = vpop.f32.mrb[1].mxu1 }
 0x200   :  { %v6640_v38 = vadd.f32 %v6639_v37, %v6638_v35  ;;  %v570_v39 = vadd.f32 %v6584_v36, %v6488_v33  ;;  %v6585_v40 = vpop.f32.mrb[2].mxu0 }
 0x201   :  { %v6586_v41 = vpop.f32.mrb[3].mxu0 }
 0x202   :  { %v6641_v42 = vpop.f32.mrb[2].mxu1  ;;  %v675_v43 = vadd.f32 %v6640_v38, %v570_v39  ;;  %v6587_v44 = vadd.f32 %v6586_v41, %v6585_v40 }
 0x203   :  { %v6642_v45 = vpop.f32.mrb[3].mxu1 }
 0x204   :  { %v6643_v46 = vadd.f32 %v6642_v45, %v6641_v42  ;;  %v575_v47 = vadd.f32 %v6587_v44, %v6488_v33  ;;  %v6588_v48 = vpop.f32.mrb[4].mxu0 }
 0x205   :  { %v6589_v49 = vpop.f32.mrb[5].mxu0 }
 0x206   :  { %v6644_v50 = vpop.f32.mrb[4].mxu1  ;;  %v680_v51 = vadd.f32 %v6643_v46, %v575_v47  ;;  %v6590_v52 = vadd.f32 %v6589_v49, %v6588_v48 }
 0x207   :  { %v6645_v53 = vpop.f32.mrb[5].mxu1 }
 0x208   :  { %v6646_v54 = vadd.f32 %v6645_v53, %v6644_v50  ;;  %v580_v55 = vadd.f32 %v6590_v52, %v6488_v33  ;;  %v6591_v56 = vpop.f32.mrb[6].mxu0 }
 0x209   :  { %v6592_v57 = vpop.f32.mrb[7].mxu0 }
 0x20a   :  { %v6647_v58 = vpop.f32.mrb[6].mxu1  ;;  %v685_v59 = vadd.f32 %v6646_v54, %v580_v55  ;;  %v6593_v60 = vadd.f32 %v6592_v57, %v6591_v56 }
 0x20b   :  { %v6648_v61 = vpop.f32.mrb[7].mxu1 }
 0x20c   :  { %v6649_v62 = vadd.f32 %v6648_v61, %v6647_v58  ;;  %v585_v63 = vadd.f32 %v6593_v60, %v6488_v33  ;;  %v6594_v0 = vpop.f32.mrb[8].mxu0  ;;  %v1805_v61 = vld [vmem:[#allocation9 + $0x8] sm:$0xff] }
 0x20d   :  { %v6595_v1 = vpop.f32.mrb[9].mxu0 }
 0x20e   :  { %v6650_v2 = vpop.f32.mrb[8].mxu1  ;;  %v10737_v3 = vadd.f32 %v6649_v62, %v585_v63  ;;  %v6596_v4 = vadd.f32 %v6595_v1, %v6594_v0  ;;  %v1809_v62 = vld [vmem:[#allocation9 + $0x28] sm:$0xff]  ;;  %v1807_v63 = vld [vmem:[#allocation9 + $0x18] sm:$0xff] }
 0x20f   :  { %v6651_v5 = vpop.f32.mrb[9].mxu1 }
 0x210   :  { %v6652_v6 = vadd.f32 %v6651_v5, %v6650_v2  ;;  %v590_v7 = vadd.f32 %v6596_v4, %v6488_v33  ;;  %v6597_v8 = vpop.f32.mrb[10].mxu0  ;;  %v1811_v4 = vld [vmem:[#allocation9 + $0x38] sm:$0xff]  ;;  %v1804_v5 = vld [vmem:[#allocation9] sm:$0xff] }
 0x211   :  { %v6598_v9 = vpop.f32.mrb[11].mxu0 }
 0x212   :  { %v6653_v10 = vpop.f32.mrb[10].mxu1  ;;  %v10739_v11 = vadd.f32 %v6652_v6, %v590_v7  ;;  %v6599_v12 = vadd.f32 %v6598_v9, %v6597_v8  ;;  %v1808_v6 = vld [vmem:[#allocation9 + $0x20] sm:$0xff]  ;;  %v7416_v8 = vpack.c.bf16 %v1811_v4, %v1807_v63 }
 0x213   :  { %v6654_v13 = vpop.f32.mrb[11].mxu1  ;;  %v7162_v9 = vpack.c.bf16 %v1808_v6, %v1804_v5  ;;  %v1821_v6 = vld [vmem:[#allocation9 + $0x88] sm:$0xff] }
 0x214   :  { %v6655_v14 = vadd.f32 %v6654_v13, %v6653_v10  ;;  %v595_v15 = vadd.f32 %v6599_v12, %v6488_v33  ;;  %v6600_v16 = vpop.f32.mrb[12].mxu0  ;;  %v1806_v10 = vld [vmem:[#allocation9 + $0x10] sm:$0xff]  ;;  %7417 = vmatprep.subr.bf16.mxu1 %v7416_v8  ;;  %v1823_v8 = vld [vmem:[#allocation9 + $0x98] sm:$0xff] }
 0x215   :  { %v6601_v17 = vpop.f32.mrb[13].mxu0  ;;  %v1810_v12 = vld [vmem:[#allocation9 + $0x30] sm:$0xff] }
 0x216   :  { %v6656_v18 = vpop.f32.mrb[12].mxu1  ;;  %v10741_v19 = vadd.f32 %v6655_v14, %v595_v15  ;;  %v6602_v20 = vadd.f32 %v6601_v17, %v6600_v16  ;;  %v7418_v15 = vpack.c.bf16 %v1810_v12, %v1806_v10  ;;  %v1817_v16 = vld [vmem:[#allocation9 + $0x68] sm:$0xff]  ;;  %v1815_v17 = vld [vmem:[#allocation9 + $0x58] sm:$0xff] }
 0x217   :  { %v6657_v21 = vpop.f32.mrb[13].mxu1  ;;  %v1827_v12 = vld [vmem:[#allocation9 + $0xb8] sm:$0xff] }
 0x218   :  { %v6658_v22 = vadd.f32 %v6657_v21, %v6656_v18  ;;  %v600_v23 = vadd.f32 %v6602_v20, %v6488_v33  ;;  %v6603_v24 = vpop.f32.mrb[14].mxu0  ;;  %v1819_v18 = vld [vmem:[#allocation9 + $0x78] sm:$0xff]  ;;  %7419 = vmatpush1.bf16.msra.mxu1 %v7418_v15 }
 0x219   :  { %v6604_v25 = vpop.f32.mrb[15].mxu0 }
 0x21a   :  { %v6659_v26 = vpop.f32.mrb[14].mxu1  ;;  %v10743_v27 = vadd.f32 %v6658_v22, %v600_v23  ;;  %v6605_v28 = vadd.f32 %v6604_v25, %v6603_v24  ;;  %v7420_v23 = vpack.c.bf16 %v1819_v18, %v1815_v17  ;;  %v1812_v24 = vld [vmem:[#allocation9 + $0x40] sm:$0xff]  ;;  %v1822_v18 = vld [vmem:[#allocation9 + $0x90] sm:$0xff] }
 0x21b   :  { %v6660_v29 = vpop.f32.mrb[15].mxu1  ;;  %v1816_v25 = vld [vmem:[#allocation9 + $0x60] sm:$0xff] }
 0x21c   :  { %v6661_v30 = vadd.f32 %v6660_v29, %v6659_v26  ;;  %v605_v31 = vadd.f32 %v6605_v28, %v6488_v33  ;;  %v6694_v32 = vpop.f32.mrb[16].mxu0  ;;  %v1814_v26 = vld [vmem:[#allocation9 + $0x50] sm:$0xff]  ;;  %7421 = vmatprep.subr.bf16.mxu1 %v7420_v23 }
 0x21d   :  { %v6695_v34 = vpop.f32.mrb[17].mxu0 }
 0x21e   :  { %v6750_v35 = vpop.f32.mrb[16].mxu1  ;;  %v10745_v36 = vadd.f32 %v6661_v30, %v605_v31  ;;  %v6696_v37 = vadd.f32 %v6695_v34, %v6694_v32  ;;  %v1818_v31 = vld [vmem:[#allocation9 + $0x70] sm:$0xff] }
 0x21f   :  { %v6751_v38 = vpop.f32.mrb[17].mxu1  ;;  %v7422_v34 = vpack.c.bf16 %v1818_v31, %v1814_v26  ;;  %v1831_v31 = vld [vmem:[#allocation9 + $0xd8] sm:$0xff] }
 0x220   :  { %v6752_v39 = vadd.f32 %v6751_v38, %v6750_v35  ;;  %v780_v40 = vadd.f32 %v6696_v37, %v675_v43  ;;  %v6697_v41 = vpop.f32.mrb[18].mxu0 }
 0x221   :  { %v6698_v42 = vpop.f32.mrb[19].mxu0  ;;  %7423 = vmatpush1.bf16.msra.mxu1 %v7422_v34 }
 0x222   :  { %v6753_v44 = vpop.f32.mrb[18].mxu1  ;;  %v10747_v45 = vadd.f32 %v6752_v39, %v780_v40  ;;  %v6699_v46 = vadd.f32 %v6698_v42, %v6697_v41 }
 0x223   :  { %v6754_v47 = vpop.f32.mrb[19].mxu1 }
 0x224   :  { %v6755_v48 = vadd.f32 %v6754_v47, %v6753_v44  ;;  %v785_v49 = vadd.f32 %v6699_v46, %v680_v51  ;;  %v6700_v50 = vpop.f32.mrb[20].mxu0  ;;  %v7160_v51 = vpack.c.bf16 %v1809_v62, %v1805_v61 }
 0x225   :  { %v6701_v33 = vpop.f32.mrb[21].mxu0 }
 0x226   :  { %v6756_v52 = vpop.f32.mrb[20].mxu1  ;;  %v10749_v53 = vadd.f32 %v6755_v48, %v785_v49  ;;  %v6702_v54 = vadd.f32 %v6701_v33, %v6700_v50  ;;  %7161 = vmatprep.subr.bf16.mxu0 %v7160_v51 }
 0x227   :  { %v6757_v55 = vpop.f32.mrb[21].mxu1  ;;  %7163 = vmatpush1.bf16.msra.mxu0 %v7162_v9 }
 0x228   :  { %v6758_v56 = vadd.f32 %v6757_v55, %v6756_v52  ;;  %v790_v57 = vadd.f32 %v6702_v54, %v685_v59  ;;  %v6703_v58 = vpop.f32.mrb[22].mxu0  ;;  %v1813_v59 = vld [vmem:[#allocation9 + $0x48] sm:$0xff] }
 0x229   :  { %v6704_v43 = vpop.f32.mrb[23].mxu0  ;;  %v7164_v22 = vpack.c.bf16 %v1817_v16, %v1813_v59  ;;  %v1820_v59 = vld [vmem:[#allocation9 + $0x80] sm:$0xff]  ;;  %v7424_v16 = vpack.c.bf16 %v1827_v12, %v1823_v8  ;;  %v1849_v8 = vld [vmem:[#allocation9 + $0x168] sm:$0xff] }
 0x22a   :  { %v6759_v60 = vpop.f32.mrb[22].mxu1  ;;  %v10751_v0 = vadd.f32 %v6758_v56, %v790_v57  ;;  %v6705_v1 = vadd.f32 %v6704_v43, %v6703_v58 }
 0x22b   :  { %v6760_v2 = vpop.f32.mrb[23].mxu1  ;;  %7165 = vmatprep.subr.bf16.mxu0 %v7164_v22  ;;  %7425 = vmatprep.subr.bf16.mxu1 %v7424_v16 }
 0x22c   :  { %v6761_v7 = vadd.f32 %v6760_v2, %v6759_v60  ;;  %v795_v13 = vadd.f32 %v6705_v1, %v10737_v3  ;;  %v6706_v14 = vpop.f32.mrb[24].mxu0  ;;  %v7166_v3 = vpack.c.bf16 %v1816_v25, %v1812_v24 }
 0x22d   :  { %v6707_v20 = vpop.f32.mrb[25].mxu0 }
 0x22e   :  { %v6762_v21 = vpop.f32.mrb[24].mxu1  ;;  %v10754_v28 = vadd.f32 %v6761_v7, %v795_v13  ;;  %v6708_v29 = vadd.f32 %v6707_v20, %v6706_v14  ;;  %7167 = vmatpush1.bf16.msra.mxu0 %v7166_v3  ;;  %v1825_v7 = vld [vmem:[#allocation9 + $0xa8] sm:$0xff]  ;;  %v1824_v13 = vld [vmem:[#allocation9 + $0xa0] sm:$0xff]  ;;  %v1826_v20 = vld [vmem:[#allocation9 + $0xb0] sm:$0xff] }
 0x22f   :  { %v6763_v30 = vpop.f32.mrb[25].mxu1  ;;  %v7168_v10 = vpack.c.bf16 %v1825_v7, %v1821_v6  ;;  %v7170_v17 = vpack.c.bf16 %v1824_v13, %v1820_v59  ;;  %v1833_v3 = vld [vmem:[#allocation9 + $0xe8] sm:$0xff] }
 0x230   :  { %v6764_v32 = vadd.f32 %v6763_v30, %v6762_v21  ;;  %v800_v35 = vadd.f32 %v6708_v29, %v10739_v11  ;;  %v6709_v37 = vpop.f32.mrb[26].mxu0  ;;  %v1829_v30 = vld [vmem:[#allocation9 + $0xc8] sm:$0xff] }
 0x231   :  { %v6710_v38 = vpop.f32.mrb[27].mxu0  ;;  %7169 = vmatprep.subr.bf16.mxu0 %v7168_v10  ;;  %v7172_v34 = vpack.c.bf16 %v1833_v3, %v1829_v30  ;;  %v1845_v6 = vld [vmem:[#allocation9 + $0x148] sm:$0xff]  ;;  %v1844_v30 = vld [vmem:[#allocation9 + $0x140] sm:$0xff] }
 0x232   :  { %v6765_v39 = vpop.f32.mrb[26].mxu1  ;;  %v10757_v40 = vadd.f32 %v6764_v32, %v800_v35  ;;  %v6711_v41 = vadd.f32 %v6710_v38, %v6709_v37  ;;  %7171 = vmatpush1.bf16.msra.mxu0 %v7170_v17  ;;  %v1835_v35 = vld [vmem:[#allocation9 + $0xf8] sm:$0xff]  ;;  %v1828_v37 = vld [vmem:[#allocation9 + $0xc0] sm:$0xff] }
 0x233   :  { %v6766_v42 = vpop.f32.mrb[27].mxu1  ;;  %7173 = vmatprep.subr.bf16.mxu0 %v7172_v34 }
 0x234   :  { %v6767_v44 = vadd.f32 %v6766_v42, %v6765_v39  ;;  %v805_v46 = vadd.f32 %v6711_v41, %v10741_v19  ;;  %v6712_v47 = vpop.f32.mrb[28].mxu0  ;;  %v7428_v41 = vpack.c.bf16 %v1835_v35, %v1831_v31  ;;  %v1848_v31 = vld [vmem:[#allocation9 + $0x160] sm:$0xff] }
 0x235   :  { %v6713_v48 = vpop.f32.mrb[29].mxu0  ;;  %v7182_v35 = vpack.c.bf16 %v1848_v31, %v1844_v30  ;;  %v1879_v31 = vld [vmem:[#allocation9 + $0x258] sm:$0xff] }
 0x236   :  { %v6768_v49 = vpop.f32.mrb[28].mxu1  ;;  %v10760_v50 = vadd.f32 %v6767_v44, %v805_v46  ;;  %v6714_v33 = vadd.f32 %v6713_v48, %v6712_v47  ;;  %v1830_v44 = vld [vmem:[#allocation9 + $0xd0] sm:$0xff]  ;;  %v1837_v47 = vld [vmem:[#allocation9 + $0x108] sm:$0xff] }
 0x237   :  { %v6769_v52 = vpop.f32.mrb[29].mxu1  ;;  %v1834_v46 = vld [vmem:[#allocation9 + $0xf0] sm:$0xff] }
 0x238   :  { %v6770_v11 = vadd.f32 %v6769_v52, %v6768_v49  ;;  %v810_v54 = vadd.f32 %v6714_v33, %v10743_v27  ;;  %v6715_v55 = vpop.f32.mrb[30].mxu0  ;;  %v7430_v49 = vpack.c.bf16 %v1834_v46, %v1830_v44  ;;  %v1841_v33 = vld [vmem:[#allocation9 + $0x128] sm:$0xff]  ;;  %v1839_v52 = vld [vmem:[#allocation9 + $0x118] sm:$0xff] }
 0x239   :  { %v6716_v56 = vpop.f32.mrb[31].mxu0 }
 0x23a   :  { %v6771_v57 = vpop.f32.mrb[30].mxu1  ;;  %v10763_v58 = vadd.f32 %v6770_v11, %v810_v54  ;;  %v6717_v43 = vadd.f32 %v6716_v56, %v6715_v55  ;;  %v1843_v11 = vld [vmem:[#allocation9 + $0x138] sm:$0xff] }
 0x23b   :  { %v6772_v60 = vpop.f32.mrb[31].mxu1 }
 0x23c   :  { %v6773_v61 = vadd.f32 %v6772_v60, %v6771_v57  ;;  %v815_v19 = vadd.f32 %v6717_v43, %v10745_v36  ;;  %v6806_v62 = vpop.f32.mrb[32].mxu0  ;;  %v7176_v57 = vpack.c.bf16 %v1841_v33, %v1837_v47  ;;  %v1840_v43 = vld [vmem:[#allocation9 + $0x120] sm:$0xff]  ;;  %v1838_v60 = vld [vmem:[#allocation9 + $0x110] sm:$0xff] }
 0x23d   :  { %v6807_v63 = vpop.f32.mrb[33].mxu0 }
 0x23e   :  { %v10766_v1 = vadd.f32 %v6773_v61, %v815_v19  ;;  %v6808_v2 = vadd.f32 %v6807_v63, %v6806_v62  ;;  %v6958_v51 = vpop.f32.mrb[32].mxu1  ;;  %v7432_v62 = vpack.c.bf16 %v1843_v11, %v1839_v52 }
 0x23f   :  { %v1094_v4 = vpop.f32.mrb[33].mxu1 }
 0x240   :  { %v6809_v5 = vpop.f32.mrb[34].mxu0  ;;  %v990_v27 = vadd.f32 %v6808_v2, %v10747_v45  ;;  %v7426_v45 = vpack.c.bf16 %v1826_v20, %v1822_v18  ;;  %v1842_v2 = vld [vmem:[#allocation9 + $0x130] sm:$0xff]  ;;  %v1851_v18 = vld [vmem:[#allocation9 + $0x178] sm:$0xff] }
 0x241   :  { %v6810_v9 = vpop.f32.mrb[35].mxu0 }
 0x242   :  { %v6811_v36 = vadd.f32 %v6810_v9, %v6809_v5  ;;  %v1095_v14 = vadd.f32 %v1094_v4, %v990_v27  ;;  %v10769_v15 = vpop.f32.mrb[34].mxu1  ;;  %7427 = vmatpush1.bf16.msra.mxu1 %v7426_v45  ;;  %v7434_v27 = vpack.c.bf16 %v1842_v2, %v1838_v60  ;;  %v1858_v60 = vld [vmem:[#allocation9 + $0x1b0] sm:$0xff]  ;;  %v1865_v2 = vld [vmem:[#allocation9 + $0x1e8] sm:$0xff] }
 0x243   :  { %v1104_v21 = vpop.f32.mrb[35].mxu1  ;;  %7429 = vmatprep.subr.bf16.mxu1 %v7428_v41  ;;  %v1857_v41 = vld [vmem:[#allocation9 + $0x1a8] sm:$0xff] }
 0x244   :  { %v995_v22 = vadd.f32 %v6811_v36, %v10749_v53  ;;  %1134 = vst.msk [vmem:[#allocation2] sm:$0xff] %vm1133_vm0, %v1095_v14  ;;  %v6812_v23 = vpop.f32.mrb[36].mxu0  ;;  %v1832_v53 = vld [vmem:[#allocation9 + $0xe0] sm:$0xff] }
 0x245   :  { %v6813_v24 = vpop.f32.mrb[37].mxu0  ;;  %v7174_v42 = vpack.c.bf16 %v1832_v53, %v1828_v37  ;;  %v1846_v37 = vld [vmem:[#allocation9 + $0x150] sm:$0xff] }
 0x246   :  { %v1100_v25 = vadd.f32 %v6958_v51, %v995_v22  ;;  %v6814_v26 = vadd.f32 %v6813_v24, %v6812_v23  ;;  %v10773_v29 = vpop.f32.mrb[36].mxu1  ;;  %7431 = vmatpush1.bf16.msra.mxu1 %v7430_v49  ;;  %v1859_v49 = vld [vmem:[#allocation9 + $0x1b8] sm:$0xff] }
 0x247   :  { %v10775_v32 = vpop.f32.mrb[37].mxu1  ;;  %7175 = vmatpush1.bf16.msra.mxu0 %v7174_v42  ;;  %7433 = vmatprep.subr.bf16.mxu1 %v7432_v62 }
 0x248   :  { %1135 = vst.msk [vmem:[#allocation2 + $0x8] sm:$0xff] %vm1133_vm0, %v1100_v25  ;;  %v6815_v38 = vpop.f32.mrb[38].mxu0  ;;  %v1000_v39 = vadd.f32 %v6814_v26, %v10751_v0  ;;  %v1836_v0 = vld [vmem:[#allocation9 + $0x100] sm:$0xff]  ;;  %7177 = vmatprep.subr.bf16.mxu0 %v7176_v57 }
 0x249   :  { %v6816_v48 = vpop.f32.mrb[39].mxu0  ;;  %v7178_v63 = vpack.c.bf16 %v1840_v43, %v1836_v0  ;;  %v1854_v43 = vld [vmem:[#allocation9 + $0x190] sm:$0xff] }
 0x24a   :  { %v6817_v54 = vadd.f32 %v6816_v48, %v6815_v38  ;;  %v1105_v55 = vadd.f32 %v1104_v21, %v1000_v39  ;;  %v10779_v56 = vpop.f32.mrb[38].mxu1  ;;  %7435 = vmatpush1.bf16.msra.mxu1 %v7434_v27  ;;  %v1853_v39 = vld [vmem:[#allocation9 + $0x188] sm:$0xff]  ;;  %v1855_v48 = vld [vmem:[#allocation9 + $0x198] sm:$0xff]  ;;  %v7442_v62 = vpack.c.bf16 %v1858_v60, %v1854_v43 }
 0x24b   :  { %v6493_v61 = vld.sshfl [vmem:[#allocation2 + $0x6] sm:$0x1 pattern:$0x76325410]  ;;  %v10781_v19 = vpop.f32.mrb[39].mxu1  ;;  %7179 = vmatpush1.bf16.msra.mxu0 %v7178_v63  ;;  %v7184_v47 = vpack.c.bf16 %v1857_v41, %v1853_v39  ;;  %v7440_v11 = vpack.c.bf16 %v1859_v49, %v1855_v48  ;;  %v1882_v39 = vld [vmem:[#allocation9 + $0x270] sm:$0xff] }
 0x24c   :  { %v1005_v51 = vadd.f32 %v6817_v54, %v10754_v28  ;;  %1136 = vst.msk [vmem:[#allocation2 + $0x10] sm:$0xff] %vm1133_vm0, %v1105_v55  ;;  %v6818_v4 = vpop.f32.mrb[40].mxu0  ;;  %1211 = vrot.lane.b32.xlu1 %v6493_v61, %s9651_s13  ;;  %v6489_v5 = vld.sshfl [vmem:[#allocation2 + $0x1] sm:$0x1 pattern:$0x76325410]  ;;  %v7180_v28 = vpack.c.bf16 %v1849_v8, %v1845_v6 }
 0x24d   :  { %1154 = vrot.lane.b32.xlu0 %v6489_v5, %s9655_s25  ;;  %v6819_v7 = vpop.f32.mrb[41].mxu0  ;;  %v1142_v12 = vld [vmem:[#allocation2] sm:$0x1]  ;;  %v1187_v13 = vld [vmem:[#allocation2 + $0x4] sm:$0x1]  ;;  %v1887_v48 = vld [vmem:[#allocation9 + $0x298] sm:$0xff] }
 0x24e   :  { %v1110_v9 = vadd.f32 %v10769_v15, %v1005_v51  ;;  %v6820_v10 = vadd.f32 %v6819_v7, %v6818_v4  ;;  %v6494_v59 = vld.sshfl [vmem:[#allocation2 + $0x7] sm:$0x1 pattern:$0x76325410]  ;;  %1144 = vst.msk [vmem:[#allocation3] sm:$0x1] %vm1143_vm1, %v1142_v12  ;;  %7181 = vmatprep.subr.bf16.mxu0 %v7180_v28 }
 0x24f   :  { %v6492_v14 = vld.sshfl [vmem:[#allocation2 + $0x5] sm:$0x1 pattern:$0x76325410]  ;;  %1188 = vst.msk [vmem:[#allocation3 + $0x2] sm:$0x1] %vm1143_vm1, %v1187_v13  ;;  %7183 = vmatpush1.bf16.msra.mxu0 %v7182_v35 }
 0x250   :  { %1137 = vst.msk [vmem:[#allocation2 + $0x18] sm:$0xff] %vm1133_vm0, %v1110_v9  ;;  %v6821_v36 = vpop.f32.mrb[42].mxu0  ;;  %1224 = vrot.lane.b32.xlu1 %v6494_v59, %s9658_s28  ;;  %v1010_v16 = vadd.f32 %v6820_v10, %v10757_v40  ;;  %v1847_v15 = vld [vmem:[#allocation9 + $0x158] sm:$0xff]  ;;  %v1228_v45 = vld [vmem:[#allocation2 + $0x8] sm:$0x1]  ;;  %7185 = vmatprep.subr.bf16.mxu0 %v7184_v47  ;;  %v1852_v54 = vld [vmem:[#allocation9 + $0x180] sm:$0xff] }
 0x251   :  { %1198 = vrot.lane.b32.xlu0 %v6492_v14, %s9655_s25  ;;  %v6822_v17 = vpop.f32.mrb[43].mxu0  ;;  %v7436_v22 = vpack.c.bf16 %v1851_v18, %v1847_v15  ;;  %v6495_v23 = vld.sshfl [vmem:[#allocation2 + $0x9] sm:$0x1 pattern:$0x76325410]  ;;  %v1856_v55 = vld [vmem:[#allocation9 + $0x1a0] sm:$0xff] }
 0x252   :  { %v6823_v20 = vadd.f32 %v6822_v17, %v6821_v36  ;;  %v1115_v21 = vadd.f32 %v10775_v32, %v1010_v16  ;;  %1229 = vst.msk [vmem:[#allocation3 + $0x4] sm:$0x1] %vm1143_vm1, %v1228_v45  ;;  %v1269_v24 = vld [vmem:[#allocation2 + $0xc] sm:$0x1]  ;;  %v7186_v0 = vpack.c.bf16 %v1856_v55, %v1852_v54  ;;  %v1861_v63 = vld [vmem:[#allocation9 + $0x1c8] sm:$0xff]  ;;  %v1863_v51 = vld [vmem:[#allocation9 + $0x1d8] sm:$0xff] }
 0x253   :  { %v6490_v26 = vld.sshfl [vmem:[#allocation2 + $0x2] sm:$0x1 pattern:$0x76325410]  ;;  %1270 = vst.msk [vmem:[#allocation3 + $0x6] sm:$0x1] %vm1143_vm1, %v1269_v24  ;;  %7437 = vmatprep.subr.bf16.mxu1 %v7436_v22 }
 0x254   :  { %v1015_v25 = vadd.f32 %v6823_v20, %v10760_v50  ;;  %1138 = vst.msk [vmem:[#allocation2 + $0x20] sm:$0xff] %vm1133_vm0, %v1115_v21  ;;  %v6824_v40 = vpop.f32.mrb[44].mxu0  ;;  %1239 = vrot.lane.b32.xlu1 %v6495_v23, %s9655_s25  ;;  %v1850_v50 = vld [vmem:[#allocation9 + $0x170] sm:$0xff]  ;;  %7187 = vmatpush1.bf16.msra.mxu0 %v7186_v0  ;;  %v1867_v4 = vld [vmem:[#allocation9 + $0x1f8] sm:$0xff]  ;;  %v1864_v6 = vld [vmem:[#allocation9 + $0x1e0] sm:$0xff] }
 0x255   :  { %1168 = vrot.lane.b32.xlu0 %v6490_v26, %s9651_s13  ;;  %v6825_v3 = vpop.f32.mrb[45].mxu0  ;;  %v6498_v53 = vld.sshfl [vmem:[#allocation2 + $0xd] sm:$0x1 pattern:$0x76325410]  ;;  %v7438_v38 = vpack.c.bf16 %v1850_v50, %v1846_v37  ;;  %v7444_v27 = vpack.c.bf16 %v1867_v4, %v1863_v51  ;;  %v1869_v13 = vld [vmem:[#allocation9 + $0x208] sm:$0xff] }
 0x256   :  { %v1120_v32 = vadd.f32 %v10773_v29, %v1015_v25  ;;  %v6826_v34 = vadd.f32 %v6825_v3, %v6824_v40  ;;  %v6491_v44 = vld.sshfl [vmem:[#allocation2 + $0x3] sm:$0x1 pattern:$0x76325410]  ;;  %v1862_v9 = vld [vmem:[#allocation9 + $0x1d0] sm:$0xff]  ;;  %v1871_v15 = vld [vmem:[#allocation9 + $0x218] sm:$0xff] }
 0x257   :  { %7439 = vmatpush1.bf16.msra.mxu1 %v7438_v38  ;;  %v6499_v57 = vld.sshfl [vmem:[#allocation2 + $0xe] sm:$0x1 pattern:$0x76325410]  ;;  %v1873_v36 = vld [vmem:[#allocation9 + $0x228] sm:$0xff]  ;;  %v1875_v17 = vld [vmem:[#allocation9 + $0x238] sm:$0xff] }
 0x258   :  { %1139 = vst.msk [vmem:[#allocation2 + $0x28] sm:$0xff] %vm1133_vm0, %v1120_v32  ;;  %v6827_v42 = vpop.f32.mrb[46].mxu0  ;;  %1280 = vrot.lane.b32.xlu1 %v6498_v53, %s9655_s25  ;;  %v1020_v46 = vadd.f32 %v6826_v34, %v10763_v58  ;;  %v6496_v61 = vld.sshfl [vmem:[#allocation2 + $0xa] sm:$0x1 pattern:$0x76325410]  ;;  %7441 = vmatprep.subr.bf16.mxu1 %v7440_v11  ;;  %v7192_v16 = vpack.c.bf16 %v1873_v36, %v1869_v13 }
 0x259   :  { %1182 = vrot.lane.b32.xlu0 %v6491_v44, %s9658_s28  ;;  %v6828_v29 = vpop.f32.mrb[47].mxu0  ;;  %v6500_v7 = vld.sshfl [vmem:[#allocation2 + $0xf] sm:$0x1 pattern:$0x76325410]  ;;  %v7448_v20 = vpack.c.bf16 %v1875_v17, %v1871_v15  ;;  %v1868_v21 = vld [vmem:[#allocation9 + $0x200] sm:$0xff] }
 0x25a   :  { %v6829_v33 = vadd.f32 %v6828_v29, %v6827_v42  ;;  %v1125_v52 = vadd.f32 %v10781_v19, %v1020_v46  ;;  %v7188_v19 = vpack.c.bf16 %v1865_v2, %v1861_v63  ;;  %v1866_v10 = vld [vmem:[#allocation9 + $0x1f0] sm:$0xff]  ;;  %v1872_v45 = vld [vmem:[#allocation9 + $0x220] sm:$0xff]  ;;  %v1877_v40 = vld [vmem:[#allocation9 + $0x248] sm:$0xff] }
 0x25b   :  { %7443 = vmatpush1.bf16.msra.mxu1 %v7442_v62  ;;  %v6497_v12 = vld.sshfl [vmem:[#allocation2 + $0xb] sm:$0x1 pattern:$0x76325410]  ;;  %v7446_v28 = vpack.c.bf16 %v1866_v10, %v1862_v9  ;;  %v1515_v59 = vld [vmem:[#allocation2 + $0x24] sm:$0x1]  ;;  %v7194_v22 = vpack.c.bf16 %v1872_v45, %v1868_v21 }
 0x25c   :  { %v1025_v58 = vadd.f32 %v6829_v33, %v10766_v1  ;;  %1140 = vst.msk [vmem:[#allocation2 + $0x30] sm:$0xff] %vm1133_vm0, %v1125_v52  ;;  %1293 = vrot.lane.b32.xlu1 %v6499_v57, %s9651_s13  ;;  %v1860_v1 = vld [vmem:[#allocation9 + $0x1c0] sm:$0xff]  ;;  %7189 = vmatprep.subr.bf16.mxu0 %v7188_v19  ;;  %v6516_v14 = vld.sshfl [vmem:[#allocation2 + $0x25] sm:$0x1 pattern:$0x76325410] }
 0x25d   :  { %1252 = vrot.lane.b32.xlu0 %v6496_v61, %s9651_s13  ;;  %v7190_v8 = vpack.c.bf16 %v1864_v6, %v1860_v1  ;;  %7445 = vmatprep.subr.bf16.mxu1 %v7444_v27  ;;  %1516 = vst.msk [vmem:[#allocation3 + $0x3] sm:$0x1] %vm1143_vm1, %v1515_v59  ;;  %v6513_v18 = vld.sshfl [vmem:[#allocation2 + $0x21] sm:$0x1 pattern:$0x76325410] }
 0x25e   :  { %v1130_v5 = vadd.f32 %v10779_v56, %v1025_v58  ;;  %v1474_v56 = vld [vmem:[#allocation2 + $0x20] sm:$0x1]  ;;  %v1870_v23 = vld [vmem:[#allocation9 + $0x210] sm:$0xff]  ;;  %v1881_v26 = vld [vmem:[#allocation9 + $0x268] sm:$0xff] }
 0x25f   :  { %7191 = vmatpush1.bf16.msra.mxu0 %v7190_v8  ;;  %7447 = vmatpush1.bf16.msra.mxu1 %v7446_v28  ;;  %1475 = vst.msk [vmem:[#allocation3 + $0x1] sm:$0x1] %vm1143_vm1, %v1474_v56  ;;  %v1874_v24 = vld [vmem:[#allocation9 + $0x230] sm:$0xff]  ;;  %v7196_v3 = vpack.c.bf16 %v1881_v26, %v1877_v40  ;;  %v1883_v32 = vld [vmem:[#allocation9 + $0x278] sm:$0xff]  ;;  %v1876_v37 = vld [vmem:[#allocation9 + $0x240] sm:$0xff] }
 0x260   :  { %1141 = vst.msk [vmem:[#allocation2 + $0x38] sm:$0xff] %vm1133_vm0, %v1130_v5  ;;  %1306 = vrot.lane.b32.xlu1 %v6500_v7, %s9658_s28  ;;  %7193 = vmatprep.subr.bf16.mxu0 %v7192_v16  ;;  %v7450_v25 = vpack.c.bf16 %v1874_v24, %v1870_v23  ;;  %v6517_v30 = vld.sshfl [vmem:[#allocation2 + $0x26] sm:$0x1 pattern:$0x76325410]  ;;  %v7452_v35 = vpack.c.bf16 %v1883_v32, %v1879_v31  ;;  %v1880_v50 = vld [vmem:[#allocation9 + $0x260] sm:$0xff] }
 0x261   :  { %1265 = vrot.lane.b32.xlu0 %v6497_v12, %s9658_s28  ;;  %7449 = vmatprep.subr.bf16.mxu1 %v7448_v20  ;;  %v6514_v34 = vld.sshfl [vmem:[#allocation2 + $0x22] sm:$0x1 pattern:$0x76325410]  ;;  %v7198_v53 = vpack.c.bf16 %v1880_v50, %v1876_v37  ;;  %v1878_v38 = vld [vmem:[#allocation9 + $0x250] sm:$0xff]  ;;  %v1891_v29 = vld [vmem:[#allocation9 + $0x2b8] sm:$0xff] }
 0x262   :  { %v7454_v41 = vpack.c.bf16 %v1882_v39, %v1878_v38  ;;  %v1885_v42 = vld [vmem:[#allocation9 + $0x288] sm:$0xff]  ;;  %v7456_v33 = vpack.c.bf16 %v1891_v29, %v1887_v48  ;;  %v1884_v52 = vld [vmem:[#allocation9 + $0x280] sm:$0xff]  ;;  %v1886_v55 = vld [vmem:[#allocation9 + $0x290] sm:$0xff] }
 0x263   :  { %7195 = vmatpush1.bf16.msra.mxu0 %v7194_v22  ;;  %7451 = vmatpush1.bf16.msra.mxu1 %v7450_v25  ;;  %v1889_v44 = vld [vmem:[#allocation9 + $0x2a8] sm:$0xff]  ;;  %v1888_v11 = vld [vmem:[#allocation9 + $0x2a0] sm:$0xff]  ;;  %v1890_v57 = vld [vmem:[#allocation9 + $0x2b0] sm:$0xff] }
 0x264   :  { %1526 = vrot.lane.b32.xlu1 %v6516_v14, %s9655_s25  ;;  %7197 = vmatprep.subr.bf16.mxu0 %v7196_v3  ;;  %v6518_v46 = vld.sshfl [vmem:[#allocation2 + $0x27] sm:$0x1 pattern:$0x76325410]  ;;  %v7200_v47 = vpack.c.bf16 %v1889_v44, %v1885_v42  ;;  %v7202_v54 = vpack.c.bf16 %v1888_v11, %v1884_v52  ;;  %v7458_v0 = vpack.c.bf16 %v1890_v57, %v1886_v55  ;;  %v1597_v43 = vld [vmem:[#allocation2 + $0x2c] sm:$0x1] }
 0x265   :  { %1485 = vrot.lane.b32.xlu0 %v6513_v18, %s9655_s25  ;;  %7453 = vmatprep.subr.bf16.mxu1 %v7452_v35  ;;  %v6515_v49 = vld.sshfl [vmem:[#allocation2 + $0x23] sm:$0x1 pattern:$0x76325410]  ;;  %1598 = vst.msk [vmem:[#allocation3 + $0x7] sm:$0x1] %vm1143_vm1, %v1597_v43 }
 0x266   :  { %v6522_v60 = vld.sshfl [vmem:[#allocation2 + $0x2d] sm:$0x1 pattern:$0x76325410]  ;;  %v1556_v58 = vld [vmem:[#allocation2 + $0x28] sm:$0x1] }
 0x267   :  { %7199 = vmatpush1.bf16.msra.mxu0 %v7198_v53  ;;  %7455 = vmatpush1.bf16.msra.mxu1 %v7454_v41  ;;  %v6519_v61 = vld.sshfl [vmem:[#allocation2 + $0x29] sm:$0x1 pattern:$0x76325410]  ;;  %1557 = vst.msk [vmem:[#allocation3 + $0x5] sm:$0x1] %vm1143_vm1, %v1556_v58 }
 0x268   :  { %1539 = vrot.lane.b32.xlu1 %v6517_v30, %s9651_s13  ;;  %7201 = vmatprep.subr.bf16.mxu0 %v7200_v47  ;;  %v1893_v62 = vld [vmem:[#allocation9 + $0x2c8] sm:$0xff]  ;;  %v1895_v19 = vld [vmem:[#allocation9 + $0x2d8] sm:$0xff]  ;;  %v1892_v5 = vld [vmem:[#allocation9 + $0x2c0] sm:$0xff] }
 0x269   :  { %1498 = vrot.lane.b32.xlu0 %v6514_v34, %s9651_s13  ;;  %7457 = vmatprep.subr.bf16.mxu1 %v7456_v33  ;;  %v1897_v63 = vld [vmem:[#allocation9 + $0x2e8] sm:$0xff]  ;;  %v1899_v51 = vld [vmem:[#allocation9 + $0x2f8] sm:$0xff]  ;;  %v1896_v27 = vld [vmem:[#allocation9 + $0x2e0] sm:$0xff] }
 0x26a   :  { %v7204_v2 = vpack.c.bf16 %v1897_v63, %v1893_v62  ;;  %v7460_v4 = vpack.c.bf16 %v1899_v51, %v1895_v19  ;;  %v6523_v1 = vld.sshfl [vmem:[#allocation2 + $0x2e] sm:$0x1 pattern:$0x76325410]  ;;  %v7206_v6 = vpack.c.bf16 %v1896_v27, %v1892_v5  ;;  %v1901_v12 = vld [vmem:[#allocation9 + $0x308] sm:$0xff]  ;;  %v1903_v56 = vld [vmem:[#allocation9 + $0x318] sm:$0xff] }
 0x26b   :  { %7203 = vmatpush1.bf16.msra.mxu0 %v7202_v54  ;;  %7459 = vmatpush1.bf16.msra.mxu1 %v7458_v0  ;;  %v1894_v7 = vld [vmem:[#allocation9 + $0x2d0] sm:$0xff]  ;;  %v1905_v28 = vld [vmem:[#allocation9 + $0x328] sm:$0xff]  ;;  %v1907_v13 = vld [vmem:[#allocation9 + $0x338] sm:$0xff] }
 0x26c   :  { %1552 = vrot.lane.b32.xlu1 %v6518_v46, %s9658_s28  ;;  %7205 = vmatprep.subr.bf16.mxu0 %v7204_v2  ;;  %v1898_v8 = vld [vmem:[#allocation9 + $0x2f0] sm:$0xff]  ;;  %v7208_v59 = vpack.c.bf16 %v1905_v28, %v1901_v12  ;;  %v7464_v36 = vpack.c.bf16 %v1907_v13, %v1903_v56  ;;  %v1900_v14 = vld [vmem:[#allocation9 + $0x300] sm:$0xff]  ;;  %v1909_v22 = vld [vmem:[#allocation9 + $0x348] sm:$0xff] }
 0x26d   :  { %1511 = vrot.lane.b32.xlu0 %v6515_v49, %s9658_s28  ;;  %v6520_v9 = vld.sshfl [vmem:[#allocation2 + $0x2a] sm:$0x1 pattern:$0x76325410]  ;;  %7461 = vmatprep.subr.bf16.mxu1 %v7460_v4  ;;  %v7462_v10 = vpack.c.bf16 %v1898_v8, %v1894_v7  ;;  %v1904_v16 = vld [vmem:[#allocation9 + $0x320] sm:$0xff]  ;;  %v1913_v23 = vld [vmem:[#allocation9 + $0x368] sm:$0xff] }
 0x26e   :  { %v6524_v15 = vld.sshfl [vmem:[#allocation2 + $0x2f] sm:$0x1 pattern:$0x76325410]  ;;  %v7210_v17 = vpack.c.bf16 %v1904_v16, %v1900_v14  ;;  %v7212_v25 = vpack.c.bf16 %v1913_v23, %v1909_v22  ;;  %v1911_v40 = vld [vmem:[#allocation9 + $0x358] sm:$0xff]  ;;  %v1908_v31 = vld [vmem:[#allocation9 + $0x340] sm:$0xff] }
 0x26f   :  { %7207 = vmatpush1.bf16.msra.mxu0 %v7206_v6  ;;  %7463 = vmatpush1.bf16.msra.mxu1 %v7462_v10  ;;  %v1902_v18 = vld [vmem:[#allocation9 + $0x310] sm:$0xff]  ;;  %v6504_v24 = vld.sshfl [vmem:[#allocation2 + $0x15] sm:$0x1 pattern:$0x76325410]  ;;  %v1912_v32 = vld [vmem:[#allocation9 + $0x360] sm:$0xff] }
 0x270   :  { %1608 = vrot.lane.b32.xlu1 %v6522_v60, %s9655_s25  ;;  %7209 = vmatprep.subr.bf16.mxu0 %v7208_v59  ;;  %v1906_v20 = vld [vmem:[#allocation9 + $0x330] sm:$0xff]  ;;  %v1915_v26 = vld [vmem:[#allocation9 + $0x378] sm:$0xff]  ;;  %v7214_v34 = vpack.c.bf16 %v1912_v32, %v1908_v31  ;;  %v1917_v39 = vld [vmem:[#allocation9 + $0x388] sm:$0xff] }
 0x271   :  { %1567 = vrot.lane.b32.xlu0 %v6519_v61, %s9655_s25  ;;  %v6521_v21 = vld.sshfl [vmem:[#allocation2 + $0x2b] sm:$0x1 pattern:$0x76325410]  ;;  %7465 = vmatprep.subr.bf16.mxu1 %v7464_v36  ;;  %v7466_v45 = vpack.c.bf16 %v1906_v20, %v1902_v18  ;;  %v7468_v3 = vpack.c.bf16 %v1915_v26, %v1911_v40  ;;  %v1351_v50 = vld [vmem:[#allocation2 + $0x14] sm:$0x1] }
 0x272   :  { %v6501_v30 = vld.sshfl [vmem:[#allocation2 + $0x11] sm:$0x1 pattern:$0x76325410]  ;;  %1352 = vst.msk [vmem:[#allocation3 + $0xa] sm:$0x1] %vm1143_vm1, %v1351_v50 }
 0x273   :  { %7211 = vmatpush1.bf16.msra.mxu0 %v7210_v17  ;;  %7467 = vmatpush1.bf16.msra.mxu1 %v7466_v45  ;;  %v1910_v35 = vld [vmem:[#allocation9 + $0x350] sm:$0xff]  ;;  %v1921_v41 = vld [vmem:[#allocation9 + $0x3a8] sm:$0xff]  ;;  %v6510_v42 = vld.sshfl [vmem:[#allocation2 + $0x1d] sm:$0x1 pattern:$0x76325410] }
 0x274   :  { %1621 = vrot.lane.b32.xlu1 %v6523_v1, %s9651_s13  ;;  %7213 = vmatprep.subr.bf16.mxu0 %v7212_v25  ;;  %v1914_v37 = vld [vmem:[#allocation9 + $0x370] sm:$0xff]  ;;  %v7216_v44 = vpack.c.bf16 %v1921_v41, %v1917_v39  ;;  %v1919_v46 = vld [vmem:[#allocation9 + $0x398] sm:$0xff]  ;;  %v1916_v48 = vld [vmem:[#allocation9 + $0x380] sm:$0xff] }
 0x275   :  { %1580 = vrot.lane.b32.xlu0 %v6520_v9, %s9651_s13  ;;  %7469 = vmatprep.subr.bf16.mxu1 %v7468_v3  ;;  %v7470_v53 = vpack.c.bf16 %v1914_v37, %v1910_v35  ;;  %v1310_v38 = vld [vmem:[#allocation2 + $0x10] sm:$0x1]  ;;  %v1923_v47 = vld [vmem:[#allocation9 + $0x3b8] sm:$0xff]  ;;  %v1920_v33 = vld [vmem:[#allocation9 + $0x3a0] sm:$0xff] }
 0x276   :  { %1311 = vst.msk [vmem:[#allocation3 + $0x8] sm:$0x1] %vm1143_vm1, %v1310_v38  ;;  %v6507_v29 = vld.sshfl [vmem:[#allocation2 + $0x19] sm:$0x1 pattern:$0x76325410]  ;;  %v7472_v49 = vpack.c.bf16 %v1923_v47, %v1919_v46  ;;  %v7218_v54 = vpack.c.bf16 %v1920_v33, %v1916_v48 }
 0x277   :  { %7215 = vmatpush1.bf16.msra.mxu0 %v7214_v34  ;;  %7471 = vmatpush1.bf16.msra.mxu1 %v7470_v53  ;;  %v1918_v52 = vld [vmem:[#allocation9 + $0x390] sm:$0xff]  ;;  %v1433_v57 = vld [vmem:[#allocation2 + $0x1c] sm:$0x1]  ;;  %v1392_v0 = vld [vmem:[#allocation2 + $0x18] sm:$0x1] }
 0x278   :  { %1634 = vrot.lane.b32.xlu1 %v6524_v15, %s9658_s28  ;;  %v1922_v11 = vld [vmem:[#allocation9 + $0x3b0] sm:$0xff]  ;;  %7217 = vmatprep.subr.bf16.mxu0 %v7216_v44  ;;  %v1925_v43 = vld [vmem:[#allocation9 + $0x3c8] sm:$0xff]  ;;  %1434 = vst.msk [vmem:[#allocation3 + $0xe] sm:$0x1] %vm1143_vm1, %v1433_v57  ;;  %1393 = vst.msk [vmem:[#allocation3 + $0xc] sm:$0x1] %vm1143_vm1, %v1392_v0 }
 0x279   :  { %1593 = vrot.lane.b32.xlu0 %v6521_v21, %s9658_s28  ;;  %v7474_v55 = vpack.c.bf16 %v1922_v11, %v1918_v52  ;;  %7473 = vmatprep.subr.bf16.mxu1 %v7472_v49  ;;  %v1929_v60 = vld [vmem:[#allocation9 + $0x3e8] sm:$0xff]  ;;  %v1927_v58 = vld [vmem:[#allocation9 + $0x3d8] sm:$0xff]  ;;  %v1924_v2 = vld [vmem:[#allocation9 + $0x3c0] sm:$0xff] }
 0x27a   :  { %v1931_v61 = vld [vmem:[#allocation9 + $0x3f8] sm:$0xff]  ;;  %v7220_v62 = vpack.c.bf16 %v1929_v60, %v1925_v43  ;;  %v1928_v19 = vld [vmem:[#allocation9 + $0x3e0] sm:$0xff]  ;;  %v1926_v51 = vld [vmem:[#allocation9 + $0x3d0] sm:$0xff]  ;;  %v2318_v43 = vlaneseq  ;;  %v9668_v60 = vmov 1983009808  }
 0x27b   :  { %7219 = vmatpush1.bf16.msra.mxu0 %v7218_v54  ;;  %v7476_v63 = vpack.c.bf16 %v1931_v61, %v1927_v58  ;;  %7475 = vmatpush1.bf16.msra.mxu1 %v7474_v55  ;;  %v7222_v4 = vpack.c.bf16 %v1928_v19, %v1924_v2  ;;  %v1930_v5 = vld [vmem:[#allocation9 + $0x3f0] sm:$0xff]  ;;  %v1933_v27 = vld [vmem:[#allocation9 + $0x408] sm:$0xff]  ;;  %v6505_v6 = vld.sshfl [vmem:[#allocation2 + $0x16] sm:$0x1 pattern:$0x76325410]  ;;  %v2342_v58 = vunpack.c.l.s4 %v9668_v60 }
 0x27c   :  { %1362 = vrot.lane.b32.xlu1 %v6504_v24, %s9655_s25  ;;  %v1937_v1 = vld [vmem:[#allocation9 + $0x428] sm:$0xff]  ;;  %7221 = vmatprep.subr.bf16.mxu0 %v7220_v62  ;;  %v7478_v7 = vpack.c.bf16 %v1930_v5, %v1926_v51  ;;  %v1935_v9 = vld [vmem:[#allocation9 + $0x418] sm:$0xff]  ;;  %v6511_v59 = vld.sshfl [vmem:[#allocation2 + $0x1e] sm:$0x1 pattern:$0x76325410] }
 0x27d   :  { %1321 = vrot.lane.b32.xlu0 %v6501_v30, %s9655_s25  ;;  %7477 = vmatprep.subr.bf16.mxu1 %v7476_v63  ;;  %v7224_v8 = vpack.c.bf16 %v1937_v1, %v1933_v27  ;;  %v1939_v10 = vld [vmem:[#allocation9 + $0x438] sm:$0xff]  ;;  %v6508_v56 = vld.sshfl [vmem:[#allocation2 + $0x1a] sm:$0x1 pattern:$0x76325410]  ;;  %v10887_v63 = vshrl.u32 %v2318_v43, 7  ;;  %v2343_v2 = vunpack.c.0.s8 %v2342_v58 }
 0x27e   :  { %v6502_v12 = vld.sshfl [vmem:[#allocation2 + $0x12] sm:$0x1 pattern:$0x76325410]  ;;  %v7480_v28 = vpack.c.bf16 %v1939_v10, %v1935_v9  ;;  %v1679_v14 = vld [vmem:[#allocation2 + $0x34] sm:$0x1] }
 0x27f   :  { %7223 = vmatpush1.bf16.msra.mxu0 %v7222_v4  ;;  %7479 = vmatpush1.bf16.msra.mxu1 %v7478_v7  ;;  %v6506_v13 = vld.sshfl [vmem:[#allocation2 + $0x17] sm:$0x1 pattern:$0x76325410]  ;;  %v1638_v16 = vld [vmem:[#allocation2 + $0x30] sm:$0x1]  ;;  %v10892_v4 = vsub.s32 %v2343_v2, %v10887_v63 }
 0x280   :  { %1444 = vrot.lane.b32.xlu1 %v6510_v42, %s9655_s25  ;;  %7225 = vmatprep.subr.bf16.mxu0 %v7224_v8  ;;  %v6503_v36 = vld.sshfl [vmem:[#allocation2 + $0x13] sm:$0x1 pattern:$0x76325410]  ;;  %1680 = vst.msk [vmem:[#allocation3 + $0xb] sm:$0x1] %vm1143_vm1, %v1679_v14 }
 0x281   :  { %1403 = vrot.lane.b32.xlu0 %v6507_v29, %s9655_s25  ;;  %7481 = vmatprep.subr.bf16.mxu1 %v7480_v28  ;;  %1639 = vst.msk [vmem:[#allocation3 + $0x9] sm:$0x1] %vm1143_vm1, %v1638_v16  ;;  %v6512_v15 = vld.sshfl [vmem:[#allocation2 + $0x1f] sm:$0x1 pattern:$0x76325410] }
 0x282   :  { %v6509_v17 = vld.sshfl [vmem:[#allocation2 + $0x1b] sm:$0x1 pattern:$0x76325410]  ;;  %v1761_v21 = vld [vmem:[#allocation2 + $0x3c] sm:$0x1] }
 0x283   :  { %v6528_v18 = vld.sshfl [vmem:[#allocation2 + $0x35] sm:$0x1 pattern:$0x76325410]  ;;  %1762 = vst.msk [vmem:[#allocation3 + $0xf] sm:$0x1] %vm1143_vm1, %v1761_v21 }
 0x284   :  { %1375 = vrot.lane.b32.xlu1 %v6505_v6, %s9651_s13  ;;  %v6525_v20 = vld.sshfl [vmem:[#allocation2 + $0x31] sm:$0x1 pattern:$0x76325410]  ;;  %v1720_v45 = vld [vmem:[#allocation2 + $0x38] sm:$0x1] }
 0x285   :  { %1334 = vrot.lane.b32.xlu0 %v6502_v12, %s9651_s13  ;;  %v6529_v22 = vld.sshfl [vmem:[#allocation2 + $0x36] sm:$0x1 pattern:$0x76325410]  ;;  %1721 = vst.msk [vmem:[#allocation3 + $0xd] sm:$0x1] %vm1143_vm1, %v1720_v45 }
 0x286   :  { %v6526_v23 = vld.sshfl [vmem:[#allocation2 + $0x32] sm:$0x1 pattern:$0x76325410]  ;;  %v1932_v27 = vld [vmem:[#allocation9 + $0x400] sm:$0xff]  ;;  %v1934_v8 = vld [vmem:[#allocation9 + $0x410] sm:$0xff] }
 0x287   :  { %v6530_v24 = vld.sshfl [vmem:[#allocation2 + $0x37] sm:$0x1 pattern:$0x76325410]  ;;  %v1936_v1 = vld [vmem:[#allocation9 + $0x420] sm:$0xff]  ;;  %v1938_v9 = vld [vmem:[#allocation9 + $0x430] sm:$0xff] }
 0x288   :  { %1457 = vrot.lane.b32.xlu1 %v6511_v59, %s9651_s13  ;;  %v6527_v25 = vld.sshfl [vmem:[#allocation2 + $0x33] sm:$0x1 pattern:$0x76325410]  ;;  %v1941_v28 = vld [vmem:[#allocation9 + $0x448] sm:$0xff]  ;;  %v7226_v16 = vpack.c.bf16 %v1936_v1, %v1932_v27  ;;  %v1942_v45 = vld [vmem:[#allocation9 + $0x450] sm:$0xff] }
 0x289   :  { %1416 = vrot.lane.b32.xlu0 %v6508_v56, %s9651_s13  ;;  %v6534_v40 = vld.sshfl [vmem:[#allocation2 + $0x3d] sm:$0x1 pattern:$0x76325410]  ;;  %v1945_v59 = vld [vmem:[#allocation9 + $0x468] sm:$0xff]  ;;  %v1943_v56 = vld [vmem:[#allocation9 + $0x458] sm:$0xff] }
 0x28a   :  { %v6531_v26 = vld.sshfl [vmem:[#allocation2 + $0x39] sm:$0x1 pattern:$0x76325410]  ;;  %v1965_v43 = vld [vmem:[#allocation9 + $0x508] sm:$0xff] }
 0x28b   :  { %v6535_v30 = vld.sshfl [vmem:[#allocation2 + $0x3e] sm:$0x1 pattern:$0x76325410]  ;;  %v1969_v60 = vld [vmem:[#allocation9 + $0x528] sm:$0xff]  ;;  %v1967_v58 = vld [vmem:[#allocation9 + $0x518] sm:$0xff] }
 0x28c   :  { %1388 = vrot.lane.b32.xlu1 %v6506_v13, %s9658_s28  ;;  %v6532_v3 = vld.sshfl [vmem:[#allocation2 + $0x3a] sm:$0x1 pattern:$0x76325410]  ;;  %v1947_v13 = vld [vmem:[#allocation9 + $0x478] sm:$0xff]  ;;  %v7240_v1 = vpack.c.bf16 %v1969_v60, %v1965_v43 }
 0x28d   :  { %1347 = vrot.lane.b32.xlu0 %v6503_v36, %s9658_s28  ;;  %v6536_v31 = vld.sshfl [vmem:[#allocation2 + $0x3f] sm:$0x1 pattern:$0x76325410] }
 0x28e   :  { %v6533_v32 = vld.sshfl [vmem:[#allocation2 + $0x3b] sm:$0x1 pattern:$0x76325410] }
 0x290   :  { %1470 = vrot.lane.b32.xlu1 %v6512_v15, %s9658_s28  ;;  %v7482_v15 = vpack.c.bf16 %v1938_v9, %v1934_v8  ;;  %v1970_v8 = vld [vmem:[#allocation9 + $0x530] sm:$0xff]  ;;  %v1973_v9 = vld [vmem:[#allocation9 + $0x548] sm:$0xff] }
 0x291   :  { %1429 = vrot.lane.b32.xlu0 %v6509_v17, %s9658_s28 }
 0x294   :  { %1690 = vrot.lane.b32.xlu1 %v6528_v18, %s9655_s25  ;;  %v1940_v18 = vld [vmem:[#allocation9 + $0x440] sm:$0xff] }
 0x295   :  { %1649 = vrot.lane.b32.xlu0 %v6525_v20, %s9655_s25  ;;  %v1944_v20 = vld [vmem:[#allocation9 + $0x460] sm:$0xff] }
 0x298   :  { %1703 = vrot.lane.b32.xlu1 %v6529_v22, %s9651_s13  ;;  %v1946_v22 = vld [vmem:[#allocation9 + $0x470] sm:$0xff] }
 0x299   :  { %1662 = vrot.lane.b32.xlu0 %v6526_v23, %s9651_s13  ;;  %v1949_v23 = vld [vmem:[#allocation9 + $0x488] sm:$0xff] }
 0x29c   :  { %1716 = vrot.lane.b32.xlu1 %v6530_v24, %s9658_s28 }
 0x29d   :  { %1675 = vrot.lane.b32.xlu0 %v6527_v25, %s9658_s28  ;;  %v7228_v25 = vpack.c.bf16 %v1945_v59, %v1941_v28  ;;  %v1979_v28 = vld [vmem:[#allocation9 + $0x578] sm:$0xff] }
 0x2a0   :  { %1772 = vrot.lane.b32.xlu1 %v6534_v40, %s9655_s25  ;;  %v7484_v40 = vpack.c.bf16 %v1947_v13, %v1943_v56 }
 0x2a1   :  { %1731 = vrot.lane.b32.xlu0 %v6531_v26, %s9655_s25  ;;  %v1953_v26 = vld [vmem:[#allocation9 + $0x4a8] sm:$0xff]  ;;  %s9669_s25 = smov [#allocation27]  }
 0x2a4   :  { %1785 = vrot.lane.b32.xlu1 %v6535_v30, %s9651_s13  ;;  %v1951_v30 = vld [vmem:[#allocation9 + $0x498] sm:$0xff] }
 0x2a5   :  { %1744 = vrot.lane.b32.xlu0 %v6532_v3, %s9651_s13  ;;  %v1955_v3 = vld [vmem:[#allocation9 + $0x4b8] sm:$0xff] }
 0x2a8   :  { %1798 = vrot.lane.b32.xlu1 %v6536_v31, %s9658_s28 }
 0x2a9   :  { %1757 = vrot.lane.b32.xlu0 %v6533_v32, %s9658_s28  ;;  %v7230_v32 = vpack.c.bf16 %v1944_v20, %v1940_v18  ;;  %v1974_v20 = vld [vmem:[#allocation9 + $0x550] sm:$0xff]  ;;  %s6467_s28 = sshll.u32 %s9669_s25, 4  ;;  %s6468_s28 = int_to_ptr.vmem [resolvable:$true] %s6467_s28 }
 0x2aa   :  { %s9604_s29 = scalar_lea.vmem %s6468_s28, 128  ;;  %p9609_p1 = scmp.lt.s32.totalorder %s6468_s28, %s6468_s28 }
 0x2ab   :  { %p9605_p0 = scmp.ne.s32.totalorder %s6468_s28, %s9604_s29  ;;  %p9610_p2 = scmp.lt.s32.totalorder %s9604_s29, %s9604_s29 }
 0x2ad   :  { %p9611_p3 = por %p9610_p2, %p9609_p1 }
 0x2af   :  { %p9612_p4 = pnand %p9611_p3, %p9605_p0 }
 0x2be   :  { %v1212_v34 = vpop.permute.xlu1 %1211 }
 0x2bf   :  { %v1155_v35 = vpop.permute.xlu0 %1154 }
 0x2c0   :  { %1158 = vst.msk [vmem:[#allocation3] sm:$0x1] %vm1157_vm2, %v1155_v35  ;;  %v1948_v35 = vld [vmem:[#allocation9 + $0x480] sm:$0xff] }
 0x2c2   :  { %v1225_v37 = vpop.permute.xlu1 %1224 }
 0x2c3   :  { %v1199_v50 = vpop.permute.xlu0 %1198 }
 0x2c4   :  { %1201 = vst.msk [vmem:[#allocation3 + $0x2] sm:$0x1] %vm1157_vm2, %v1199_v50 }
 0x2c5   :  { %1214 = vst.msk [vmem:[#allocation3 + $0x2] sm:$0x1] %vm1171_vm3, %v1212_v34  ;;  %v7486_v34 = vpack.c.bf16 %v1946_v22, %v1942_v45  ;;  %v1981_v45 = vld [vmem:[#allocation9 + $0x588] sm:$0xff] }
 0x2c6   :  { %1227 = vst.msk [vmem:[#allocation3 + $0x2] sm:$0x1] %vm1185_vm4, %v1225_v37  ;;  %v1240_v53 = vpop.permute.xlu1 %1239  ;;  %v1952_v37 = vld [vmem:[#allocation9 + $0x4a0] sm:$0xff]  ;;  %v1985_v22 = vld [vmem:[#allocation9 + $0x5a8] sm:$0xff] }
 0x2c7   :  { %1242 = vst.msk [vmem:[#allocation3 + $0x4] sm:$0x1] %vm1157_vm2, %v1240_v53  ;;  %v1169_v38 = vpop.permute.xlu0 %1168  ;;  %v7232_v53 = vpack.c.bf16 %v1953_v26, %v1949_v23  ;;  %v1983_v23 = vld [vmem:[#allocation9 + $0x598] sm:$0xff] }
 0x2c8   :  { %1172 = vst.msk [vmem:[#allocation3] sm:$0x1] %vm1171_vm3, %v1169_v38  ;;  %v7488_v38 = vpack.c.bf16 %v1955_v3, %v1951_v30  ;;  %v1980_v30 = vld [vmem:[#allocation9 + $0x580] sm:$0xff] }
 0x2c9   :  { %v1984_v3 = vld [vmem:[#allocation9 + $0x5a0] sm:$0xff] }
 0x2ca   :  { %v1281_v39 = vpop.permute.xlu1 %1280 }
 0x2cb   :  { %1283 = vst.msk [vmem:[#allocation3 + $0x6] sm:$0x1] %vm1157_vm2, %v1281_v39  ;;  %v1183_v41 = vpop.permute.xlu0 %1182  ;;  %v1950_v39 = vld [vmem:[#allocation9 + $0x490] sm:$0xff] }
 0x2cc   :  { %1186 = vst.msk [vmem:[#allocation3] sm:$0x1] %vm1185_vm4, %v1183_v41  ;;  %v1954_v41 = vld [vmem:[#allocation9 + $0x4b0] sm:$0xff] }
 0x2ce   :  { %v1294_v42 = vpop.permute.xlu1 %1293 }
 0x2cf   :  { %1296 = vst.msk [vmem:[#allocation3 + $0x6] sm:$0x1] %vm1171_vm3, %v1294_v42  ;;  %v1253_v44 = vpop.permute.xlu0 %1252  ;;  %v1957_v42 = vld [vmem:[#allocation9 + $0x4c8] sm:$0xff] }
 0x2d0   :  { %1255 = vst.msk [vmem:[#allocation3 + $0x4] sm:$0x1] %vm1171_vm3, %v1253_v44  ;;  %v1961_v44 = vld [vmem:[#allocation9 + $0x4e8] sm:$0xff] }
 0x2d2   :  { %v1307_v46 = vpop.permute.xlu1 %1306 }
 0x2d3   :  { %1309 = vst.msk [vmem:[#allocation3 + $0x6] sm:$0x1] %vm1185_vm4, %v1307_v46  ;;  %v1266_v47 = vpop.permute.xlu0 %1265  ;;  %v1959_v46 = vld [vmem:[#allocation9 + $0x4d8] sm:$0xff] }
 0x2d4   :  { %1268 = vst.msk [vmem:[#allocation3 + $0x4] sm:$0x1] %vm1185_vm4, %v1266_v47  ;;  %v1963_v47 = vld [vmem:[#allocation9 + $0x4f8] sm:$0xff] }
 0x2d6   :  { %v1527_v48 = vpop.permute.xlu1 %1526 }
 0x2d7   :  { %1529 = vst.msk [vmem:[#allocation3 + $0x3] sm:$0x1] %vm1157_vm2, %v1527_v48  ;;  %v1486_v29 = vpop.permute.xlu0 %1485 }
 0x2d8   :  { %1488 = vst.msk [vmem:[#allocation3 + $0x1] sm:$0x1] %vm1157_vm2, %v1486_v29  ;;  %v7234_v29 = vpack.c.bf16 %v1952_v37, %v1948_v35  ;;  %v1982_v35 = vld [vmem:[#allocation9 + $0x590] sm:$0xff] }
 0x2d9   :  { %v1986_v37 = vld [vmem:[#allocation9 + $0x5b0] sm:$0xff] }
 0x2da   :  { %v1540_v49 = vpop.permute.xlu1 %1539 }
 0x2db   :  { %1542 = vst.msk [vmem:[#allocation3 + $0x3] sm:$0x1] %vm1171_vm3, %v1540_v49  ;;  %v1499_v33 = vpop.permute.xlu0 %1498  ;;  %v7490_v49 = vpack.c.bf16 %v1954_v41, %v1950_v39  ;;  %v1995_v39 = vld [vmem:[#allocation9 + $0x5f8] sm:$0xff] }
 0x2dc   :  { %1501 = vst.msk [vmem:[#allocation3 + $0x1] sm:$0x1] %vm1171_vm3, %v1499_v33  ;;  %v1956_v33 = vld [vmem:[#allocation9 + $0x4c0] sm:$0xff] }
 0x2de   :  { %v1553_v52 = vpop.permute.xlu1 %1552 }
 0x2df   :  { %1555 = vst.msk [vmem:[#allocation3 + $0x3] sm:$0x1] %vm1185_vm4, %v1553_v52  ;;  %v1512_v11 = vpop.permute.xlu0 %1511  ;;  %v1960_v52 = vld [vmem:[#allocation9 + $0x4e0] sm:$0xff] }
 0x2e0   :  { %1514 = vst.msk [vmem:[#allocation3 + $0x1] sm:$0x1] %vm1185_vm4, %v1512_v11  ;;  %v7238_v2 = vpack.c.bf16 %v1960_v52, %v1956_v33  ;;  %v1990_v33 = vld [vmem:[#allocation9 + $0x5d0] sm:$0xff] }
 0x2e1   :  { %v1994_v52 = vld [vmem:[#allocation9 + $0x5f0] sm:$0xff] }
 0x2e2   :  { %v1609_v54 = vpop.permute.xlu1 %1608  ;;  %v7510_v60 = vpack.c.bf16 %v1994_v52, %v1990_v33  ;;  %v2028_v52 = vld [vmem:[#allocation9 + $0x700] sm:$0xff] }
 0x2e3   :  { %1611 = vst.msk [vmem:[#allocation3 + $0x7] sm:$0x1] %vm1157_vm2, %v1609_v54  ;;  %v1568_v55 = vpop.permute.xlu0 %1567  ;;  %v7236_v54 = vpack.c.bf16 %v1961_v44, %v1957_v42  ;;  %v7250_v42 = vpack.c.bf16 %v1984_v3, %v1980_v30  ;;  %v7506_v44 = vpack.c.bf16 %v1986_v37, %v1982_v35  ;;  %v2014_v30 = vld [vmem:[#allocation9 + $0x690] sm:$0xff]  ;;  %v2027_v35 = vld [vmem:[#allocation9 + $0x6f8] sm:$0xff] }
 0x2e4   :  { %1570 = vst.msk [vmem:[#allocation3 + $0x5] sm:$0x1] %vm1157_vm2, %v1568_v55  ;;  %v7492_v55 = vpack.c.bf16 %v1963_v47, %v1959_v46  ;;  %v1988_v46 = vld [vmem:[#allocation9 + $0x5c0] sm:$0xff]  ;;  %v2018_v3 = vld [vmem:[#allocation9 + $0x6b0] sm:$0xff] }
 0x2e5   :  { %v1992_v47 = vld [vmem:[#allocation9 + $0x5e0] sm:$0xff] }
 0x2e6   :  { %v1622_v57 = vpop.permute.xlu1 %1621  ;;  %v7254_v43 = vpack.c.bf16 %v1992_v47, %v1988_v46  ;;  %v2029_v46 = vld [vmem:[#allocation9 + $0x708] sm:$0xff] }
 0x2e7   :  { %1624 = vst.msk [vmem:[#allocation3 + $0x7] sm:$0x1] %vm1171_vm3, %v1622_v57  ;;  %v1581_v0 = vpop.permute.xlu0 %1580  ;;  %v1958_v57 = vld [vmem:[#allocation9 + $0x4d0] sm:$0xff]  ;;  %v2033_v47 = vld [vmem:[#allocation9 + $0x728] sm:$0xff] }
 0x2e8   :  { %1583 = vst.msk [vmem:[#allocation3 + $0x5] sm:$0x1] %vm1171_vm3, %v1581_v0  ;;  %v1962_v0 = vld [vmem:[#allocation9 + $0x4f0] sm:$0xff] }
 0x2ea   :  { %v1635_v61 = vpop.permute.xlu1 %1634 }
 0x2eb   :  { %1637 = vst.msk [vmem:[#allocation3 + $0x7] sm:$0x1] %vm1185_vm4, %v1635_v61  ;;  %v1594_v62 = vpop.permute.xlu0 %1593  ;;  %v1971_v61 = vld [vmem:[#allocation9 + $0x538] sm:$0xff] }
 0x2ec   :  { %1596 = vst.msk [vmem:[#allocation3 + $0x5] sm:$0x1] %vm1185_vm4, %v1594_v62 }
 0x2ee   :  { %v1363_v19 = vpop.permute.xlu1 %1362 }
 0x2ef   :  { %1365 = vst.msk [vmem:[#allocation3 + $0xa] sm:$0x1] %vm1157_vm2, %v1363_v19  ;;  %v1322_v51 = vpop.permute.xlu0 %1321  ;;  %v7494_v19 = vpack.c.bf16 %v1962_v0, %v1958_v57  ;;  %v2003_v57 = vld [vmem:[#allocation9 + $0x638] sm:$0xff] }
 0x2f0   :  { %1324 = vst.msk [vmem:[#allocation3 + $0x8] sm:$0x1] %vm1157_vm2, %v1322_v51  ;;  %v1964_v51 = vld [vmem:[#allocation9 + $0x500] sm:$0xff] }
 0x2f2   :  { %v1445_v5 = vpop.permute.xlu1 %1444 }
 0x2f3   :  { %1447 = vst.msk [vmem:[#allocation3 + $0xe] sm:$0x1] %vm1157_vm2, %v1445_v5  ;;  %v1404_v6 = vpop.permute.xlu0 %1403  ;;  %v1802_v7 = vld [vmem:[#allocation3] sm:$0xff] }
 0x2f4   :  { %1406 = vst.msk [vmem:[#allocation3 + $0xc] sm:$0x1] %vm1157_vm2, %v1404_v6  ;;  %v2347_v10 = vrot.slane %v1802_v7, %v10892_v4  ;;  %v2340_v12 = vcombine.high %v1802_v7, %v1802_v7  ;;  %v1968_v5 = vld [vmem:[#allocation9 + $0x520] sm:$0xff]  ;;  %v7496_v6 = vpack.c.bf16 %v1971_v61, %v1967_v58  ;;  %v1966_v7 = vld [vmem:[#allocation9 + $0x510] sm:$0xff] }
 0x2f5   :  { %v7242_v56 = vpack.c.bf16 %v1968_v5, %v1964_v51  ;;  %v7498_v13 = vpack.c.bf16 %v1970_v8, %v1966_v7  ;;  %v1996_v58 = vld [vmem:[#allocation9 + $0x600] sm:$0xff]  ;;  %v1998_v51 = vld [vmem:[#allocation9 + $0x610] sm:$0xff]  ;;  %v2011_v7 = vld [vmem:[#allocation9 + $0x678] sm:$0xff] }
 0x2f6   :  { %v1376_v36 = vpop.permute.xlu1 %1375  ;;  %v2355_v14 = vcombine.high %v2347_v10, %v2347_v10  ;;  %v10898_v17 = vrot.slane %v2340_v12, %v10892_v4  ;;  %v1975_v12 = vld [vmem:[#allocation9 + $0x558] sm:$0xff]  ;;  %v2000_v61 = vld [vmem:[#allocation9 + $0x620] sm:$0xff]  ;;  %v2002_v5 = vld [vmem:[#allocation9 + $0x630] sm:$0xff] }
 0x2f7   :  { %1378 = vst.msk [vmem:[#allocation3 + $0xa] sm:$0x1] %vm1171_vm3, %v1376_v36  ;;  %v1335_v21 = vpop.permute.xlu0 %1334  ;;  %v1972_v36 = vld [vmem:[#allocation9 + $0x540] sm:$0xff]  ;;  %v7500_v18 = vpack.c.bf16 %v1979_v28, %v1975_v12 }
 0x2f8   :  { %1337 = vst.msk [vmem:[#allocation3 + $0x8] sm:$0x1] %vm1171_vm3, %v1335_v21  ;;  %2446 = vmatprep.mubr.f32.mxu0 %v2355_v14  ;;  %2730 = vmatprep.mubr.f32.mxu1 %v2355_v14  ;;  %v2356_v24 = vcombine.high %v10898_v17, %v10898_v17  ;;  %v1976_v14 = vld [vmem:[#allocation9 + $0x560] sm:$0xff]  ;;  %v1978_v21 = vld [vmem:[#allocation9 + $0x570] sm:$0xff] }
 0x2f9   :  { %2447 = vmatmul.mubr.f32.vlgmr.msra.gmra.mrb[48].mxu0 %v2347_v10  ;;  %2731 = vmatmul.mubr.f32.vlgmr.msra.gmra.mrb[40].mxu1 %v2347_v10  ;;  %v1977_v10 = vld [vmem:[#allocation9 + $0x568] sm:$0xff]  ;;  %v7502_v26 = vpack.c.bf16 %v1978_v21, %v1974_v20  ;;  %v2004_v12 = vld [vmem:[#allocation9 + $0x640] sm:$0xff]  ;;  %v2019_v20 = vld [vmem:[#allocation9 + $0x6b8] sm:$0xff] }
 0x2fa   :  { %7227 = vmatpush1.bf16.msra.mxu0 %v7226_v16  ;;  %7483 = vmatpush1.bf16.msra.mxu1 %v7482_v15  ;;  %v1458_v31 = vpop.permute.xlu1 %1457  ;;  %v7244_v15 = vpack.c.bf16 %v1977_v10, %v1973_v9  ;;  %v7258_v9 = vpack.c.bf16 %v2000_v61, %v1996_v58  ;;  %v7514_v10 = vpack.c.bf16 %v2002_v5, %v1998_v51  ;;  %v2008_v28 = vld [vmem:[#allocation9 + $0x660] sm:$0xff]  ;;  %v2039_v58 = vld [vmem:[#allocation9 + $0x758] sm:$0xff] }
 0x2fb   :  { %2517 = vmatprep.mubr.f32.mxu0 %v2356_v24  ;;  %2801 = vmatprep.mubr.f32.mxu1 %v2356_v24  ;;  %1460 = vst.msk [vmem:[#allocation3 + $0xe] sm:$0x1] %vm1171_vm3, %v1458_v31  ;;  %v1417_v50 = vpop.permute.xlu0 %1416  ;;  %v1987_v24 = vld [vmem:[#allocation9 + $0x5b8] sm:$0xff]  ;;  %v2040_v51 = vld [vmem:[#allocation9 + $0x760] sm:$0xff] }
 0x2fc   :  { %1419 = vst.msk [vmem:[#allocation3 + $0xc] sm:$0x1] %vm1171_vm3, %v1417_v50  ;;  %7229 = vmatprep.subr.bf16.mxu0 %v7228_v25  ;;  %7485 = vmatprep.subr.bf16.mxu1 %v7484_v40  ;;  %v7246_v40 = vpack.c.bf16 %v1976_v14, %v1972_v36  ;;  %v1989_v50 = vld [vmem:[#allocation9 + $0x5c8] sm:$0xff]  ;;  %v2006_v36 = vld [vmem:[#allocation9 + $0x650] sm:$0xff]  ;;  %v2043_v61 = vld [vmem:[#allocation9 + $0x778] sm:$0xff] }
 0x2fd   :  { %v2010_v14 = vld [vmem:[#allocation9 + $0x670] sm:$0xff] }
 0x2fe   :  { %7231 = vmatpush1.bf16.msra.mxu0 %v7230_v32  ;;  %7487 = vmatpush1.bf16.msra.mxu1 %v7486_v34  ;;  %v1389_v48 = vpop.permute.xlu1 %1388  ;;  %v7248_v32 = vpack.c.bf16 %v1985_v22, %v1981_v45  ;;  %v7504_v34 = vpack.c.bf16 %v1987_v24, %v1983_v23  ;;  %v7262_v45 = vpack.c.bf16 %v2008_v28, %v2004_v12  ;;  %v2012_v23 = vld [vmem:[#allocation9 + $0x680] sm:$0xff] }
 0x2ff   :  { %1391 = vst.msk [vmem:[#allocation3 + $0xa] sm:$0x1] %vm1185_vm4, %v1389_v48  ;;  %v1348_v11 = vpop.permute.xlu0 %1347  ;;  %7233 = vmatprep.subr.bf16.mxu0 %v7232_v53  ;;  %7489 = vmatprep.subr.bf16.mxu1 %v7488_v38  ;;  %v1993_v53 = vld [vmem:[#allocation9 + $0x5e8] sm:$0xff]  ;;  %v1991_v38 = vld [vmem:[#allocation9 + $0x5d8] sm:$0xff]  ;;  %v7518_v22 = vpack.c.bf16 %v2010_v14, %v2006_v36  ;;  %v2016_v24 = vld [vmem:[#allocation9 + $0x6a0] sm:$0xff] }
 0x300   :  { %1350 = vst.msk [vmem:[#allocation3 + $0x8] sm:$0x1] %vm1185_vm4, %v1348_v11  ;;  %v1997_v11 = vld [vmem:[#allocation9 + $0x608] sm:$0xff]  ;;  %v7266_v37 = vpack.c.bf16 %v2016_v24, %v2012_v23  ;;  %v2046_v14 = vld [vmem:[#allocation9 + $0x790] sm:$0xff]  ;;  %v2052_v23 = vld [vmem:[#allocation9 + $0x7c0] sm:$0xff] }
 0x301   :  { %v2056_v24 = vld [vmem:[#allocation9 + $0x7e0] sm:$0xff] }
 0x302   :  { %7235 = vmatpush1.bf16.msra.mxu0 %v7234_v29  ;;  %7491 = vmatpush1.bf16.msra.mxu1 %v7490_v49  ;;  %v1471_v62 = vpop.permute.xlu1 %1470  ;;  %v7252_v29 = vpack.c.bf16 %v1993_v53, %v1989_v50  ;;  %v7508_v49 = vpack.c.bf16 %v1995_v39, %v1991_v38  ;;  %v7522_v50 = vpack.c.bf16 %v2018_v3, %v2014_v30  ;;  %v2020_v53 = vld [vmem:[#allocation9 + $0x6c0] sm:$0xff]  ;;  %v2058_v30 = vld [vmem:[#allocation9 + $0x7f0] sm:$0xff]  ;;  %v2061_v3 = vld [vmem:[#allocation9 + $0x808] sm:$0xff] }
 0x303   :  { %1473 = vst.msk [vmem:[#allocation3 + $0xe] sm:$0x1] %vm1185_vm4, %v1471_v62  ;;  %v1430_v27 = vpop.permute.xlu0 %1429  ;;  %7237 = vmatprep.subr.bf16.mxu0 %v7236_v54  ;;  %7493 = vmatprep.subr.bf16.mxu1 %v7492_v55  ;;  %v2001_v54 = vld [vmem:[#allocation9 + $0x628] sm:$0xff]  ;;  %v1999_v55 = vld [vmem:[#allocation9 + $0x618] sm:$0xff]  ;;  %v2024_v38 = vld [vmem:[#allocation9 + $0x6e0] sm:$0xff] }
 0x304   :  { %1432 = vst.msk [vmem:[#allocation3 + $0xc] sm:$0x1] %vm1185_vm4, %v1430_v27  ;;  %v2005_v27 = vld [vmem:[#allocation9 + $0x648] sm:$0xff] }
 0x306   :  { %7239 = vmatpush1.bf16.msra.mxu0 %v7238_v2  ;;  %7495 = vmatpush1.bf16.msra.mxu1 %v7494_v19  ;;  %v1691_v59 = vpop.permute.xlu1 %1690  ;;  %v7256_v2 = vpack.c.bf16 %v2001_v54, %v1997_v11  ;;  %v7512_v19 = vpack.c.bf16 %v2003_v57, %v1999_v55  ;;  %v2032_v11 = vld [vmem:[#allocation9 + $0x720] sm:$0xff]  ;;  %v7272_v54 = vpack.c.bf16 %v2033_v47, %v2029_v46  ;;  %v2030_v57 = vld [vmem:[#allocation9 + $0x710] sm:$0xff]  ;;  %v2069_v47 = vld [vmem:[#allocation9 + $0x848] sm:$0xff] }
 0x307   :  { %1693 = vst.msk [vmem:[#allocation3 + $0xb] sm:$0x1] %vm1157_vm2, %v1691_v59  ;;  %v1650_v16 = vpop.permute.xlu0 %1649  ;;  %7241 = vmatprep.subr.bf16.mxu0 %v7240_v1  ;;  %7497 = vmatprep.subr.bf16.mxu1 %v7496_v6  ;;  %v2009_v1 = vld [vmem:[#allocation9 + $0x668] sm:$0xff]  ;;  %v2007_v6 = vld [vmem:[#allocation9 + $0x658] sm:$0xff]  ;;  %v2066_v46 = vld [vmem:[#allocation9 + $0x830] sm:$0xff] }
 0x308   :  { %1652 = vst.msk [vmem:[#allocation3 + $0x9] sm:$0x1] %vm1157_vm2, %v1650_v16  ;;  %v2013_v16 = vld [vmem:[#allocation9 + $0x688] sm:$0xff] }
 0x30a   :  { %7243 = vmatpush1.bf16.msra.mxu0 %v7242_v56  ;;  %7499 = vmatpush1.bf16.msra.mxu1 %v7498_v13  ;;  %v1704_v25 = vpop.permute.xlu1 %1703  ;;  %v7260_v56 = vpack.c.bf16 %v2009_v1, %v2005_v27  ;;  %v7516_v13 = vpack.c.bf16 %v2011_v7, %v2007_v6  ;;  %v7532_v27 = vpack.c.bf16 %v2043_v61, %v2039_v58  ;;  %v2038_v1 = vld [vmem:[#allocation9 + $0x750] sm:$0xff]  ;;  %v2045_v7 = vld [vmem:[#allocation9 + $0x788] sm:$0xff] }
 0x30b   :  { %1706 = vst.msk [vmem:[#allocation3 + $0xb] sm:$0x1] %vm1171_vm3, %v1704_v25  ;;  %v1663_v31 = vpop.permute.xlu0 %1662  ;;  %7245 = vmatprep.subr.bf16.mxu0 %v7244_v15  ;;  %7501 = vmatprep.subr.bf16.mxu1 %v7500_v18  ;;  %v2017_v15 = vld [vmem:[#allocation9 + $0x6a8] sm:$0xff]  ;;  %v2015_v18 = vld [vmem:[#allocation9 + $0x698] sm:$0xff]  ;;  %v2042_v6 = vld [vmem:[#allocation9 + $0x770] sm:$0xff] }
 0x30c   :  { %1665 = vst.msk [vmem:[#allocation3 + $0x9] sm:$0x1] %vm1171_vm3, %v1663_v31  ;;  %v2021_v31 = vld [vmem:[#allocation9 + $0x6c8] sm:$0xff]  ;;  %v7534_v28 = vpack.c.bf16 %v2042_v6, %v2038_v1  ;;  %v2080_v1 = vld [vmem:[#allocation9 + $0x8a0] sm:$0xff]  ;;  %v2078_v6 = vld [vmem:[#allocation9 + $0x890] sm:$0xff] }
 0x30d   :  { %v2077_v58 = vld [vmem:[#allocation9 + $0x888] sm:$0xff] }
 0x30e   :  { %7247 = vmatpush1.bf16.msra.mxu0 %v7246_v40  ;;  %7503 = vmatpush1.bf16.msra.mxu1 %v7502_v26  ;;  %v1717_v41 = vpop.permute.xlu1 %1716  ;;  %v7264_v40 = vpack.c.bf16 %v2017_v15, %v2013_v16  ;;  %v7520_v26 = vpack.c.bf16 %v2019_v20, %v2015_v18  ;;  %v2050_v16 = vld [vmem:[#allocation9 + $0x7b0] sm:$0xff]  ;;  %v2053_v15 = vld [vmem:[#allocation9 + $0x7c8] sm:$0xff]  ;;  %v2055_v20 = vld [vmem:[#allocation9 + $0x7d8] sm:$0xff] }
 0x30f   :  { %1719 = vst.msk [vmem:[#allocation3 + $0xb] sm:$0x1] %vm1185_vm4, %v1717_v41  ;;  %v1676_v48 = vpop.permute.xlu0 %1675  ;;  %7249 = vmatprep.subr.bf16.mxu0 %v7248_v32  ;;  %7505 = vmatprep.subr.bf16.mxu1 %v7504_v34  ;;  %v2025_v32 = vld [vmem:[#allocation9 + $0x6e8] sm:$0xff]  ;;  %v2023_v34 = vld [vmem:[#allocation9 + $0x6d8] sm:$0xff] }
 0x310   :  { %1678 = vst.msk [vmem:[#allocation3 + $0x9] sm:$0x1] %vm1185_vm4, %v1676_v48  ;;  %v7268_v39 = vpack.c.bf16 %v2025_v32, %v2021_v31  ;;  %v7524_v41 = vpack.c.bf16 %v2027_v35, %v2023_v34  ;;  %v2031_v48 = vld [vmem:[#allocation9 + $0x718] sm:$0xff]  ;;  %v2057_v18 = vld [vmem:[#allocation9 + $0x7e8] sm:$0xff] }
 0x311   :  { %v2065_v31 = vld [vmem:[#allocation9 + $0x828] sm:$0xff]  ;;  %v2063_v32 = vld [vmem:[#allocation9 + $0x818] sm:$0xff] }
 0x312   :  { %7251 = vmatpush1.bf16.msra.mxu0 %v7250_v42  ;;  %7507 = vmatpush1.bf16.msra.mxu1 %v7506_v44  ;;  %v1773_v0 = vpop.permute.xlu1 %1772  ;;  %v2022_v42 = vld [vmem:[#allocation9 + $0x6d0] sm:$0xff]  ;;  %v2067_v34 = vld [vmem:[#allocation9 + $0x838] sm:$0xff]  ;;  %v2081_v61 = vld [vmem:[#allocation9 + $0x8a8] sm:$0xff] }
 0x313   :  { %1775 = vst.msk [vmem:[#allocation3 + $0xf] sm:$0x1] %vm1157_vm2, %v1773_v0  ;;  %v1732_v62 = vpop.permute.xlu0 %1731  ;;  %7253 = vmatprep.subr.bf16.mxu0 %v7252_v29  ;;  %7509 = vmatprep.subr.bf16.mxu1 %v7508_v49  ;;  %v2026_v44 = vld [vmem:[#allocation9 + $0x6f0] sm:$0xff]  ;;  %v2035_v29 = vld [vmem:[#allocation9 + $0x738] sm:$0xff]  ;;  %v7270_v49 = vpack.c.bf16 %v2024_v38, %v2020_v53  ;;  %v7288_v53 = vpack.c.bf16 %v2065_v31, %v2061_v3  ;;  %v2101_v31 = vld [vmem:[#allocation9 + $0x948] sm:$0xff] }
 0x314   :  { %1734 = vst.msk [vmem:[#allocation3 + $0xd] sm:$0x1] %vm1157_vm2, %v1732_v62  ;;  %v7526_v33 = vpack.c.bf16 %v2026_v44, %v2022_v42  ;;  %v7528_v55 = vpack.c.bf16 %v2035_v29, %v2031_v48  ;;  %v2034_v0 = vld [vmem:[#allocation9 + $0x730] sm:$0xff]  ;;  %v7274_v62 = vpack.c.bf16 %v2032_v11, %v2028_v52  ;;  %v7544_v38 = vpack.c.bf16 %v2067_v34, %v2063_v32  ;;  %v2073_v48 = vld [vmem:[#allocation9 + $0x868] sm:$0xff]  ;;  %v2071_v29 = vld [vmem:[#allocation9 + $0x858] sm:$0xff] }
 0x315   :  { %v2062_v44 = vld [vmem:[#allocation9 + $0x810] sm:$0xff]  ;;  %v2068_v11 = vld [vmem:[#allocation9 + $0x840] sm:$0xff]  ;;  %v2105_v32 = vld [vmem:[#allocation9 + $0x968] sm:$0xff] }
 0x316   :  { %7255 = vmatpush1.bf16.msra.mxu0 %v7254_v43  ;;  %7511 = vmatpush1.bf16.msra.mxu1 %v7510_v60  ;;  %v1786_v8 = vpop.permute.xlu1 %1785  ;;  %v2037_v43 = vld [vmem:[#allocation9 + $0x748] sm:$0xff]  ;;  %v7546_v52 = vpack.c.bf16 %v2066_v46, %v2062_v44  ;;  %v2098_v3 = vld [vmem:[#allocation9 + $0x930] sm:$0xff]  ;;  %v2103_v34 = vld [vmem:[#allocation9 + $0x958] sm:$0xff] }
 0x317   :  { %1788 = vst.msk [vmem:[#allocation3 + $0xf] sm:$0x1] %vm1171_vm3, %v1786_v8  ;;  %v1745_v59 = vpop.permute.xlu0 %1744  ;;  %7257 = vmatprep.subr.bf16.mxu0 %v7256_v2  ;;  %7513 = vmatprep.subr.bf16.mxu1 %v7512_v19  ;;  %v2041_v60 = vld [vmem:[#allocation9 + $0x768] sm:$0xff]  ;;  %v7530_v2 = vpack.c.bf16 %v2034_v0, %v2030_v57  ;;  %v2036_v19 = vld [vmem:[#allocation9 + $0x740] sm:$0xff]  ;;  %v7292_v0 = vpack.c.bf16 %v2073_v48, %v2069_v47  ;;  %v2102_v44 = vld [vmem:[#allocation9 + $0x950] sm:$0xff] }
 0x318   :  { %1747 = vst.msk [vmem:[#allocation3 + $0xd] sm:$0x1] %vm1171_vm3, %v1745_v59  ;;  %v7276_v5 = vpack.c.bf16 %v2041_v60, %v2037_v43  ;;  %v2049_v8 = vld [vmem:[#allocation9 + $0x7a8] sm:$0xff]  ;;  %v7278_v12 = vpack.c.bf16 %v2040_v51, %v2036_v19  ;;  %v2044_v59 = vld [vmem:[#allocation9 + $0x780] sm:$0xff]  ;;  %v2074_v60 = vld [vmem:[#allocation9 + $0x870] sm:$0xff] }
 0x319   :  { %v2106_v47 = vld [vmem:[#allocation9 + $0x970] sm:$0xff]  ;;  %v2109_v48 = vld [vmem:[#allocation9 + $0x988] sm:$0xff] }
 0x31a   :  { %7259 = vmatpush1.bf16.msra.mxu0 %v7258_v9  ;;  %7515 = vmatpush1.bf16.msra.mxu1 %v7514_v10  ;;  %v1799_v21 = vpop.permute.xlu1 %1798  ;;  %v2047_v9 = vld [vmem:[#allocation9 + $0x798] sm:$0xff] }
 0x31b   :  { %1801 = vst.msk [vmem:[#allocation3 + $0xf] sm:$0x1] %vm1185_vm4, %v1799_v21  ;;  %v1758_v25 = vpop.permute.xlu0 %1757  ;;  %7261 = vmatprep.subr.bf16.mxu0 %v7260_v56  ;;  %7517 = vmatprep.subr.bf16.mxu1 %v7516_v13  ;;  %v2051_v10 = vld [vmem:[#allocation9 + $0x7b8] sm:$0xff]  ;;  %v2048_v56 = vld [vmem:[#allocation9 + $0x7a0] sm:$0xff]  ;;  %v7280_v13 = vpack.c.bf16 %v2049_v8, %v2045_v7  ;;  %v2082_v8 = vld [vmem:[#allocation9 + $0x8b0] sm:$0xff] }
 0x31c   :  { %1760 = vst.msk [vmem:[#allocation3 + $0xd] sm:$0x1] %vm1185_vm4, %v1758_v25  ;;  %v7536_v36 = vpack.c.bf16 %v2051_v10, %v2047_v9  ;;  %v2059_v21 = vld [vmem:[#allocation9 + $0x7f8] sm:$0xff]  ;;  %v7284_v25 = vpack.c.bf16 %v2057_v18, %v2053_v15  ;;  %v2085_v9 = vld [vmem:[#allocation9 + $0x8c8] sm:$0xff]  ;;  %v2090_v15 = vld [vmem:[#allocation9 + $0x8f0] sm:$0xff] }
 0x31d   :  { %v2089_v10 = vld [vmem:[#allocation9 + $0x8e8] sm:$0xff] }
 0x31e   :  { %7263 = vmatpush1.bf16.msra.mxu0 %v7262_v45  ;;  %7519 = vmatpush1.bf16.msra.mxu1 %v7518_v22  ;;  %v7282_v45 = vpack.c.bf16 %v2048_v56, %v2044_v59  ;;  %v7538_v22 = vpack.c.bf16 %v2050_v16, %v2046_v14  ;;  %v7554_v59 = vpack.c.bf16 %v2082_v8, %v2078_v6  ;;  %v2086_v14 = vld [vmem:[#allocation9 + $0x8d0] sm:$0xff]  ;;  %v2093_v18 = vld [vmem:[#allocation9 + $0x908] sm:$0xff] }
 0x31f   :  { %7265 = vmatprep.subr.bf16.mxu0 %v7264_v40  ;;  %7521 = vmatprep.subr.bf16.mxu1 %v7520_v26  ;;  %v7540_v40 = vpack.c.bf16 %v2059_v21, %v2055_v20  ;;  %v2054_v26 = vld [vmem:[#allocation9 + $0x7d0] sm:$0xff]  ;;  %v7300_v56 = vpack.c.bf16 %v2089_v10, %v2085_v9  ;;  %v2097_v20 = vld [vmem:[#allocation9 + $0x928] sm:$0xff]  ;;  %v2095_v21 = vld [vmem:[#allocation9 + $0x918] sm:$0xff] }
 0x320   :  { %v2118_v6 = vld [vmem:[#allocation9 + $0x9d0] sm:$0xff]  ;;  %v2125_v9 = vld [vmem:[#allocation9 + $0xa08] sm:$0xff] }
 0x321   :  { %v2122_v8 = vld [vmem:[#allocation9 + $0x9f0] sm:$0xff]  ;;  %v2129_v10 = vld [vmem:[#allocation9 + $0xa28] sm:$0xff] }
 0x322   :  { %7267 = vmatpush1.bf16.msra.mxu0 %v7266_v37  ;;  %7523 = vmatpush1.bf16.msra.mxu1 %v7522_v50  ;;  %v7286_v37 = vpack.c.bf16 %v2056_v24, %v2052_v23  ;;  %v7542_v50 = vpack.c.bf16 %v2058_v30, %v2054_v26  ;;  %v7558_v23 = vpack.c.bf16 %v2090_v15, %v2086_v14  ;;  %v2094_v26 = vld [vmem:[#allocation9 + $0x910] sm:$0xff] }
 0x323   :  { %7269 = vmatprep.subr.bf16.mxu0 %v7268_v39  ;;  %7525 = vmatprep.subr.bf16.mxu1 %v7524_v41  ;;  %v10922_v35 = vld [vmem:[#allocation3 + $0x8] sm:$0xff]  ;;  %v2060_v39 = vld [vmem:[#allocation9 + $0x800] sm:$0xff]  ;;  %v7304_v24 = vpack.c.bf16 %v2097_v20, %v2093_v18 }
 0x324   :  { %v2064_v41 = vld [vmem:[#allocation9 + $0x820] sm:$0xff]  ;;  %v10926_v42 = vrot.slane %v10922_v35, %v10892_v4  ;;  %v2126_v14 = vld [vmem:[#allocation9 + $0xa10] sm:$0xff]  ;;  %v2133_v18 = vld [vmem:[#allocation9 + $0xa48] sm:$0xff] }
 0x325   :  { %v2130_v15 = vld [vmem:[#allocation9 + $0xa30] sm:$0xff]  ;;  %v2137_v20 = vld [vmem:[#allocation9 + $0xa68] sm:$0xff] }
 0x326   :  { %7271 = vmatpush1.bf16.msra.mxu0 %v7270_v49  ;;  %7527 = vmatpush1.bf16.msra.mxu1 %v7526_v33  ;;  %v2075_v49 = vld [vmem:[#allocation9 + $0x878] sm:$0xff]  ;;  %v7290_v33 = vpack.c.bf16 %v2064_v41, %v2060_v39  ;;  %v2372_v57 = vcombine.high %v10926_v42, %v10926_v42  ;;  %v2100_v39 = vld [vmem:[#allocation9 + $0x940] sm:$0xff] }
 0x327   :  { %7273 = vmatprep.subr.bf16.mxu0 %v7272_v54  ;;  %7529 = vmatprep.subr.bf16.mxu1 %v7528_v55  ;;  %v2072_v54 = vld [vmem:[#allocation9 + $0x860] sm:$0xff]  ;;  %v2070_v55 = vld [vmem:[#allocation9 + $0x850] sm:$0xff]  ;;  %v7548_v43 = vpack.c.bf16 %v2075_v49, %v2071_v29  ;;  %v2113_v29 = vld [vmem:[#allocation9 + $0x9a8] sm:$0xff] }
 0x328   :  { %v7294_v19 = vpack.c.bf16 %v2072_v54, %v2068_v11  ;;  %v7550_v51 = vpack.c.bf16 %v2074_v60, %v2070_v55  ;;  %v2104_v41 = vld [vmem:[#allocation9 + $0x960] sm:$0xff]  ;;  %v2111_v49 = vld [vmem:[#allocation9 + $0x998] sm:$0xff]  ;;  %v7566_v11 = vpack.c.bf16 %v2106_v47, %v2102_v44  ;;  %v7312_v54 = vpack.c.bf16 %v2113_v29, %v2109_v48  ;;  %v2114_v60 = vld [vmem:[#allocation9 + $0x9b0] sm:$0xff] }
 0x329   :  { %v2108_v55 = vld [vmem:[#allocation9 + $0x980] sm:$0xff]  ;;  %v2142_v44 = vld [vmem:[#allocation9 + $0xa90] sm:$0xff]  ;;  %v2149_v48 = vld [vmem:[#allocation9 + $0xac8] sm:$0xff] }
 0x32a   :  { %7275 = vmatpush1.bf16.msra.mxu0 %v7274_v62  ;;  %7531 = vmatpush1.bf16.msra.mxu1 %v7530_v2  ;;  %v2079_v62 = vld [vmem:[#allocation9 + $0x898] sm:$0xff]  ;;  %v2146_v47 = vld [vmem:[#allocation9 + $0xab0] sm:$0xff]  ;;  %v2153_v29 = vld [vmem:[#allocation9 + $0xae8] sm:$0xff] }
 0x32b   :  { %7277 = vmatprep.subr.bf16.mxu0 %v7276_v5  ;;  %7533 = vmatprep.subr.bf16.mxu1 %v7532_v27  ;;  %v2083_v2 = vld [vmem:[#allocation9 + $0x8b8] sm:$0xff]  ;;  %v7296_v5 = vpack.c.bf16 %v2081_v61, %v2077_v58  ;;  %v2076_v27 = vld [vmem:[#allocation9 + $0x880] sm:$0xff]  ;;  %v2117_v58 = vld [vmem:[#allocation9 + $0x9c8] sm:$0xff] }
 0x32c   :  { %v7552_v7 = vpack.c.bf16 %v2083_v2, %v2079_v62  ;;  %v2121_v61 = vld [vmem:[#allocation9 + $0x9e8] sm:$0xff]  ;;  %v2119_v62 = vld [vmem:[#allocation9 + $0x9d8] sm:$0xff] }
 0x32d   :  { %v2123_v2 = vld [vmem:[#allocation9 + $0x9f8] sm:$0xff] }
 0x32e   :  { %7279 = vmatpush1.bf16.msra.mxu0 %v7278_v12  ;;  %7535 = vmatpush1.bf16.msra.mxu1 %v7534_v28  ;;  %v2087_v12 = vld [vmem:[#allocation9 + $0x8d8] sm:$0xff]  ;;  %v7298_v28 = vpack.c.bf16 %v2080_v1, %v2076_v27  ;;  %v2116_v27 = vld [vmem:[#allocation9 + $0x9c0] sm:$0xff] }
 0x32f   :  { %7281 = vmatprep.subr.bf16.mxu0 %v7280_v13  ;;  %7537 = vmatprep.subr.bf16.mxu1 %v7536_v36  ;;  %v2084_v13 = vld [vmem:[#allocation9 + $0x8c0] sm:$0xff] }
 0x330   :  { %v2088_v36 = vld [vmem:[#allocation9 + $0x8e0] sm:$0xff] }
 0x331   :  { %v2120_v1 = vld [vmem:[#allocation9 + $0x9e0] sm:$0xff] }
 0x332   :  { %7283 = vmatpush1.bf16.msra.mxu0 %v7282_v45  ;;  %7539 = vmatpush1.bf16.msra.mxu1 %v7538_v22  ;;  %v2099_v45 = vld [vmem:[#allocation9 + $0x938] sm:$0xff]  ;;  %v7302_v22 = vpack.c.bf16 %v2088_v36, %v2084_v13  ;;  %v2124_v13 = vld [vmem:[#allocation9 + $0xa00] sm:$0xff] }
 0x333   :  { %7285 = vmatprep.subr.bf16.mxu0 %v7284_v25  ;;  %7541 = vmatprep.subr.bf16.mxu1 %v7540_v40  ;;  %v2092_v25 = vld [vmem:[#allocation9 + $0x900] sm:$0xff]  ;;  %v7560_v30 = vpack.c.bf16 %v2099_v45, %v2095_v21  ;;  %v2135_v21 = vld [vmem:[#allocation9 + $0xa58] sm:$0xff] }
 0x334   :  { %v2096_v40 = vld [vmem:[#allocation9 + $0x920] sm:$0xff]  ;;  %v2139_v45 = vld [vmem:[#allocation9 + $0xa78] sm:$0xff] }
 0x335   :  { %v2128_v36 = vld [vmem:[#allocation9 + $0xa20] sm:$0xff] }
 0x336   :  { %7287 = vmatpush1.bf16.msra.mxu0 %v7286_v37  ;;  %7543 = vmatpush1.bf16.msra.mxu1 %v7542_v50  ;;  %v2107_v37 = vld [vmem:[#allocation9 + $0x978] sm:$0xff]  ;;  %v7306_v50 = vpack.c.bf16 %v2096_v40, %v2092_v25  ;;  %v2132_v25 = vld [vmem:[#allocation9 + $0xa40] sm:$0xff] }
 0x337   :  { %7289 = vmatprep.subr.bf16.mxu0 %v7288_v53  ;;  %7545 = vmatprep.subr.bf16.mxu1 %v7544_v38  ;;  %v7562_v53 = vpack.c.bf16 %v2098_v3, %v2094_v26  ;;  %v7308_v38 = vpack.c.bf16 %v2105_v32, %v2101_v31  ;;  %v7564_v46 = vpack.c.bf16 %v2107_v37, %v2103_v34  ;;  %v2136_v40 = vld [vmem:[#allocation9 + $0xa60] sm:$0xff]  ;;  %v2134_v26 = vld [vmem:[#allocation9 + $0xa50] sm:$0xff]  ;;  %v2141_v31 = vld [vmem:[#allocation9 + $0xa88] sm:$0xff] }
 0x338   :  { %v2138_v3 = vld [vmem:[#allocation9 + $0xa70] sm:$0xff]  ;;  %v2145_v32 = vld [vmem:[#allocation9 + $0xaa8] sm:$0xff]  ;;  %v2143_v34 = vld [vmem:[#allocation9 + $0xa98] sm:$0xff] }
 0x339   :  { %2518 = vmatmul.mubr.f32.vlgmr.msra.gmra.mrb[48].mxu0 %v10898_v17  ;;  %2802 = vmatmul.mubr.f32.vlgmr.msra.gmra.mrb[40].mxu1 %v10898_v17  ;;  %v2091_v17 = vld [vmem:[#allocation9 + $0x8f8] sm:$0xff] }
 0x33a   :  { %7291 = vmatpush1.bf16.msra.mxu0 %v7290_v33  ;;  %2588 = vmatprep.mubr.f32.mxu0 %v2372_v57  ;;  %v7556_v16 = vpack.c.bf16 %v2091_v17, %v2087_v12  ;;  %v2115_v33 = vld [vmem:[#allocation9 + $0x9b8] sm:$0xff] }
 0x33b   :  { %7547 = vmatpush1.bf16.msra.mxu1 %v7546_v52  ;;  %2872 = vmatprep.mubr.f32.mxu1 %v2372_v57  ;;  %v7310_v52 = vpack.c.bf16 %v2104_v41, %v2100_v39  ;;  %v2112_v57 = vld [vmem:[#allocation9 + $0x9a0] sm:$0xff]  ;;  %v2127_v12 = vld [vmem:[#allocation9 + $0xa18] sm:$0xff] }
 0x33c   :  { %7293 = vmatprep.subr.bf16.mxu0 %v7292_v0  ;;  %7549 = vmatprep.subr.bf16.mxu1 %v7548_v43  ;;  %v2110_v0 = vld [vmem:[#allocation9 + $0x990] sm:$0xff]  ;;  %v7568_v43 = vpack.c.bf16 %v2115_v33, %v2111_v49  ;;  %v2131_v17 = vld [vmem:[#allocation9 + $0xa38] sm:$0xff]  ;;  %v2140_v39 = vld [vmem:[#allocation9 + $0xa80] sm:$0xff] }
 0x33d   :  { %v2147_v37 = vld [vmem:[#allocation9 + $0xab8] sm:$0xff]  ;;  %v2144_v41 = vld [vmem:[#allocation9 + $0xaa0] sm:$0xff] }
 0x33e   :  { %7295 = vmatpush1.bf16.msra.mxu0 %v7294_v19  ;;  %v7314_v19 = vpack.c.bf16 %v2112_v57, %v2108_v55  ;;  %v2151_v49 = vld [vmem:[#allocation9 + $0xad8] sm:$0xff]  ;;  %v2148_v55 = vld [vmem:[#allocation9 + $0xac0] sm:$0xff] }
 0x33f   :  { %7551 = vmatpush1.bf16.msra.mxu1 %v7550_v51  ;;  %7297 = vmatprep.subr.bf16.mxu0 %v7296_v5  ;;  %v7570_v51 = vpack.c.bf16 %v2114_v60, %v2110_v0  ;;  %v7316_v5 = vpack.c.bf16 %v2121_v61, %v2117_v58  ;;  %v2155_v33 = vld [vmem:[#allocation9 + $0xaf8] sm:$0xff]  ;;  %v2152_v57 = vld [vmem:[#allocation9 + $0xae0] sm:$0xff]  ;;  %v2150_v0 = vld [vmem:[#allocation9 + $0xad0] sm:$0xff] }
 0x340   :  { %7553 = vmatprep.subr.bf16.mxu1 %v7552_v7  ;;  %v7572_v7 = vpack.c.bf16 %v2123_v2, %v2119_v62  ;;  %v2154_v60 = vld [vmem:[#allocation9 + $0xaf0] sm:$0xff]  ;;  %v2157_v58 = vld [vmem:[#allocation9 + $0xb08] sm:$0xff]  ;;  %v2159_v62 = vld [vmem:[#allocation9 + $0xb18] sm:$0xff] }
 0x341   :  { %v2161_v61 = vld [vmem:[#allocation9 + $0xb28] sm:$0xff]  ;;  %v2163_v2 = vld [vmem:[#allocation9 + $0xb38] sm:$0xff] }
 0x342   :  { %7299 = vmatpush1.bf16.msra.mxu0 %v7298_v28  ;;  %v7318_v28 = vpack.c.bf16 %v2120_v1, %v2116_v27  ;;  %v2156_v27 = vld [vmem:[#allocation9 + $0xb00] sm:$0xff] }
 0x343   :  { %7555 = vmatpush1.bf16.msra.mxu1 %v7554_v59  ;;  %7301 = vmatprep.subr.bf16.mxu0 %v7300_v56  ;;  %v7574_v59 = vpack.c.bf16 %v2122_v8, %v2118_v6  ;;  %v7320_v56 = vpack.c.bf16 %v2129_v10, %v2125_v9  ;;  %v2160_v1 = vld [vmem:[#allocation9 + $0xb20] sm:$0xff]  ;;  %v2158_v6 = vld [vmem:[#allocation9 + $0xb10] sm:$0xff]  ;;  %v2165_v9 = vld [vmem:[#allocation9 + $0xb48] sm:$0xff] }
 0x344   :  { %7557 = vmatprep.subr.bf16.mxu1 %v7556_v16  ;;  %v7576_v16 = vpack.c.bf16 %v2131_v17, %v2127_v12  ;;  %v2162_v8 = vld [vmem:[#allocation9 + $0xb30] sm:$0xff]  ;;  %v2169_v10 = vld [vmem:[#allocation9 + $0xb68] sm:$0xff]  ;;  %v2167_v12 = vld [vmem:[#allocation9 + $0xb58] sm:$0xff] }
 0x345   :  { %v2171_v17 = vld [vmem:[#allocation9 + $0xb78] sm:$0xff] }
 0x346   :  { %7303 = vmatpush1.bf16.msra.mxu0 %v7302_v22  ;;  %v7322_v22 = vpack.c.bf16 %v2128_v36, %v2124_v13  ;;  %v2164_v13 = vld [vmem:[#allocation9 + $0xb40] sm:$0xff] }
 0x347   :  { %7559 = vmatpush1.bf16.msra.mxu1 %v7558_v23  ;;  %7305 = vmatprep.subr.bf16.mxu0 %v7304_v24  ;;  %v7578_v23 = vpack.c.bf16 %v2130_v15, %v2126_v14  ;;  %v7324_v24 = vpack.c.bf16 %v2137_v20, %v2133_v18  ;;  %v2168_v36 = vld [vmem:[#allocation9 + $0xb60] sm:$0xff]  ;;  %v2166_v14 = vld [vmem:[#allocation9 + $0xb50] sm:$0xff]  ;;  %v2173_v18 = vld [vmem:[#allocation9 + $0xb88] sm:$0xff] }
 0x348   :  { %7561 = vmatprep.subr.bf16.mxu1 %v7560_v30  ;;  %v7580_v30 = vpack.c.bf16 %v2139_v45, %v2135_v21  ;;  %v2170_v15 = vld [vmem:[#allocation9 + $0xb70] sm:$0xff]  ;;  %v2177_v20 = vld [vmem:[#allocation9 + $0xba8] sm:$0xff]  ;;  %v2175_v21 = vld [vmem:[#allocation9 + $0xb98] sm:$0xff] }
 0x349   :  { %v2179_v45 = vld [vmem:[#allocation9 + $0xbb8] sm:$0xff] }
 0x34a   :  { %7307 = vmatpush1.bf16.msra.mxu0 %v7306_v50  ;;  %v7326_v50 = vpack.c.bf16 %v2136_v40, %v2132_v25  ;;  %v2172_v25 = vld [vmem:[#allocation9 + $0xb80] sm:$0xff] }
 0x34b   :  { %7563 = vmatpush1.bf16.msra.mxu1 %v7562_v53  ;;  %7309 = vmatprep.subr.bf16.mxu0 %v7308_v38  ;;  %v7582_v53 = vpack.c.bf16 %v2138_v3, %v2134_v26  ;;  %v7328_v38 = vpack.c.bf16 %v2145_v32, %v2141_v31  ;;  %v2176_v40 = vld [vmem:[#allocation9 + $0xba0] sm:$0xff]  ;;  %v2174_v26 = vld [vmem:[#allocation9 + $0xb90] sm:$0xff]  ;;  %v2181_v31 = vld [vmem:[#allocation9 + $0xbc8] sm:$0xff] }
 0x34c   :  { %7565 = vmatprep.subr.bf16.mxu1 %v7564_v46  ;;  %v7584_v46 = vpack.c.bf16 %v2147_v37, %v2143_v34  ;;  %v2178_v3 = vld [vmem:[#allocation9 + $0xbb0] sm:$0xff]  ;;  %v2185_v32 = vld [vmem:[#allocation9 + $0xbe8] sm:$0xff]  ;;  %v2183_v34 = vld [vmem:[#allocation9 + $0xbd8] sm:$0xff] }
 0x34d   :  { %v2187_v37 = vld [vmem:[#allocation9 + $0xbf8] sm:$0xff] }
 0x34e   :  { %7311 = vmatpush1.bf16.msra.mxu0 %v7310_v52  ;;  %v7330_v52 = vpack.c.bf16 %v2144_v41, %v2140_v39  ;;  %v2180_v39 = vld [vmem:[#allocation9 + $0xbc0] sm:$0xff] }
 0x34f   :  { %7567 = vmatpush1.bf16.msra.mxu1 %v7566_v11  ;;  %7313 = vmatprep.subr.bf16.mxu0 %v7312_v54  ;;  %v7586_v11 = vpack.c.bf16 %v2146_v47, %v2142_v44  ;;  %v7332_v54 = vpack.c.bf16 %v2153_v29, %v2149_v48  ;;  %v2184_v41 = vld [vmem:[#allocation9 + $0xbe0] sm:$0xff]  ;;  %v2182_v44 = vld [vmem:[#allocation9 + $0xbd0] sm:$0xff]  ;;  %v2189_v48 = vld [vmem:[#allocation9 + $0xc08] sm:$0xff] }
 0x350   :  { %7569 = vmatprep.subr.bf16.mxu1 %v7568_v43  ;;  %v7588_v43 = vpack.c.bf16 %v2155_v33, %v2151_v49  ;;  %v2186_v47 = vld [vmem:[#allocation9 + $0xbf0] sm:$0xff]  ;;  %v2193_v29 = vld [vmem:[#allocation9 + $0xc28] sm:$0xff]  ;;  %v2191_v49 = vld [vmem:[#allocation9 + $0xc18] sm:$0xff] }
 0x351   :  { %v2195_v33 = vld [vmem:[#allocation9 + $0xc38] sm:$0xff] }
 0x352   :  { %7315 = vmatpush1.bf16.msra.mxu0 %v7314_v19  ;;  %v7334_v19 = vpack.c.bf16 %v2152_v57, %v2148_v55  ;;  %v7352_v55 = vpack.c.bf16 %v2193_v29, %v2189_v48  ;;  %v2188_v57 = vld [vmem:[#allocation9 + $0xc00] sm:$0xff]  ;;  %v2229_v48 = vld [vmem:[#allocation9 + $0xd48] sm:$0xff] }
 0x353   :  { %7571 = vmatpush1.bf16.msra.mxu1 %v7570_v51  ;;  %7317 = vmatprep.subr.bf16.mxu0 %v7316_v5  ;;  %v7590_v51 = vpack.c.bf16 %v2154_v60, %v2150_v0  ;;  %v7336_v5 = vpack.c.bf16 %v2161_v61, %v2157_v58  ;;  %v2192_v0 = vld [vmem:[#allocation9 + $0xc20] sm:$0xff]  ;;  %v2190_v60 = vld [vmem:[#allocation9 + $0xc10] sm:$0xff]  ;;  %v2233_v29 = vld [vmem:[#allocation9 + $0xd68] sm:$0xff] }
 0x354   :  { %7573 = vmatprep.subr.bf16.mxu1 %v7572_v7  ;;  %v7592_v7 = vpack.c.bf16 %v2163_v2, %v2159_v62  ;;  %v2194_v58 = vld [vmem:[#allocation9 + $0xc30] sm:$0xff]  ;;  %v2197_v62 = vld [vmem:[#allocation9 + $0xc48] sm:$0xff] }
 0x355   :  { %v2201_v2 = vld [vmem:[#allocation9 + $0xc68] sm:$0xff] }
 0x356   :  { %7319 = vmatpush1.bf16.msra.mxu0 %v7318_v28  ;;  %v7338_v28 = vpack.c.bf16 %v2160_v1, %v2156_v27  ;;  %v2196_v27 = vld [vmem:[#allocation9 + $0xc40] sm:$0xff] }
 0x357   :  { %7575 = vmatpush1.bf16.msra.mxu1 %v7574_v59  ;;  %7321 = vmatprep.subr.bf16.mxu0 %v7320_v56  ;;  %v7594_v59 = vpack.c.bf16 %v2162_v8, %v2158_v6  ;;  %v7340_v56 = vpack.c.bf16 %v2169_v10, %v2165_v9  ;;  %v2200_v1 = vld [vmem:[#allocation9 + $0xc60] sm:$0xff]  ;;  %v2198_v6 = vld [vmem:[#allocation9 + $0xc50] sm:$0xff]  ;;  %v2205_v9 = vld [vmem:[#allocation9 + $0xc88] sm:$0xff] }
 0x358   :  { %7577 = vmatprep.subr.bf16.mxu1 %v7576_v16  ;;  %v7596_v16 = vpack.c.bf16 %v2171_v17, %v2167_v12  ;;  %v2202_v8 = vld [vmem:[#allocation9 + $0xc70] sm:$0xff]  ;;  %v2209_v10 = vld [vmem:[#allocation9 + $0xca8] sm:$0xff]  ;;  %v2207_v17 = vld [vmem:[#allocation9 + $0xc98] sm:$0xff] }
 0x35a   :  { %7323 = vmatpush1.bf16.msra.mxu0 %v7322_v22  ;;  %v7342_v22 = vpack.c.bf16 %v2168_v36, %v2164_v13  ;;  %v7360_v13 = vpack.c.bf16 %v2209_v10, %v2205_v9  ;;  %v2204_v36 = vld [vmem:[#allocation9 + $0xc80] sm:$0xff]  ;;  %v2245_v9 = vld [vmem:[#allocation9 + $0xdc8] sm:$0xff] }
 0x35b   :  { %7579 = vmatpush1.bf16.msra.mxu1 %v7578_v23  ;;  %7325 = vmatprep.subr.bf16.mxu0 %v7324_v24  ;;  %v7598_v23 = vpack.c.bf16 %v2170_v15, %v2166_v14  ;;  %v7344_v24 = vpack.c.bf16 %v2177_v20, %v2173_v18  ;;  %v2208_v14 = vld [vmem:[#allocation9 + $0xca0] sm:$0xff]  ;;  %v2210_v18 = vld [vmem:[#allocation9 + $0xcb0] sm:$0xff]  ;;  %v2213_v20 = vld [vmem:[#allocation9 + $0xcc8] sm:$0xff] }
 0x35c   :  { %7581 = vmatprep.subr.bf16.mxu1 %v7580_v30  ;;  %v7600_v30 = vpack.c.bf16 %v2179_v45, %v2175_v21  ;;  %v2217_v21 = vld [vmem:[#allocation9 + $0xce8] sm:$0xff]  ;;  %v2215_v45 = vld [vmem:[#allocation9 + $0xcd8] sm:$0xff] }
 0x35d   :  { %v2249_v10 = vld [vmem:[#allocation9 + $0xde8] sm:$0xff] }
 0x35e   :  { %7327 = vmatpush1.bf16.msra.mxu0 %v7326_v50  ;;  %v7346_v50 = vpack.c.bf16 %v2176_v40, %v2172_v25  ;;  %v2212_v25 = vld [vmem:[#allocation9 + $0xcc0] sm:$0xff] }
 0x35f   :  { %7583 = vmatpush1.bf16.msra.mxu1 %v7582_v53  ;;  %7329 = vmatprep.subr.bf16.mxu0 %v7328_v38  ;;  %v7602_v53 = vpack.c.bf16 %v2178_v3, %v2174_v26  ;;  %v7348_v38 = vpack.c.bf16 %v2185_v32, %v2181_v31  ;;  %v2216_v40 = vld [vmem:[#allocation9 + $0xce0] sm:$0xff]  ;;  %v2214_v26 = vld [vmem:[#allocation9 + $0xcd0] sm:$0xff]  ;;  %v2221_v31 = vld [vmem:[#allocation9 + $0xd08] sm:$0xff] }
 0x360   :  { %7585 = vmatprep.subr.bf16.mxu1 %v7584_v46  ;;  %v7604_v46 = vpack.c.bf16 %v2187_v37, %v2183_v34  ;;  %v2218_v3 = vld [vmem:[#allocation9 + $0xcf0] sm:$0xff]  ;;  %v2225_v32 = vld [vmem:[#allocation9 + $0xd28] sm:$0xff]  ;;  %v2223_v34 = vld [vmem:[#allocation9 + $0xd18] sm:$0xff] }
 0x361   :  { %v2227_v37 = vld [vmem:[#allocation9 + $0xd38] sm:$0xff] }
 0x362   :  { %7331 = vmatpush1.bf16.msra.mxu0 %v7330_v52  ;;  %v2357_v52 = vcombine.high %v10922_v35, %v10922_v35  ;;  %v2199_v35 = vld [vmem:[#allocation9 + $0xc58] sm:$0xff] }
 0x363   :  { %7587 = vmatpush1.bf16.msra.mxu1 %v7586_v11  ;;  %7333 = vmatprep.subr.bf16.mxu0 %v7332_v54  ;;  %v7350_v11 = vpack.c.bf16 %v2184_v41, %v2180_v39  ;;  %v7606_v54 = vpack.c.bf16 %v2186_v47, %v2182_v44  ;;  %v2220_v39 = vld [vmem:[#allocation9 + $0xd00] sm:$0xff]  ;;  %v2222_v44 = vld [vmem:[#allocation9 + $0xd10] sm:$0xff] }
 0x364   :  { %7589 = vmatprep.subr.bf16.mxu1 %v7588_v43  ;;  %v7608_v43 = vpack.c.bf16 %v2195_v33, %v2191_v49  ;;  %v10935_v61 = vrot.slane %v2357_v52, %v10892_v4  ;;  %v2224_v41 = vld [vmem:[#allocation9 + $0xd20] sm:$0xff]  ;;  %v2226_v47 = vld [vmem:[#allocation9 + $0xd30] sm:$0xff]  ;;  %v2231_v49 = vld [vmem:[#allocation9 + $0xd58] sm:$0xff] }
 0x365   :  { %v2235_v33 = vld [vmem:[#allocation9 + $0xd78] sm:$0xff]  ;;  %v7370_v52 = vpack.c.bf16 %v2224_v41, %v2220_v39  ;;  %v2262_v39 = vld [vmem:[#allocation9 + $0xe50] sm:$0xff] }
 0x366   :  { %7335 = vmatpush1.bf16.msra.mxu0 %v7334_v19  ;;  %v7354_v19 = vpack.c.bf16 %v2192_v0, %v2188_v57  ;;  %v2373_v4 = vcombine.high %v10935_v61, %v10935_v61  ;;  %v2232_v57 = vld [vmem:[#allocation9 + $0xd60] sm:$0xff]  ;;  %v2230_v0 = vld [vmem:[#allocation9 + $0xd50] sm:$0xff] }
 0x367   :  { %7591 = vmatpush1.bf16.msra.mxu1 %v7590_v51  ;;  %7337 = vmatprep.subr.bf16.mxu0 %v7336_v5  ;;  %v2203_v51 = vld [vmem:[#allocation9 + $0xc78] sm:$0xff]  ;;  %v7610_v5 = vpack.c.bf16 %v2194_v58, %v2190_v60  ;;  %v2234_v60 = vld [vmem:[#allocation9 + $0xd70] sm:$0xff]  ;;  %v2237_v58 = vld [vmem:[#allocation9 + $0xd88] sm:$0xff] }
 0x368   :  { %7593 = vmatprep.subr.bf16.mxu1 %v7592_v7  ;;  %v7356_v7 = vpack.c.bf16 %v2201_v2, %v2197_v62  ;;  %v7612_v12 = vpack.c.bf16 %v2203_v51, %v2199_v35  ;;  %v2241_v62 = vld [vmem:[#allocation9 + $0xda8] sm:$0xff]  ;;  %v2239_v2 = vld [vmem:[#allocation9 + $0xd98] sm:$0xff]  ;;  %v7630_v51 = vpack.c.bf16 %v2234_v60, %v2230_v0  ;;  %v2274_v0 = vld [vmem:[#allocation9 + $0xeb0] sm:$0xff] }
 0x369   :  { %v2281_v60 = vld [vmem:[#allocation9 + $0xee8] sm:$0xff] }
 0x36a   :  { %7339 = vmatpush1.bf16.msra.mxu0 %v7338_v28  ;;  %v2211_v28 = vld [vmem:[#allocation9 + $0xcb8] sm:$0xff] }
 0x36b   :  { %7595 = vmatpush1.bf16.msra.mxu1 %v7594_v59  ;;  %7341 = vmatprep.subr.bf16.mxu0 %v7340_v56  ;;  %v7358_v59 = vpack.c.bf16 %v2200_v1, %v2196_v27  ;;  %v7614_v56 = vpack.c.bf16 %v2202_v8, %v2198_v6  ;;  %v7616_v15 = vpack.c.bf16 %v2211_v28, %v2207_v17  ;;  %v2236_v27 = vld [vmem:[#allocation9 + $0xd80] sm:$0xff]  ;;  %v2238_v6 = vld [vmem:[#allocation9 + $0xd90] sm:$0xff] }
 0x36c   :  { %7597 = vmatprep.subr.bf16.mxu1 %v7596_v16  ;;  %v2206_v16 = vld [vmem:[#allocation9 + $0xc90] sm:$0xff]  ;;  %v2240_v1 = vld [vmem:[#allocation9 + $0xda0] sm:$0xff] }
 0x36d   :  { %v2242_v8 = vld [vmem:[#allocation9 + $0xdb0] sm:$0xff]  ;;  %v7378_v17 = vpack.c.bf16 %v2240_v1, %v2236_v27 }
 0x36e   :  { %7343 = vmatpush1.bf16.msra.mxu0 %v7342_v22  ;;  %v2219_v22 = vld [vmem:[#allocation9 + $0xcf8] sm:$0xff]  ;;  %v7634_v28 = vpack.c.bf16 %v2242_v8, %v2238_v6  ;;  %v2278_v27 = vld [vmem:[#allocation9 + $0xed0] sm:$0xff]  ;;  %v2289_v8 = vld [vmem:[#allocation9 + $0xf28] sm:$0xff] }
 0x36f   :  { %7599 = vmatpush1.bf16.msra.mxu1 %v7598_v23  ;;  %7345 = vmatprep.subr.bf16.mxu0 %v7344_v24  ;;  %v7618_v23 = vpack.c.bf16 %v2210_v18, %v2206_v16  ;;  %v7364_v24 = vpack.c.bf16 %v2217_v21, %v2213_v20  ;;  %v2250_v16 = vld [vmem:[#allocation9 + $0xdf0] sm:$0xff]  ;;  %v2257_v18 = vld [vmem:[#allocation9 + $0xe28] sm:$0xff]  ;;  %v2255_v20 = vld [vmem:[#allocation9 + $0xe18] sm:$0xff] }
 0x370   :  { %7601 = vmatprep.subr.bf16.mxu1 %v7600_v30  ;;  %v7620_v30 = vpack.c.bf16 %v2219_v22, %v2215_v45  ;;  %v2259_v21 = vld [vmem:[#allocation9 + $0xe38] sm:$0xff]  ;;  %v2282_v6 = vld [vmem:[#allocation9 + $0xef0] sm:$0xff] }
 0x372   :  { %7347 = vmatpush1.bf16.msra.mxu0 %v7346_v50  ;;  %v7366_v50 = vpack.c.bf16 %v2216_v40, %v2212_v25  ;;  %v2254_v25 = vld [vmem:[#allocation9 + $0xe10] sm:$0xff]  ;;  %v7640_v40 = vpack.c.bf16 %v2259_v21, %v2255_v20 }
 0x373   :  { %7603 = vmatpush1.bf16.msra.mxu1 %v7602_v53  ;;  %7349 = vmatprep.subr.bf16.mxu0 %v7348_v38  ;;  %v7622_v53 = vpack.c.bf16 %v2218_v3, %v2214_v26  ;;  %v7368_v38 = vpack.c.bf16 %v2225_v32, %v2221_v31  ;;  %v2258_v26 = vld [vmem:[#allocation9 + $0xe30] sm:$0xff]  ;;  %v2265_v3 = vld [vmem:[#allocation9 + $0xe68] sm:$0xff]  ;;  %v2263_v31 = vld [vmem:[#allocation9 + $0xe58] sm:$0xff] }
 0x374   :  { %7605 = vmatprep.subr.bf16.mxu1 %v7604_v46  ;;  %v7624_v46 = vpack.c.bf16 %v2227_v37, %v2223_v34  ;;  %v2267_v32 = vld [vmem:[#allocation9 + $0xe78] sm:$0xff]  ;;  %v7642_v37 = vpack.c.bf16 %v2258_v26, %v2254_v25  ;;  %v2298_v25 = vld [vmem:[#allocation9 + $0xf70] sm:$0xff]  ;;  %v2305_v26 = vld [vmem:[#allocation9 + $0xfa8] sm:$0xff] }
 0x375   :  { %v7644_v41 = vpack.c.bf16 %v2267_v32, %v2263_v31 }
 0x376   :  { %7351 = vmatpush1.bf16.msra.mxu0 %v7350_v11  ;;  %v7626_v11 = vpack.c.bf16 %v2226_v47, %v2222_v44  ;;  %v2266_v44 = vld [vmem:[#allocation9 + $0xe70] sm:$0xff]  ;;  %v2273_v47 = vld [vmem:[#allocation9 + $0xea8] sm:$0xff] }
 0x377   :  { %7607 = vmatpush1.bf16.msra.mxu1 %v7606_v54  ;;  %7353 = vmatprep.subr.bf16.mxu0 %v7352_v55  ;;  %v7372_v54 = vpack.c.bf16 %v2233_v29, %v2229_v48  ;;  %v2228_v55 = vld [vmem:[#allocation9 + $0xd40] sm:$0xff]  ;;  %v2271_v48 = vld [vmem:[#allocation9 + $0xe98] sm:$0xff] }
 0x378   :  { %7609 = vmatprep.subr.bf16.mxu1 %v7608_v43  ;;  %v7628_v43 = vpack.c.bf16 %v2235_v33, %v2231_v49  ;;  %v7374_v35 = vpack.c.bf16 %v2232_v57, %v2228_v55  ;;  %v2275_v29 = vld [vmem:[#allocation9 + $0xeb8] sm:$0xff]  ;;  %v7646_v33 = vpack.c.bf16 %v2266_v44, %v2262_v39  ;;  %v2270_v55 = vld [vmem:[#allocation9 + $0xe90] sm:$0xff]  ;;  %v2313_v44 = vld [vmem:[#allocation9 + $0xfe8] sm:$0xff] }
 0x379   :  { %2589 = vmatmul.mubr.f32.vlgmr.msra.gmra.mrb[48].mxu0 %v10926_v42  ;;  %v7648_v57 = vpack.c.bf16 %v2275_v29, %v2271_v48  ;;  %v2306_v39 = vld [vmem:[#allocation9 + $0xfb0] sm:$0xff] }
 0x37a   :  { %2873 = vmatmul.mubr.f32.vlgmr.msra.gmra.mrb[40].mxu1 %v10926_v42  ;;  %7355 = vmatpush1.bf16.msra.mxu0 %v7354_v19  ;;  %v7362_v42 = vpack.c.bf16 %v2208_v14, %v2204_v36  ;;  %v2243_v19 = vld [vmem:[#allocation9 + $0xdb8] sm:$0xff]  ;;  %v2246_v36 = vld [vmem:[#allocation9 + $0xdd0] sm:$0xff] }
 0x37b   :  { %2659 = vmatprep.mubr.f32.mxu0 %v2373_v4  ;;  %7611 = vmatpush1.bf16.msra.mxu1 %v7610_v5  ;;  %v7376_v5 = vpack.c.bf16 %v2241_v62, %v2237_v58  ;;  %v7638_v22 = vpack.c.bf16 %v2250_v16, %v2246_v36  ;;  %v2279_v58 = vld [vmem:[#allocation9 + $0xed8] sm:$0xff]  ;;  %v2290_v36 = vld [vmem:[#allocation9 + $0xf30] sm:$0xff]  ;;  %v2297_v16 = vld [vmem:[#allocation9 + $0xf68] sm:$0xff] }
 0x37c   :  { %2943 = vmatprep.mubr.f32.mxu1 %v2373_v4  ;;  %7357 = vmatprep.subr.bf16.mxu0 %v7356_v7  ;;  %v7632_v7 = vpack.c.bf16 %v2243_v19, %v2239_v2  ;;  %v2247_v4 = vld [vmem:[#allocation9 + $0xdd8] sm:$0xff]  ;;  %v7650_v19 = vpack.c.bf16 %v2274_v0, %v2270_v55  ;;  %v2314_v55 = vld [vmem:[#allocation9 + $0xff0] sm:$0xff] }
 0x37d   :  { %7613 = vmatprep.subr.bf16.mxu1 %v7612_v12  ;;  %v2251_v12 = vld [vmem:[#allocation9 + $0xdf8] sm:$0xff]  ;;  %v2987_v0 = vld [vmem:[#allocation12 + $0x68] sm:$0xff] }
 0x37e   :  { %7359 = vmatpush1.bf16.msra.mxu0 %v7358_v59  ;;  %v7380_v59 = vpack.c.bf16 %v2249_v10, %v2245_v9  ;;  %v7636_v14 = vpack.c.bf16 %v2251_v12, %v2247_v4  ;;  %v2283_v62 = vld [vmem:[#allocation9 + $0xef8] sm:$0xff]  ;;  %v7654_v12 = vpack.c.bf16 %v2282_v6, %v2278_v27  ;;  %v3011_v6 = vld [vmem:[#allocation12 + $0x128] sm:$0xff] }
 0x37f   :  { %7615 = vmatpush1.bf16.msra.mxu1 %v7614_v56  ;;  %7361 = vmatprep.subr.bf16.mxu0 %v7360_v13  ;;  %v2244_v56 = vld [vmem:[#allocation9 + $0xdc0] sm:$0xff]  ;;  %v7652_v1 = vpack.c.bf16 %v2283_v62, %v2279_v58  ;;  %v2287_v9 = vld [vmem:[#allocation9 + $0xf18] sm:$0xff] }
 0x380   :  { %7617 = vmatprep.subr.bf16.mxu1 %v7616_v15  ;;  %v2248_v13 = vld [vmem:[#allocation9 + $0xde0] sm:$0xff]  ;;  %v2253_v15 = vld [vmem:[#allocation9 + $0xe08] sm:$0xff]  ;;  %v2291_v10 = vld [vmem:[#allocation9 + $0xf38] sm:$0xff] }
 0x381   :  { %v7382_v45 = vpack.c.bf16 %v2248_v13, %v2244_v56  ;;  %v2286_v56 = vld [vmem:[#allocation9 + $0xf10] sm:$0xff]  ;;  %v7656_v13 = vpack.c.bf16 %v2291_v10, %v2287_v9 }
 0x382   :  { %7363 = vmatpush1.bf16.msra.mxu0 %v7362_v42  ;;  %v7384_v42 = vpack.c.bf16 %v2257_v18, %v2253_v15  ;;  %v2295_v15 = vld [vmem:[#allocation9 + $0xf58] sm:$0xff]  ;;  %v7658_v21 = vpack.c.bf16 %v2290_v36, %v2286_v56  ;;  %v3035_v36 = vld [vmem:[#allocation12 + $0x1e8] sm:$0xff] }
 0x383   :  { %7619 = vmatpush1.bf16.msra.mxu1 %v7618_v23  ;;  %7365 = vmatprep.subr.bf16.mxu0 %v7364_v24  ;;  %v2252_v23 = vld [vmem:[#allocation9 + $0xe00] sm:$0xff]  ;;  %v2299_v18 = vld [vmem:[#allocation9 + $0xf78] sm:$0xff] }
 0x384   :  { %7621 = vmatprep.subr.bf16.mxu1 %v7620_v30  ;;  %v2256_v24 = vld [vmem:[#allocation9 + $0xe20] sm:$0xff]  ;;  %v2261_v30 = vld [vmem:[#allocation9 + $0xe48] sm:$0xff]  ;;  %v2988_v27 = vld [vmem:[#allocation12 + $0x70] sm:$0xff] }
 0x385   :  { %v7386_v34 = vpack.c.bf16 %v2256_v24, %v2252_v23  ;;  %v2294_v23 = vld [vmem:[#allocation9 + $0xf50] sm:$0xff]  ;;  %v7660_v24 = vpack.c.bf16 %v2299_v18, %v2295_v15 }
 0x386   :  { %7367 = vmatpush1.bf16.msra.mxu0 %v7366_v50  ;;  %v7388_v50 = vpack.c.bf16 %v2265_v3, %v2261_v30  ;;  %v2303_v30 = vld [vmem:[#allocation9 + $0xf98] sm:$0xff]  ;;  %v7662_v32 = vpack.c.bf16 %v2298_v25, %v2294_v23  ;;  %v3059_v25 = vld [vmem:[#allocation12 + $0x2a8] sm:$0xff] }
 0x387   :  { %7623 = vmatpush1.bf16.msra.mxu1 %v7622_v53  ;;  %7369 = vmatprep.subr.bf16.mxu0 %v7368_v38  ;;  %v2260_v53 = vld [vmem:[#allocation9 + $0xe40] sm:$0xff]  ;;  %v2307_v3 = vld [vmem:[#allocation9 + $0xfb8] sm:$0xff] }
 0x388   :  { %7625 = vmatprep.subr.bf16.mxu1 %v7624_v46  ;;  %v2264_v38 = vld [vmem:[#allocation9 + $0xe60] sm:$0xff]  ;;  %v2269_v46 = vld [vmem:[#allocation9 + $0xe88] sm:$0xff]  ;;  %v3012_v56 = vld [vmem:[#allocation12 + $0x130] sm:$0xff] }
 0x389   :  { %v7390_v49 = vpack.c.bf16 %v2264_v38, %v2260_v53  ;;  %v2302_v53 = vld [vmem:[#allocation9 + $0xf90] sm:$0xff]  ;;  %v7664_v38 = vpack.c.bf16 %v2307_v3, %v2303_v30 }
 0x38a   :  { %7371 = vmatpush1.bf16.msra.mxu0 %v7370_v52  ;;  %v7392_v52 = vpack.c.bf16 %v2273_v47, %v2269_v46  ;;  %v2311_v46 = vld [vmem:[#allocation9 + $0xfd8] sm:$0xff]  ;;  %v7666_v29 = vpack.c.bf16 %v2306_v39, %v2302_v53  ;;  %v3071_v53 = vld [vmem:[#allocation12 + $0x308] sm:$0xff] }
 0x38b   :  { %7627 = vmatpush1.bf16.msra.mxu1 %v7626_v11  ;;  %7373 = vmatprep.subr.bf16.mxu0 %v7372_v54  ;;  %v2268_v11 = vld [vmem:[#allocation9 + $0xe80] sm:$0xff]  ;;  %v2315_v47 = vld [vmem:[#allocation9 + $0xff8] sm:$0xff] }
 0x38c   :  { %7629 = vmatprep.subr.bf16.mxu1 %v7628_v43  ;;  %v2272_v54 = vld [vmem:[#allocation9 + $0xea0] sm:$0xff]  ;;  %v2277_v43 = vld [vmem:[#allocation9 + $0xec8] sm:$0xff]  ;;  %v3036_v23 = vld [vmem:[#allocation12 + $0x1f0] sm:$0xff] }
 0x38d   :  { %v7394_v2 = vpack.c.bf16 %v2272_v54, %v2268_v11  ;;  %v2310_v11 = vld [vmem:[#allocation9 + $0xfd0] sm:$0xff]  ;;  %v7668_v54 = vpack.c.bf16 %v2315_v47, %v2311_v46  ;;  %v3073_v39 = vld [vmem:[#allocation12 + $0x318] sm:$0xff] }
 0x38e   :  { %7375 = vmatpush1.bf16.msra.mxu0 %v7374_v35  ;;  %v7396_v35 = vpack.c.bf16 %v2281_v60, %v2277_v43  ;;  %v2977_v43 = vld [vmem:[#allocation12 + $0x18] sm:$0xff]  ;;  %v7670_v62 = vpack.c.bf16 %v2314_v55, %v2310_v11  ;;  %v3095_v11 = vld [vmem:[#allocation12 + $0x3c8] sm:$0xff] }
 0x38f   :  { %7631 = vmatpush1.bf16.msra.mxu1 %v7630_v51  ;;  %7377 = vmatprep.subr.bf16.mxu0 %v7376_v5  ;;  %v2276_v51 = vld [vmem:[#allocation9 + $0xec0] sm:$0xff] }
 0x390   :  { %7633 = vmatprep.subr.bf16.mxu1 %v7632_v7  ;;  %v2280_v5 = vld [vmem:[#allocation9 + $0xee0] sm:$0xff]  ;;  %v2285_v7 = vld [vmem:[#allocation9 + $0xf08] sm:$0xff] }
 0x391   :  { %v7398_v4 = vpack.c.bf16 %v2280_v5, %v2276_v51  ;;  %v2989_v60 = vld [vmem:[#allocation12 + $0x78] sm:$0xff]  ;;  %v2976_v51 = vld [vmem:[#allocation12 + $0x10] sm:$0xff] }
 0x392   :  { %7379 = vmatpush1.bf16.msra.mxu0 %v7378_v17  ;;  %v7400_v17 = vpack.c.bf16 %v2289_v8, %v2285_v7  ;;  %v7800_v5 = vpack.c.bf16 %v2989_v60, %v2977_v43  ;;  %v3001_v7 = vld [vmem:[#allocation12 + $0xd8] sm:$0xff]  ;;  %v7802_v10 = vpack.c.bf16 %v2988_v27, %v2976_v51  ;;  %v3119_v51 = vld [vmem:[#allocation12 + $0x488] sm:$0xff] }
 0x393   :  { %7635 = vmatpush1.bf16.msra.mxu1 %v7634_v28  ;;  %7381 = vmatprep.subr.bf16.mxu0 %v7380_v59  ;;  %v2284_v28 = vld [vmem:[#allocation9 + $0xf00] sm:$0xff] }
 0x394   :  { %7637 = vmatprep.subr.bf16.mxu1 %v7636_v14  ;;  %v2288_v59 = vld [vmem:[#allocation9 + $0xf20] sm:$0xff]  ;;  %v2293_v14 = vld [vmem:[#allocation9 + $0xf48] sm:$0xff] }
 0x395   :  { %v7402_v20 = vpack.c.bf16 %v2288_v59, %v2284_v28  ;;  %v3013_v8 = vld [vmem:[#allocation12 + $0x138] sm:$0xff]  ;;  %v3000_v28 = vld [vmem:[#allocation12 + $0xd0] sm:$0xff] }
 0x396   :  { %7383 = vmatpush1.bf16.msra.mxu0 %v7382_v45  ;;  %v7404_v45 = vpack.c.bf16 %v2297_v16, %v2293_v14  ;;  %v7804_v59 = vpack.c.bf16 %v3013_v8, %v3001_v7  ;;  %v3025_v14 = vld [vmem:[#allocation12 + $0x198] sm:$0xff]  ;;  %v7806_v18 = vpack.c.bf16 %v3012_v56, %v3000_v28  ;;  %v3143_v28 = vld [vmem:[#allocation12 + $0x548] sm:$0xff] }
 0x397   :  { %7639 = vmatpush1.bf16.msra.mxu1 %v7638_v22  ;;  %7385 = vmatprep.subr.bf16.mxu0 %v7384_v42  ;;  %v2292_v22 = vld [vmem:[#allocation9 + $0xf40] sm:$0xff] }
 0x398   :  { %7641 = vmatprep.subr.bf16.mxu1 %v7640_v40  ;;  %v2296_v42 = vld [vmem:[#allocation9 + $0xf60] sm:$0xff]  ;;  %v2301_v40 = vld [vmem:[#allocation9 + $0xf88] sm:$0xff] }
 0x399   :  { %v7406_v31 = vpack.c.bf16 %v2296_v42, %v2292_v22  ;;  %v3037_v16 = vld [vmem:[#allocation12 + $0x1f8] sm:$0xff]  ;;  %v3024_v22 = vld [vmem:[#allocation12 + $0x190] sm:$0xff] }
 0x39a   :  { %7387 = vmatpush1.bf16.msra.mxu0 %v7386_v34  ;;  %v7408_v34 = vpack.c.bf16 %v2305_v26, %v2301_v40  ;;  %v7808_v42 = vpack.c.bf16 %v3037_v16, %v3025_v14  ;;  %v3049_v40 = vld [vmem:[#allocation12 + $0x258] sm:$0xff] }
 0x39b   :  { %7643 = vmatpush1.bf16.msra.mxu1 %v7642_v37  ;;  %7389 = vmatprep.subr.bf16.mxu0 %v7388_v50  ;;  %v2300_v37 = vld [vmem:[#allocation9 + $0xf80] sm:$0xff] }
 0x39c   :  { %7645 = vmatprep.subr.bf16.mxu1 %v7644_v41  ;;  %v2304_v50 = vld [vmem:[#allocation9 + $0xfa0] sm:$0xff]  ;;  %v2309_v41 = vld [vmem:[#allocation9 + $0xfc8] sm:$0xff] }
 0x39d   :  { %v7410_v48 = vpack.c.bf16 %v2304_v50, %v2300_v37  ;;  %v3061_v26 = vld [vmem:[#allocation12 + $0x2b8] sm:$0xff]  ;;  %v3060_v50 = vld [vmem:[#allocation12 + $0x2b0] sm:$0xff] }
 0x39e   :  { %7391 = vmatpush1.bf16.msra.mxu0 %v7390_v49  ;;  %v7412_v49 = vpack.c.bf16 %v2313_v44, %v2309_v41  ;;  %v7812_v37 = vpack.c.bf16 %v3061_v26, %v3049_v40  ;;  %v3085_v41 = vld [vmem:[#allocation12 + $0x378] sm:$0xff] }
 0x39f   :  { %7647 = vmatpush1.bf16.msra.mxu1 %v7646_v33  ;;  %7393 = vmatprep.subr.bf16.mxu0 %v7392_v52  ;;  %v2308_v33 = vld [vmem:[#allocation9 + $0xfc0] sm:$0xff] }
 0x3a0   :  { %7649 = vmatprep.subr.bf16.mxu1 %v7648_v57  ;;  %v2312_v52 = vld [vmem:[#allocation9 + $0xfe0] sm:$0xff]  ;;  %v2975_v57 = vld [vmem:[#allocation12 + $0x8] sm:$0xff] }
 0x3a1   :  { %v7414_v58 = vpack.c.bf16 %v2312_v52, %v2308_v33  ;;  %v7816_v33 = vpack.c.bf16 %v3085_v41, %v3073_v39  ;;  %v3084_v52 = vld [vmem:[#allocation12 + $0x370] sm:$0xff]  ;;  %v3097_v55 = vld [vmem:[#allocation12 + $0x3d8] sm:$0xff] }
 0x3a2   :  { %7395 = vmatpush1.bf16.msra.mxu0 %v7394_v2  ;;  %v7672_v2 = vpack.c.bf16 %v2987_v0, %v2975_v57  ;;  %v3109_v57 = vld [vmem:[#allocation12 + $0x438] sm:$0xff] }
 0x3a3   :  { %7651 = vmatpush1.bf16.msra.mxu1 %v7650_v19  ;;  %7397 = vmatprep.subr.bf16.mxu0 %v7396_v35  ;;  %v2974_v19 = vld [vmem:[#allocation12] sm:$0xff]  ;;  %v3121_v27 = vld [vmem:[#allocation12 + $0x498] sm:$0xff] }
 0x3a4   :  { %7653 = vmatprep.subr.bf16.mxu1 %v7652_v1  ;;  %v2986_v35 = vld [vmem:[#allocation12 + $0x60] sm:$0xff]  ;;  %v2999_v1 = vld [vmem:[#allocation12 + $0xc8] sm:$0xff]  ;;  %v3145_v56 = vld [vmem:[#allocation12 + $0x558] sm:$0xff] }
 0x3a5   :  { %v7674_v9 = vpack.c.bf16 %v2986_v35, %v2974_v19  ;;  %v7820_v19 = vpack.c.bf16 %v3109_v57, %v3097_v55  ;;  %v3108_v35 = vld [vmem:[#allocation12 + $0x430] sm:$0xff] }
 0x3a6   :  { %7399 = vmatpush1.bf16.msra.mxu0 %v7398_v4  ;;  %v7676_v4 = vpack.c.bf16 %v3011_v6, %v2999_v1  ;;  %v3133_v1 = vld [vmem:[#allocation12 + $0x4f8] sm:$0xff] }
 0x3a7   :  { %7655 = vmatpush1.bf16.msra.mxu1 %v7654_v12  ;;  %7401 = vmatprep.subr.bf16.mxu0 %v7400_v17  ;;  %v2998_v12 = vld [vmem:[#allocation12 + $0xc0] sm:$0xff] }
 0x3a8   :  { %7657 = vmatprep.subr.bf16.mxu1 %v7656_v13  ;;  %v3010_v17 = vld [vmem:[#allocation12 + $0x120] sm:$0xff]  ;;  %v3023_v13 = vld [vmem:[#allocation12 + $0x188] sm:$0xff] }
 0x3a9   :  { %v7678_v15 = vpack.c.bf16 %v3010_v17, %v2998_v12  ;;  %v7824_v12 = vpack.c.bf16 %v3133_v1, %v3121_v27  ;;  %v3132_v17 = vld [vmem:[#allocation12 + $0x4f0] sm:$0xff]  ;;  %v3253_v1 = vld [vmem:[#allocation12 + $0x8b8] sm:$0xff] }
 0x3aa   :  { %7403 = vmatpush1.bf16.msra.mxu0 %v7402_v20  ;;  %v7680_v20 = vpack.c.bf16 %v3035_v36, %v3023_v13  ;;  %v3157_v13 = vld [vmem:[#allocation12 + $0x5b8] sm:$0xff] }
 0x3ab   :  { %7659 = vmatpush1.bf16.msra.mxu1 %v7658_v21  ;;  %7405 = vmatprep.subr.bf16.mxu0 %v7404_v45  ;;  %v3022_v21 = vld [vmem:[#allocation12 + $0x180] sm:$0xff] }
 0x3ac   :  { %7661 = vmatprep.subr.bf16.mxu1 %v7660_v24  ;;  %v3034_v45 = vld [vmem:[#allocation12 + $0x1e0] sm:$0xff]  ;;  %v3047_v24 = vld [vmem:[#allocation12 + $0x248] sm:$0xff] }
 0x3ad   :  { %v7682_v30 = vpack.c.bf16 %v3034_v45, %v3022_v21  ;;  %v7684_v3 = vpack.c.bf16 %v3059_v25, %v3047_v24  ;;  %v7828_v21 = vpack.c.bf16 %v3157_v13, %v3145_v56  ;;  %v3156_v45 = vld [vmem:[#allocation12 + $0x5b0] sm:$0xff]  ;;  %v3181_v24 = vld [vmem:[#allocation12 + $0x678] sm:$0xff] }
 0x3ae   :  { %7407 = vmatpush1.bf16.msra.mxu0 %v7406_v31  ;;  %v3046_v31 = vld [vmem:[#allocation12 + $0x240] sm:$0xff]  ;;  %v3277_v56 = vld [vmem:[#allocation12 + $0x978] sm:$0xff] }
 0x3af   :  { %7663 = vmatpush1.bf16.msra.mxu1 %v7662_v32  ;;  %7409 = vmatprep.subr.bf16.mxu0 %v7408_v34  ;;  %v3058_v32 = vld [vmem:[#allocation12 + $0x2a0] sm:$0xff]  ;;  %v3048_v34 = vld [vmem:[#allocation12 + $0x250] sm:$0xff] }
 0x3b0   :  { %7665 = vmatprep.subr.bf16.mxu1 %v7664_v38  ;;  %v3083_v38 = vld [vmem:[#allocation12 + $0x368] sm:$0xff]  ;;  %v7686_v44 = vpack.c.bf16 %v3058_v32, %v3046_v31  ;;  %v7814_v46 = vpack.c.bf16 %v3060_v50, %v3048_v34  ;;  %v3180_v32 = vld [vmem:[#allocation12 + $0x670] sm:$0xff]  ;;  %v3193_v50 = vld [vmem:[#allocation12 + $0x6d8] sm:$0xff] }
 0x3b1   :  { %v7688_v47 = vpack.c.bf16 %v3083_v38, %v3071_v53  ;;  %v3191_v34 = vld [vmem:[#allocation12 + $0x6c8] sm:$0xff]  ;;  %v3205_v53 = vld [vmem:[#allocation12 + $0x738] sm:$0xff] }
 0x3b2   :  { %7411 = vmatpush1.bf16.msra.mxu0 %v7410_v48  ;;  %v3070_v48 = vld [vmem:[#allocation12 + $0x300] sm:$0xff] }
 0x3b3   :  { %7667 = vmatpush1.bf16.msra.mxu1 %v7666_v29  ;;  %7413 = vmatprep.subr.bf16.mxu0 %v7412_v49  ;;  %v3082_v29 = vld [vmem:[#allocation12 + $0x360] sm:$0xff]  ;;  %v3072_v49 = vld [vmem:[#allocation12 + $0x310] sm:$0xff] }
 0x3b4   :  { %7669 = vmatprep.subr.bf16.mxu1 %v7668_v54  ;;  %v3107_v54 = vld [vmem:[#allocation12 + $0x428] sm:$0xff]  ;;  %v7690_v0 = vpack.c.bf16 %v3082_v29, %v3070_v48  ;;  %v7818_v43 = vpack.c.bf16 %v3084_v52, %v3072_v49  ;;  %v7836_v48 = vpack.c.bf16 %v3205_v53, %v3193_v50  ;;  %v3204_v29 = vld [vmem:[#allocation12 + $0x730] sm:$0xff]  ;;  %v3217_v52 = vld [vmem:[#allocation12 + $0x798] sm:$0xff] }
 0x3b5   :  { %v7692_v60 = vpack.c.bf16 %v3107_v54, %v3095_v11  ;;  %v3215_v49 = vld [vmem:[#allocation12 + $0x788] sm:$0xff]  ;;  %v3229_v11 = vld [vmem:[#allocation12 + $0x7f8] sm:$0xff] }
 0x3b6   :  { %7415 = vmatpush1.bf16.msra.mxu0 %v7414_v58  ;;  %v3094_v58 = vld [vmem:[#allocation12 + $0x3c0] sm:$0xff]  ;;  %v3325_v53 = vld [vmem:[#allocation12 + $0xaf8] sm:$0xff] }
 0x3b7   :  { %7671 = vmatpush1.bf16.msra.mxu1 %v7670_v62  ;;  %7673 = vmatprep.subr.bf16.mxu0 %v7672_v2  ;;  %v3106_v62 = vld [vmem:[#allocation12 + $0x420] sm:$0xff]  ;;  %v3096_v2 = vld [vmem:[#allocation12 + $0x3d0] sm:$0xff] }
 0x3b8   :  { %7801 = vmatprep.subr.bf16.mxu1 %v7800_v5  ;;  %v3131_v5 = vld [vmem:[#allocation12 + $0x4e8] sm:$0xff]  ;;  %v7694_v6 = vpack.c.bf16 %v3106_v62, %v3094_v58  ;;  %v7822_v7 = vpack.c.bf16 %v3108_v35, %v3096_v2  ;;  %v3216_v58 = vld [vmem:[#allocation12 + $0x790] sm:$0xff] }
 0x3b9   :  { %2660 = vmatmul.mubr.f32.vlgmr.msra.gmra.mrb[48].mxu0 %v10935_v61  ;;  %v7696_v8 = vpack.c.bf16 %v3131_v5, %v3119_v51  ;;  %v3228_v62 = vld [vmem:[#allocation12 + $0x7f0] sm:$0xff]  ;;  %v3239_v35 = vld [vmem:[#allocation12 + $0x848] sm:$0xff]  ;;  %v3241_v5 = vld [vmem:[#allocation12 + $0x858] sm:$0xff] }
 0x3ba   :  { %2944 = vmatmul.mubr.f32.vlgmr.msra.gmra.mrb[40].mxu1 %v10935_v61  ;;  %7675 = vmatpush1.bf16.msra.mxu0 %v7674_v9  ;;  %v7810_v61 = vpack.c.bf16 %v3036_v23, %v3024_v22  ;;  %v3118_v9 = vld [vmem:[#allocation12 + $0x480] sm:$0xff]  ;;  %v3167_v22 = vld [vmem:[#allocation12 + $0x608] sm:$0xff]  ;;  %v3169_v23 = vld [vmem:[#allocation12 + $0x618] sm:$0xff] }
 0x3bb   :  { %7803 = vmatpush1.bf16.msra.mxu1 %v7802_v10  ;;  %7677 = vmatprep.subr.bf16.mxu0 %v7676_v4  ;;  %v3130_v10 = vld [vmem:[#allocation12 + $0x4e0] sm:$0xff]  ;;  %v3120_v4 = vld [vmem:[#allocation12 + $0x490] sm:$0xff]  ;;  %v7832_v31 = vpack.c.bf16 %v3181_v24, %v3169_v23  ;;  %v3251_v51 = vld [vmem:[#allocation12 + $0x8a8] sm:$0xff] }
 0x3bc   :  { %7805 = vmatprep.subr.bf16.mxu1 %v7804_v59  ;;  %v3155_v59 = vld [vmem:[#allocation12 + $0x5a8] sm:$0xff]  ;;  %v7698_v36 = vpack.c.bf16 %v3130_v10, %v3118_v9  ;;  %v7826_v14 = vpack.c.bf16 %v3132_v17, %v3120_v4  ;;  %v7716_v27 = vpack.c.bf16 %v3251_v51, %v3239_v35  ;;  %v3240_v10 = vld [vmem:[#allocation12 + $0x850] sm:$0xff]  ;;  %v3289_v23 = vld [vmem:[#allocation12 + $0x9d8] sm:$0xff] }
 0x3bd   :  { %v7700_v16 = vpack.c.bf16 %v3155_v59, %v3143_v28  ;;  %v3252_v4 = vld [vmem:[#allocation12 + $0x8b0] sm:$0xff]  ;;  %v3275_v28 = vld [vmem:[#allocation12 + $0x968] sm:$0xff]  ;;  %v3265_v59 = vld [vmem:[#allocation12 + $0x918] sm:$0xff] }
 0x3be   :  { %7679 = vmatpush1.bf16.msra.mxu0 %v7678_v15  ;;  %v3142_v15 = vld [vmem:[#allocation12 + $0x540] sm:$0xff]  ;;  %v7846_v17 = vpack.c.bf16 %v3252_v4, %v3240_v10  ;;  %v3301_v24 = vld [vmem:[#allocation12 + $0xa38] sm:$0xff] }
 0x3bf   :  { %7807 = vmatpush1.bf16.msra.mxu1 %v7806_v18  ;;  %7681 = vmatprep.subr.bf16.mxu0 %v7680_v20  ;;  %v3154_v18 = vld [vmem:[#allocation12 + $0x5a0] sm:$0xff]  ;;  %v3144_v20 = vld [vmem:[#allocation12 + $0x550] sm:$0xff] }
 0x3c0   :  { %7809 = vmatprep.subr.bf16.mxu1 %v7808_v42  ;;  %v3179_v42 = vld [vmem:[#allocation12 + $0x668] sm:$0xff]  ;;  %v7702_v25 = vpack.c.bf16 %v3154_v18, %v3142_v15  ;;  %v7830_v40 = vpack.c.bf16 %v3156_v45, %v3144_v20  ;;  %v3264_v15 = vld [vmem:[#allocation12 + $0x910] sm:$0xff] }
 0x3c1   :  { %v7704_v26 = vpack.c.bf16 %v3179_v42, %v3167_v22  ;;  %v3276_v20 = vld [vmem:[#allocation12 + $0x970] sm:$0xff]  ;;  %v3299_v45 = vld [vmem:[#allocation12 + $0xa28] sm:$0xff] }
 0x3c2   :  { %7683 = vmatpush1.bf16.msra.mxu0 %v7682_v30  ;;  %v3166_v30 = vld [vmem:[#allocation12 + $0x600] sm:$0xff]  ;;  %v7850_v22 = vpack.c.bf16 %v3276_v20, %v3264_v15 }
 0x3c3   :  { %7811 = vmatpush1.bf16.msra.mxu1 %v7810_v61  ;;  %7685 = vmatprep.subr.bf16.mxu0 %v7684_v3  ;;  %v3178_v61 = vld [vmem:[#allocation12 + $0x660] sm:$0xff]  ;;  %v3168_v3 = vld [vmem:[#allocation12 + $0x610] sm:$0xff] }
 0x3c4   :  { %7813 = vmatprep.subr.bf16.mxu1 %v7812_v37  ;;  %v3203_v37 = vld [vmem:[#allocation12 + $0x728] sm:$0xff]  ;;  %v7706_v38 = vpack.c.bf16 %v3178_v61, %v3166_v30  ;;  %v7834_v39 = vpack.c.bf16 %v3180_v32, %v3168_v3  ;;  %v3288_v30 = vld [vmem:[#allocation12 + $0x9d0] sm:$0xff] }
 0x3c5   :  { %v7708_v41 = vpack.c.bf16 %v3203_v37, %v3191_v34  ;;  %v3300_v61 = vld [vmem:[#allocation12 + $0xa30] sm:$0xff]  ;;  %v3323_v32 = vld [vmem:[#allocation12 + $0xae8] sm:$0xff]  ;;  %v3313_v34 = vld [vmem:[#allocation12 + $0xa98] sm:$0xff] }
 0x3c6   :  { %7687 = vmatpush1.bf16.msra.mxu0 %v7686_v44  ;;  %v3190_v44 = vld [vmem:[#allocation12 + $0x6c0] sm:$0xff]  ;;  %v7854_v37 = vpack.c.bf16 %v3300_v61, %v3288_v30  ;;  %v3395_v61 = vld [vmem:[#allocation12 + $0xd28] sm:$0xff] }
 0x3c7   :  { %7815 = vmatpush1.bf16.msra.mxu1 %v7814_v46  ;;  %7689 = vmatprep.subr.bf16.mxu0 %v7688_v47  ;;  %v3202_v46 = vld [vmem:[#allocation12 + $0x720] sm:$0xff]  ;;  %v3192_v47 = vld [vmem:[#allocation12 + $0x6d0] sm:$0xff] }
 0x3c8   :  { %7817 = vmatprep.subr.bf16.mxu1 %v7816_v33  ;;  %v3227_v33 = vld [vmem:[#allocation12 + $0x7e8] sm:$0xff]  ;;  %v7710_v54 = vpack.c.bf16 %v3202_v46, %v3190_v44  ;;  %v7838_v55 = vpack.c.bf16 %v3204_v29, %v3192_v47  ;;  %v3312_v44 = vld [vmem:[#allocation12 + $0xa90] sm:$0xff]  ;;  %v3337_v29 = vld [vmem:[#allocation12 + $0xb58] sm:$0xff] }
 0x3c9   :  { %v7712_v57 = vpack.c.bf16 %v3227_v33, %v3215_v49  ;;  %v3324_v46 = vld [vmem:[#allocation12 + $0xaf0] sm:$0xff]  ;;  %v3335_v47 = vld [vmem:[#allocation12 + $0xb48] sm:$0xff]  ;;  %v3349_v49 = vld [vmem:[#allocation12 + $0xbb8] sm:$0xff] }
 0x3ca   :  { %7691 = vmatpush1.bf16.msra.mxu0 %v7690_v0  ;;  %v3214_v0 = vld [vmem:[#allocation12 + $0x780] sm:$0xff] }
 0x3cb   :  { %7819 = vmatpush1.bf16.msra.mxu1 %v7818_v43  ;;  %7693 = vmatprep.subr.bf16.mxu0 %v7692_v60  ;;  %v3226_v43 = vld [vmem:[#allocation12 + $0x7e0] sm:$0xff]  ;;  %v7840_v60 = vpack.c.bf16 %v3229_v11, %v3217_v52  ;;  %v7858_v52 = vpack.c.bf16 %v3324_v46, %v3312_v44  ;;  %v3407_v44 = vld [vmem:[#allocation12 + $0xd88] sm:$0xff] }
 0x3cc   :  { %7821 = vmatprep.subr.bf16.mxu1 %v7820_v19  ;;  %v7714_v2 = vpack.c.bf16 %v3226_v43, %v3214_v0  ;;  %v7842_v19 = vpack.c.bf16 %v3228_v62, %v3216_v58  ;;  %v7860_v0 = vpack.c.bf16 %v3349_v49, %v3337_v29  ;;  %v3348_v43 = vld [vmem:[#allocation12 + $0xbb0] sm:$0xff]  ;;  %v3371_v58 = vld [vmem:[#allocation12 + $0xc68] sm:$0xff]  ;;  %v3361_v62 = vld [vmem:[#allocation12 + $0xc18] sm:$0xff] }
 0x3cd   :  { %v3419_v29 = vld [vmem:[#allocation12 + $0xde8] sm:$0xff]  ;;  %v3409_v49 = vld [vmem:[#allocation12 + $0xd98] sm:$0xff] }
 0x3ce   :  { %7695 = vmatpush1.bf16.msra.mxu0 %v7694_v6  ;;  %v3238_v6 = vld [vmem:[#allocation12 + $0x840] sm:$0xff] }
 0x3cf   :  { %7823 = vmatpush1.bf16.msra.mxu1 %v7822_v7  ;;  %7697 = vmatprep.subr.bf16.mxu0 %v7696_v8  ;;  %v3250_v7 = vld [vmem:[#allocation12 + $0x8a0] sm:$0xff]  ;;  %v7844_v8 = vpack.c.bf16 %v3253_v1, %v3241_v5  ;;  %v10946_v1 = vld [vmem:[#allocation10] sm:$0xf] }
 0x3d0   :  { %7825 = vmatprep.subr.bf16.mxu1 %v7824_v12  ;;  %v7718_v9 = vpack.c.bf16 %v3250_v7, %v3238_v6  ;;  %v3263_v12 = vld [vmem:[#allocation12 + $0x908] sm:$0xff]  ;;  %v10949_v6 = vsub.s32 1, %v10887_v63  ;;  %v10952_v7 = vsub.s32 3, %v10887_v63 }
 0x3d1   :  { %v7720_v13 = vpack.c.bf16 %v3275_v28, %v3263_v12 }
 0x3d2   :  { %7699 = vmatpush1.bf16.msra.mxu0 %v7698_v36  ;;  %v7848_v36 = vpack.c.bf16 %v3277_v56, %v3265_v59  ;;  %v2333_v10 = vrot.slane %v10946_v1, %v10952_v7 }
 0x3d3   :  { %7827 = vmatpush1.bf16.msra.mxu1 %v7826_v14  ;;  %7701 = vmatprep.subr.bf16.mxu0 %v7700_v16  ;;  %v3262_v14 = vld [vmem:[#allocation12 + $0x900] sm:$0xff] }
 0x3d4   :  { %7829 = vmatprep.subr.bf16.mxu1 %v7828_v21  ;;  %v3274_v16 = vld [vmem:[#allocation12 + $0x960] sm:$0xff]  ;;  %v3287_v21 = vld [vmem:[#allocation12 + $0x9c8] sm:$0xff] }
 0x3d5   :  { %v7722_v18 = vpack.c.bf16 %v3274_v16, %v3262_v14  ;;  %v7724_v42 = vpack.c.bf16 %v3299_v45, %v3287_v21  ;;  %v3358_v45 = vld [vmem:[#allocation12 + $0xc00] sm:$0xff] }
 0x3d6   :  { %7703 = vmatpush1.bf16.msra.mxu0 %v7702_v25  ;;  %v3286_v25 = vld [vmem:[#allocation12 + $0x9c0] sm:$0xff] }
 0x3d7   :  { %7831 = vmatpush1.bf16.msra.mxu1 %v7830_v40  ;;  %7705 = vmatprep.subr.bf16.mxu0 %v7704_v26  ;;  %v7852_v40 = vpack.c.bf16 %v3301_v24, %v3289_v23  ;;  %v3298_v26 = vld [vmem:[#allocation12 + $0xa20] sm:$0xff]  ;;  %v3372_v23 = vld [vmem:[#allocation12 + $0xc70] sm:$0xff] }
 0x3d8   :  { %7833 = vmatprep.subr.bf16.mxu1 %v7832_v31  ;;  %v7726_v3 = vpack.c.bf16 %v3298_v26, %v3286_v25  ;;  %v3311_v31 = vld [vmem:[#allocation12 + $0xa88] sm:$0xff] }
 0x3d9   :  { %v7728_v50 = vpack.c.bf16 %v3323_v32, %v3311_v31  ;;  %v3397_v31 = vld [vmem:[#allocation12 + $0xd38] sm:$0xff] }
 0x3da   :  { %7707 = vmatpush1.bf16.msra.mxu0 %v7706_v38  ;;  %v3310_v38 = vld [vmem:[#allocation12 + $0xa80] sm:$0xff] }
 0x3db   :  { %7835 = vmatpush1.bf16.msra.mxu1 %v7834_v39  ;;  %7709 = vmatprep.subr.bf16.mxu0 %v7708_v41  ;;  %v3322_v39 = vld [vmem:[#allocation12 + $0xae0] sm:$0xff]  ;;  %v7856_v41 = vpack.c.bf16 %v3325_v53, %v3313_v34 }
 0x3dc   :  { %7837 = vmatprep.subr.bf16.mxu1 %v7836_v48  ;;  %v3347_v48 = vld [vmem:[#allocation12 + $0xba8] sm:$0xff]  ;;  %v7730_v33 = vpack.c.bf16 %v3322_v39, %v3310_v38  ;;  %v3394_v53 = vld [vmem:[#allocation12 + $0xd20] sm:$0xff]  ;;  %v3384_v39 = vld [vmem:[#allocation12 + $0xcd0] sm:$0xff] }
 0x3dd   :  { %v7732_v11 = vpack.c.bf16 %v3347_v48, %v3335_v47 }
 0x3de   :  { %7711 = vmatpush1.bf16.msra.mxu0 %v7710_v54  ;;  %v3334_v54 = vld [vmem:[#allocation12 + $0xb40] sm:$0xff] }
 0x3df   :  { %7839 = vmatpush1.bf16.msra.mxu1 %v7838_v55  ;;  %7713 = vmatprep.subr.bf16.mxu0 %v7712_v57  ;;  %v3346_v55 = vld [vmem:[#allocation12 + $0xba0] sm:$0xff]  ;;  %v3336_v57 = vld [vmem:[#allocation12 + $0xb50] sm:$0xff] }
 0x3e0   :  { %7841 = vmatprep.subr.bf16.mxu1 %v7840_v60  ;;  %v3359_v60 = vld [vmem:[#allocation12 + $0xc08] sm:$0xff]  ;;  %v7862_v35 = vpack.c.bf16 %v3348_v43, %v3336_v57  ;;  %v3418_v57 = vld [vmem:[#allocation12 + $0xde0] sm:$0xff] }
 0x3e1   :  { %v7736_v51 = vpack.c.bf16 %v3371_v58, %v3359_v60  ;;  %v3408_v60 = vld [vmem:[#allocation12 + $0xd90] sm:$0xff] }
 0x3e2   :  { %7715 = vmatpush1.bf16.msra.mxu0 %v7714_v2  ;;  %v3373_v2 = vld [vmem:[#allocation12 + $0xc78] sm:$0xff]  ;;  %v3420_v58 = vld [vmem:[#allocation12 + $0xdf0] sm:$0xff] }
 0x3e3   :  { %7843 = vmatpush1.bf16.msra.mxu1 %v7842_v19  ;;  %7717 = vmatprep.subr.bf16.mxu0 %v7716_v27  ;;  %v7734_v19 = vpack.c.bf16 %v3346_v55, %v3334_v54  ;;  %v7864_v5 = vpack.c.bf16 %v3373_v2, %v3361_v62  ;;  %v10944_v27 = vsub.s32 0, %v10887_v63  ;;  %v3406_v55 = vld [vmem:[#allocation12 + $0xd80] sm:$0xff]  ;;  %v3431_v62 = vld [vmem:[#allocation12 + $0xe48] sm:$0xff] }
 0x3e4   :  { %7845 = vmatprep.subr.bf16.mxu1 %v7844_v8  ;;  %v3443_v2 = vld [vmem:[#allocation12 + $0xea8] sm:$0xff] }
 0x3e5   :  { %v2321_v8 = vrot.slane %v10946_v1, %v10944_v27 }
 0x3e6   :  { %7719 = vmatpush1.bf16.msra.mxu0 %v7718_v9  ;;  %v2325_v9 = vrot.slane %v10946_v1, %v10949_v6 }
 0x3e7   :  { %7847 = vmatpush1.bf16.msra.mxu1 %v7846_v17  ;;  %7721 = vmatprep.subr.bf16.mxu0 %v7720_v13 }
 0x3e8   :  { %7849 = vmatprep.subr.bf16.mxu1 %v7848_v36 }
 0x3ea   :  { %7723 = vmatpush1.bf16.msra.mxu0 %v7722_v18 }
 0x3eb   :  { %7851 = vmatpush1.bf16.msra.mxu1 %v7850_v22  ;;  %7725 = vmatprep.subr.bf16.mxu0 %v7724_v42  ;;  %v3370_v22 = vld [vmem:[#allocation12 + $0xc60] sm:$0xff]  ;;  %v3360_v42 = vld [vmem:[#allocation12 + $0xc10] sm:$0xff] }
 0x3ec   :  { %7853 = vmatprep.subr.bf16.mxu1 %v7852_v40  ;;  %v3383_v40 = vld [vmem:[#allocation12 + $0xcc8] sm:$0xff]  ;;  %v7738_v34 = vpack.c.bf16 %v3370_v22, %v3358_v45  ;;  %v3456_v45 = vld [vmem:[#allocation12 + $0xf10] sm:$0xff] }
 0x3ed   :  { %v7740_v47 = vpack.c.bf16 %v3395_v61, %v3383_v40  ;;  %v3468_v22 = vld [vmem:[#allocation12 + $0xf70] sm:$0xff]  ;;  %v3490_v61 = vld [vmem:[#allocation12 + $0x1020] sm:$0xff] }
 0x3ee   :  { %7727 = vmatpush1.bf16.msra.mxu0 %v7726_v3  ;;  %v3385_v3 = vld [vmem:[#allocation12 + $0xcd8] sm:$0xff] }
 0x3ef   :  { %7855 = vmatpush1.bf16.msra.mxu1 %v7854_v37  ;;  %7729 = vmatprep.subr.bf16.mxu0 %v7728_v50  ;;  %v7866_v37 = vpack.c.bf16 %v3372_v23, %v3360_v42  ;;  %v3382_v50 = vld [vmem:[#allocation12 + $0xcc0] sm:$0xff]  ;;  %v7868_v48 = vpack.c.bf16 %v3397_v31, %v3385_v3  ;;  %v3479_v42 = vld [vmem:[#allocation12 + $0xfc8] sm:$0xff] }
 0x3f0   :  { %7857 = vmatprep.subr.bf16.mxu1 %v7856_v41  ;;  %v3396_v41 = vld [vmem:[#allocation12 + $0xd30] sm:$0xff]  ;;  %v3491_v23 = vld [vmem:[#allocation12 + $0x1028] sm:$0xff] }
 0x3f1   :  { %v7870_v54 = vpack.c.bf16 %v3396_v41, %v3384_v39  ;;  %v7756_v3 = vpack.c.bf16 %v3491_v23, %v3479_v42  ;;  %v3517_v39 = vld [vmem:[#allocation12 + $0x10f8] sm:$0xff]  ;;  %v3574_v42 = vld [vmem:[#allocation12 + $0x12c0] sm:$0xff] }
 0x3f2   :  { %7731 = vmatpush1.bf16.msra.mxu0 %v7730_v33  ;;  %v3421_v33 = vld [vmem:[#allocation12 + $0xdf8] sm:$0xff]  ;;  %v3586_v23 = vld [vmem:[#allocation12 + $0x1320] sm:$0xff] }
 0x3f3   :  { %7859 = vmatpush1.bf16.msra.mxu1 %v7858_v52  ;;  %7733 = vmatprep.subr.bf16.mxu0 %v7732_v11  ;;  %v7742_v11 = vpack.c.bf16 %v3394_v53, %v3382_v50  ;;  %v7872_v43 = vpack.c.bf16 %v3421_v33, %v3409_v49  ;;  %v3515_v50 = vld [vmem:[#allocation12 + $0x10e8] sm:$0xff]  ;;  %v3505_v53 = vld [vmem:[#allocation12 + $0x1098] sm:$0xff]  ;;  %v3504_v33 = vld [vmem:[#allocation12 + $0x1090] sm:$0xff] }
 0x3f4   :  { %7861 = vmatprep.subr.bf16.mxu1 %v7860_v0  ;;  %v7744_v0 = vpack.c.bf16 %v3419_v29, %v3407_v44  ;;  %v7888_v49 = vpack.c.bf16 %v3517_v39, %v3505_v53  ;;  %v3610_v53 = vld [vmem:[#allocation12 + $0x13e0] sm:$0xff] }
 0x3f6   :  { %7735 = vmatpush1.bf16.msra.mxu0 %v7734_v19  ;;  %v3433_v19 = vld [vmem:[#allocation12 + $0xe58] sm:$0xff] }
 0x3f7   :  { %7863 = vmatpush1.bf16.msra.mxu1 %v7862_v35  ;;  %7737 = vmatprep.subr.bf16.mxu0 %v7736_v51  ;;  %v3445_v35 = vld [vmem:[#allocation12 + $0xeb8] sm:$0xff]  ;;  %v7746_v51 = vpack.c.bf16 %v3418_v57, %v3406_v55  ;;  %v3539_v55 = vld [vmem:[#allocation12 + $0x11a8] sm:$0xff] }
 0x3f8   :  { %7865 = vmatprep.subr.bf16.mxu1 %v7864_v5  ;;  %v7874_v5 = vpack.c.bf16 %v3420_v58, %v3408_v60  ;;  %v3529_v57 = vld [vmem:[#allocation12 + $0x1158] sm:$0xff]  ;;  %v3526_v58 = vld [vmem:[#allocation12 + $0x1140] sm:$0xff] }
 0x48c   :  { %v2661_v4 = vpop.f32.mrb[48].mxu0 }
 0x48d   :  { %v9144_v12 = vadd.f32 %v2661_v4, %v2321_v8  ;;  %v10960_v17 = vpop.f32.mrb[40].mxu1  ;;  %v2663_v28 = vpop.f32.mrb[49].mxu0  ;;  %v3430_v8 = vld [vmem:[#allocation12 + $0xe40] sm:$0xff]  ;;  %v7876_v4 = vpack.c.bf16 %v3445_v35, %v3433_v19  ;;  %v3528_v35 = vld [vmem:[#allocation12 + $0x1150] sm:$0xff] }
 0x48e   :  { %v9145_v59 = vadd.f32 %v2663_v28, %v2325_v9  ;;  %v2947_v56 = vpop.f32.mrb[41].mxu1  ;;  %v3442_v9 = vld [vmem:[#allocation12 + $0xea0] sm:$0xff]  ;;  %v3444_v28 = vld [vmem:[#allocation12 + $0xeb0] sm:$0xff] }
 0x48f   :  { %v2954_v13 = vmin.f32 %v9144_v12, 0.0  ;;  %v9147_v36 = vadd.f32 %v2947_v56, %v2333_v10  ;;  %vm2950_vm6 = vcmp.gt.f32.partialorder %v9144_v12, 0.0  ;;  %v7748_v10 = vpack.c.bf16 %v3443_v2, %v3431_v62  ;;  %v3467_v56 = vld [vmem:[#allocation12 + $0xf68] sm:$0xff]  ;;  %v3538_v62 = vld [vmem:[#allocation12 + $0x11a0] sm:$0xff] }
 0x490   :  { %v2955_v14 = vmin.f32 %v9145_v59, 0.0  ;;  %vm2951_vm5 = vcmp.gt.f32.partialorder %v9145_v59, 0.0 }
 0x491   :  { %v2958_v16 = vmul.f32 1.442695, %v2954_v13  ;;  %v2957_v15 = vmin.f32 %v9147_v36, 0.0  ;;  %vm2953_vm7 = vcmp.gt.f32.partialorder %v9147_v36, 0.0  ;;  %v3457_v13 = vld [vmem:[#allocation12 + $0xf18] sm:$0xff] }
 0x492   :  { %v2960_v18 = vmul.f32 1.442695, %v2955_v14  ;;  %v7750_v14 = vpack.c.bf16 %v3442_v9, %v3430_v8  ;;  %v3563_v8 = vld [vmem:[#allocation12 + $0x1268] sm:$0xff]  ;;  %v3553_v9 = vld [vmem:[#allocation12 + $0x1218] sm:$0xff] }
 0x493   :  { %9236 = vpow2.f32 %v2958_v16  ;;  %v2964_v20 = vmul.f32 1.442695, %v2957_v15  ;;  %v3454_v15 = vld [vmem:[#allocation12 + $0xf00] sm:$0xff] }
 0x494   :  { %9238 = vpow2.f32 %v2960_v18  ;;  %v3466_v18 = vld [vmem:[#allocation12 + $0xf60] sm:$0xff] }
 0x495   :  { %9240 = vpow2.f32 %v2964_v20  ;;  %v7754_v40 = vpack.c.bf16 %v3466_v18, %v3454_v15  ;;  %v3575_v15 = vld [vmem:[#allocation12 + $0x12c8] sm:$0xff] }
 0x496   :  { %v3587_v18 = vld [vmem:[#allocation12 + $0x1328] sm:$0xff] }
 0x49d   :  { %v9237_v21 = vpop.eup %9236 }
 0x49e   :  { %v9239_v24 = vpop.eup %9238  ;;  %v6537_v25 = vadd.f32 -1.0, %v9237_v21 }
 0x49f   :  { %v9241_v26 = vpop.eup %9240  ;;  %v6538_v30 = vadd.f32 -1.0, %v9239_v24  ;;  %v3481_v24 = vld [vmem:[#allocation12 + $0xfd8] sm:$0xff] }
 0x4a0   :  { %v6540_v32 = vadd.f32 -1.0, %v9241_v26  ;;  %v10964_v46 = vsel %vm2950_vm6, %v9144_v12, %v6537_v25  ;;  %v3432_v12 = vld [vmem:[#allocation12 + $0xe50] sm:$0xff]  ;;  %v3493_v25 = vld [vmem:[#allocation12 + $0x1038] sm:$0xff]  ;;  %v7882_v26 = vpack.c.bf16 %v3468_v22, %v3456_v45 }
 0x4a1   :  { %v10962_v38 = vsel %vm2951_vm5, %v9145_v59, %v6538_v30  ;;  %v3455_v59 = vld [vmem:[#allocation12 + $0xf08] sm:$0xff]  ;;  %v7878_v16 = vpack.c.bf16 %v3444_v28, %v3432_v12  ;;  %v3478_v30 = vld [vmem:[#allocation12 + $0xfc0] sm:$0xff]  ;;  %v7884_v31 = vpack.c.bf16 %v3493_v25, %v3481_v24  ;;  %v7772_v25 = vpack.c.bf16 %v3587_v18, %v3575_v15 }
 0x4a2   :  { %3870 = vmatprep.mubr.f32.mxu0 %v10962_v38  ;;  %4012 = vmatprep.mubr.f32.mxu1 %v10962_v38  ;;  %v10970_v52 = vsel %vm2953_vm7, %v9147_v36, %v6540_v32  ;;  %v3469_v36 = vld [vmem:[#allocation12 + $0xf78] sm:$0xff]  ;;  %v7752_v20 = vpack.c.bf16 %v3467_v56, %v3455_v59  ;;  %v3480_v32 = vld [vmem:[#allocation12 + $0xfd0] sm:$0xff]  ;;  %v7758_v41 = vpack.c.bf16 %v3490_v61, %v3478_v30  ;;  %v3550_v28 = vld [vmem:[#allocation12 + $0x1200] sm:$0xff]  ;;  %v10975_v56 = vsub.s32 2, %v10887_v63 }
 0x4a3   :  { %3871 = vmatmul.mubr.f32.vlgmr.msra.gmra.mrb[50].mxu0 %v10964_v46  ;;  %4013 = vmatmul.mubr.f32.vlgmr.msra.gmra.mrb[42].mxu1 %v10964_v46  ;;  %v7880_v21 = vpack.c.bf16 %v3469_v36, %v3457_v13  ;;  %v3562_v59 = vld [vmem:[#allocation12 + $0x1260] sm:$0xff]  ;;  %v3588_v30 = vld [vmem:[#allocation12 + $0x1330] sm:$0xff]  ;;  %v3599_v61 = vld [vmem:[#allocation12 + $0x1388] sm:$0xff] }
 0x4a4   :  { %7739 = vmatpush1.bf16.msra.mxu0 %v7738_v34  ;;  %7867 = vmatpush1.bf16.msra.mxu1 %v7866_v37  ;;  %v3492_v34 = vld [vmem:[#allocation12 + $0x1030] sm:$0xff]  ;;  %v3503_v37 = vld [vmem:[#allocation12 + $0x1088] sm:$0xff]  ;;  %v7770_v45 = vpack.c.bf16 %v3562_v59, %v3550_v28  ;;  %v2329_v24 = vrot.slane %v10946_v1, %v10975_v56 }
 0x4a5   :  { %3941 = vmatprep.mubr.f32.mxu0 %v10970_v52  ;;  %4083 = vmatprep.mubr.f32.mxu1 %v10970_v52  ;;  %v7886_v44 = vpack.c.bf16 %v3492_v34, %v3480_v32  ;;  %v7760_v29 = vpack.c.bf16 %v3515_v50, %v3503_v37  ;;  %v3613_v32 = vld [vmem:[#allocation12 + $0x13f8] sm:$0xff]  ;;  %v7774_v34 = vpack.c.bf16 %v3586_v23, %v3574_v42  ;;  %v3598_v50 = vld [vmem:[#allocation12 + $0x1380] sm:$0xff]  ;;  %v3648_v28 = vld [vmem:[#allocation12 + $0x1510] sm:$0xff] }
 0x4a6   :  { %7741 = vmatprep.subr.bf16.mxu0 %v7740_v47  ;;  %7869 = vmatprep.subr.bf16.mxu1 %v7868_v48  ;;  %v3502_v47 = vld [vmem:[#allocation12 + $0x1080] sm:$0xff]  ;;  %v10980_v39 = vadd.f32 %v10960_v17, %v2329_v24  ;;  %v3660_v59 = vld [vmem:[#allocation12 + $0x1570] sm:$0xff]  ;;  %v3695_v24 = vld [vmem:[#allocation12 + $0x1688] sm:$0xff] }
 0x4a7   :  { %v3514_v48 = vld [vmem:[#allocation12 + $0x10e0] sm:$0xff]  ;;  %v7914_v18 = vpack.c.bf16 %v3660_v59, %v3648_v28  ;;  %v3672_v42 = vld [vmem:[#allocation12 + $0x15d0] sm:$0xff]  ;;  %v3017_v28 = vld [vmem:[#allocation12 + $0x158] sm:$0xff] }
 0x4a8   :  { %7743 = vmatpush1.bf16.msra.mxu0 %v7742_v11  ;;  %7871 = vmatpush1.bf16.msra.mxu1 %v7870_v54  ;;  %v3516_v11 = vld [vmem:[#allocation12 + $0x10f0] sm:$0xff]  ;;  %v3527_v54 = vld [vmem:[#allocation12 + $0x1148] sm:$0xff]  ;;  %vm2952_vm8 = vcmp.gt.f32.partialorder %v10980_v39, 0.0 }
 0x4a9   :  { %7745 = vmatprep.subr.bf16.mxu0 %v7744_v0  ;;  %7873 = vmatprep.subr.bf16.mxu1 %v7872_v43  ;;  %v3541_v0 = vld [vmem:[#allocation12 + $0x11b8] sm:$0xff]  ;;  %v7762_v43 = vpack.c.bf16 %v3514_v48, %v3502_v47  ;;  %v7890_v60 = vpack.c.bf16 %v3516_v11, %v3504_v33  ;;  %v7764_v2 = vpack.c.bf16 %v3539_v55, %v3527_v54  ;;  %v3612_v47 = vld [vmem:[#allocation12 + $0x13f0] sm:$0xff]  ;;  %v3623_v48 = vld [vmem:[#allocation12 + $0x1448] sm:$0xff] }
 0x4aa   :  { %v7892_v19 = vpack.c.bf16 %v3541_v0, %v3529_v57  ;;  %v3637_v33 = vld [vmem:[#allocation12 + $0x14b8] sm:$0xff]  ;;  %v7778_v11 = vpack.c.bf16 %v3610_v53, %v3598_v50  ;;  %v3622_v55 = vld [vmem:[#allocation12 + $0x1440] sm:$0xff]  ;;  %v2956_v0 = vmin.f32 %v10980_v39, 0.0  ;;  %v3684_v23 = vld [vmem:[#allocation12 + $0x1630] sm:$0xff] }
 0x4ab   :  { %v3634_v57 = vld [vmem:[#allocation12 + $0x14a0] sm:$0xff]  ;;  %v3708_v50 = vld [vmem:[#allocation12 + $0x16f0] sm:$0xff]  ;;  %v3719_v53 = vld [vmem:[#allocation12 + $0x1748] sm:$0xff] }
 0x4ac   :  { %7747 = vmatpush1.bf16.msra.mxu0 %v7746_v51  ;;  %7875 = vmatpush1.bf16.msra.mxu1 %v7874_v5  ;;  %v3540_v51 = vld [vmem:[#allocation12 + $0x11b0] sm:$0xff]  ;;  %v3551_v5 = vld [vmem:[#allocation12 + $0x1208] sm:$0xff] }
 0x4ad   :  { %7749 = vmatprep.subr.bf16.mxu0 %v7748_v10  ;;  %7877 = vmatprep.subr.bf16.mxu1 %v7876_v4  ;;  %v3565_v10 = vld [vmem:[#allocation12 + $0x1278] sm:$0xff]  ;;  %v7766_v4 = vpack.c.bf16 %v3538_v62, %v3526_v58  ;;  %v7894_v12 = vpack.c.bf16 %v3540_v51, %v3528_v35  ;;  %v7768_v13 = vpack.c.bf16 %v3563_v8, %v3551_v5  ;;  %v3636_v58 = vld [vmem:[#allocation12 + $0x14b0] sm:$0xff]  ;;  %v3647_v62 = vld [vmem:[#allocation12 + $0x1508] sm:$0xff] }
 0x4ae   :  { %v7896_v36 = vpack.c.bf16 %v3565_v10, %v3553_v9  ;;  %v3661_v35 = vld [vmem:[#allocation12 + $0x1578] sm:$0xff]  ;;  %v7782_v51 = vpack.c.bf16 %v3634_v57, %v3622_v55  ;;  %v3646_v8 = vld [vmem:[#allocation12 + $0x1500] sm:$0xff]  ;;  %v2962_v10 = vmul.f32 1.442695, %v2956_v0  ;;  %v3732_v55 = vld [vmem:[#allocation12 + $0x17b0] sm:$0xff] }
 0x4af   :  { %v3658_v9 = vld [vmem:[#allocation12 + $0x1560] sm:$0xff]  ;;  %v2979_v57 = vld [vmem:[#allocation12 + $0x28] sm:$0xff] }
 0x4b0   :  { %7751 = vmatpush1.bf16.msra.mxu0 %v7750_v14  ;;  %7879 = vmatpush1.bf16.msra.mxu1 %v7878_v16  ;;  %v3552_v14 = vld [vmem:[#allocation12 + $0x1210] sm:$0xff]  ;;  %v7786_v15 = vpack.c.bf16 %v3658_v9, %v3646_v8  ;;  %9242 = vpow2.f32 %v2962_v10  ;;  %v2991_v0 = vld [vmem:[#allocation12 + $0x88] sm:$0xff] }
 0x4b1   :  { %7753 = vmatprep.subr.bf16.mxu0 %v7752_v20  ;;  %7881 = vmatprep.subr.bf16.mxu1 %v7880_v21  ;;  %v3564_v16 = vld [vmem:[#allocation12 + $0x1270] sm:$0xff]  ;;  %v3577_v20 = vld [vmem:[#allocation12 + $0x12d8] sm:$0xff]  ;;  %v3003_v10 = vld [vmem:[#allocation12 + $0xe8] sm:$0xff] }
 0x4b2   :  { %v3589_v21 = vld [vmem:[#allocation12 + $0x1338] sm:$0xff]  ;;  %v7898_v22 = vpack.c.bf16 %v3564_v16, %v3552_v14  ;;  %v2980_v8 = vld [vmem:[#allocation12 + $0x30] sm:$0xff] }
 0x4b3   :  { %v3673_v14 = vld [vmem:[#allocation12 + $0x15d8] sm:$0xff]  ;;  %v2992_v9 = vld [vmem:[#allocation12 + $0x90] sm:$0xff] }
 0x4b4   :  { %7755 = vmatpush1.bf16.msra.mxu0 %v7754_v40  ;;  %7883 = vmatpush1.bf16.msra.mxu1 %v7882_v26  ;;  %v7900_v40 = vpack.c.bf16 %v3589_v21, %v3577_v20  ;;  %v3576_v26 = vld [vmem:[#allocation12 + $0x12d0] sm:$0xff]  ;;  %v3685_v16 = vld [vmem:[#allocation12 + $0x1638] sm:$0xff]  ;;  %v3670_v20 = vld [vmem:[#allocation12 + $0x15c0] sm:$0xff] }
 0x4b5   :  { %7757 = vmatprep.subr.bf16.mxu0 %v7756_v3  ;;  %7885 = vmatprep.subr.bf16.mxu1 %v7884_v31  ;;  %v3611_v3 = vld [vmem:[#allocation12 + $0x13e8] sm:$0xff]  ;;  %v3601_v31 = vld [vmem:[#allocation12 + $0x1398] sm:$0xff]  ;;  %v7902_v37 = vpack.c.bf16 %v3588_v30, %v3576_v26  ;;  %v3682_v21 = vld [vmem:[#allocation12 + $0x1620] sm:$0xff] }
 0x4b6   :  { %v7776_v1 = vpack.c.bf16 %v3611_v3, %v3599_v61  ;;  %v3709_v26 = vld [vmem:[#allocation12 + $0x16f8] sm:$0xff]  ;;  %v7790_v30 = vpack.c.bf16 %v3682_v21, %v3670_v20  ;;  %v7918_v61 = vpack.c.bf16 %v3684_v23, %v3672_v42  ;;  %v3694_v3 = vld [vmem:[#allocation12 + $0x1680] sm:$0xff]  ;;  %v3016_v21 = vld [vmem:[#allocation12 + $0x150] sm:$0xff] }
 0x4b7   :  { %v3029_v42 = vld [vmem:[#allocation12 + $0x1b8] sm:$0xff] }
 0x4b8   :  { %7759 = vmatpush1.bf16.msra.mxu0 %v7758_v41  ;;  %7887 = vmatpush1.bf16.msra.mxu1 %v7886_v44  ;;  %v7904_v41 = vpack.c.bf16 %v3613_v32, %v3601_v31  ;;  %v3600_v44 = vld [vmem:[#allocation12 + $0x1390] sm:$0xff]  ;;  %v3706_v31 = vld [vmem:[#allocation12 + $0x16e0] sm:$0xff]  ;;  %v3041_v23 = vld [vmem:[#allocation12 + $0x218] sm:$0xff] }
 0x4b9   :  { %7761 = vmatprep.subr.bf16.mxu0 %v7760_v29  ;;  %7889 = vmatprep.subr.bf16.mxu1 %v7888_v49  ;;  %v3635_v29 = vld [vmem:[#allocation12 + $0x14a8] sm:$0xff]  ;;  %v3625_v49 = vld [vmem:[#allocation12 + $0x1458] sm:$0xff]  ;;  %v7906_v54 = vpack.c.bf16 %v3612_v47, %v3600_v44  ;;  %v7794_v47 = vpack.c.bf16 %v3706_v31, %v3694_v3  ;;  %v3040_v3 = vld [vmem:[#allocation12 + $0x210] sm:$0xff] }
 0x4ba   :  { %v7780_v17 = vpack.c.bf16 %v3635_v29, %v3623_v48  ;;  %v3733_v44 = vld [vmem:[#allocation12 + $0x17b8] sm:$0xff]  ;;  %v3718_v29 = vld [vmem:[#allocation12 + $0x1740] sm:$0xff]  ;;  %v3051_v31 = vld [vmem:[#allocation12 + $0x268] sm:$0xff] }
 0x4bc   :  { %7763 = vmatpush1.bf16.msra.mxu0 %v7762_v43  ;;  %7891 = vmatpush1.bf16.msra.mxu1 %v7890_v60  ;;  %v7908_v43 = vpack.c.bf16 %v3637_v33, %v3625_v49  ;;  %v3624_v60 = vld [vmem:[#allocation12 + $0x1450] sm:$0xff]  ;;  %v3730_v49 = vld [vmem:[#allocation12 + $0x17a0] sm:$0xff] }
 0x4bd   :  { %7765 = vmatprep.subr.bf16.mxu0 %v7764_v2  ;;  %7893 = vmatprep.subr.bf16.mxu1 %v7892_v19  ;;  %v3659_v2 = vld [vmem:[#allocation12 + $0x1568] sm:$0xff]  ;;  %v3649_v19 = vld [vmem:[#allocation12 + $0x1518] sm:$0xff]  ;;  %v7910_v5 = vpack.c.bf16 %v3636_v58, %v3624_v60  ;;  %v9243_v60 = vpop.eup %9242  ;;  %v7798_v58 = vpack.c.bf16 %v3730_v49, %v3718_v29  ;;  %v3064_v29 = vld [vmem:[#allocation12 + $0x2d0] sm:$0xff] }
 0x4be   :  { %v3075_v49 = vld [vmem:[#allocation12 + $0x328] sm:$0xff] }
 0x4c0   :  { %7767 = vmatpush1.bf16.msra.mxu0 %v7766_v4  ;;  %7895 = vmatpush1.bf16.msra.mxu1 %v7894_v12  ;;  %v7784_v4 = vpack.c.bf16 %v3659_v2, %v3647_v62  ;;  %v7912_v12 = vpack.c.bf16 %v3661_v35, %v3649_v19  ;;  %v7928_v2 = vpack.c.bf16 %v2991_v0, %v2979_v57  ;;  %v2978_v35 = vld [vmem:[#allocation12 + $0x20] sm:$0xff] }
 0x4c1   :  { %7769 = vmatprep.subr.bf16.mxu0 %v7768_v13  ;;  %7897 = vmatprep.subr.bf16.mxu1 %v7896_v36  ;;  %v3671_v13 = vld [vmem:[#allocation12 + $0x15c8] sm:$0xff] }
 0x4c2   :  { %v3683_v36 = vld [vmem:[#allocation12 + $0x1628] sm:$0xff] }
 0x4c4   :  { %7771 = vmatpush1.bf16.msra.mxu0 %v7770_v45  ;;  %7899 = vmatpush1.bf16.msra.mxu1 %v7898_v22  ;;  %v7788_v45 = vpack.c.bf16 %v3683_v36, %v3671_v13  ;;  %v7916_v22 = vpack.c.bf16 %v3685_v16, %v3673_v14  ;;  %v8058_v13 = vpack.c.bf16 %v2992_v9, %v2980_v8  ;;  %v3002_v36 = vld [vmem:[#allocation12 + $0xe0] sm:$0xff]  ;;  %v3004_v16 = vld [vmem:[#allocation12 + $0xf0] sm:$0xff] }
 0x4c5   :  { %7773 = vmatprep.subr.bf16.mxu0 %v7772_v25  ;;  %7901 = vmatprep.subr.bf16.mxu1 %v7900_v40  ;;  %v3707_v25 = vld [vmem:[#allocation12 + $0x16e8] sm:$0xff]  ;;  %v3697_v40 = vld [vmem:[#allocation12 + $0x1698] sm:$0xff]  ;;  %v3014_v14 = vld [vmem:[#allocation12 + $0x140] sm:$0xff] }
 0x4c6   :  { %v7792_v32 = vpack.c.bf16 %v3707_v25, %v3695_v24  ;;  %v7934_v24 = vpack.c.bf16 %v3014_v14, %v3002_v36  ;;  %v3135_v36 = vld [vmem:[#allocation12 + $0x508] sm:$0xff]  ;;  %v3125_v14 = vld [vmem:[#allocation12 + $0x4b8] sm:$0xff] }
 0x4c8   :  { %7775 = vmatpush1.bf16.msra.mxu0 %v7774_v34  ;;  %7903 = vmatpush1.bf16.msra.mxu1 %v7902_v37  ;;  %v7920_v34 = vpack.c.bf16 %v3709_v26, %v3697_v40  ;;  %v3696_v37 = vld [vmem:[#allocation12 + $0x1690] sm:$0xff]  ;;  %v3026_v40 = vld [vmem:[#allocation12 + $0x1a0] sm:$0xff] }
 0x4c9   :  { %7777 = vmatprep.subr.bf16.mxu0 %v7776_v1  ;;  %7905 = vmatprep.subr.bf16.mxu1 %v7904_v41  ;;  %v3731_v1 = vld [vmem:[#allocation12 + $0x17a8] sm:$0xff]  ;;  %v3721_v41 = vld [vmem:[#allocation12 + $0x1758] sm:$0xff]  ;;  %v7922_v48 = vpack.c.bf16 %v3708_v50, %v3696_v37  ;;  %v3038_v26 = vld [vmem:[#allocation12 + $0x200] sm:$0xff] }
 0x4ca   :  { %v7796_v33 = vpack.c.bf16 %v3731_v1, %v3719_v53  ;;  %v3065_v37 = vld [vmem:[#allocation12 + $0x2d8] sm:$0xff]  ;;  %v7938_v50 = vpack.c.bf16 %v3038_v26, %v3026_v40 }
 0x4cb   :  { %v3149_v40 = vld [vmem:[#allocation12 + $0x578] sm:$0xff] }
 0x4cc   :  { %7779 = vmatpush1.bf16.msra.mxu0 %v7778_v11  ;;  %7907 = vmatpush1.bf16.msra.mxu1 %v7906_v54  ;;  %v7924_v11 = vpack.c.bf16 %v3733_v44, %v3721_v41  ;;  %v3720_v54 = vld [vmem:[#allocation12 + $0x1750] sm:$0xff]  ;;  %v3050_v41 = vld [vmem:[#allocation12 + $0x260] sm:$0xff]  ;;  %v3161_v26 = vld [vmem:[#allocation12 + $0x5d8] sm:$0xff] }
 0x4cd   :  { %7781 = vmatprep.subr.bf16.mxu0 %v7780_v17  ;;  %7909 = vmatprep.subr.bf16.mxu1 %v7908_v43  ;;  %v2981_v17 = vld [vmem:[#allocation12 + $0x38] sm:$0xff]  ;;  %v7926_v62 = vpack.c.bf16 %v3732_v55, %v3720_v54  ;;  %v3062_v44 = vld [vmem:[#allocation12 + $0x2c0] sm:$0xff] }
 0x4ce   :  { %v2993_v43 = vld [vmem:[#allocation12 + $0x98] sm:$0xff]  ;;  %v7942_v55 = vpack.c.bf16 %v3062_v44, %v3050_v41 }
 0x4cf   :  { %v8056_v19 = vpack.c.bf16 %v2993_v43, %v2981_v17  ;;  %v3089_v54 = vld [vmem:[#allocation12 + $0x398] sm:$0xff]  ;;  %v3074_v17 = vld [vmem:[#allocation12 + $0x320] sm:$0xff] }
 0x4d0   :  { %7783 = vmatpush1.bf16.msra.mxu0 %v7782_v51  ;;  %7911 = vmatpush1.bf16.msra.mxu1 %v7910_v5  ;;  %v2990_v51 = vld [vmem:[#allocation12 + $0x80] sm:$0xff]  ;;  %v6539_v5 = vadd.f32 -1.0, %v9243_v60  ;;  %v3076_v60 = vld [vmem:[#allocation12 + $0x330] sm:$0xff]  ;;  %v3173_v41 = vld [vmem:[#allocation12 + $0x638] sm:$0xff] }
 0x4d1   :  { %7785 = vmatprep.subr.bf16.mxu0 %v7784_v4  ;;  %7913 = vmatprep.subr.bf16.mxu1 %v7912_v12  ;;  %v3015_v4 = vld [vmem:[#allocation12 + $0x148] sm:$0xff]  ;;  %v3005_v12 = vld [vmem:[#allocation12 + $0xf8] sm:$0xff]  ;;  %v7930_v59 = vpack.c.bf16 %v2990_v51, %v2978_v35  ;;  %v3086_v43 = vld [vmem:[#allocation12 + $0x380] sm:$0xff] }
 0x4d2   :  { %v8060_v20 = vpack.c.bf16 %v3017_v28, %v3005_v12  ;;  %v3101_v35 = vld [vmem:[#allocation12 + $0x3f8] sm:$0xff]  ;;  %v3100_v12 = vld [vmem:[#allocation12 + $0x3f0] sm:$0xff] }
 0x4d3   :  { %v3113_v51 = vld [vmem:[#allocation12 + $0x458] sm:$0xff] }
 0x4d4   :  { %7787 = vmatpush1.bf16.msra.mxu0 %v7786_v15  ;;  %7915 = vmatpush1.bf16.msra.mxu1 %v7914_v18  ;;  %v10985_v15 = vsel %vm2952_vm8, %v10980_v39, %v6539_v5  ;;  %v7932_v18 = vpack.c.bf16 %v3015_v4, %v3003_v10  ;;  %v8062_v39 = vpack.c.bf16 %v3016_v21, %v3004_v16  ;;  %v3098_v10 = vld [vmem:[#allocation12 + $0x3e0] sm:$0xff]  ;;  %v3137_v16 = vld [vmem:[#allocation12 + $0x518] sm:$0xff] }
 0x4d5   :  { %7789 = vmatprep.subr.bf16.mxu0 %v7788_v45  ;;  %7917 = vmatprep.subr.bf16.mxu1 %v7916_v22  ;;  %v3027_v45 = vld [vmem:[#allocation12 + $0x1a8] sm:$0xff]  ;;  %v7946_v5 = vpack.c.bf16 %v3086_v43, %v3074_v17  ;;  %v3110_v4 = vld [vmem:[#allocation12 + $0x440] sm:$0xff]  ;;  %v8076_v28 = vpack.c.bf16 %v3113_v51, %v3101_v35  ;;  %v3185_v44 = vld [vmem:[#allocation12 + $0x698] sm:$0xff] }
 0x4d6   :  { %v3039_v22 = vld [vmem:[#allocation12 + $0x208] sm:$0xff]  ;;  %v3197_v17 = vld [vmem:[#allocation12 + $0x6f8] sm:$0xff]  ;;  %v3196_v35 = vld [vmem:[#allocation12 + $0x6f0] sm:$0xff] }
 0x4d7   :  { %v7936_v25 = vpack.c.bf16 %v3039_v22, %v3027_v45  ;;  %v3122_v45 = vld [vmem:[#allocation12 + $0x4a0] sm:$0xff]  ;;  %v3209_v43 = vld [vmem:[#allocation12 + $0x758] sm:$0xff] }
 0x4d8   :  { %7791 = vmatpush1.bf16.msra.mxu0 %v7790_v30  ;;  %7919 = vmatpush1.bf16.msra.mxu1 %v7918_v61  ;;  %v3028_v30 = vld [vmem:[#allocation12 + $0x1b0] sm:$0xff]  ;;  %v8064_v61 = vpack.c.bf16 %v3041_v23, %v3029_v42  ;;  %v3134_v22 = vld [vmem:[#allocation12 + $0x500] sm:$0xff]  ;;  %v8080_v23 = vpack.c.bf16 %v3137_v16, %v3125_v14  ;;  %v8092_v51 = vpack.c.bf16 %v3209_v43, %v3197_v17 }
 0x4d9   :  { %7793 = vmatprep.subr.bf16.mxu0 %v7792_v32  ;;  %7921 = vmatprep.subr.bf16.mxu1 %v7920_v34  ;;  %v3063_v32 = vld [vmem:[#allocation12 + $0x2c8] sm:$0xff]  ;;  %v3053_v34 = vld [vmem:[#allocation12 + $0x278] sm:$0xff]  ;;  %v8066_v53 = vpack.c.bf16 %v3040_v3, %v3028_v30  ;;  %v3124_v42 = vld [vmem:[#allocation12 + $0x4b0] sm:$0xff]  ;;  %v7954_v30 = vpack.c.bf16 %v3134_v22, %v3122_v45 }
 0x4da   :  { %v7940_v1 = vpack.c.bf16 %v3063_v32, %v3051_v31  ;;  %v3146_v31 = vld [vmem:[#allocation12 + $0x560] sm:$0xff]  ;;  %v3220_v14 = vld [vmem:[#allocation12 + $0x7b0] sm:$0xff]  ;;  %v3245_v45 = vld [vmem:[#allocation12 + $0x878] sm:$0xff] }
 0x4db   :  { %v3158_v32 = vld [vmem:[#allocation12 + $0x5c0] sm:$0xff]  ;;  %v3257_v22 = vld [vmem:[#allocation12 + $0x8d8] sm:$0xff]  ;;  %v3292_v17 = vld [vmem:[#allocation12 + $0x9f0] sm:$0xff] }
 0x4dc   :  { %7795 = vmatpush1.bf16.msra.mxu0 %v7794_v47  ;;  %7923 = vmatpush1.bf16.msra.mxu1 %v7922_v48  ;;  %v3052_v47 = vld [vmem:[#allocation12 + $0x270] sm:$0xff]  ;;  %v8068_v48 = vpack.c.bf16 %v3065_v37, %v3053_v34  ;;  %v8084_v37 = vpack.c.bf16 %v3161_v26, %v3149_v40  ;;  %v8100_v26 = vpack.c.bf16 %v3257_v22, %v3245_v45 }
 0x4dd   :  { %7797 = vmatprep.subr.bf16.mxu0 %v7796_v33  ;;  %7925 = vmatprep.subr.bf16.mxu1 %v7924_v11  ;;  %v3087_v33 = vld [vmem:[#allocation12 + $0x388] sm:$0xff]  ;;  %v3077_v11 = vld [vmem:[#allocation12 + $0x338] sm:$0xff]  ;;  %v8070_v57 = vpack.c.bf16 %v3064_v29, %v3052_v47  ;;  %v3148_v34 = vld [vmem:[#allocation12 + $0x570] sm:$0xff]  ;;  %v7958_v47 = vpack.c.bf16 %v3158_v32, %v3146_v31 }
 0x4de   :  { %v7944_v0 = vpack.c.bf16 %v3087_v33, %v3075_v49  ;;  %v3170_v49 = vld [vmem:[#allocation12 + $0x620] sm:$0xff]  ;;  %v3244_v40 = vld [vmem:[#allocation12 + $0x870] sm:$0xff]  ;;  %v3269_v31 = vld [vmem:[#allocation12 + $0x938] sm:$0xff] }
 0x4df   :  { %v3182_v33 = vld [vmem:[#allocation12 + $0x680] sm:$0xff]  ;;  %v3281_v32 = vld [vmem:[#allocation12 + $0x998] sm:$0xff]  ;;  %v3340_v45 = vld [vmem:[#allocation12 + $0xb70] sm:$0xff] }
 0x4e0   :  { %7799 = vmatpush1.bf16.msra.mxu0 %v7798_v58  ;;  %7927 = vmatpush1.bf16.msra.mxu1 %v7926_v62  ;;  %v8072_v58 = vpack.c.bf16 %v3089_v54, %v3077_v11  ;;  %v3088_v62 = vld [vmem:[#allocation12 + $0x390] sm:$0xff]  ;;  %v8088_v54 = vpack.c.bf16 %v3185_v44, %v3173_v41  ;;  %v8104_v44 = vpack.c.bf16 %v3281_v32, %v3269_v31 }
 0x4e1   :  { %7929 = vmatprep.subr.bf16.mxu0 %v7928_v2  ;;  %8057 = vmatprep.subr.bf16.mxu1 %v8056_v19  ;;  %v3099_v2 = vld [vmem:[#allocation12 + $0x3e8] sm:$0xff]  ;;  %v8074_v8 = vpack.c.bf16 %v3088_v62, %v3076_v60  ;;  %v3172_v11 = vld [vmem:[#allocation12 + $0x630] sm:$0xff]  ;;  %v7962_v60 = vpack.c.bf16 %v3182_v33, %v3170_v49  ;;  %v3293_v49 = vld [vmem:[#allocation12 + $0x9f8] sm:$0xff] }
 0x4e2   :  { %v3111_v19 = vld [vmem:[#allocation12 + $0x448] sm:$0xff]  ;;  %v3268_v41 = vld [vmem:[#allocation12 + $0x930] sm:$0xff]  ;;  %v3305_v33 = vld [vmem:[#allocation12 + $0xa58] sm:$0xff] }
 0x4e3   :  { %3942 = vmatmul.mubr.f32.vlgmr.msra.gmra.mrb[50].mxu0 %v10985_v15  ;;  %4084 = vmatmul.mubr.f32.vlgmr.msra.gmra.mrb[42].mxu1 %v10985_v15  ;;  %v7948_v9 = vpack.c.bf16 %v3111_v19, %v3099_v2  ;;  %v3194_v2 = vld [vmem:[#allocation12 + $0x6e0] sm:$0xff]  ;;  %v8108_v43 = vpack.c.bf16 %v3305_v33, %v3293_v49  ;;  %v3364_v32 = vld [vmem:[#allocation12 + $0xc30] sm:$0xff] }
 0x4e4   :  { %7931 = vmatpush1.bf16.msra.mxu0 %v7930_v59  ;;  %4154 = vmatprep.mubr.f32.mxu0 %v10962_v38  ;;  %v3112_v59 = vld [vmem:[#allocation12 + $0x450] sm:$0xff]  ;;  %v3206_v19 = vld [vmem:[#allocation12 + $0x740] sm:$0xff] }
 0x4e5   :  { %8059 = vmatpush1.bf16.msra.mxu1 %v8058_v13  ;;  %4296 = vmatprep.mubr.f32.mxu1 %v10962_v38  ;;  %v3123_v13 = vld [vmem:[#allocation12 + $0x4a8] sm:$0xff]  ;;  %v3400_v33 = vld [vmem:[#allocation12 + $0xd50] sm:$0xff] }
 0x4e6   :  { %7933 = vmatprep.subr.bf16.mxu0 %v7932_v18  ;;  %8061 = vmatprep.subr.bf16.mxu1 %v8060_v20  ;;  %v7950_v18 = vpack.c.bf16 %v3110_v4, %v3098_v10  ;;  %v8078_v20 = vpack.c.bf16 %v3112_v59, %v3100_v12  ;;  %v7952_v21 = vpack.c.bf16 %v3135_v36, %v3123_v13  ;;  %v3221_v10 = vld [vmem:[#allocation12 + $0x7b8] sm:$0xff]  ;;  %v3218_v13 = vld [vmem:[#allocation12 + $0x7a0] sm:$0xff] }
 0x4e7   :  { %v3233_v4 = vld [vmem:[#allocation12 + $0x818] sm:$0xff]  ;;  %v7966_v12 = vpack.c.bf16 %v3206_v19, %v3194_v2  ;;  %v3230_v36 = vld [vmem:[#allocation12 + $0x800] sm:$0xff] }
 0x4e8   :  { %7935 = vmatpush1.bf16.msra.mxu0 %v7934_v24  ;;  %v3136_v24 = vld [vmem:[#allocation12 + $0x510] sm:$0xff]  ;;  %v8096_v16 = vpack.c.bf16 %v3233_v4, %v3221_v10  ;;  %v3317_v2 = vld [vmem:[#allocation12 + $0xab8] sm:$0xff] }
 0x4e9   :  { %8063 = vmatpush1.bf16.msra.mxu1 %v8062_v39  ;;  %7937 = vmatprep.subr.bf16.mxu0 %v7936_v25  ;;  %v3147_v39 = vld [vmem:[#allocation12 + $0x568] sm:$0xff]  ;;  %v3329_v19 = vld [vmem:[#allocation12 + $0xb18] sm:$0xff]  ;;  %v3316_v10 = vld [vmem:[#allocation12 + $0xab0] sm:$0xff] }
 0x4ea   :  { %8065 = vmatprep.subr.bf16.mxu1 %v8064_v61  ;;  %v3159_v25 = vld [vmem:[#allocation12 + $0x5c8] sm:$0xff]  ;;  %v8082_v61 = vpack.c.bf16 %v3136_v24, %v3124_v42  ;;  %v7970_v42 = vpack.c.bf16 %v3230_v36, %v3218_v13  ;;  %v8112_v4 = vpack.c.bf16 %v3329_v19, %v3317_v2  ;;  %v3341_v13 = vld [vmem:[#allocation12 + $0xb78] sm:$0xff]  ;;  %v3412_v2 = vld [vmem:[#allocation12 + $0xdb0] sm:$0xff] }
 0x4eb   :  { %v7956_v3 = vpack.c.bf16 %v3159_v25, %v3147_v39  ;;  %v3242_v39 = vld [vmem:[#allocation12 + $0x860] sm:$0xff]  ;;  %v3353_v36 = vld [vmem:[#allocation12 + $0xbd8] sm:$0xff] }
 0x4ec   :  { %7939 = vmatpush1.bf16.msra.mxu0 %v7938_v50  ;;  %v3160_v50 = vld [vmem:[#allocation12 + $0x5d0] sm:$0xff]  ;;  %v3254_v25 = vld [vmem:[#allocation12 + $0x8c0] sm:$0xff]  ;;  %v8116_v22 = vpack.c.bf16 %v3353_v36, %v3341_v13 }
 0x4ed   :  { %8067 = vmatpush1.bf16.msra.mxu1 %v8066_v53  ;;  %7941 = vmatprep.subr.bf16.mxu0 %v7940_v1  ;;  %v3171_v53 = vld [vmem:[#allocation12 + $0x628] sm:$0xff]  ;;  %v3436_v13 = vld [vmem:[#allocation12 + $0xe70] sm:$0xff] }
 0x4ee   :  { %8069 = vmatprep.subr.bf16.mxu1 %v8068_v48  ;;  %v3183_v1 = vld [vmem:[#allocation12 + $0x688] sm:$0xff]  ;;  %v8086_v48 = vpack.c.bf16 %v3160_v50, %v3148_v34  ;;  %v7974_v34 = vpack.c.bf16 %v3254_v25, %v3242_v39  ;;  %v3365_v39 = vld [vmem:[#allocation12 + $0xc38] sm:$0xff] }
 0x4ef   :  { %v7960_v29 = vpack.c.bf16 %v3183_v1, %v3171_v53  ;;  %v3266_v53 = vld [vmem:[#allocation12 + $0x920] sm:$0xff]  ;;  %v3377_v25 = vld [vmem:[#allocation12 + $0xc98] sm:$0xff] }
 0x4f0   :  { %7943 = vmatpush1.bf16.msra.mxu0 %v7942_v55  ;;  %v3184_v55 = vld [vmem:[#allocation12 + $0x690] sm:$0xff]  ;;  %v3278_v1 = vld [vmem:[#allocation12 + $0x980] sm:$0xff]  ;;  %v8120_v31 = vpack.c.bf16 %v3377_v25, %v3365_v39 }
 0x4f1   :  { %8071 = vmatpush1.bf16.msra.mxu1 %v8070_v57  ;;  %7945 = vmatprep.subr.bf16.mxu0 %v7944_v0  ;;  %v3195_v57 = vld [vmem:[#allocation12 + $0x6e8] sm:$0xff]  ;;  %v3460_v39 = vld [vmem:[#allocation12 + $0xf30] sm:$0xff] }
 0x4f2   :  { %8073 = vmatprep.subr.bf16.mxu1 %v8072_v58  ;;  %v3207_v0 = vld [vmem:[#allocation12 + $0x748] sm:$0xff]  ;;  %v8090_v58 = vpack.c.bf16 %v3184_v55, %v3172_v11  ;;  %v7978_v11 = vpack.c.bf16 %v3278_v1, %v3266_v53  ;;  %v3389_v1 = vld [vmem:[#allocation12 + $0xcf8] sm:$0xff] }
 0x4f3   :  { %v7964_v62 = vpack.c.bf16 %v3207_v0, %v3195_v57  ;;  %v3290_v57 = vld [vmem:[#allocation12 + $0x9e0] sm:$0xff] }
 0x4f4   :  { %7947 = vmatpush1.bf16.msra.mxu0 %v7946_v5  ;;  %v3208_v5 = vld [vmem:[#allocation12 + $0x750] sm:$0xff]  ;;  %v3302_v0 = vld [vmem:[#allocation12 + $0xa40] sm:$0xff] }
 0x4f5   :  { %8075 = vmatpush1.bf16.msra.mxu1 %v8074_v8  ;;  %7949 = vmatprep.subr.bf16.mxu0 %v7948_v9  ;;  %v3219_v8 = vld [vmem:[#allocation12 + $0x7a8] sm:$0xff] }
 0x4f6   :  { %8077 = vmatprep.subr.bf16.mxu1 %v8076_v28  ;;  %v3231_v9 = vld [vmem:[#allocation12 + $0x808] sm:$0xff]  ;;  %v8094_v28 = vpack.c.bf16 %v3208_v5, %v3196_v35  ;;  %v7982_v35 = vpack.c.bf16 %v3302_v0, %v3290_v57  ;;  %v3413_v57 = vld [vmem:[#allocation12 + $0xdb8] sm:$0xff] }
 0x4f7   :  { %v7968_v59 = vpack.c.bf16 %v3231_v9, %v3219_v8  ;;  %v3314_v8 = vld [vmem:[#allocation12 + $0xaa0] sm:$0xff]  ;;  %v3425_v0 = vld [vmem:[#allocation12 + $0xe18] sm:$0xff] }
 0x4f8   :  { %7951 = vmatpush1.bf16.msra.mxu0 %v7950_v18  ;;  %v3232_v18 = vld [vmem:[#allocation12 + $0x810] sm:$0xff]  ;;  %v3326_v9 = vld [vmem:[#allocation12 + $0xb00] sm:$0xff]  ;;  %v8128_v19 = vpack.c.bf16 %v3425_v0, %v3413_v57 }
 0x4f9   :  { %8079 = vmatpush1.bf16.msra.mxu1 %v8078_v20  ;;  %7953 = vmatprep.subr.bf16.mxu0 %v7952_v21  ;;  %v3243_v20 = vld [vmem:[#allocation12 + $0x868] sm:$0xff]  ;;  %v3508_v57 = vld [vmem:[#allocation12 + $0x10b0] sm:$0xff] }
 0x4fa   :  { %8081 = vmatprep.subr.bf16.mxu1 %v8080_v23  ;;  %v3255_v21 = vld [vmem:[#allocation12 + $0x8c8] sm:$0xff]  ;;  %v8098_v23 = vpack.c.bf16 %v3232_v18, %v3220_v14  ;;  %v7986_v14 = vpack.c.bf16 %v3326_v9, %v3314_v8  ;;  %v3437_v8 = vld [vmem:[#allocation12 + $0xe78] sm:$0xff] }
 0x4fb   :  { %v7972_v24 = vpack.c.bf16 %v3255_v21, %v3243_v20  ;;  %v3338_v20 = vld [vmem:[#allocation12 + $0xb60] sm:$0xff]  ;;  %v3449_v9 = vld [vmem:[#allocation12 + $0xed8] sm:$0xff] }
 0x4fc   :  { %7955 = vmatpush1.bf16.msra.mxu0 %v7954_v30  ;;  %v3256_v30 = vld [vmem:[#allocation12 + $0x8d0] sm:$0xff]  ;;  %v3350_v21 = vld [vmem:[#allocation12 + $0xbc0] sm:$0xff]  ;;  %v8132_v36 = vpack.c.bf16 %v3449_v9, %v3437_v8 }
 0x4fd   :  { %8083 = vmatpush1.bf16.msra.mxu1 %v8082_v61  ;;  %7957 = vmatprep.subr.bf16.mxu0 %v7956_v3  ;;  %v3267_v61 = vld [vmem:[#allocation12 + $0x928] sm:$0xff]  ;;  %v3532_v8 = vld [vmem:[#allocation12 + $0x1170] sm:$0xff] }
 0x4fe   :  { %8085 = vmatprep.subr.bf16.mxu1 %v8084_v37  ;;  %v3279_v3 = vld [vmem:[#allocation12 + $0x988] sm:$0xff]  ;;  %v8102_v37 = vpack.c.bf16 %v3256_v30, %v3244_v40  ;;  %v7990_v40 = vpack.c.bf16 %v3350_v21, %v3338_v20  ;;  %v3461_v20 = vld [vmem:[#allocation12 + $0xf38] sm:$0xff] }
 0x4ff   :  { %v7976_v50 = vpack.c.bf16 %v3279_v3, %v3267_v61  ;;  %v3362_v61 = vld [vmem:[#allocation12 + $0xc20] sm:$0xff]  ;;  %v3473_v21 = vld [vmem:[#allocation12 + $0xf98] sm:$0xff] }
 0x500   :  { %7959 = vmatpush1.bf16.msra.mxu0 %v7958_v47  ;;  %v3280_v47 = vld [vmem:[#allocation12 + $0x990] sm:$0xff]  ;;  %v3374_v3 = vld [vmem:[#allocation12 + $0xc80] sm:$0xff]  ;;  %v8136_v25 = vpack.c.bf16 %v3473_v21, %v3461_v20 }
 0x501   :  { %8087 = vmatpush1.bf16.msra.mxu1 %v8086_v48  ;;  %7961 = vmatprep.subr.bf16.mxu0 %v7960_v29  ;;  %v3291_v48 = vld [vmem:[#allocation12 + $0x9e8] sm:$0xff]  ;;  %v7994_v53 = vpack.c.bf16 %v3374_v3, %v3362_v61  ;;  %v3485_v61 = vld [vmem:[#allocation12 + $0xff8] sm:$0xff]  ;;  %v3556_v20 = vld [vmem:[#allocation12 + $0x1230] sm:$0xff] }
 0x502   :  { %8089 = vmatprep.subr.bf16.mxu1 %v8088_v54  ;;  %v3303_v29 = vld [vmem:[#allocation12 + $0xa48] sm:$0xff]  ;;  %v8106_v54 = vpack.c.bf16 %v3280_v47, %v3268_v41  ;;  %v3401_v41 = vld [vmem:[#allocation12 + $0xd58] sm:$0xff]  ;;  %v3386_v47 = vld [vmem:[#allocation12 + $0xce0] sm:$0xff] }
 0x503   :  { %v7980_v55 = vpack.c.bf16 %v3303_v29, %v3291_v48  ;;  %v3398_v48 = vld [vmem:[#allocation12 + $0xd40] sm:$0xff]  ;;  %v3388_v29 = vld [vmem:[#allocation12 + $0xcf0] sm:$0xff]  ;;  %v3497_v3 = vld [vmem:[#allocation12 + $0x1058] sm:$0xff] }
 0x504   :  { %7963 = vmatpush1.bf16.msra.mxu0 %v7962_v60  ;;  %v3304_v60 = vld [vmem:[#allocation12 + $0xa50] sm:$0xff] }
 0x505   :  { %8091 = vmatpush1.bf16.msra.mxu1 %v8090_v58  ;;  %7965 = vmatprep.subr.bf16.mxu0 %v7964_v62  ;;  %v3315_v58 = vld [vmem:[#allocation12 + $0xaa8] sm:$0xff] }
 0x506   :  { %8093 = vmatprep.subr.bf16.mxu1 %v8092_v51  ;;  %v3327_v62 = vld [vmem:[#allocation12 + $0xb08] sm:$0xff]  ;;  %v8110_v51 = vpack.c.bf16 %v3304_v60, %v3292_v17  ;;  %v7998_v17 = vpack.c.bf16 %v3398_v48, %v3386_v47  ;;  %v3509_v48 = vld [vmem:[#allocation12 + $0x10b8] sm:$0xff] }
 0x507   :  { %v7984_v5 = vpack.c.bf16 %v3327_v62, %v3315_v58  ;;  %v3410_v58 = vld [vmem:[#allocation12 + $0xda0] sm:$0xff]  ;;  %v3519_v47 = vld [vmem:[#allocation12 + $0x1108] sm:$0xff] }
 0x508   :  { %7967 = vmatpush1.bf16.msra.mxu0 %v7966_v12  ;;  %v3328_v12 = vld [vmem:[#allocation12 + $0xb10] sm:$0xff]  ;;  %v3422_v62 = vld [vmem:[#allocation12 + $0xe00] sm:$0xff] }
 0x509   :  { %8095 = vmatpush1.bf16.msra.mxu1 %v8094_v28  ;;  %7969 = vmatprep.subr.bf16.mxu0 %v7968_v59  ;;  %v3339_v28 = vld [vmem:[#allocation12 + $0xb68] sm:$0xff] }
 0x50a   :  { %8097 = vmatprep.subr.bf16.mxu1 %v8096_v16  ;;  %v3351_v59 = vld [vmem:[#allocation12 + $0xbc8] sm:$0xff]  ;;  %v8114_v16 = vpack.c.bf16 %v3328_v12, %v3316_v10  ;;  %v8002_v10 = vpack.c.bf16 %v3422_v62, %v3410_v58  ;;  %v3533_v58 = vld [vmem:[#allocation12 + $0x1178] sm:$0xff] }
 0x50b   :  { %v7988_v18 = vpack.c.bf16 %v3351_v59, %v3339_v28  ;;  %v3434_v28 = vld [vmem:[#allocation12 + $0xe60] sm:$0xff]  ;;  %v3545_v62 = vld [vmem:[#allocation12 + $0x11d8] sm:$0xff] }
 0x50c   :  { %7971 = vmatpush1.bf16.msra.mxu0 %v7970_v42  ;;  %v3352_v42 = vld [vmem:[#allocation12 + $0xbd0] sm:$0xff]  ;;  %v3446_v59 = vld [vmem:[#allocation12 + $0xec0] sm:$0xff]  ;;  %v8148_v9 = vpack.c.bf16 %v3545_v62, %v3533_v58 }
 0x50d   :  { %8099 = vmatpush1.bf16.msra.mxu1 %v8098_v23  ;;  %7973 = vmatprep.subr.bf16.mxu0 %v7972_v24  ;;  %v3363_v23 = vld [vmem:[#allocation12 + $0xc28] sm:$0xff]  ;;  %v3628_v58 = vld [vmem:[#allocation12 + $0x1470] sm:$0xff] }
 0x50e   :  { %8101 = vmatprep.subr.bf16.mxu1 %v8100_v26  ;;  %v3375_v24 = vld [vmem:[#allocation12 + $0xc88] sm:$0xff]  ;;  %v8118_v26 = vpack.c.bf16 %v3352_v42, %v3340_v45  ;;  %v8006_v45 = vpack.c.bf16 %v3446_v59, %v3434_v28  ;;  %v3557_v28 = vld [vmem:[#allocation12 + $0x1238] sm:$0xff] }
 0x50f   :  { %v7992_v30 = vpack.c.bf16 %v3375_v24, %v3363_v23  ;;  %v3458_v23 = vld [vmem:[#allocation12 + $0xf20] sm:$0xff]  ;;  %v3569_v59 = vld [vmem:[#allocation12 + $0x1298] sm:$0xff] }
 0x510   :  { %7975 = vmatpush1.bf16.msra.mxu0 %v7974_v34  ;;  %v3376_v34 = vld [vmem:[#allocation12 + $0xc90] sm:$0xff]  ;;  %v3470_v24 = vld [vmem:[#allocation12 + $0xf80] sm:$0xff]  ;;  %v8152_v21 = vpack.c.bf16 %v3569_v59, %v3557_v28 }
 0x511   :  { %8103 = vmatpush1.bf16.msra.mxu1 %v8102_v37  ;;  %7977 = vmatprep.subr.bf16.mxu0 %v7976_v50  ;;  %v3387_v37 = vld [vmem:[#allocation12 + $0xce8] sm:$0xff]  ;;  %v3652_v28 = vld [vmem:[#allocation12 + $0x1530] sm:$0xff] }
 0x512   :  { %8105 = vmatprep.subr.bf16.mxu1 %v8104_v44  ;;  %v3399_v50 = vld [vmem:[#allocation12 + $0xd48] sm:$0xff]  ;;  %v8122_v44 = vpack.c.bf16 %v3376_v34, %v3364_v32 }
 0x513   :  { %v7996_v49 = vpack.c.bf16 %v3399_v50, %v3387_v37  ;;  %v3482_v37 = vld [vmem:[#allocation12 + $0xfe0] sm:$0xff] }
 0x514   :  { %7979 = vmatpush1.bf16.msra.mxu0 %v7978_v11  ;;  %v3411_v11 = vld [vmem:[#allocation12 + $0xda8] sm:$0xff]  ;;  %v3494_v50 = vld [vmem:[#allocation12 + $0x1040] sm:$0xff] }
 0x515   :  { %8107 = vmatpush1.bf16.msra.mxu1 %v8106_v54  ;;  %7981 = vmatprep.subr.bf16.mxu0 %v7980_v55  ;;  %v3423_v54 = vld [vmem:[#allocation12 + $0xe08] sm:$0xff]  ;;  %v8124_v55 = vpack.c.bf16 %v3401_v41, %v3389_v1  ;;  %v8140_v1 = vpack.c.bf16 %v3497_v3, %v3485_v61  ;;  %v3496_v41 = vld [vmem:[#allocation12 + $0x1050] sm:$0xff] }
 0x516   :  { %8109 = vmatprep.subr.bf16.mxu1 %v8108_v43  ;;  %v8126_v43 = vpack.c.bf16 %v3400_v33, %v3388_v29  ;;  %v8000_v60 = vpack.c.bf16 %v3423_v54, %v3411_v11  ;;  %v3521_v29 = vld [vmem:[#allocation12 + $0x1118] sm:$0xff]  ;;  %v3506_v54 = vld [vmem:[#allocation12 + $0x10a0] sm:$0xff]  ;;  %v3580_v61 = vld [vmem:[#allocation12 + $0x12f0] sm:$0xff] }
 0x517   :  { %v8144_v0 = vpack.c.bf16 %v3521_v29, %v3509_v48  ;;  %v3604_v48 = vld [vmem:[#allocation12 + $0x13b0] sm:$0xff] }
 0x518   :  { %7983 = vmatpush1.bf16.msra.mxu0 %v7982_v35  ;;  %v3424_v35 = vld [vmem:[#allocation12 + $0xe10] sm:$0xff] }
 0x519   :  { %8111 = vmatpush1.bf16.msra.mxu1 %v8110_v51  ;;  %7985 = vmatprep.subr.bf16.mxu0 %v7984_v5  ;;  %v3435_v51 = vld [vmem:[#allocation12 + $0xe68] sm:$0xff] }
 0x51a   :  { %8113 = vmatprep.subr.bf16.mxu1 %v8112_v4  ;;  %v3447_v5 = vld [vmem:[#allocation12 + $0xec8] sm:$0xff]  ;;  %v8130_v4 = vpack.c.bf16 %v3424_v35, %v3412_v2 }
 0x51b   :  { %v8004_v12 = vpack.c.bf16 %v3447_v5, %v3435_v51  ;;  %v3530_v51 = vld [vmem:[#allocation12 + $0x1160] sm:$0xff] }
 0x51c   :  { %7987 = vmatpush1.bf16.msra.mxu0 %v7986_v14  ;;  %v3448_v14 = vld [vmem:[#allocation12 + $0xed0] sm:$0xff]  ;;  %v3542_v5 = vld [vmem:[#allocation12 + $0x11c0] sm:$0xff] }
 0x51d   :  { %8115 = vmatpush1.bf16.msra.mxu1 %v8114_v16  ;;  %7989 = vmatprep.subr.bf16.mxu0 %v7988_v18  ;;  %v3459_v16 = vld [vmem:[#allocation12 + $0xf28] sm:$0xff] }
 0x51e   :  { %8117 = vmatprep.subr.bf16.mxu1 %v8116_v22  ;;  %v3471_v18 = vld [vmem:[#allocation12 + $0xf88] sm:$0xff]  ;;  %v8134_v22 = vpack.c.bf16 %v3448_v14, %v3436_v13  ;;  %v8022_v13 = vpack.c.bf16 %v3542_v5, %v3530_v51  ;;  %v3653_v51 = vld [vmem:[#allocation12 + $0x1538] sm:$0xff] }
 0x51f   :  { %v8008_v42 = vpack.c.bf16 %v3471_v18, %v3459_v16  ;;  %v3554_v16 = vld [vmem:[#allocation12 + $0x1220] sm:$0xff]  ;;  %v3665_v5 = vld [vmem:[#allocation12 + $0x1598] sm:$0xff] }
 0x520   :  { %7991 = vmatpush1.bf16.msra.mxu0 %v7990_v40  ;;  %v3472_v40 = vld [vmem:[#allocation12 + $0xf90] sm:$0xff]  ;;  %v3566_v18 = vld [vmem:[#allocation12 + $0x1280] sm:$0xff]  ;;  %v8168_v59 = vpack.c.bf16 %v3665_v5, %v3653_v51 }
 0x521   :  { %8119 = vmatpush1.bf16.msra.mxu1 %v8118_v26  ;;  %7993 = vmatprep.subr.bf16.mxu0 %v7992_v30  ;;  %v3483_v26 = vld [vmem:[#allocation12 + $0xfe8] sm:$0xff]  ;;  %v8138_v32 = vpack.c.bf16 %v3472_v40, %v3460_v39  ;;  %v8026_v39 = vpack.c.bf16 %v3566_v18, %v3554_v16  ;;  %v3677_v16 = vld [vmem:[#allocation12 + $0x15f8] sm:$0xff]  ;;  %v2984_v5 = vld [vmem:[#allocation12 + $0x50] sm:$0xff] }
 0x522   :  { %8121 = vmatprep.subr.bf16.mxu1 %v8120_v31  ;;  %v3495_v30 = vld [vmem:[#allocation12 + $0x1048] sm:$0xff]  ;;  %v8010_v31 = vpack.c.bf16 %v3470_v24, %v3458_v23  ;;  %v3581_v23 = vld [vmem:[#allocation12 + $0x12f8] sm:$0xff] }
 0x523   :  { %4155 = vmatmul.mubr.f32.vlgmr.msra.gmra.mrb[52].mxu0 %v10964_v46  ;;  %v8012_v34 = vpack.c.bf16 %v3495_v30, %v3483_v26  ;;  %v3593_v24 = vld [vmem:[#allocation12 + $0x1358] sm:$0xff]  ;;  %v3578_v26 = vld [vmem:[#allocation12 + $0x12e0] sm:$0xff] }
 0x524   :  { %4297 = vmatmul.mubr.f32.vlgmr.msra.gmra.mrb[44].mxu1 %v10964_v46  ;;  %7995 = vmatpush1.bf16.msra.mxu0 %v7994_v53  ;;  %v3484_v53 = vld [vmem:[#allocation12 + $0xff0] sm:$0xff]  ;;  %v3590_v30 = vld [vmem:[#allocation12 + $0x1340] sm:$0xff]  ;;  %v8156_v3 = vpack.c.bf16 %v3593_v24, %v3581_v23  ;;  %v3689_v18 = vld [vmem:[#allocation12 + $0x1658] sm:$0xff] }
 0x525   :  { %4225 = vmatprep.mubr.f32.mxu0 %v10970_v52  ;;  %8123 = vmatpush1.bf16.msra.mxu1 %v8122_v44  ;;  %v3507_v44 = vld [vmem:[#allocation12 + $0x10a8] sm:$0xff]  ;;  %v8142_v33 = vpack.c.bf16 %v3496_v41, %v3484_v53  ;;  %v8030_v53 = vpack.c.bf16 %v3590_v30, %v3578_v26  ;;  %v3676_v23 = vld [vmem:[#allocation12 + $0x15f0] sm:$0xff]  ;;  %v8172_v24 = vpack.c.bf16 %v3689_v18, %v3677_v16  ;;  %v3701_v26 = vld [vmem:[#allocation12 + $0x16b8] sm:$0xff] }
 0x526   :  { %4367 = vmatprep.mubr.f32.mxu1 %v10970_v52  ;;  %7997 = vmatprep.subr.bf16.mxu0 %v7996_v49  ;;  %v8014_v49 = vpack.c.bf16 %v3494_v50, %v3482_v37  ;;  %v8016_v11 = vpack.c.bf16 %v3519_v47, %v3507_v44  ;;  %v3605_v37 = vld [vmem:[#allocation12 + $0x13b8] sm:$0xff]  ;;  %v3602_v44 = vld [vmem:[#allocation12 + $0x13a0] sm:$0xff]  ;;  %v3020_v18 = vld [vmem:[#allocation12 + $0x170] sm:$0xff] }
 0x527   :  { %8125 = vmatprep.subr.bf16.mxu1 %v8124_v55  ;;  %v3518_v55 = vld [vmem:[#allocation12 + $0x1100] sm:$0xff]  ;;  %v3617_v50 = vld [vmem:[#allocation12 + $0x1418] sm:$0xff] }
 0x528   :  { %7999 = vmatpush1.bf16.msra.mxu0 %v7998_v17  ;;  %v3520_v17 = vld [vmem:[#allocation12 + $0x1110] sm:$0xff]  ;;  %v8018_v2 = vpack.c.bf16 %v3518_v55, %v3506_v54  ;;  %v3614_v47 = vld [vmem:[#allocation12 + $0x1400] sm:$0xff]  ;;  %v8160_v29 = vpack.c.bf16 %v3617_v50, %v3605_v37  ;;  %v3629_v54 = vld [vmem:[#allocation12 + $0x1478] sm:$0xff] }
 0x529   :  { %8127 = vmatpush1.bf16.msra.mxu1 %v8126_v43  ;;  %8001 = vmatprep.subr.bf16.mxu0 %v8000_v60  ;;  %v3531_v43 = vld [vmem:[#allocation12 + $0x1168] sm:$0xff]  ;;  %v3641_v55 = vld [vmem:[#allocation12 + $0x14d8] sm:$0xff]  ;;  %v3700_v37 = vld [vmem:[#allocation12 + $0x16b0] sm:$0xff] }
 0x52a   :  { %8129 = vmatprep.subr.bf16.mxu1 %v8128_v19  ;;  %v3543_v60 = vld [vmem:[#allocation12 + $0x11c8] sm:$0xff]  ;;  %v8146_v19 = vpack.c.bf16 %v3520_v17, %v3508_v57  ;;  %v8034_v57 = vpack.c.bf16 %v3614_v47, %v3602_v44  ;;  %v8164_v62 = vpack.c.bf16 %v3641_v55, %v3629_v54  ;;  %v3713_v30 = vld [vmem:[#allocation12 + $0x1718] sm:$0xff]  ;;  %v3724_v54 = vld [vmem:[#allocation12 + $0x1770] sm:$0xff] }
 0x52b   :  { %v8020_v35 = vpack.c.bf16 %v3543_v60, %v3531_v43  ;;  %v3626_v43 = vld [vmem:[#allocation12 + $0x1460] sm:$0xff]  ;;  %v8176_v50 = vpack.c.bf16 %v3713_v30, %v3701_v26  ;;  %v3725_v44 = vld [vmem:[#allocation12 + $0x1778] sm:$0xff]  ;;  %v3032_v26 = vld [vmem:[#allocation12 + $0x1d0] sm:$0xff] }
 0x52c   :  { %8003 = vmatpush1.bf16.msra.mxu0 %v8002_v10  ;;  %v3544_v10 = vld [vmem:[#allocation12 + $0x11d0] sm:$0xff]  ;;  %v3638_v60 = vld [vmem:[#allocation12 + $0x14c0] sm:$0xff]  ;;  %v3737_v47 = vld [vmem:[#allocation12 + $0x17d8] sm:$0xff] }
 0x52d   :  { %8131 = vmatpush1.bf16.msra.mxu1 %v8130_v4  ;;  %8005 = vmatprep.subr.bf16.mxu0 %v8004_v12  ;;  %v3555_v4 = vld [vmem:[#allocation12 + $0x1228] sm:$0xff]  ;;  %v8180_v55 = vpack.c.bf16 %v3737_v47, %v3725_v44  ;;  %v3056_v44 = vld [vmem:[#allocation12 + $0x290] sm:$0xff] }
 0x52e   :  { %8133 = vmatprep.subr.bf16.mxu1 %v8132_v36  ;;  %v3567_v12 = vld [vmem:[#allocation12 + $0x1288] sm:$0xff]  ;;  %v8150_v36 = vpack.c.bf16 %v3544_v10, %v3532_v8  ;;  %v8038_v8 = vpack.c.bf16 %v3638_v60, %v3626_v43  ;;  %v2985_v43 = vld [vmem:[#allocation12 + $0x58] sm:$0xff] }
 0x52f   :  { %v8024_v14 = vpack.c.bf16 %v3567_v12, %v3555_v4  ;;  %v3650_v4 = vld [vmem:[#allocation12 + $0x1520] sm:$0xff]  ;;  %v2997_v60 = vld [vmem:[#allocation12 + $0xb8] sm:$0xff] }
 0x530   :  { %8007 = vmatpush1.bf16.msra.mxu0 %v8006_v45  ;;  %v3568_v45 = vld [vmem:[#allocation12 + $0x1290] sm:$0xff]  ;;  %v3662_v12 = vld [vmem:[#allocation12 + $0x1580] sm:$0xff]  ;;  %v8312_v51 = vpack.c.bf16 %v2997_v60, %v2985_v43 }
 0x531   :  { %8135 = vmatpush1.bf16.msra.mxu1 %v8134_v22  ;;  %8009 = vmatprep.subr.bf16.mxu0 %v8008_v42  ;;  %v3579_v22 = vld [vmem:[#allocation12 + $0x12e8] sm:$0xff]  ;;  %v3092_v60 = vld [vmem:[#allocation12 + $0x3b0] sm:$0xff] }
 0x532   :  { %8137 = vmatprep.subr.bf16.mxu1 %v8136_v25  ;;  %v3591_v42 = vld [vmem:[#allocation12 + $0x1348] sm:$0xff]  ;;  %v8154_v25 = vpack.c.bf16 %v3568_v45, %v3556_v20  ;;  %v8042_v20 = vpack.c.bf16 %v3662_v12, %v3650_v4  ;;  %v3009_v12 = vld [vmem:[#allocation12 + $0x118] sm:$0xff] }
 0x533   :  { %v8028_v40 = vpack.c.bf16 %v3591_v42, %v3579_v22  ;;  %v3674_v22 = vld [vmem:[#allocation12 + $0x15e0] sm:$0xff] }
 0x534   :  { %8011 = vmatpush1.bf16.msra.mxu0 %v8010_v31  ;;  %v3592_v31 = vld [vmem:[#allocation12 + $0x1350] sm:$0xff]  ;;  %v3686_v42 = vld [vmem:[#allocation12 + $0x1640] sm:$0xff] }
 0x535   :  { %8139 = vmatpush1.bf16.msra.mxu1 %v8138_v32  ;;  %8013 = vmatprep.subr.bf16.mxu0 %v8012_v34  ;;  %v3603_v32 = vld [vmem:[#allocation12 + $0x13a8] sm:$0xff] }
 0x536   :  { %8141 = vmatprep.subr.bf16.mxu1 %v8140_v1  ;;  %v3615_v34 = vld [vmem:[#allocation12 + $0x1408] sm:$0xff]  ;;  %v8158_v1 = vpack.c.bf16 %v3592_v31, %v3580_v61  ;;  %v8046_v61 = vpack.c.bf16 %v3686_v42, %v3674_v22  ;;  %v3033_v22 = vld [vmem:[#allocation12 + $0x1d8] sm:$0xff] }
 0x537   :  { %v8032_v41 = vpack.c.bf16 %v3615_v34, %v3603_v32  ;;  %v3698_v32 = vld [vmem:[#allocation12 + $0x16a0] sm:$0xff]  ;;  %v3045_v42 = vld [vmem:[#allocation12 + $0x238] sm:$0xff] }
 0x538   :  { %8015 = vmatpush1.bf16.msra.mxu0 %v8014_v49  ;;  %v3616_v49 = vld [vmem:[#allocation12 + $0x1410] sm:$0xff]  ;;  %v3710_v34 = vld [vmem:[#allocation12 + $0x1700] sm:$0xff]  ;;  %v8320_v30 = vpack.c.bf16 %v3045_v42, %v3033_v22 }
 0x539   :  { %8143 = vmatpush1.bf16.msra.mxu1 %v8142_v33  ;;  %8017 = vmatprep.subr.bf16.mxu0 %v8016_v11  ;;  %v3627_v33 = vld [vmem:[#allocation12 + $0x1468] sm:$0xff]  ;;  %v3140_v42 = vld [vmem:[#allocation12 + $0x530] sm:$0xff] }
 0x53a   :  { %8145 = vmatprep.subr.bf16.mxu1 %v8144_v0  ;;  %v3639_v11 = vld [vmem:[#allocation12 + $0x14c8] sm:$0xff]  ;;  %v8162_v0 = vpack.c.bf16 %v3616_v49, %v3604_v48  ;;  %v8050_v48 = vpack.c.bf16 %v3710_v34, %v3698_v32  ;;  %v3057_v32 = vld [vmem:[#allocation12 + $0x298] sm:$0xff] }
 0x53b   :  { %v8036_v17 = vpack.c.bf16 %v3639_v11, %v3627_v33  ;;  %v3722_v33 = vld [vmem:[#allocation12 + $0x1760] sm:$0xff]  ;;  %v3069_v34 = vld [vmem:[#allocation12 + $0x2f8] sm:$0xff] }
 0x53c   :  { %8019 = vmatpush1.bf16.msra.mxu0 %v8018_v2  ;;  %v3640_v2 = vld [vmem:[#allocation12 + $0x14d0] sm:$0xff]  ;;  %v3734_v11 = vld [vmem:[#allocation12 + $0x17c0] sm:$0xff]  ;;  %v8324_v47 = vpack.c.bf16 %v3069_v34, %v3057_v32 }
 0x53d   :  { %8147 = vmatpush1.bf16.msra.mxu1 %v8146_v19  ;;  %8021 = vmatprep.subr.bf16.mxu0 %v8020_v35  ;;  %v3651_v19 = vld [vmem:[#allocation12 + $0x1528] sm:$0xff]  ;;  %v3164_v34 = vld [vmem:[#allocation12 + $0x5f0] sm:$0xff] }
 0x53e   :  { %8149 = vmatprep.subr.bf16.mxu1 %v8148_v9  ;;  %v3663_v35 = vld [vmem:[#allocation12 + $0x1588] sm:$0xff]  ;;  %v8166_v9 = vpack.c.bf16 %v3640_v2, %v3628_v58  ;;  %v8054_v58 = vpack.c.bf16 %v3734_v11, %v3722_v33  ;;  %v3093_v33 = vld [vmem:[#allocation12 + $0x3b8] sm:$0xff] }
 0x53f   :  { %v8040_v10 = vpack.c.bf16 %v3663_v35, %v3651_v19  ;;  %v2982_v19 = vld [vmem:[#allocation12 + $0x40] sm:$0xff] }
 0x540   :  { %8023 = vmatpush1.bf16.msra.mxu0 %v8022_v13  ;;  %v3664_v13 = vld [vmem:[#allocation12 + $0x1590] sm:$0xff]  ;;  %v2994_v35 = vld [vmem:[#allocation12 + $0xa0] sm:$0xff] }
 0x541   :  { %8151 = vmatpush1.bf16.msra.mxu1 %v8150_v36  ;;  %8025 = vmatprep.subr.bf16.mxu0 %v8024_v14  ;;  %v3675_v36 = vld [vmem:[#allocation12 + $0x15e8] sm:$0xff]  ;;  %v8186_v4 = vpack.c.bf16 %v2994_v35, %v2982_v19  ;;  %v3117_v19 = vld [vmem:[#allocation12 + $0x478] sm:$0xff] }
 0x542   :  { %8153 = vmatprep.subr.bf16.mxu1 %v8152_v21  ;;  %v3687_v14 = vld [vmem:[#allocation12 + $0x1648] sm:$0xff]  ;;  %v8170_v21 = vpack.c.bf16 %v3664_v13, %v3652_v28  ;;  %v3021_v28 = vld [vmem:[#allocation12 + $0x178] sm:$0xff]  ;;  %v3006_v13 = vld [vmem:[#allocation12 + $0x100] sm:$0xff] }
 0x543   :  { %v8044_v45 = vpack.c.bf16 %v3687_v14, %v3675_v36  ;;  %v3018_v36 = vld [vmem:[#allocation12 + $0x160] sm:$0xff]  ;;  %v3008_v14 = vld [vmem:[#allocation12 + $0x110] sm:$0xff] }
 0x544   :  { %8027 = vmatpush1.bf16.msra.mxu0 %v8026_v39  ;;  %v3688_v39 = vld [vmem:[#allocation12 + $0x1650] sm:$0xff] }
 0x545   :  { %8155 = vmatpush1.bf16.msra.mxu1 %v8154_v25  ;;  %8029 = vmatprep.subr.bf16.mxu0 %v8028_v40  ;;  %v3699_v25 = vld [vmem:[#allocation12 + $0x16a8] sm:$0xff] }
 0x546   :  { %8157 = vmatprep.subr.bf16.mxu1 %v8156_v3  ;;  %v3711_v40 = vld [vmem:[#allocation12 + $0x1708] sm:$0xff]  ;;  %v8174_v3 = vpack.c.bf16 %v3688_v39, %v3676_v23  ;;  %v8190_v23 = vpack.c.bf16 %v3018_v36, %v3006_v13  ;;  %v3129_v13 = vld [vmem:[#allocation12 + $0x4d8] sm:$0xff] }
 0x547   :  { %v8048_v31 = vpack.c.bf16 %v3711_v40, %v3699_v25  ;;  %v3030_v25 = vld [vmem:[#allocation12 + $0x1c0] sm:$0xff]  ;;  %v3141_v36 = vld [vmem:[#allocation12 + $0x538] sm:$0xff] }
 0x548   :  { %8031 = vmatpush1.bf16.msra.mxu0 %v8030_v53  ;;  %v3712_v53 = vld [vmem:[#allocation12 + $0x1710] sm:$0xff]  ;;  %v3042_v40 = vld [vmem:[#allocation12 + $0x220] sm:$0xff]  ;;  %v8336_v22 = vpack.c.bf16 %v3141_v36, %v3129_v13 }
 0x549   :  { %8159 = vmatpush1.bf16.msra.mxu1 %v8158_v1  ;;  %8033 = vmatprep.subr.bf16.mxu0 %v8032_v41  ;;  %v3723_v1 = vld [vmem:[#allocation12 + $0x1768] sm:$0xff]  ;;  %v3236_v36 = vld [vmem:[#allocation12 + $0x830] sm:$0xff] }
 0x54a   :  { %8161 = vmatprep.subr.bf16.mxu1 %v8160_v29  ;;  %v3735_v41 = vld [vmem:[#allocation12 + $0x17c8] sm:$0xff]  ;;  %v8178_v29 = vpack.c.bf16 %v3712_v53, %v3700_v37  ;;  %v8194_v37 = vpack.c.bf16 %v3042_v40, %v3030_v25  ;;  %v3165_v25 = vld [vmem:[#allocation12 + $0x5f8] sm:$0xff] }
 0x54b   :  { %v8052_v49 = vpack.c.bf16 %v3735_v41, %v3723_v1  ;;  %v3054_v1 = vld [vmem:[#allocation12 + $0x280] sm:$0xff] }
 0x54c   :  { %8035 = vmatpush1.bf16.msra.mxu0 %v8034_v57  ;;  %v3736_v57 = vld [vmem:[#allocation12 + $0x17d0] sm:$0xff]  ;;  %v3066_v41 = vld [vmem:[#allocation12 + $0x2e0] sm:$0xff] }
 0x54d   :  { %8163 = vmatpush1.bf16.msra.mxu1 %v8162_v0  ;;  %8037 = vmatprep.subr.bf16.mxu0 %v8036_v17  ;;  %v2983_v0 = vld [vmem:[#allocation12 + $0x48] sm:$0xff]  ;;  %v8198_v11 = vpack.c.bf16 %v3066_v41, %v3054_v1  ;;  %v3189_v1 = vld [vmem:[#allocation12 + $0x6b8] sm:$0xff] }
 0x54e   :  { %8165 = vmatprep.subr.bf16.mxu1 %v8164_v62  ;;  %v2995_v17 = vld [vmem:[#allocation12 + $0xa8] sm:$0xff]  ;;  %v8182_v62 = vpack.c.bf16 %v3736_v57, %v3724_v54  ;;  %v3078_v57 = vld [vmem:[#allocation12 + $0x340] sm:$0xff] }
 0x54f   :  { %v8184_v2 = vpack.c.bf16 %v2995_v17, %v2983_v0  ;;  %v3090_v0 = vld [vmem:[#allocation12 + $0x3a0] sm:$0xff]  ;;  %v3080_v17 = vld [vmem:[#allocation12 + $0x350] sm:$0xff] }
 0x550   :  { %8039 = vmatpush1.bf16.msra.mxu0 %v8038_v8  ;;  %v2996_v8 = vld [vmem:[#allocation12 + $0xb0] sm:$0xff]  ;;  %v8202_v35 = vpack.c.bf16 %v3090_v0, %v3078_v57  ;;  %v3213_v57 = vld [vmem:[#allocation12 + $0x778] sm:$0xff] }
 0x551   :  { %8167 = vmatpush1.bf16.msra.mxu1 %v8166_v9  ;;  %8041 = vmatprep.subr.bf16.mxu0 %v8040_v10  ;;  %v3007_v9 = vld [vmem:[#allocation12 + $0x108] sm:$0xff] }
 0x552   :  { %8169 = vmatprep.subr.bf16.mxu1 %v8168_v59  ;;  %v3019_v10 = vld [vmem:[#allocation12 + $0x168] sm:$0xff]  ;;  %v8314_v59 = vpack.c.bf16 %v2996_v8, %v2984_v5  ;;  %v3102_v8 = vld [vmem:[#allocation12 + $0x400] sm:$0xff] }
 0x553   :  { %v8188_v16 = vpack.c.bf16 %v3019_v10, %v3007_v9  ;;  %v3114_v9 = vld [vmem:[#allocation12 + $0x460] sm:$0xff]  ;;  %v3104_v10 = vld [vmem:[#allocation12 + $0x410] sm:$0xff] }
 0x554   :  { %8043 = vmatpush1.bf16.msra.mxu0 %v8042_v20  ;;  %v3031_v20 = vld [vmem:[#allocation12 + $0x1c8] sm:$0xff] }
 0x555   :  { %8171 = vmatpush1.bf16.msra.mxu1 %v8170_v21  ;;  %8045 = vmatprep.subr.bf16.mxu0 %v8044_v45  ;;  %v3043_v21 = vld [vmem:[#allocation12 + $0x228] sm:$0xff]  ;;  %v8316_v45 = vpack.c.bf16 %v3021_v28, %v3009_v12  ;;  %v3116_v12 = vld [vmem:[#allocation12 + $0x470] sm:$0xff] }
 0x556   :  { %8173 = vmatprep.subr.bf16.mxu1 %v8172_v24  ;;  %v8318_v24 = vpack.c.bf16 %v3020_v18, %v3008_v14  ;;  %v8192_v39 = vpack.c.bf16 %v3043_v21, %v3031_v20  ;;  %v3127_v28 = vld [vmem:[#allocation12 + $0x4c8] sm:$0xff]  ;;  %v8206_v14 = vpack.c.bf16 %v3114_v9, %v3102_v8  ;;  %v3126_v20 = vld [vmem:[#allocation12 + $0x4c0] sm:$0xff]  ;;  %v3237_v8 = vld [vmem:[#allocation12 + $0x838] sm:$0xff] }
 0x557   :  { %v3138_v21 = vld [vmem:[#allocation12 + $0x520] sm:$0xff] }
 0x558   :  { %8047 = vmatpush1.bf16.msra.mxu0 %v8046_v61  ;;  %v3044_v61 = vld [vmem:[#allocation12 + $0x230] sm:$0xff]  ;;  %v8210_v40 = vpack.c.bf16 %v3138_v21, %v3126_v20  ;;  %v3261_v20 = vld [vmem:[#allocation12 + $0x8f8] sm:$0xff] }
 0x559   :  { %8175 = vmatpush1.bf16.msra.mxu1 %v8174_v3  ;;  %8049 = vmatprep.subr.bf16.mxu0 %v8048_v31  ;;  %v3055_v3 = vld [vmem:[#allocation12 + $0x288] sm:$0xff] }
 0x55a   :  { %8177 = vmatprep.subr.bf16.mxu1 %v8176_v50  ;;  %v3067_v31 = vld [vmem:[#allocation12 + $0x2e8] sm:$0xff]  ;;  %v8322_v50 = vpack.c.bf16 %v3044_v61, %v3032_v26  ;;  %v3150_v61 = vld [vmem:[#allocation12 + $0x580] sm:$0xff] }
 0x55b   :  { %v8196_v53 = vpack.c.bf16 %v3067_v31, %v3055_v3  ;;  %v3162_v3 = vld [vmem:[#allocation12 + $0x5e0] sm:$0xff]  ;;  %v3152_v31 = vld [vmem:[#allocation12 + $0x590] sm:$0xff] }
 0x55c   :  { %8051 = vmatpush1.bf16.msra.mxu0 %v8050_v48  ;;  %v3079_v48 = vld [vmem:[#allocation12 + $0x348] sm:$0xff]  ;;  %v8214_v41 = vpack.c.bf16 %v3162_v3, %v3150_v61  ;;  %v3285_v61 = vld [vmem:[#allocation12 + $0x9b8] sm:$0xff] }
 0x55d   :  { %8179 = vmatpush1.bf16.msra.mxu1 %v8178_v29  ;;  %8053 = vmatprep.subr.bf16.mxu0 %v8052_v49  ;;  %v3091_v29 = vld [vmem:[#allocation12 + $0x3a8] sm:$0xff]  ;;  %v3081_v49 = vld [vmem:[#allocation12 + $0x358] sm:$0xff] }
 0x55e   :  { %8181 = vmatprep.subr.bf16.mxu1 %v8180_v55  ;;  %v8200_v55 = vpack.c.bf16 %v3091_v29, %v3079_v48  ;;  %v8328_v43 = vpack.c.bf16 %v3093_v33, %v3081_v49  ;;  %v3186_v48 = vld [vmem:[#allocation12 + $0x6a0] sm:$0xff]  ;;  %v3176_v29 = vld [vmem:[#allocation12 + $0x650] sm:$0xff] }
 0x55f   :  { %v3188_v33 = vld [vmem:[#allocation12 + $0x6b0] sm:$0xff] }
 0x560   :  { %8055 = vmatpush1.bf16.msra.mxu0 %v8054_v58  ;;  %v3103_v58 = vld [vmem:[#allocation12 + $0x408] sm:$0xff] }
 0x561   :  { %8183 = vmatpush1.bf16.msra.mxu1 %v8182_v62  ;;  %8185 = vmatprep.subr.bf16.mxu0 %v8184_v2  ;;  %v3115_v62 = vld [vmem:[#allocation12 + $0x468] sm:$0xff]  ;;  %v3105_v2 = vld [vmem:[#allocation12 + $0x418] sm:$0xff] }
 0x562   :  { %8313 = vmatprep.subr.bf16.mxu1 %v8312_v51  ;;  %v8330_v51 = vpack.c.bf16 %v3092_v60, %v3080_v17  ;;  %v8204_v5 = vpack.c.bf16 %v3115_v62, %v3103_v58  ;;  %v8346_v17 = vpack.c.bf16 %v3188_v33, %v3176_v29  ;;  %v3198_v60 = vld [vmem:[#allocation12 + $0x700] sm:$0xff]  ;;  %v3200_v62 = vld [vmem:[#allocation12 + $0x710] sm:$0xff] }
 0x563   :  { %4226 = vmatmul.mubr.f32.vlgmr.msra.gmra.mrb[52].mxu0 %v10985_v15  ;;  %v3210_v58 = vld [vmem:[#allocation12 + $0x760] sm:$0xff] }
 0x564   :  { %4368 = vmatmul.mubr.f32.vlgmr.msra.gmra.mrb[44].mxu1 %v10985_v15  ;;  %8187 = vmatpush1.bf16.msra.mxu0 %v8186_v4  ;;  %v8332_v4 = vpack.c.bf16 %v3117_v19, %v3105_v2  ;;  %v3212_v19 = vld [vmem:[#allocation12 + $0x770] sm:$0xff]  ;;  %v8222_v9 = vpack.c.bf16 %v3210_v58, %v3198_v60  ;;  %v3294_v33 = vld [vmem:[#allocation12 + $0xa00] sm:$0xff]  ;;  %v3333_v60 = vld [vmem:[#allocation12 + $0xb38] sm:$0xff] }
 0x565   :  { %4438 = vmatprep.mubr.f32.mxu0 %v10962_v38  ;;  %8315 = vmatpush1.bf16.msra.mxu1 %v8314_v59  ;;  %v3139_v59 = vld [vmem:[#allocation12 + $0x528] sm:$0xff] }
 0x566   :  { %4580 = vmatprep.mubr.f32.mxu1 %v10962_v38  ;;  %8189 = vmatprep.subr.bf16.mxu0 %v8188_v16  ;;  %v3068_v38 = vld [vmem:[#allocation12 + $0x2f0] sm:$0xff]  ;;  %v8334_v16 = vpack.c.bf16 %v3116_v12, %v3104_v10  ;;  %v8208_v18 = vpack.c.bf16 %v3139_v59, %v3127_v28  ;;  %v8350_v10 = vpack.c.bf16 %v3212_v19, %v3200_v62  ;;  %v3222_v12 = vld [vmem:[#allocation12 + $0x7c0] sm:$0xff] }
 0x567   :  { %8317 = vmatprep.subr.bf16.mxu1 %v8316_v45  ;;  %v8326_v54 = vpack.c.bf16 %v3068_v38, %v3056_v44  ;;  %v3128_v45 = vld [vmem:[#allocation12 + $0x4d0] sm:$0xff]  ;;  %v8342_v44 = vpack.c.bf16 %v3164_v34, %v3152_v31  ;;  %v3174_v38 = vld [vmem:[#allocation12 + $0x640] sm:$0xff] }
 0x568   :  { %8191 = vmatpush1.bf16.msra.mxu0 %v8190_v23  ;;  %v3151_v23 = vld [vmem:[#allocation12 + $0x588] sm:$0xff]  ;;  %v8338_v26 = vpack.c.bf16 %v3140_v42, %v3128_v45  ;;  %v8218_v0 = vpack.c.bf16 %v3186_v48, %v3174_v38  ;;  %v3234_v28 = vld [vmem:[#allocation12 + $0x820] sm:$0xff]  ;;  %v3224_v59 = vld [vmem:[#allocation12 + $0x7d0] sm:$0xff] }
 0x569   :  { %8319 = vmatpush1.bf16.msra.mxu1 %v8318_v24  ;;  %8193 = vmatprep.subr.bf16.mxu0 %v8192_v39  ;;  %v3163_v24 = vld [vmem:[#allocation12 + $0x5e8] sm:$0xff]  ;;  %v3153_v39 = vld [vmem:[#allocation12 + $0x598] sm:$0xff]  ;;  %v8226_v21 = vpack.c.bf16 %v3234_v28, %v3222_v12  ;;  %v8354_v45 = vpack.c.bf16 %v3236_v36, %v3224_v59  ;;  %v3246_v42 = vld [vmem:[#allocation12 + $0x880] sm:$0xff] }
 0x56a   :  { %8321 = vmatprep.subr.bf16.mxu1 %v8320_v30  ;;  %v8212_v30 = vpack.c.bf16 %v3163_v24, %v3151_v23  ;;  %v8340_v32 = vpack.c.bf16 %v3165_v25, %v3153_v39  ;;  %v3258_v23 = vld [vmem:[#allocation12 + $0x8e0] sm:$0xff]  ;;  %v3248_v24 = vld [vmem:[#allocation12 + $0x890] sm:$0xff]  ;;  %v3309_v38 = vld [vmem:[#allocation12 + $0xa78] sm:$0xff] }
 0x56b   :  { %v3260_v25 = vld [vmem:[#allocation12 + $0x8f0] sm:$0xff]  ;;  %v8230_v3 = vpack.c.bf16 %v3258_v23, %v3246_v42  ;;  %v3270_v34 = vld [vmem:[#allocation12 + $0x940] sm:$0xff]  ;;  %v3357_v12 = vld [vmem:[#allocation12 + $0xbf8] sm:$0xff] }
 0x56c   :  { %8195 = vmatpush1.bf16.msra.mxu0 %v8194_v37  ;;  %v3175_v37 = vld [vmem:[#allocation12 + $0x648] sm:$0xff]  ;;  %v8358_v31 = vpack.c.bf16 %v3260_v25, %v3248_v24  ;;  %v3318_v19 = vld [vmem:[#allocation12 + $0xac0] sm:$0xff]  ;;  %v3381_v42 = vld [vmem:[#allocation12 + $0xcb8] sm:$0xff] }
 0x56d   :  { %8323 = vmatpush1.bf16.msra.mxu1 %v8322_v50  ;;  %8197 = vmatprep.subr.bf16.mxu0 %v8196_v53  ;;  %v3187_v50 = vld [vmem:[#allocation12 + $0x6a8] sm:$0xff]  ;;  %v3177_v53 = vld [vmem:[#allocation12 + $0x658] sm:$0xff]  ;;  %v3342_v36 = vld [vmem:[#allocation12 + $0xb80] sm:$0xff] }
 0x56e   :  { %8325 = vmatprep.subr.bf16.mxu1 %v8324_v47  ;;  %v8216_v47 = vpack.c.bf16 %v3187_v50, %v3175_v37  ;;  %v8344_v49 = vpack.c.bf16 %v3189_v1, %v3177_v53  ;;  %v3282_v37 = vld [vmem:[#allocation12 + $0x9a0] sm:$0xff]  ;;  %v3272_v50 = vld [vmem:[#allocation12 + $0x950] sm:$0xff] }
 0x56f   :  { %v3284_v1 = vld [vmem:[#allocation12 + $0x9b0] sm:$0xff]  ;;  %v8234_v48 = vpack.c.bf16 %v3282_v37, %v3270_v34  ;;  %v3366_v25 = vld [vmem:[#allocation12 + $0xc40] sm:$0xff]  ;;  %v3393_v34 = vld [vmem:[#allocation12 + $0xd18] sm:$0xff] }
 0x570   :  { %8199 = vmatpush1.bf16.msra.mxu0 %v8198_v11  ;;  %v3199_v11 = vld [vmem:[#allocation12 + $0x708] sm:$0xff]  ;;  %v8362_v29 = vpack.c.bf16 %v3284_v1, %v3272_v50  ;;  %v3405_v37 = vld [vmem:[#allocation12 + $0xd78] sm:$0xff]  ;;  %v3402_v1 = vld [vmem:[#allocation12 + $0xd60] sm:$0xff] }
 0x571   :  { %8327 = vmatpush1.bf16.msra.mxu1 %v8326_v54  ;;  %8201 = vmatprep.subr.bf16.mxu0 %v8200_v55  ;;  %v3211_v54 = vld [vmem:[#allocation12 + $0x768] sm:$0xff]  ;;  %v3201_v55 = vld [vmem:[#allocation12 + $0x718] sm:$0xff] }
 0x572   :  { %8329 = vmatprep.subr.bf16.mxu1 %v8328_v43  ;;  %v8220_v43 = vpack.c.bf16 %v3211_v54, %v3199_v11  ;;  %v8348_v2 = vpack.c.bf16 %v3213_v57, %v3201_v55  ;;  %v3306_v11 = vld [vmem:[#allocation12 + $0xa60] sm:$0xff]  ;;  %v3296_v54 = vld [vmem:[#allocation12 + $0xa10] sm:$0xff] }
 0x573   :  { %v3308_v57 = vld [vmem:[#allocation12 + $0xa70] sm:$0xff]  ;;  %v8238_v58 = vpack.c.bf16 %v3306_v11, %v3294_v33  ;;  %v3429_v33 = vld [vmem:[#allocation12 + $0xe38] sm:$0xff] }
 0x574   :  { %8203 = vmatpush1.bf16.msra.mxu0 %v8202_v35  ;;  %v3223_v35 = vld [vmem:[#allocation12 + $0x7c8] sm:$0xff]  ;;  %v8366_v62 = vpack.c.bf16 %v3308_v57, %v3296_v54  ;;  %v3414_v57 = vld [vmem:[#allocation12 + $0xdc0] sm:$0xff] }
 0x575   :  { %8331 = vmatpush1.bf16.msra.mxu1 %v8330_v51  ;;  %8205 = vmatprep.subr.bf16.mxu0 %v8204_v5  ;;  %v3235_v51 = vld [vmem:[#allocation12 + $0x828] sm:$0xff]  ;;  %v3225_v5 = vld [vmem:[#allocation12 + $0x7d8] sm:$0xff] }
 0x576   :  { %8333 = vmatprep.subr.bf16.mxu1 %v8332_v4  ;;  %v8224_v4 = vpack.c.bf16 %v3235_v51, %v3223_v35  ;;  %v8352_v13 = vpack.c.bf16 %v3237_v8, %v3225_v5  ;;  %v3330_v35 = vld [vmem:[#allocation12 + $0xb20] sm:$0xff]  ;;  %v3320_v51 = vld [vmem:[#allocation12 + $0xad0] sm:$0xff] }
 0x577   :  { %v3332_v8 = vld [vmem:[#allocation12 + $0xb30] sm:$0xff]  ;;  %v8242_v28 = vpack.c.bf16 %v3330_v35, %v3318_v19 }
 0x578   :  { %8207 = vmatpush1.bf16.msra.mxu0 %v8206_v14  ;;  %v3247_v14 = vld [vmem:[#allocation12 + $0x888] sm:$0xff]  ;;  %v8370_v59 = vpack.c.bf16 %v3332_v8, %v3320_v51  ;;  %v3450_v8 = vld [vmem:[#allocation12 + $0xee0] sm:$0xff] }
 0x579   :  { %8335 = vmatpush1.bf16.msra.mxu1 %v8334_v16  ;;  %8209 = vmatprep.subr.bf16.mxu0 %v8208_v18  ;;  %v3259_v16 = vld [vmem:[#allocation12 + $0x8e8] sm:$0xff]  ;;  %v3249_v18 = vld [vmem:[#allocation12 + $0x898] sm:$0xff] }
 0x57a   :  { %8337 = vmatprep.subr.bf16.mxu1 %v8336_v22  ;;  %v8228_v22 = vpack.c.bf16 %v3259_v16, %v3247_v14  ;;  %v8356_v39 = vpack.c.bf16 %v3261_v20, %v3249_v18  ;;  %v3354_v14 = vld [vmem:[#allocation12 + $0xbe0] sm:$0xff]  ;;  %v3344_v16 = vld [vmem:[#allocation12 + $0xb90] sm:$0xff] }
 0x57b   :  { %v3356_v20 = vld [vmem:[#allocation12 + $0xbf0] sm:$0xff]  ;;  %v8246_v23 = vpack.c.bf16 %v3354_v14, %v3342_v36 }
 0x57c   :  { %8211 = vmatpush1.bf16.msra.mxu0 %v8210_v40  ;;  %v3271_v40 = vld [vmem:[#allocation12 + $0x948] sm:$0xff]  ;;  %v8374_v24 = vpack.c.bf16 %v3356_v20, %v3344_v16  ;;  %v3462_v16 = vld [vmem:[#allocation12 + $0xf40] sm:$0xff]  ;;  %v3464_v20 = vld [vmem:[#allocation12 + $0xf50] sm:$0xff] }
 0x57d   :  { %8339 = vmatpush1.bf16.msra.mxu1 %v8338_v26  ;;  %8213 = vmatprep.subr.bf16.mxu0 %v8212_v30  ;;  %v3283_v26 = vld [vmem:[#allocation12 + $0x9a8] sm:$0xff]  ;;  %v3273_v30 = vld [vmem:[#allocation12 + $0x958] sm:$0xff] }
 0x57e   :  { %8341 = vmatprep.subr.bf16.mxu1 %v8340_v32  ;;  %v8232_v32 = vpack.c.bf16 %v3283_v26, %v3271_v40  ;;  %v8360_v53 = vpack.c.bf16 %v3285_v61, %v3273_v30  ;;  %v3378_v40 = vld [vmem:[#allocation12 + $0xca0] sm:$0xff]  ;;  %v3368_v30 = vld [vmem:[#allocation12 + $0xc50] sm:$0xff] }
 0x57f   :  { %v3380_v61 = vld [vmem:[#allocation12 + $0xcb0] sm:$0xff] }
 0x580   :  { %8215 = vmatpush1.bf16.msra.mxu0 %v8214_v41  ;;  %v3295_v41 = vld [vmem:[#allocation12 + $0xa08] sm:$0xff]  ;;  %v8378_v50 = vpack.c.bf16 %v3380_v61, %v3368_v30  ;;  %v3498_v30 = vld [vmem:[#allocation12 + $0x1060] sm:$0xff]  ;;  %v3488_v61 = vld [vmem:[#allocation12 + $0x1010] sm:$0xff] }
 0x581   :  { %8343 = vmatpush1.bf16.msra.mxu1 %v8342_v44  ;;  %8217 = vmatprep.subr.bf16.mxu0 %v8216_v47  ;;  %v3307_v44 = vld [vmem:[#allocation12 + $0xa68] sm:$0xff]  ;;  %v3297_v47 = vld [vmem:[#allocation12 + $0xa18] sm:$0xff] }
 0x582   :  { %8345 = vmatprep.subr.bf16.mxu1 %v8344_v49  ;;  %v8236_v49 = vpack.c.bf16 %v3307_v44, %v3295_v41  ;;  %v8364_v55 = vpack.c.bf16 %v3309_v38, %v3297_v47  ;;  %v3392_v41 = vld [vmem:[#allocation12 + $0xd10] sm:$0xff]  ;;  %v3415_v38 = vld [vmem:[#allocation12 + $0xdc8] sm:$0xff] }
 0x583   :  { %v3404_v47 = vld [vmem:[#allocation12 + $0xd70] sm:$0xff] }
 0x584   :  { %8219 = vmatpush1.bf16.msra.mxu0 %v8218_v0  ;;  %v3319_v0 = vld [vmem:[#allocation12 + $0xac8] sm:$0xff]  ;;  %v8382_v54 = vpack.c.bf16 %v3404_v47, %v3392_v41  ;;  %v3522_v47 = vld [vmem:[#allocation12 + $0x1120] sm:$0xff] }
 0x585   :  { %8347 = vmatpush1.bf16.msra.mxu1 %v8346_v17  ;;  %8221 = vmatprep.subr.bf16.mxu0 %v8220_v43  ;;  %v3331_v17 = vld [vmem:[#allocation12 + $0xb28] sm:$0xff]  ;;  %v3321_v43 = vld [vmem:[#allocation12 + $0xad8] sm:$0xff] }
 0x586   :  { %8349 = vmatprep.subr.bf16.mxu1 %v8348_v2  ;;  %v8240_v2 = vpack.c.bf16 %v3331_v17, %v3319_v0  ;;  %v8368_v5 = vpack.c.bf16 %v3333_v60, %v3321_v43  ;;  %v3426_v0 = vld [vmem:[#allocation12 + $0xe20] sm:$0xff]  ;;  %v3416_v17 = vld [vmem:[#allocation12 + $0xdd0] sm:$0xff] }
 0x587   :  { %v3428_v60 = vld [vmem:[#allocation12 + $0xe30] sm:$0xff]  ;;  %v8258_v19 = vpack.c.bf16 %v3426_v0, %v3414_v57 }
 0x588   :  { %8223 = vmatpush1.bf16.msra.mxu0 %v8222_v9  ;;  %v3343_v9 = vld [vmem:[#allocation12 + $0xb88] sm:$0xff]  ;;  %v8386_v35 = vpack.c.bf16 %v3428_v60, %v3416_v17  ;;  %v3534_v17 = vld [vmem:[#allocation12 + $0x1180] sm:$0xff]  ;;  %v3536_v60 = vld [vmem:[#allocation12 + $0x1190] sm:$0xff] }
 0x589   :  { %8351 = vmatpush1.bf16.msra.mxu1 %v8350_v10  ;;  %8225 = vmatprep.subr.bf16.mxu0 %v8224_v4  ;;  %v3355_v10 = vld [vmem:[#allocation12 + $0xbe8] sm:$0xff]  ;;  %v3345_v4 = vld [vmem:[#allocation12 + $0xb98] sm:$0xff] }
 0x58a   :  { %8353 = vmatprep.subr.bf16.mxu1 %v8352_v13  ;;  %v8244_v13 = vpack.c.bf16 %v3355_v10, %v3343_v9  ;;  %v8372_v18 = vpack.c.bf16 %v3357_v12, %v3345_v4  ;;  %v3440_v9 = vld [vmem:[#allocation12 + $0xe90] sm:$0xff]  ;;  %v3463_v4 = vld [vmem:[#allocation12 + $0xf48] sm:$0xff] }
 0x58b   :  { %v3475_v12 = vld [vmem:[#allocation12 + $0xfa8] sm:$0xff] }
 0x58c   :  { %8227 = vmatpush1.bf16.msra.mxu0 %v8226_v21  ;;  %v3367_v21 = vld [vmem:[#allocation12 + $0xc48] sm:$0xff]  ;;  %v8264_v14 = vpack.c.bf16 %v3475_v12, %v3463_v4  ;;  %v3572_v12 = vld [vmem:[#allocation12 + $0x12b0] sm:$0xff] }
 0x58d   :  { %8355 = vmatpush1.bf16.msra.mxu1 %v8354_v45  ;;  %8229 = vmatprep.subr.bf16.mxu0 %v8228_v22  ;;  %v3379_v45 = vld [vmem:[#allocation12 + $0xca8] sm:$0xff]  ;;  %v3369_v22 = vld [vmem:[#allocation12 + $0xc58] sm:$0xff] }
 0x58e   :  { %8357 = vmatprep.subr.bf16.mxu1 %v8356_v39  ;;  %v8248_v39 = vpack.c.bf16 %v3379_v45, %v3367_v21  ;;  %v8376_v26 = vpack.c.bf16 %v3381_v42, %v3369_v22  ;;  %v3476_v45 = vld [vmem:[#allocation12 + $0xfb0] sm:$0xff]  ;;  %v3487_v22 = vld [vmem:[#allocation12 + $0x1008] sm:$0xff] }
 0x58f   :  { %v3499_v42 = vld [vmem:[#allocation12 + $0x1068] sm:$0xff] }
 0x590   :  { %8231 = vmatpush1.bf16.msra.mxu0 %v8230_v3  ;;  %v3391_v3 = vld [vmem:[#allocation12 + $0xd08] sm:$0xff] }
 0x591   :  { %8359 = vmatpush1.bf16.msra.mxu1 %v8358_v31  ;;  %8233 = vmatprep.subr.bf16.mxu0 %v8232_v32  ;;  %v3403_v31 = vld [vmem:[#allocation12 + $0xd68] sm:$0xff]  ;;  %v8250_v32 = vpack.c.bf16 %v3378_v40, %v3366_v25  ;;  %v8394_v25 = vpack.c.bf16 %v3476_v45, %v3464_v20  ;;  %v8268_v40 = vpack.c.bf16 %v3499_v42, %v3487_v22  ;;  %v3582_v20 = vld [vmem:[#allocation12 + $0x1300] sm:$0xff]  ;;  %v3584_v45 = vld [vmem:[#allocation12 + $0x1310] sm:$0xff] }
 0x592   :  { %8361 = vmatprep.subr.bf16.mxu1 %v8360_v53  ;;  %v3390_v53 = vld [vmem:[#allocation12 + $0xd00] sm:$0xff]  ;;  %v8252_v44 = vpack.c.bf16 %v3403_v31, %v3391_v3  ;;  %v3500_v31 = vld [vmem:[#allocation12 + $0x1070] sm:$0xff] }
 0x593   :  { %v8254_v11 = vpack.c.bf16 %v3402_v1, %v3390_v53  ;;  %v8398_v1 = vpack.c.bf16 %v3500_v31, %v3488_v61  ;;  %v3596_v42 = vld [vmem:[#allocation12 + $0x1370] sm:$0xff]  ;;  %v3606_v61 = vld [vmem:[#allocation12 + $0x13c0] sm:$0xff] }
 0x594   :  { %8235 = vmatpush1.bf16.msra.mxu0 %v8234_v48  ;;  %v3427_v48 = vld [vmem:[#allocation12 + $0xe28] sm:$0xff]  ;;  %v3608_v31 = vld [vmem:[#allocation12 + $0x13d0] sm:$0xff] }
 0x595   :  { %8363 = vmatpush1.bf16.msra.mxu1 %v8362_v29  ;;  %8237 = vmatprep.subr.bf16.mxu0 %v8236_v49  ;;  %v8380_v29 = vpack.c.bf16 %v3405_v37, %v3393_v34  ;;  %v3417_v49 = vld [vmem:[#allocation12 + $0xdd8] sm:$0xff]  ;;  %v3523_v34 = vld [vmem:[#allocation12 + $0x1128] sm:$0xff] }
 0x596   :  { %8365 = vmatprep.subr.bf16.mxu1 %v8364_v55  ;;  %v8256_v55 = vpack.c.bf16 %v3427_v48, %v3415_v38  ;;  %v8384_v43 = vpack.c.bf16 %v3429_v33, %v3417_v49  ;;  %v3513_v37 = vld [vmem:[#allocation12 + $0x10d8] sm:$0xff]  ;;  %v3512_v38 = vld [vmem:[#allocation12 + $0x10d0] sm:$0xff]  ;;  %v3535_v49 = vld [vmem:[#allocation12 + $0x1188] sm:$0xff] }
 0x597   :  { %v3547_v33 = vld [vmem:[#allocation12 + $0x11e8] sm:$0xff] }
 0x598   :  { %8239 = vmatpush1.bf16.msra.mxu0 %v8238_v58  ;;  %v3439_v58 = vld [vmem:[#allocation12 + $0xe88] sm:$0xff]  ;;  %v8276_v0 = vpack.c.bf16 %v3547_v33, %v3535_v49  ;;  %v3644_v33 = vld [vmem:[#allocation12 + $0x14f0] sm:$0xff] }
 0x599   :  { %8367 = vmatpush1.bf16.msra.mxu1 %v8366_v62  ;;  %8241 = vmatprep.subr.bf16.mxu0 %v8240_v2  ;;  %v3451_v62 = vld [vmem:[#allocation12 + $0xee8] sm:$0xff]  ;;  %v3441_v2 = vld [vmem:[#allocation12 + $0xe98] sm:$0xff] }
 0x59a   :  { %8369 = vmatprep.subr.bf16.mxu1 %v8368_v5  ;;  %v8260_v51 = vpack.c.bf16 %v3451_v62, %v3439_v58  ;;  %v3438_v5 = vld [vmem:[#allocation12 + $0xe80] sm:$0xff]  ;;  %v3548_v62 = vld [vmem:[#allocation12 + $0x11f0] sm:$0xff] }
 0x59c   :  { %8243 = vmatpush1.bf16.msra.mxu0 %v8242_v28  ;;  %v3465_v28 = vld [vmem:[#allocation12 + $0xf58] sm:$0xff] }
 0x59d   :  { %8371 = vmatpush1.bf16.msra.mxu1 %v8370_v59  ;;  %8245 = vmatprep.subr.bf16.mxu0 %v8244_v13  ;;  %v3477_v59 = vld [vmem:[#allocation12 + $0xfb8] sm:$0xff]  ;;  %v8262_v13 = vpack.c.bf16 %v3450_v8, %v3438_v5  ;;  %v8406_v5 = vpack.c.bf16 %v3548_v62, %v3536_v60  ;;  %v3654_v60 = vld [vmem:[#allocation12 + $0x1540] sm:$0xff]  ;;  %v3656_v62 = vld [vmem:[#allocation12 + $0x1550] sm:$0xff] }
 0x59e   :  { %8373 = vmatprep.subr.bf16.mxu1 %v8372_v18  ;;  %v3474_v18 = vld [vmem:[#allocation12 + $0xfa0] sm:$0xff]  ;;  %v8392_v21 = vpack.c.bf16 %v3477_v59, %v3465_v28  ;;  %v3583_v28 = vld [vmem:[#allocation12 + $0x1308] sm:$0xff] }
 0x59f   :  { %v3595_v59 = vld [vmem:[#allocation12 + $0x1368] sm:$0xff] }
 0x5a0   :  { %8247 = vmatpush1.bf16.msra.mxu0 %v8246_v23  ;;  %v3489_v23 = vld [vmem:[#allocation12 + $0x1018] sm:$0xff] }
 0x5a1   :  { %8375 = vmatpush1.bf16.msra.mxu1 %v8374_v24  ;;  %8249 = vmatprep.subr.bf16.mxu0 %v8248_v39  ;;  %v3501_v24 = vld [vmem:[#allocation12 + $0x1078] sm:$0xff]  ;;  %v8266_v39 = vpack.c.bf16 %v3474_v18, %v3462_v16  ;;  %v8284_v18 = vpack.c.bf16 %v3595_v59, %v3583_v28  ;;  %v3692_v59 = vld [vmem:[#allocation12 + $0x1670] sm:$0xff] }
 0x5a2   :  { %8377 = vmatprep.subr.bf16.mxu1 %v8376_v26  ;;  %v3486_v26 = vld [vmem:[#allocation12 + $0x1000] sm:$0xff]  ;;  %v8396_v3 = vpack.c.bf16 %v3501_v24, %v3489_v23  ;;  %v3607_v23 = vld [vmem:[#allocation12 + $0x13c8] sm:$0xff] }
 0x5a3   :  { %4439 = vmatmul.mubr.f32.vlgmr.msra.gmra.mrb[54].mxu0 %v10964_v46  ;;  %v8270_v53 = vpack.c.bf16 %v3498_v30, %v3486_v26  ;;  %v3619_v24 = vld [vmem:[#allocation12 + $0x1428] sm:$0xff]  ;;  %v8414_v26 = vpack.c.bf16 %v3596_v42, %v3584_v45  ;;  %v3702_v45 = vld [vmem:[#allocation12 + $0x16c0] sm:$0xff]  ;;  %v3704_v42 = vld [vmem:[#allocation12 + $0x16d0] sm:$0xff] }
 0x5a4   :  { %4581 = vmatmul.mubr.f32.vlgmr.msra.gmra.mrb[46].mxu1 %v10964_v46  ;;  %8251 = vmatpush1.bf16.msra.mxu0 %v8250_v32  ;;  %v3453_v46 = vld [vmem:[#allocation12 + $0xef8] sm:$0xff]  ;;  %v3511_v32 = vld [vmem:[#allocation12 + $0x10c8] sm:$0xff]  ;;  %v8288_v30 = vpack.c.bf16 %v3619_v24, %v3607_v23  ;;  %v3716_v24 = vld [vmem:[#allocation12 + $0x1730] sm:$0xff] }
 0x5a5   :  { %4509 = vmatprep.mubr.f32.mxu0 %v10970_v52  ;;  %8379 = vmatpush1.bf16.msra.mxu1 %v8378_v50  ;;  %v8388_v10 = vpack.c.bf16 %v3453_v46, %v3441_v2  ;;  %v3525_v50 = vld [vmem:[#allocation12 + $0x1138] sm:$0xff]  ;;  %v8272_v41 = vpack.c.bf16 %v3523_v34, %v3511_v32  ;;  %v3559_v2 = vld [vmem:[#allocation12 + $0x1248] sm:$0xff]  ;;  %v3620_v34 = vld [vmem:[#allocation12 + $0x1430] sm:$0xff] }
 0x5a6   :  { %4651 = vmatprep.mubr.f32.mxu1 %v10970_v52  ;;  %8253 = vmatprep.subr.bf16.mxu0 %v8252_v44  ;;  %v3452_v52 = vld [vmem:[#allocation12 + $0xef0] sm:$0xff]  ;;  %v3510_v44 = vld [vmem:[#allocation12 + $0x10c0] sm:$0xff]  ;;  %v8400_v48 = vpack.c.bf16 %v3525_v50, %v3513_v37  ;;  %v3571_v46 = vld [vmem:[#allocation12 + $0x12a8] sm:$0xff] }
 0x5a7   :  { %8381 = vmatprep.subr.bf16.mxu1 %v8380_v29  ;;  %v8390_v36 = vpack.c.bf16 %v3452_v52, %v3440_v9  ;;  %v3524_v29 = vld [vmem:[#allocation12 + $0x1130] sm:$0xff]  ;;  %v8280_v8 = vpack.c.bf16 %v3571_v46, %v3559_v2  ;;  %v3558_v9 = vld [vmem:[#allocation12 + $0x1240] sm:$0xff]  ;;  %v3631_v37 = vld [vmem:[#allocation12 + $0x1488] sm:$0xff] }
 0x5a8   :  { %8255 = vmatpush1.bf16.msra.mxu0 %v8254_v11  ;;  %v3537_v11 = vld [vmem:[#allocation12 + $0x1198] sm:$0xff]  ;;  %v8402_v57 = vpack.c.bf16 %v3524_v29, %v3512_v38  ;;  %v3560_v52 = vld [vmem:[#allocation12 + $0x1250] sm:$0xff]  ;;  %v3643_v50 = vld [vmem:[#allocation12 + $0x14e8] sm:$0xff] }
 0x5a9   :  { %8383 = vmatpush1.bf16.msra.mxu1 %v8382_v54  ;;  %8257 = vmatprep.subr.bf16.mxu0 %v8256_v55  ;;  %v3549_v54 = vld [vmem:[#allocation12 + $0x11f8] sm:$0xff]  ;;  %v8274_v55 = vpack.c.bf16 %v3522_v47, %v3510_v44  ;;  %v8410_v16 = vpack.c.bf16 %v3572_v12, %v3560_v52  ;;  %v8418_v44 = vpack.c.bf16 %v3620_v34, %v3608_v31  ;;  %v3630_v38 = vld [vmem:[#allocation12 + $0x1480] sm:$0xff]  ;;  %v3632_v29 = vld [vmem:[#allocation12 + $0x1490] sm:$0xff] }
 0x5aa   :  { %8385 = vmatprep.subr.bf16.mxu1 %v8384_v43  ;;  %v3546_v43 = vld [vmem:[#allocation12 + $0x11e0] sm:$0xff]  ;;  %v8404_v58 = vpack.c.bf16 %v3549_v54, %v3537_v11  ;;  %v8292_v47 = vpack.c.bf16 %v3643_v50, %v3631_v37  ;;  %v3655_v11 = vld [vmem:[#allocation12 + $0x1548] sm:$0xff]  ;;  %v3668_v46 = vld [vmem:[#allocation12 + $0x15b0] sm:$0xff] }
 0x5ab   :  { %v3667_v54 = vld [vmem:[#allocation12 + $0x15a8] sm:$0xff]  ;;  %v3678_v52 = vld [vmem:[#allocation12 + $0x1600] sm:$0xff]  ;;  %v3680_v12 = vld [vmem:[#allocation12 + $0x1610] sm:$0xff] }
 0x5ac   :  { %8259 = vmatpush1.bf16.msra.mxu0 %v8258_v19  ;;  %v3561_v19 = vld [vmem:[#allocation12 + $0x1258] sm:$0xff]  ;;  %v3726_v31 = vld [vmem:[#allocation12 + $0x1780] sm:$0xff]  ;;  %v3728_v34 = vld [vmem:[#allocation12 + $0x1790] sm:$0xff] }
 0x5ad   :  { %8387 = vmatpush1.bf16.msra.mxu1 %v8386_v35  ;;  %8261 = vmatprep.subr.bf16.mxu0 %v8260_v51  ;;  %v3573_v35 = vld [vmem:[#allocation12 + $0x12b8] sm:$0xff]  ;;  %v8278_v51 = vpack.c.bf16 %v3546_v43, %v3534_v17  ;;  %v8422_v17 = vpack.c.bf16 %v3644_v33, %v3632_v29  ;;  %v8296_v43 = vpack.c.bf16 %v3667_v54, %v3655_v11  ;;  %v3740_v50 = vld [vmem:[#allocation12 + $0x17f0] sm:$0xff] }
 0x5ae   :  { %8389 = vmatprep.subr.bf16.mxu1 %v8388_v10  ;;  %v3570_v10 = vld [vmem:[#allocation12 + $0x12a0] sm:$0xff]  ;;  %v8408_v4 = vpack.c.bf16 %v3573_v35, %v3561_v19  ;;  %v3679_v19 = vld [vmem:[#allocation12 + $0x1608] sm:$0xff] }
 0x5af   :  { %v3691_v35 = vld [vmem:[#allocation12 + $0x1668] sm:$0xff]  ;;  %v4663_v33 = vld [vmem:[#allocation15 + $0x10] sm:$0xff] }
 0x5b0   :  { %8263 = vmatpush1.bf16.msra.mxu0 %v8262_v13  ;;  %v3585_v13 = vld [vmem:[#allocation12 + $0x1318] sm:$0xff]  ;;  %v4661_v29 = vld [vmem:[#allocation15] sm:$0xff] }
 0x5b1   :  { %8391 = vmatpush1.bf16.msra.mxu1 %v8390_v36  ;;  %8265 = vmatprep.subr.bf16.mxu0 %v8264_v14  ;;  %v3597_v36 = vld [vmem:[#allocation12 + $0x1378] sm:$0xff]  ;;  %v8282_v14 = vpack.c.bf16 %v3570_v10, %v3558_v9  ;;  %v8426_v9 = vpack.c.bf16 %v3668_v46, %v3656_v62  ;;  %v8300_v10 = vpack.c.bf16 %v3691_v35, %v3679_v19  ;;  %v4669_v54 = vld [vmem:[#allocation15 + $0x40] sm:$0xff] }
 0x5b2   :  { %8393 = vmatprep.subr.bf16.mxu1 %v8392_v21  ;;  %v3594_v21 = vld [vmem:[#allocation12 + $0x1360] sm:$0xff]  ;;  %v8412_v22 = vpack.c.bf16 %v3597_v36, %v3585_v13  ;;  %v3703_v13 = vld [vmem:[#allocation12 + $0x16c8] sm:$0xff] }
 0x5b3   :  { %v3715_v36 = vld [vmem:[#allocation12 + $0x1728] sm:$0xff]  ;;  %v4679_v46 = vld [vmem:[#allocation15 + $0x90] sm:$0xff] }
 0x5b4   :  { %8267 = vmatpush1.bf16.msra.mxu0 %v8266_v39  ;;  %v3609_v39 = vld [vmem:[#allocation12 + $0x13d8] sm:$0xff] }
 0x5b5   :  { %8395 = vmatpush1.bf16.msra.mxu1 %v8394_v25  ;;  %8269 = vmatprep.subr.bf16.mxu0 %v8268_v40  ;;  %v3621_v25 = vld [vmem:[#allocation12 + $0x1438] sm:$0xff]  ;;  %v8286_v40 = vpack.c.bf16 %v3594_v21, %v3582_v20  ;;  %v8430_v20 = vpack.c.bf16 %v3692_v59, %v3680_v12  ;;  %v8304_v21 = vpack.c.bf16 %v3715_v36, %v3703_v13  ;;  %v4685_v59 = vld [vmem:[#allocation15 + $0xc0] sm:$0xff] }
 0x5b6   :  { %8397 = vmatprep.subr.bf16.mxu1 %v8396_v3  ;;  %v3618_v3 = vld [vmem:[#allocation12 + $0x1420] sm:$0xff]  ;;  %v8416_v32 = vpack.c.bf16 %v3621_v25, %v3609_v39  ;;  %v3727_v39 = vld [vmem:[#allocation12 + $0x1788] sm:$0xff] }
 0x5b7   :  { %v3739_v25 = vld [vmem:[#allocation12 + $0x17e8] sm:$0xff]  ;;  %v4675_v19 = vld [vmem:[#allocation15 + $0x70] sm:$0xff] }
 0x5b8   :  { %8271 = vmatpush1.bf16.msra.mxu0 %v8270_v53  ;;  %v3633_v53 = vld [vmem:[#allocation12 + $0x1498] sm:$0xff] }
 0x5b9   :  { %8399 = vmatpush1.bf16.msra.mxu1 %v8398_v1  ;;  %8273 = vmatprep.subr.bf16.mxu0 %v8272_v41  ;;  %v3645_v1 = vld [vmem:[#allocation12 + $0x14f8] sm:$0xff]  ;;  %v8290_v41 = vpack.c.bf16 %v3618_v3, %v3606_v61  ;;  %v8434_v61 = vpack.c.bf16 %v3716_v24, %v3704_v42  ;;  %v8308_v3 = vpack.c.bf16 %v3739_v25, %v3727_v39 }
 0x5ba   :  { %8401 = vmatprep.subr.bf16.mxu1 %v8400_v48  ;;  %v3642_v48 = vld [vmem:[#allocation12 + $0x14e0] sm:$0xff]  ;;  %v8420_v49 = vpack.c.bf16 %v3645_v1, %v3633_v53  ;;  %v4662_v53 = vld [vmem:[#allocation15 + $0x8] sm:$0xff] }
 0x5bb   :  { %v4668_v1 = vld [vmem:[#allocation15 + $0x38] sm:$0xff]  ;;  %v4691_v13 = vld [vmem:[#allocation15 + $0xf0] sm:$0xff] }
 0x5bc   :  { %8275 = vmatpush1.bf16.msra.mxu0 %v8274_v55  ;;  %v3657_v55 = vld [vmem:[#allocation12 + $0x1558] sm:$0xff] }
 0x5bd   :  { %8403 = vmatpush1.bf16.msra.mxu1 %v8402_v57  ;;  %8277 = vmatprep.subr.bf16.mxu0 %v8276_v0  ;;  %v3669_v57 = vld [vmem:[#allocation12 + $0x15b8] sm:$0xff]  ;;  %v8294_v0 = vpack.c.bf16 %v3642_v48, %v3630_v38  ;;  %v8438_v38 = vpack.c.bf16 %v3740_v50, %v3728_v34  ;;  %v8440_v48 = vpack.c.bf16 %v4668_v1, %v4662_v53 }
 0x5be   :  { %8405 = vmatprep.subr.bf16.mxu1 %v8404_v58  ;;  %v3666_v58 = vld [vmem:[#allocation12 + $0x15a0] sm:$0xff]  ;;  %v8424_v2 = vpack.c.bf16 %v3669_v57, %v3657_v55  ;;  %v4674_v55 = vld [vmem:[#allocation15 + $0x68] sm:$0xff] }
 0x5bf   :  { %v4680_v57 = vld [vmem:[#allocation15 + $0x98] sm:$0xff]  ;;  %v4687_v36 = vld [vmem:[#allocation15 + $0xd0] sm:$0xff] }
 0x5c0   :  { %8279 = vmatpush1.bf16.msra.mxu0 %v8278_v51  ;;  %v3681_v51 = vld [vmem:[#allocation12 + $0x1618] sm:$0xff]  ;;  %v8444_v62 = vpack.c.bf16 %v4680_v57, %v4674_v55 }
 0x5c1   :  { %8407 = vmatpush1.bf16.msra.mxu1 %v8406_v5  ;;  %8281 = vmatprep.subr.bf16.mxu0 %v8280_v8  ;;  %v3693_v5 = vld [vmem:[#allocation12 + $0x1678] sm:$0xff]  ;;  %v8298_v8 = vpack.c.bf16 %v3666_v58, %v3654_v60  ;;  %v8506_v58 = vpack.c.bf16 %v4669_v54, %v4663_v33 }
 0x5c2   :  { %8409 = vmatprep.subr.bf16.mxu1 %v8408_v4  ;;  %v3690_v4 = vld [vmem:[#allocation12 + $0x1660] sm:$0xff]  ;;  %v8428_v28 = vpack.c.bf16 %v3693_v5, %v3681_v51  ;;  %v4681_v51 = vld [vmem:[#allocation15 + $0xa0] sm:$0xff]  ;;  %v4686_v5 = vld [vmem:[#allocation15 + $0xc8] sm:$0xff] }
 0x5c3   :  { %v8510_v12 = vpack.c.bf16 %v4681_v51, %v4675_v19  ;;  %v4703_v24 = vld [vmem:[#allocation15 + $0x150] sm:$0xff] }
 0x5c4   :  { %8283 = vmatpush1.bf16.msra.mxu0 %v8282_v14  ;;  %v3705_v14 = vld [vmem:[#allocation12 + $0x16d8] sm:$0xff] }
 0x5c5   :  { %8411 = vmatpush1.bf16.msra.mxu1 %v8410_v16  ;;  %8285 = vmatprep.subr.bf16.mxu0 %v8284_v18  ;;  %v3717_v16 = vld [vmem:[#allocation12 + $0x1738] sm:$0xff]  ;;  %v8302_v18 = vpack.c.bf16 %v3690_v4, %v3678_v52 }
 0x5c6   :  { %8413 = vmatprep.subr.bf16.mxu1 %v8412_v22  ;;  %v3714_v22 = vld [vmem:[#allocation12 + $0x1720] sm:$0xff]  ;;  %v8432_v23 = vpack.c.bf16 %v3717_v16, %v3705_v14  ;;  %v4694_v52 = vld [vmem:[#allocation15 + $0x108] sm:$0xff]  ;;  %v4693_v16 = vld [vmem:[#allocation15 + $0x100] sm:$0xff] }
 0x5c7   :  { %v4699_v39 = vld [vmem:[#allocation15 + $0x130] sm:$0xff] }
 0x5c8   :  { %8287 = vmatpush1.bf16.msra.mxu0 %v8286_v40  ;;  %v3729_v40 = vld [vmem:[#allocation12 + $0x1798] sm:$0xff] }
 0x5c9   :  { %8415 = vmatpush1.bf16.msra.mxu1 %v8414_v26  ;;  %8289 = vmatprep.subr.bf16.mxu0 %v8288_v30  ;;  %v3741_v26 = vld [vmem:[#allocation12 + $0x17f8] sm:$0xff]  ;;  %v8306_v30 = vpack.c.bf16 %v3714_v22, %v3702_v45  ;;  %v8514_v22 = vpack.c.bf16 %v4693_v16, %v4687_v36 }
 0x5ca   :  { %8417 = vmatprep.subr.bf16.mxu1 %v8416_v32  ;;  %v3738_v32 = vld [vmem:[#allocation12 + $0x17e0] sm:$0xff]  ;;  %v8436_v37 = vpack.c.bf16 %v3741_v26, %v3729_v40  ;;  %v4706_v45 = vld [vmem:[#allocation15 + $0x168] sm:$0xff]  ;;  %v4705_v40 = vld [vmem:[#allocation15 + $0x160] sm:$0xff] }
 0x5cb   :  { %v4710_v26 = vld [vmem:[#allocation15 + $0x188] sm:$0xff]  ;;  %v4715_v50 = vld [vmem:[#allocation15 + $0x1b0] sm:$0xff] }
 0x5cc   :  { %8291 = vmatpush1.bf16.msra.mxu0 %v8290_v41  ;;  %v4664_v41 = vld [vmem:[#allocation15 + $0x18] sm:$0xff]  ;;  %v4711_v53 = vld [vmem:[#allocation15 + $0x190] sm:$0xff] }
 0x5cd   :  { %8419 = vmatpush1.bf16.msra.mxu1 %v8418_v44  ;;  %8293 = vmatprep.subr.bf16.mxu0 %v8292_v47  ;;  %v4670_v44 = vld [vmem:[#allocation15 + $0x48] sm:$0xff]  ;;  %v8310_v47 = vpack.c.bf16 %v3738_v32, %v3726_v31  ;;  %v8518_v32 = vpack.c.bf16 %v4705_v40, %v4699_v39  ;;  %v4727_v54 = vld [vmem:[#allocation15 + $0x210] sm:$0xff] }
 0x5ce   :  { %8421 = vmatprep.subr.bf16.mxu1 %v8420_v49  ;;  %v4667_v49 = vld [vmem:[#allocation15 + $0x30] sm:$0xff]  ;;  %v8504_v11 = vpack.c.bf16 %v4670_v44, %v4664_v41  ;;  %v4717_v41 = vld [vmem:[#allocation15 + $0x1c0] sm:$0xff]  ;;  %v4722_v44 = vld [vmem:[#allocation15 + $0x1e8] sm:$0xff] }
 0x5cf   :  { %v8442_v60 = vpack.c.bf16 %v4667_v49, %v4661_v29  ;;  %v8522_v49 = vpack.c.bf16 %v4717_v41, %v4711_v53  ;;  %v4723_v55 = vld [vmem:[#allocation15 + $0x1f0] sm:$0xff] }
 0x5d0   :  { %8295 = vmatpush1.bf16.msra.mxu0 %v8294_v0  ;;  %v4676_v0 = vld [vmem:[#allocation15 + $0x78] sm:$0xff]  ;;  %v4739_v51 = vld [vmem:[#allocation15 + $0x270] sm:$0xff] }
 0x5d1   :  { %8423 = vmatpush1.bf16.msra.mxu1 %v8422_v17  ;;  %8297 = vmatprep.subr.bf16.mxu0 %v8296_v43  ;;  %v4682_v17 = vld [vmem:[#allocation15 + $0xa8] sm:$0xff]  ;;  %v4751_v16 = vld [vmem:[#allocation15 + $0x2d0] sm:$0xff] }
 0x5d2   :  { %8425 = vmatprep.subr.bf16.mxu1 %v8424_v2  ;;  %v11003_v43 = vld.sshfl [vmem:[#allocation4] sm:$0x33 pattern:$0x76325410]  ;;  %v8508_v35 = vpack.c.bf16 %v4682_v17, %v4676_v0  ;;  %v4763_v40 = vld [vmem:[#allocation15 + $0x330] sm:$0xff] }
 0x5d3   :  { %v4673_v2 = vld [vmem:[#allocation15 + $0x60] sm:$0xff]  ;;  %v4734_v17 = vld [vmem:[#allocation15 + $0x248] sm:$0xff]  ;;  %v4775_v41 = vld [vmem:[#allocation15 + $0x390] sm:$0xff] }
 0x5d4   :  { %8299 = vmatpush1.bf16.msra.mxu0 %v8298_v8  ;;  %v4692_v8 = vld [vmem:[#allocation15 + $0xf8] sm:$0xff]  ;;  %v8446_v4 = vpack.c.bf16 %v4679_v46, %v4673_v2  ;;  %v4729_v0 = vld [vmem:[#allocation15 + $0x220] sm:$0xff] }
 0x5d5   :  { %8427 = vmatpush1.bf16.msra.mxu1 %v8426_v9  ;;  %8301 = vmatprep.subr.bf16.mxu0 %v8300_v10  ;;  %v11007_v9 = vcombine.high %v11003_v43, %v11003_v43  ;;  %v4688_v10 = vld [vmem:[#allocation15 + $0xd8] sm:$0xff]  ;;  %v8526_v46 = vpack.c.bf16 %v4729_v0, %v4723_v55  ;;  %v4787_v0 = vld [vmem:[#allocation15 + $0x3f0] sm:$0xff] }
 0x5d6   :  { %8429 = vmatprep.subr.bf16.mxu1 %v8428_v28  ;;  %v8448_v28 = vpack.c.bf16 %v4692_v8, %v4686_v5  ;;  %v8512_v14 = vpack.c.bf16 %v4694_v52, %v4688_v10  ;;  %v4735_v5 = vld [vmem:[#allocation15 + $0x250] sm:$0xff]  ;;  %v4741_v10 = vld [vmem:[#allocation15 + $0x280] sm:$0xff]  ;;  %v4746_v52 = vld [vmem:[#allocation15 + $0x2a8] sm:$0xff] }
 0x5d8   :  { %8303 = vmatpush1.bf16.msra.mxu0 %v8302_v18  ;;  %v4698_v18 = vld [vmem:[#allocation15 + $0x128] sm:$0xff] }
 0x5d9   :  { %8431 = vmatpush1.bf16.msra.mxu1 %v8430_v20  ;;  %8305 = vmatprep.subr.bf16.mxu0 %v8304_v21  ;;  %v4704_v20 = vld [vmem:[#allocation15 + $0x158] sm:$0xff] }
 0x5da   :  { %8433 = vmatprep.subr.bf16.mxu1 %v8432_v23  ;;  %v4700_v21 = vld [vmem:[#allocation15 + $0x138] sm:$0xff]  ;;  %v8452_v42 = vpack.c.bf16 %v4704_v20, %v4698_v18  ;;  %v4697_v23 = vld [vmem:[#allocation15 + $0x120] sm:$0xff]  ;;  %v4747_v18 = vld [vmem:[#allocation15 + $0x2b0] sm:$0xff] }
 0x5db   :  { %v8516_v25 = vpack.c.bf16 %v4706_v45, %v4700_v21  ;;  %v8454_v31 = vpack.c.bf16 %v4703_v24, %v4697_v23  ;;  %v4753_v21 = vld [vmem:[#allocation15 + $0x2e0] sm:$0xff]  ;;  %v4758_v45 = vld [vmem:[#allocation15 + $0x308] sm:$0xff] }
 0x5dc   :  { %8307 = vmatpush1.bf16.msra.mxu0 %v8306_v30  ;;  %v4716_v30 = vld [vmem:[#allocation15 + $0x1b8] sm:$0xff]  ;;  %v8534_v24 = vpack.c.bf16 %v4753_v21, %v4747_v18  ;;  %v4811_v21 = vld [vmem:[#allocation15 + $0x4b0] sm:$0xff] }
 0x5dd   :  { %8435 = vmatpush1.bf16.msra.mxu1 %v8434_v61  ;;  %8309 = vmatprep.subr.bf16.mxu0 %v8308_v3  ;;  %v4712_v61 = vld [vmem:[#allocation15 + $0x198] sm:$0xff]  ;;  %v4718_v3 = vld [vmem:[#allocation15 + $0x1c8] sm:$0xff]  ;;  %v8456_v34 = vpack.c.bf16 %v4716_v30, %v4710_v26  ;;  %v4759_v26 = vld [vmem:[#allocation15 + $0x310] sm:$0xff] }
 0x5de   :  { %8437 = vmatprep.subr.bf16.mxu1 %v8436_v37  ;;  %v4709_v37 = vld [vmem:[#allocation15 + $0x180] sm:$0xff]  ;;  %v8520_v1 = vpack.c.bf16 %v4718_v3, %v4712_v61  ;;  %v4770_v3 = vld [vmem:[#allocation15 + $0x368] sm:$0xff] }
 0x5df   :  { %v8458_v29 = vpack.c.bf16 %v4715_v50, %v4709_v37  ;;  %v4765_v61 = vld [vmem:[#allocation15 + $0x340] sm:$0xff] }
 0x5e0   :  { %8311 = vmatpush1.bf16.msra.mxu0 %v8310_v47  ;;  %v4728_v47 = vld [vmem:[#allocation15 + $0x218] sm:$0xff]  ;;  %v8538_v50 = vpack.c.bf16 %v4765_v61, %v4759_v26  ;;  %v4823_v61 = vld [vmem:[#allocation15 + $0x510] sm:$0xff] }
 0x5e1   :  { %8439 = vmatpush1.bf16.msra.mxu1 %v8438_v38  ;;  %8441 = vmatprep.subr.bf16.mxu0 %v8440_v48  ;;  %v4724_v38 = vld [vmem:[#allocation15 + $0x1f8] sm:$0xff]  ;;  %v4730_v48 = vld [vmem:[#allocation15 + $0x228] sm:$0xff]  ;;  %v8460_v33 = vpack.c.bf16 %v4728_v47, %v4722_v44  ;;  %v4771_v44 = vld [vmem:[#allocation15 + $0x370] sm:$0xff] }
 0x5e2   :  { %8505 = vmatprep.subr.bf16.mxu1 %v8504_v11  ;;  %v4721_v11 = vld [vmem:[#allocation15 + $0x1e0] sm:$0xff]  ;;  %v8524_v57 = vpack.c.bf16 %v4730_v48, %v4724_v38  ;;  %v4782_v48 = vld [vmem:[#allocation15 + $0x3c8] sm:$0xff] }
 0x5e3   :  { %4510 = vmatmul.mubr.f32.vlgmr.msra.gmra.mrb[54].mxu0 %v10985_v15  ;;  %v8462_v2 = vpack.c.bf16 %v4727_v54, %v4721_v11  ;;  %v4777_v38 = vld [vmem:[#allocation15 + $0x3a0] sm:$0xff] }
 0x5e4   :  { %4652 = vmatmul.mubr.f32.vlgmr.msra.gmra.mrb[46].mxu1 %v10985_v15  ;;  %8443 = vmatpush1.bf16.msra.mxu0 %v8442_v60  ;;  %v8450_v15 = vpack.c.bf16 %v4691_v13, %v4685_v59  ;;  %v4740_v60 = vld [vmem:[#allocation15 + $0x278] sm:$0xff]  ;;  %v8530_v13 = vpack.c.bf16 %v4741_v10, %v4735_v5  ;;  %v8542_v54 = vpack.c.bf16 %v4777_v38, %v4771_v44  ;;  %v4799_v10 = vld [vmem:[#allocation15 + $0x450] sm:$0xff] }
 0x5e5   :  { %8507 = vmatpush1.bf16.msra.mxu1 %v8506_v58  ;;  %8445 = vmatprep.subr.bf16.mxu0 %v8444_v62  ;;  %v4736_v58 = vld [vmem:[#allocation15 + $0x258] sm:$0xff]  ;;  %v4742_v62 = vld [vmem:[#allocation15 + $0x288] sm:$0xff]  ;;  %v8464_v19 = vpack.c.bf16 %v4740_v60, %v4734_v17  ;;  %v4783_v17 = vld [vmem:[#allocation15 + $0x3d0] sm:$0xff] }
 0x5e6   :  { %8509 = vmatprep.subr.bf16.mxu1 %v8508_v35  ;;  %4960 = vmatprep.mubr.f32.mxu0 %v11007_v9  ;;  %v4733_v35 = vld [vmem:[#allocation15 + $0x240] sm:$0xff]  ;;  %v8528_v8 = vpack.c.bf16 %v4742_v62, %v4736_v58  ;;  %v4794_v62 = vld [vmem:[#allocation15 + $0x428] sm:$0xff]  ;;  %v4835_v38 = vld [vmem:[#allocation15 + $0x570] sm:$0xff] }
 0x5e7   :  { %5031 = vmatprep.mubr.f32.mxu1 %v11007_v9  ;;  %v8466_v59 = vpack.c.bf16 %v4739_v51, %v4733_v35  ;;  %v4789_v58 = vld [vmem:[#allocation15 + $0x400] sm:$0xff] }
 0x5e8   :  { %8447 = vmatpush1.bf16.msra.mxu0 %v8446_v4  ;;  %v4752_v4 = vld [vmem:[#allocation15 + $0x2d8] sm:$0xff]  ;;  %v8546_v51 = vpack.c.bf16 %v4789_v58, %v4783_v17  ;;  %v4847_v58 = vld [vmem:[#allocation15 + $0x5d0] sm:$0xff] }
 0x5e9   :  { %8511 = vmatpush1.bf16.msra.mxu1 %v8510_v12  ;;  %8449 = vmatprep.subr.bf16.mxu0 %v8448_v28  ;;  %v4748_v12 = vld [vmem:[#allocation15 + $0x2b8] sm:$0xff]  ;;  %v4754_v28 = vld [vmem:[#allocation15 + $0x2e8] sm:$0xff]  ;;  %v8468_v36 = vpack.c.bf16 %v4752_v4, %v4746_v52  ;;  %v4795_v52 = vld [vmem:[#allocation15 + $0x430] sm:$0xff] }
 0x5ea   :  { %8513 = vmatprep.subr.bf16.mxu1 %v8512_v14  ;;  %v4745_v14 = vld [vmem:[#allocation15 + $0x2a0] sm:$0xff]  ;;  %v8532_v20 = vpack.c.bf16 %v4754_v28, %v4748_v12  ;;  %v4806_v28 = vld [vmem:[#allocation15 + $0x488] sm:$0xff] }
 0x5eb   :  { %v8470_v23 = vpack.c.bf16 %v4751_v16, %v4745_v14  ;;  %v4801_v12 = vld [vmem:[#allocation15 + $0x460] sm:$0xff] }
 0x5ec   :  { %8451 = vmatpush1.bf16.msra.mxu0 %v8450_v15  ;;  %v4764_v15 = vld [vmem:[#allocation15 + $0x338] sm:$0xff]  ;;  %v8550_v16 = vpack.c.bf16 %v4801_v12, %v4795_v52  ;;  %v4671_v12 = vld [vmem:[#allocation15 + $0x50] sm:$0xff] }
 0x5ed   :  { %8515 = vmatpush1.bf16.msra.mxu1 %v8514_v22  ;;  %8453 = vmatprep.subr.bf16.mxu0 %v8452_v42  ;;  %v4760_v22 = vld [vmem:[#allocation15 + $0x318] sm:$0xff]  ;;  %v4766_v42 = vld [vmem:[#allocation15 + $0x348] sm:$0xff]  ;;  %v8472_v39 = vpack.c.bf16 %v4764_v15, %v4758_v45  ;;  %v4807_v45 = vld [vmem:[#allocation15 + $0x490] sm:$0xff] }
 0x5ee   :  { %8517 = vmatprep.subr.bf16.mxu1 %v8516_v25  ;;  %v4757_v25 = vld [vmem:[#allocation15 + $0x300] sm:$0xff]  ;;  %v8536_v30 = vpack.c.bf16 %v4766_v42, %v4760_v22  ;;  %v4818_v42 = vld [vmem:[#allocation15 + $0x4e8] sm:$0xff] }
 0x5ef   :  { %v8474_v37 = vpack.c.bf16 %v4763_v40, %v4757_v25  ;;  %v4813_v22 = vld [vmem:[#allocation15 + $0x4c0] sm:$0xff] }
 0x5f0   :  { %8455 = vmatpush1.bf16.msra.mxu0 %v8454_v31  ;;  %v4776_v31 = vld [vmem:[#allocation15 + $0x398] sm:$0xff]  ;;  %v8554_v40 = vpack.c.bf16 %v4813_v22, %v4807_v45  ;;  %v4677_v22 = vld [vmem:[#allocation15 + $0x80] sm:$0xff] }
 0x5f1   :  { %8519 = vmatpush1.bf16.msra.mxu1 %v8518_v32  ;;  %8457 = vmatprep.subr.bf16.mxu0 %v8456_v34  ;;  %v4772_v32 = vld [vmem:[#allocation15 + $0x378] sm:$0xff]  ;;  %v4778_v34 = vld [vmem:[#allocation15 + $0x3a8] sm:$0xff]  ;;  %v8476_v53 = vpack.c.bf16 %v4776_v31, %v4770_v3  ;;  %v4819_v3 = vld [vmem:[#allocation15 + $0x4f0] sm:$0xff] }
 0x5f2   :  { %8521 = vmatprep.subr.bf16.mxu1 %v8520_v1  ;;  %v4769_v1 = vld [vmem:[#allocation15 + $0x360] sm:$0xff]  ;;  %v8540_v47 = vpack.c.bf16 %v4778_v34, %v4772_v32  ;;  %v4830_v34 = vld [vmem:[#allocation15 + $0x548] sm:$0xff] }
 0x5f3   :  { %v8478_v11 = vpack.c.bf16 %v4775_v41, %v4769_v1  ;;  %v4825_v32 = vld [vmem:[#allocation15 + $0x520] sm:$0xff] }
 0x5f4   :  { %8459 = vmatpush1.bf16.msra.mxu0 %v8458_v29  ;;  %v4788_v29 = vld [vmem:[#allocation15 + $0x3f8] sm:$0xff]  ;;  %v8558_v41 = vpack.c.bf16 %v4825_v32, %v4819_v3 }
 0x5f5   :  { %8523 = vmatpush1.bf16.msra.mxu1 %v8522_v49  ;;  %8461 = vmatprep.subr.bf16.mxu0 %v8460_v33  ;;  %v4784_v49 = vld [vmem:[#allocation15 + $0x3d8] sm:$0xff]  ;;  %v4790_v33 = vld [vmem:[#allocation15 + $0x408] sm:$0xff]  ;;  %v8480_v55 = vpack.c.bf16 %v4788_v29, %v4782_v48  ;;  %v4831_v48 = vld [vmem:[#allocation15 + $0x550] sm:$0xff] }
 0x5f6   :  { %8525 = vmatprep.subr.bf16.mxu1 %v8524_v57  ;;  %v4781_v57 = vld [vmem:[#allocation15 + $0x3c0] sm:$0xff]  ;;  %v8544_v60 = vpack.c.bf16 %v4790_v33, %v4784_v49  ;;  %v4842_v33 = vld [vmem:[#allocation15 + $0x5a8] sm:$0xff] }
 0x5f7   :  { %v8482_v35 = vpack.c.bf16 %v4787_v0, %v4781_v57  ;;  %v4837_v49 = vld [vmem:[#allocation15 + $0x580] sm:$0xff] }
 0x5f8   :  { %8463 = vmatpush1.bf16.msra.mxu0 %v8462_v2  ;;  %v4800_v2 = vld [vmem:[#allocation15 + $0x458] sm:$0xff]  ;;  %v8562_v0 = vpack.c.bf16 %v4837_v49, %v4831_v48  ;;  %v4701_v49 = vld [vmem:[#allocation15 + $0x140] sm:$0xff] }
 0x5f9   :  { %8527 = vmatpush1.bf16.msra.mxu1 %v8526_v46  ;;  %8465 = vmatprep.subr.bf16.mxu0 %v8464_v19  ;;  %v4796_v46 = vld [vmem:[#allocation15 + $0x438] sm:$0xff]  ;;  %v4802_v19 = vld [vmem:[#allocation15 + $0x468] sm:$0xff]  ;;  %v8484_v5 = vpack.c.bf16 %v4800_v2, %v4794_v62  ;;  %v4843_v62 = vld [vmem:[#allocation15 + $0x5b0] sm:$0xff] }
 0x5fa   :  { %8529 = vmatprep.subr.bf16.mxu1 %v8528_v8  ;;  %v4793_v8 = vld [vmem:[#allocation15 + $0x420] sm:$0xff]  ;;  %v8548_v4 = vpack.c.bf16 %v4802_v19, %v4796_v46  ;;  %v4666_v19 = vld [vmem:[#allocation15 + $0x28] sm:$0xff] }
 0x5fb   :  { %v8486_v14 = vpack.c.bf16 %v4799_v10, %v4793_v8  ;;  %v4849_v46 = vld [vmem:[#allocation15 + $0x5e0] sm:$0xff] }
 0x5fc   :  { %8467 = vmatpush1.bf16.msra.mxu0 %v8466_v59  ;;  %v4812_v59 = vld [vmem:[#allocation15 + $0x4b8] sm:$0xff]  ;;  %v8566_v10 = vpack.c.bf16 %v4849_v46, %v4843_v62  ;;  %v4713_v46 = vld [vmem:[#allocation15 + $0x1a0] sm:$0xff] }
 0x5fd   :  { %8531 = vmatpush1.bf16.msra.mxu1 %v8530_v13  ;;  %8469 = vmatprep.subr.bf16.mxu0 %v8468_v36  ;;  %v4808_v13 = vld [vmem:[#allocation15 + $0x498] sm:$0xff]  ;;  %v4814_v36 = vld [vmem:[#allocation15 + $0x4c8] sm:$0xff]  ;;  %v8488_v18 = vpack.c.bf16 %v4812_v59, %v4806_v28 }
 0x5fe   :  { %8533 = vmatprep.subr.bf16.mxu1 %v8532_v20  ;;  %v4805_v20 = vld [vmem:[#allocation15 + $0x480] sm:$0xff]  ;;  %v8552_v15 = vpack.c.bf16 %v4814_v36, %v4808_v13  ;;  %v5115_v13 = vld [vmem:[#allocation18 + $0x30] sm:$0xff]  ;;  %v4678_v36 = vld [vmem:[#allocation15 + $0x88] sm:$0xff] }
 0x5ff   :  { %v8490_v25 = vpack.c.bf16 %v4811_v21, %v4805_v20  ;;  %v5109_v28 = vld [vmem:[#allocation18] sm:$0xff] }
 0x600   :  { %8471 = vmatpush1.bf16.msra.mxu0 %v8470_v23  ;;  %v4824_v23 = vld [vmem:[#allocation15 + $0x518] sm:$0xff]  ;;  %v11013_v21 = vld.sshfl [vmem:[#allocation4 + $0x4] sm:$0x33 pattern:$0x76325410]  ;;  %v8634_v45 = vpack.c.bf16 %v5115_v13, %v5109_v28  ;;  %v4725_v13 = vld [vmem:[#allocation15 + $0x200] sm:$0xff] }
 0x601   :  { %8535 = vmatpush1.bf16.msra.mxu1 %v8534_v24  ;;  %8473 = vmatprep.subr.bf16.mxu0 %v8472_v39  ;;  %v4820_v24 = vld [vmem:[#allocation15 + $0x4f8] sm:$0xff]  ;;  %v4826_v39 = vld [vmem:[#allocation15 + $0x528] sm:$0xff]  ;;  %v8492_v26 = vpack.c.bf16 %v4824_v23, %v4818_v42  ;;  %v4683_v42 = vld [vmem:[#allocation15 + $0xb0] sm:$0xff] }
 0x602   :  { %8537 = vmatprep.subr.bf16.mxu1 %v8536_v30  ;;  %v4817_v30 = vld [vmem:[#allocation15 + $0x4e0] sm:$0xff]  ;;  %v8556_v31 = vpack.c.bf16 %v4826_v39, %v4820_v24  ;;  %v5127_v39 = vld [vmem:[#allocation18 + $0x90] sm:$0xff]  ;;  %v8574_v3 = vpack.c.bf16 %v4683_v42, %v4677_v22 }
 0x603   :  { %v8494_v1 = vpack.c.bf16 %v4823_v61, %v4817_v30  ;;  %v5121_v23 = vld [vmem:[#allocation18 + $0x60] sm:$0xff]  ;;  %v5140_v30 = vld [vmem:[#allocation18 + $0xf8] sm:$0xff]  ;;  %v11018_v61 = vcombine.high %v11013_v21, %v11013_v21 }
 0x604   :  { %8475 = vmatpush1.bf16.msra.mxu0 %v8474_v37  ;;  %v4836_v37 = vld [vmem:[#allocation15 + $0x578] sm:$0xff] }
 0x605   :  { %8539 = vmatpush1.bf16.msra.mxu1 %v8538_v50  ;;  %8477 = vmatprep.subr.bf16.mxu0 %v8476_v53  ;;  %v4832_v50 = vld [vmem:[#allocation15 + $0x558] sm:$0xff]  ;;  %v4838_v53 = vld [vmem:[#allocation15 + $0x588] sm:$0xff]  ;;  %v8496_v44 = vpack.c.bf16 %v4836_v37, %v4830_v34  ;;  %v4689_v34 = vld [vmem:[#allocation15 + $0xe0] sm:$0xff] }
 0x606   :  { %8541 = vmatprep.subr.bf16.mxu1 %v8540_v47  ;;  %v4829_v47 = vld [vmem:[#allocation15 + $0x540] sm:$0xff]  ;;  %v8560_v29 = vpack.c.bf16 %v4838_v53, %v4832_v50  ;;  %v4695_v37 = vld [vmem:[#allocation15 + $0x110] sm:$0xff] }
 0x607   :  { %v8498_v57 = vpack.c.bf16 %v4835_v38, %v4829_v47  ;;  %v5133_v50 = vld [vmem:[#allocation18 + $0xc0] sm:$0xff]  ;;  %v5146_v47 = vld [vmem:[#allocation18 + $0x128] sm:$0xff]  ;;  %v5152_v38 = vld [vmem:[#allocation18 + $0x158] sm:$0xff] }
 0x608   :  { %8479 = vmatpush1.bf16.msra.mxu0 %v8478_v11  ;;  %v4848_v11 = vld [vmem:[#allocation15 + $0x5d8] sm:$0xff] }
 0x609   :  { %8543 = vmatpush1.bf16.msra.mxu1 %v8542_v54  ;;  %8481 = vmatprep.subr.bf16.mxu0 %v8480_v55  ;;  %v4844_v54 = vld [vmem:[#allocation15 + $0x5b8] sm:$0xff]  ;;  %v4850_v55 = vld [vmem:[#allocation15 + $0x5e8] sm:$0xff]  ;;  %v8500_v17 = vpack.c.bf16 %v4848_v11, %v4842_v33  ;;  %v4707_v33 = vld [vmem:[#allocation15 + $0x170] sm:$0xff] }
 0x60a   :  { %8545 = vmatprep.subr.bf16.mxu1 %v8544_v60  ;;  %v4841_v60 = vld [vmem:[#allocation15 + $0x5a0] sm:$0xff]  ;;  %v8564_v2 = vpack.c.bf16 %v4850_v55, %v4844_v54  ;;  %v8644_v54 = vpack.c.bf16 %v5152_v38, %v5146_v47  ;;  %v5151_v55 = vld [vmem:[#allocation18 + $0x150] sm:$0xff] }
 0x60b   :  { %v8502_v8 = vpack.c.bf16 %v4847_v58, %v4841_v60  ;;  %v5145_v11 = vld [vmem:[#allocation18 + $0x120] sm:$0xff]  ;;  %v5164_v60 = vld [vmem:[#allocation18 + $0x1b8] sm:$0xff]  ;;  %v8582_v58 = vpack.c.bf16 %v4707_v33, %v4701_v49  ;;  %v4755_v47 = vld [vmem:[#allocation15 + $0x2f0] sm:$0xff] }
 0x60c   :  { %8483 = vmatpush1.bf16.msra.mxu0 %v8482_v35  ;;  %v4672_v35 = vld [vmem:[#allocation15 + $0x58] sm:$0xff]  ;;  %v8646_v62 = vpack.c.bf16 %v5151_v55, %v5145_v11  ;;  %v5193_v38 = vld [vmem:[#allocation18 + $0x2a0] sm:$0xff]  ;;  %v5206_v33 = vld [vmem:[#allocation18 + $0x308] sm:$0xff] }
 0x60d   :  { %8547 = vmatpush1.bf16.msra.mxu1 %v8546_v51  ;;  %8485 = vmatprep.subr.bf16.mxu0 %v8484_v5  ;;  %v5110_v51 = vld [vmem:[#allocation18 + $0x8] sm:$0xff]  ;;  %v5116_v5 = vld [vmem:[#allocation18 + $0x38] sm:$0xff]  ;;  %v8568_v52 = vpack.c.bf16 %v4672_v35, %v4666_v19  ;;  %v5157_v35 = vld [vmem:[#allocation18 + $0x180] sm:$0xff] }
 0x60e   :  { %8549 = vmatprep.subr.bf16.mxu1 %v8548_v4  ;;  %v4665_v4 = vld [vmem:[#allocation15 + $0x20] sm:$0xff]  ;;  %v8632_v59 = vpack.c.bf16 %v5116_v5, %v5110_v51  ;;  %v4719_v19 = vld [vmem:[#allocation15 + $0x1d0] sm:$0xff]  ;;  %v4768_v49 = vld [vmem:[#allocation15 + $0x358] sm:$0xff] }
 0x60f   :  { %v8570_v20 = vpack.c.bf16 %v4671_v12, %v4665_v4  ;;  %v5163_v5 = vld [vmem:[#allocation18 + $0x1b0] sm:$0xff]  ;;  %v5176_v4 = vld [vmem:[#allocation18 + $0x218] sm:$0xff]  ;;  %v8586_v12 = vpack.c.bf16 %v4719_v19, %v4713_v46  ;;  %v5218_v19 = vld [vmem:[#allocation18 + $0x368] sm:$0xff] }
 0x610   :  { %8487 = vmatpush1.bf16.msra.mxu0 %v8486_v14  ;;  %v4684_v14 = vld [vmem:[#allocation15 + $0xb8] sm:$0xff]  ;;  %v8650_v28 = vpack.c.bf16 %v5163_v5, %v5157_v35 }
 0x611   :  { %8551 = vmatpush1.bf16.msra.mxu1 %v8550_v16  ;;  %8489 = vmatprep.subr.bf16.mxu0 %v8488_v18  ;;  %v5122_v16 = vld [vmem:[#allocation18 + $0x68] sm:$0xff]  ;;  %v5128_v18 = vld [vmem:[#allocation18 + $0x98] sm:$0xff] }
 0x612   :  { %8553 = vmatprep.subr.bf16.mxu1 %v8552_v15  ;;  %v8572_v15 = vpack.c.bf16 %v4684_v14, %v4678_v36  ;;  %v8636_v24 = vpack.c.bf16 %v5128_v18, %v5122_v16  ;;  %v4731_v36 = vld [vmem:[#allocation15 + $0x230] sm:$0xff]  ;;  %v5169_v14 = vld [vmem:[#allocation18 + $0x1e0] sm:$0xff]  ;;  %v5188_v22 = vld [vmem:[#allocation18 + $0x278] sm:$0xff] }
 0x613   :  { %v5175_v18 = vld [vmem:[#allocation18 + $0x210] sm:$0xff]  ;;  %v8590_v42 = vpack.c.bf16 %v4731_v36, %v4725_v13  ;;  %v5212_v11 = vld [vmem:[#allocation18 + $0x338] sm:$0xff]  ;;  %v5230_v36 = vld [vmem:[#allocation18 + $0x3c8] sm:$0xff] }
 0x614   :  { %8491 = vmatpush1.bf16.msra.mxu0 %v8490_v25  ;;  %v4690_v25 = vld [vmem:[#allocation15 + $0xe8] sm:$0xff]  ;;  %v4780_v46 = vld [vmem:[#allocation15 + $0x3b8] sm:$0xff] }
 0x615   :  { %8555 = vmatpush1.bf16.msra.mxu1 %v8554_v40  ;;  %8493 = vmatprep.subr.bf16.mxu0 %v8492_v26  ;;  %v4696_v40 = vld [vmem:[#allocation15 + $0x118] sm:$0xff]  ;;  %v5134_v26 = vld [vmem:[#allocation18 + $0xc8] sm:$0xff] }
 0x616   :  { %8557 = vmatprep.subr.bf16.mxu1 %v8556_v31  ;;  %v8638_v31 = vpack.c.bf16 %v5127_v39, %v5121_v23  ;;  %v8576_v32 = vpack.c.bf16 %v4696_v40, %v4690_v25  ;;  %v8640_v53 = vpack.c.bf16 %v5140_v30, %v5134_v26  ;;  %v8654_v23 = vpack.c.bf16 %v5175_v18, %v5169_v14  ;;  %v4737_v39 = vld [vmem:[#allocation15 + $0x260] sm:$0xff]  ;;  %v4743_v25 = vld [vmem:[#allocation15 + $0x290] sm:$0xff]  ;;  %v4792_v13 = vld [vmem:[#allocation15 + $0x418] sm:$0xff] }
 0x617   :  { %v5181_v40 = vld [vmem:[#allocation18 + $0x240] sm:$0xff]  ;;  %v5224_v35 = vld [vmem:[#allocation18 + $0x398] sm:$0xff] }
 0x618   :  { %8495 = vmatpush1.bf16.msra.mxu0 %v8494_v1  ;;  %v5139_v1 = vld [vmem:[#allocation18 + $0xf0] sm:$0xff]  ;;  %v5236_v14 = vld [vmem:[#allocation18 + $0x3f8] sm:$0xff] }
 0x619   :  { %8559 = vmatpush1.bf16.msra.mxu1 %v8558_v41  ;;  %8497 = vmatprep.subr.bf16.mxu0 %v8496_v44  ;;  %v4702_v41 = vld [vmem:[#allocation15 + $0x148] sm:$0xff]  ;;  %v4708_v44 = vld [vmem:[#allocation15 + $0x178] sm:$0xff]  ;;  %v8642_v48 = vpack.c.bf16 %v5139_v1, %v5133_v50 }
 0x61a   :  { %8561 = vmatprep.subr.bf16.mxu1 %v8560_v29  ;;  %v8580_v29 = vpack.c.bf16 %v4708_v44, %v4702_v41  ;;  %v5200_v50 = vld [vmem:[#allocation18 + $0x2d8] sm:$0xff] }
 0x61b   :  { %v4749_v44 = vld [vmem:[#allocation15 + $0x2c0] sm:$0xff] }
 0x61c   :  { %8499 = vmatpush1.bf16.msra.mxu0 %v8498_v57  ;;  %v4714_v57 = vld [vmem:[#allocation15 + $0x1a8] sm:$0xff] }
 0x61d   :  { %8563 = vmatpush1.bf16.msra.mxu1 %v8562_v0  ;;  %8501 = vmatprep.subr.bf16.mxu0 %v8500_v17  ;;  %v4720_v0 = vld [vmem:[#allocation15 + $0x1d8] sm:$0xff]  ;;  %v5158_v17 = vld [vmem:[#allocation18 + $0x188] sm:$0xff] }
 0x61e   :  { %8565 = vmatprep.subr.bf16.mxu1 %v8564_v2  ;;  %v8584_v2 = vpack.c.bf16 %v4720_v0, %v4714_v57  ;;  %v8648_v51 = vpack.c.bf16 %v5164_v60, %v5158_v17  ;;  %v4761_v0 = vld [vmem:[#allocation15 + $0x320] sm:$0xff]  ;;  %v4767_v17 = vld [vmem:[#allocation15 + $0x350] sm:$0xff] }
 0x61f   :  { %v5205_v60 = vld [vmem:[#allocation18 + $0x300] sm:$0xff] }
 0x620   :  { %8503 = vmatpush1.bf16.msra.mxu0 %v8502_v8  ;;  %v4726_v8 = vld [vmem:[#allocation15 + $0x208] sm:$0xff] }
 0x621   :  { %8567 = vmatpush1.bf16.msra.mxu1 %v8566_v10  ;;  %8569 = vmatprep.subr.bf16.mxu0 %v8568_v52  ;;  %v4732_v10 = vld [vmem:[#allocation15 + $0x238] sm:$0xff]  ;;  %v5170_v52 = vld [vmem:[#allocation18 + $0x1e8] sm:$0xff] }
 0x622   :  { %8633 = vmatprep.subr.bf16.mxu1 %v8632_v59  ;;  %v8588_v59 = vpack.c.bf16 %v4732_v10, %v4726_v8  ;;  %v8652_v16 = vpack.c.bf16 %v5176_v4, %v5170_v52  ;;  %v4773_v10 = vld [vmem:[#allocation15 + $0x380] sm:$0xff]  ;;  %v4779_v52 = vld [vmem:[#allocation15 + $0x3b0] sm:$0xff] }
 0x623   :  { %4961 = vmatmul.mubr.f32.vlgmr.msra.gmra.mrb[50].mxu0 %v11003_v43  ;;  %v5217_v4 = vld [vmem:[#allocation18 + $0x360] sm:$0xff] }
 0x624   :  { %5032 = vmatmul.mubr.f32.vlgmr.msra.gmra.mrb[42].mxu1 %v11003_v43  ;;  %8571 = vmatpush1.bf16.msra.mxu0 %v8570_v20  ;;  %v8578_v43 = vpack.c.bf16 %v4695_v37, %v4689_v34  ;;  %v4738_v20 = vld [vmem:[#allocation15 + $0x268] sm:$0xff] }
 0x625   :  { %8635 = vmatpush1.bf16.msra.mxu1 %v8634_v45  ;;  %8573 = vmatprep.subr.bf16.mxu0 %v8572_v15  ;;  %v4744_v45 = vld [vmem:[#allocation15 + $0x298] sm:$0xff]  ;;  %v5182_v15 = vld [vmem:[#allocation18 + $0x248] sm:$0xff] }
 0x626   :  { %8637 = vmatprep.subr.bf16.mxu1 %v8636_v24  ;;  %5102 = vmatprep.mubr.f32.mxu0 %v11007_v9  ;;  %v8592_v24 = vpack.c.bf16 %v4744_v45, %v4738_v20  ;;  %v8656_v30 = vpack.c.bf16 %v5188_v22, %v5182_v15  ;;  %v5194_v37 = vld [vmem:[#allocation18 + $0x2a8] sm:$0xff]  ;;  %v4785_v45 = vld [vmem:[#allocation15 + $0x3e0] sm:$0xff] }
 0x627   :  { %5408 = vmatprep.mubr.f32.mxu1 %v11018_v61  ;;  %v4791_v15 = vld [vmem:[#allocation15 + $0x410] sm:$0xff]  ;;  %v5229_v22 = vld [vmem:[#allocation18 + $0x3c0] sm:$0xff] }
 0x628   :  { %8575 = vmatpush1.bf16.msra.mxu0 %v8574_v3  ;;  %v5187_v3 = vld [vmem:[#allocation18 + $0x270] sm:$0xff] }
 0x629   :  { %8639 = vmatpush1.bf16.msra.mxu1 %v8638_v31  ;;  %8577 = vmatprep.subr.bf16.mxu0 %v8576_v32  ;;  %v4750_v31 = vld [vmem:[#allocation15 + $0x2c8] sm:$0xff]  ;;  %v4756_v32 = vld [vmem:[#allocation15 + $0x2f8] sm:$0xff]  ;;  %v8658_v1 = vpack.c.bf16 %v5187_v3, %v5181_v40 }
 0x62a   :  { %8641 = vmatprep.subr.bf16.mxu1 %v8640_v53  ;;  %v8594_v53 = vpack.c.bf16 %v4743_v25, %v4737_v39  ;;  %v8596_v41 = vpack.c.bf16 %v4756_v32, %v4750_v31  ;;  %v4804_v39 = vld [vmem:[#allocation15 + $0x478] sm:$0xff]  ;;  %v5242_v25 = vld [vmem:[#allocation18 + $0x428] sm:$0xff]  ;;  %v4797_v32 = vld [vmem:[#allocation15 + $0x440] sm:$0xff] }
 0x62b   :  { %v5248_v40 = vld [vmem:[#allocation18 + $0x458] sm:$0xff] }
 0x62c   :  { %8579 = vmatpush1.bf16.msra.mxu0 %v8578_v43  ;;  %v8660_v43 = vpack.c.bf16 %v5200_v50, %v5194_v37  ;;  %v4803_v37 = vld [vmem:[#allocation15 + $0x470] sm:$0xff]  ;;  %v5241_v50 = vld [vmem:[#allocation18 + $0x420] sm:$0xff] }
 0x62d   :  { %8643 = vmatpush1.bf16.msra.mxu1 %v8642_v48  ;;  %8581 = vmatprep.subr.bf16.mxu0 %v8580_v29  ;;  %v5199_v48 = vld [vmem:[#allocation18 + $0x2d0] sm:$0xff]  ;;  %v4762_v29 = vld [vmem:[#allocation15 + $0x328] sm:$0xff] }
 0x62e   :  { %8645 = vmatprep.subr.bf16.mxu1 %v8644_v54  ;;  %v8598_v54 = vpack.c.bf16 %v4755_v47, %v4749_v44  ;;  %v8662_v55 = vpack.c.bf16 %v5199_v48, %v5193_v38  ;;  %v8600_v57 = vpack.c.bf16 %v4768_v49, %v4762_v29  ;;  %v4816_v44 = vld [vmem:[#allocation15 + $0x4d8] sm:$0xff]  ;;  %v5254_v47 = vld [vmem:[#allocation18 + $0x488] sm:$0xff]  ;;  %v4809_v49 = vld [vmem:[#allocation15 + $0x4a0] sm:$0xff] }
 0x62f   :  { %v5260_v38 = vld [vmem:[#allocation18 + $0x4b8] sm:$0xff] }
 0x630   :  { %8583 = vmatpush1.bf16.msra.mxu0 %v8582_v58  ;;  %v8664_v58 = vpack.c.bf16 %v5212_v11, %v5206_v33  ;;  %v4815_v33 = vld [vmem:[#allocation15 + $0x4d0] sm:$0xff]  ;;  %v5253_v11 = vld [vmem:[#allocation18 + $0x480] sm:$0xff] }
 0x631   :  { %8647 = vmatpush1.bf16.msra.mxu1 %v8646_v62  ;;  %8585 = vmatprep.subr.bf16.mxu0 %v8584_v2  ;;  %v5211_v62 = vld [vmem:[#allocation18 + $0x330] sm:$0xff]  ;;  %v4774_v2 = vld [vmem:[#allocation15 + $0x388] sm:$0xff] }
 0x632   :  { %8649 = vmatprep.subr.bf16.mxu1 %v8648_v51  ;;  %v8602_v51 = vpack.c.bf16 %v4767_v17, %v4761_v0  ;;  %v8666_v5 = vpack.c.bf16 %v5211_v62, %v5205_v60  ;;  %v8604_v8 = vpack.c.bf16 %v4780_v46, %v4774_v2  ;;  %v4828_v0 = vld [vmem:[#allocation15 + $0x538] sm:$0xff]  ;;  %v5266_v17 = vld [vmem:[#allocation18 + $0x4e8] sm:$0xff]  ;;  %v4821_v46 = vld [vmem:[#allocation15 + $0x500] sm:$0xff] }
 0x633   :  { %v5272_v60 = vld [vmem:[#allocation18 + $0x518] sm:$0xff] }
 0x634   :  { %8587 = vmatpush1.bf16.msra.mxu0 %v8586_v12  ;;  %v8668_v12 = vpack.c.bf16 %v5224_v35, %v5218_v19  ;;  %v4827_v19 = vld [vmem:[#allocation15 + $0x530] sm:$0xff]  ;;  %v5265_v35 = vld [vmem:[#allocation18 + $0x4e0] sm:$0xff] }
 0x635   :  { %8651 = vmatpush1.bf16.msra.mxu1 %v8650_v28  ;;  %8589 = vmatprep.subr.bf16.mxu0 %v8588_v59  ;;  %v5223_v28 = vld [vmem:[#allocation18 + $0x390] sm:$0xff]  ;;  %v4786_v59 = vld [vmem:[#allocation15 + $0x3e8] sm:$0xff] }
 0x636   :  { %v11023_v26 = vpop.f32.mrb[52].mxu0  ;;  %8653 = vmatprep.subr.bf16.mxu1 %v8652_v16  ;;  %v8606_v16 = vpack.c.bf16 %v4779_v52, %v4773_v10  ;;  %v8670_v18 = vpack.c.bf16 %v5223_v28, %v5217_v4  ;;  %v8608_v20 = vpack.c.bf16 %v4792_v13, %v4786_v59  ;;  %v4840_v10 = vld [vmem:[#allocation15 + $0x598] sm:$0xff]  ;;  %v5278_v52 = vld [vmem:[#allocation18 + $0x548] sm:$0xff]  ;;  %v4833_v13 = vld [vmem:[#allocation15 + $0x560] sm:$0xff] }
 0x637   :  { %v11025_v34 = vpop.f32.mrb[53].mxu0  ;;  %v5284_v4 = vld [vmem:[#allocation18 + $0x578] sm:$0xff] }
 0x638   :  { %8591 = vmatpush1.bf16.msra.mxu0 %v8590_v42  ;;  %v8672_v42 = vpack.c.bf16 %v5236_v14, %v5230_v36  ;;  %v4839_v36 = vld [vmem:[#allocation15 + $0x590] sm:$0xff]  ;;  %v5277_v14 = vld [vmem:[#allocation18 + $0x540] sm:$0xff] }
 0x639   :  { %8655 = vmatpush1.bf16.msra.mxu1 %v8654_v23  ;;  %8593 = vmatprep.subr.bf16.mxu0 %v8592_v24  ;;  %v5235_v23 = vld [vmem:[#allocation18 + $0x3f0] sm:$0xff]  ;;  %v4798_v24 = vld [vmem:[#allocation15 + $0x448] sm:$0xff] }
 0x63a   :  { %8657 = vmatprep.subr.bf16.mxu1 %v8656_v30  ;;  %v8610_v30 = vpack.c.bf16 %v4791_v15, %v4785_v45  ;;  %v8674_v3 = vpack.c.bf16 %v5235_v23, %v5229_v22  ;;  %v8612_v31 = vpack.c.bf16 %v4804_v39, %v4798_v24  ;;  %v4852_v45 = vld [vmem:[#allocation15 + $0x5f8] sm:$0xff]  ;;  %v5290_v15 = vld [vmem:[#allocation18 + $0x5a8] sm:$0xff]  ;;  %v4845_v39 = vld [vmem:[#allocation15 + $0x5c0] sm:$0xff] }
 0x63b   :  { %v5296_v22 = vld [vmem:[#allocation18 + $0x5d8] sm:$0xff] }
 0x63c   :  { %8595 = vmatpush1.bf16.msra.mxu0 %v8594_v53  ;;  %v8676_v53 = vpack.c.bf16 %v5248_v40, %v5242_v25  ;;  %v4851_v25 = vld [vmem:[#allocation15 + $0x5f0] sm:$0xff]  ;;  %v5289_v40 = vld [vmem:[#allocation18 + $0x5a0] sm:$0xff] }
 0x63d   :  { %8659 = vmatpush1.bf16.msra.mxu1 %v8658_v1  ;;  %8597 = vmatprep.subr.bf16.mxu0 %v8596_v41  ;;  %v5247_v1 = vld [vmem:[#allocation18 + $0x450] sm:$0xff]  ;;  %v4810_v41 = vld [vmem:[#allocation15 + $0x4a8] sm:$0xff] }
 0x63e   :  { %8661 = vmatprep.subr.bf16.mxu1 %v8660_v43  ;;  %v8614_v43 = vpack.c.bf16 %v4803_v37, %v4797_v32  ;;  %v8678_v48 = vpack.c.bf16 %v5247_v1, %v5241_v50  ;;  %v8616_v29 = vpack.c.bf16 %v4816_v44, %v4810_v41  ;;  %v5118_v32 = vld [vmem:[#allocation18 + $0x48] sm:$0xff]  ;;  %v5120_v50 = vld [vmem:[#allocation18 + $0x58] sm:$0xff]  ;;  %v5111_v44 = vld [vmem:[#allocation18 + $0x10] sm:$0xff] }
 0x63f   :  { %v5114_v37 = vld [vmem:[#allocation18 + $0x28] sm:$0xff] }
 0x640   :  { %8599 = vmatpush1.bf16.msra.mxu0 %v8598_v54  ;;  %v8680_v54 = vpack.c.bf16 %v5260_v38, %v5254_v47  ;;  %v5117_v47 = vld [vmem:[#allocation18 + $0x40] sm:$0xff] }
 0x641   :  { %8663 = vmatpush1.bf16.msra.mxu1 %v8662_v55  ;;  %8601 = vmatprep.subr.bf16.mxu0 %v8600_v57  ;;  %v5259_v55 = vld [vmem:[#allocation18 + $0x4b0] sm:$0xff]  ;;  %v4822_v57 = vld [vmem:[#allocation15 + $0x508] sm:$0xff] }
 0x642   :  { %8665 = vmatprep.subr.bf16.mxu1 %v8664_v58  ;;  %v8618_v58 = vpack.c.bf16 %v4815_v33, %v4809_v49  ;;  %v8682_v62 = vpack.c.bf16 %v5259_v55, %v5253_v11  ;;  %v8620_v2 = vpack.c.bf16 %v4828_v0, %v4822_v57  ;;  %v5113_v38 = vld [vmem:[#allocation18 + $0x20] sm:$0xff]  ;;  %v5130_v49 = vld [vmem:[#allocation18 + $0xa8] sm:$0xff]  ;;  %v5132_v11 = vld [vmem:[#allocation18 + $0xb8] sm:$0xff] }
 0x643   :  { %v5126_v33 = vld [vmem:[#allocation18 + $0x88] sm:$0xff]  ;;  %v5123_v0 = vld [vmem:[#allocation18 + $0x70] sm:$0xff] }
 0x644   :  { %8603 = vmatpush1.bf16.msra.mxu0 %v8602_v51  ;;  %v8684_v51 = vpack.c.bf16 %v5272_v60, %v5266_v17  ;;  %v5129_v17 = vld [vmem:[#allocation18 + $0xa0] sm:$0xff] }
 0x645   :  { %8667 = vmatpush1.bf16.msra.mxu1 %v8666_v5  ;;  %8605 = vmatprep.subr.bf16.mxu0 %v8604_v8  ;;  %v5271_v5 = vld [vmem:[#allocation18 + $0x510] sm:$0xff]  ;;  %v4834_v8 = vld [vmem:[#allocation15 + $0x568] sm:$0xff] }
 0x646   :  { %8669 = vmatprep.subr.bf16.mxu1 %v8668_v12  ;;  %v8622_v12 = vpack.c.bf16 %v4827_v19, %v4821_v46  ;;  %v8686_v28 = vpack.c.bf16 %v5271_v5, %v5265_v35  ;;  %v8624_v59 = vpack.c.bf16 %v4840_v10, %v4834_v8  ;;  %v5125_v60 = vld [vmem:[#allocation18 + $0x80] sm:$0xff]  ;;  %v5142_v46 = vld [vmem:[#allocation18 + $0x108] sm:$0xff]  ;;  %v8702_v5 = vpack.c.bf16 %v5129_v17, %v5123_v0 }
 0x647   :  { %v9292_v19 = vld.sshfl [vmem:[#allocation4] sm:$0x33 pattern:$0x76325410]  ;;  %v5138_v35 = vld [vmem:[#allocation18 + $0xe8] sm:$0xff] }
 0x648   :  { %8607 = vmatpush1.bf16.msra.mxu0 %v8606_v16  ;;  %v8688_v16 = vpack.c.bf16 %v5284_v4, %v5278_v52  ;;  %v5135_v52 = vld [vmem:[#allocation18 + $0xd0] sm:$0xff]  ;;  %v5141_v4 = vld [vmem:[#allocation18 + $0x100] sm:$0xff]  ;;  %v5190_v0 = vld [vmem:[#allocation18 + $0x288] sm:$0xff] }
 0x649   :  { %8671 = vmatpush1.bf16.msra.mxu1 %v8670_v18  ;;  %8609 = vmatprep.subr.bf16.mxu0 %v8608_v20  ;;  %v5283_v18 = vld [vmem:[#allocation18 + $0x570] sm:$0xff]  ;;  %v4846_v20 = vld [vmem:[#allocation15 + $0x5c8] sm:$0xff] }
 0x64a   :  { %8673 = vmatprep.subr.bf16.mxu1 %v8672_v42  ;;  %v8626_v42 = vpack.c.bf16 %v4839_v36, %v4833_v13  ;;  %v8690_v23 = vpack.c.bf16 %v5283_v18, %v5277_v14  ;;  %v8628_v24 = vpack.c.bf16 %v4852_v45, %v4846_v20  ;;  %v5148_v13 = vld [vmem:[#allocation18 + $0x138] sm:$0xff]  ;;  %v5154_v36 = vld [vmem:[#allocation18 + $0x168] sm:$0xff]  ;;  %v5147_v45 = vld [vmem:[#allocation18 + $0x130] sm:$0xff] }
 0x64b   :  { %v5150_v14 = vld [vmem:[#allocation18 + $0x148] sm:$0xff]  ;;  %v8708_v20 = vpack.c.bf16 %v5154_v36, %v5148_v13  ;;  %v5195_v13 = vld [vmem:[#allocation18 + $0x2b0] sm:$0xff]  ;;  %v5201_v36 = vld [vmem:[#allocation18 + $0x2e0] sm:$0xff] }
 0x64c   :  { %8611 = vmatpush1.bf16.msra.mxu0 %v8610_v30  ;;  %v8692_v30 = vpack.c.bf16 %v5296_v22, %v5290_v15  ;;  %v5153_v15 = vld [vmem:[#allocation18 + $0x160] sm:$0xff]  ;;  %v5186_v17 = vld [vmem:[#allocation18 + $0x268] sm:$0xff] }
 0x64d   :  { %8675 = vmatpush1.bf16.msra.mxu1 %v8674_v3  ;;  %8613 = vmatprep.subr.bf16.mxu0 %v8612_v31  ;;  %v5295_v3 = vld [vmem:[#allocation18 + $0x5d0] sm:$0xff]  ;;  %v5112_v31 = vld [vmem:[#allocation18 + $0x18] sm:$0xff]  ;;  %v5149_v22 = vld [vmem:[#allocation18 + $0x140] sm:$0xff] }
 0x64e   :  { %8677 = vmatprep.subr.bf16.mxu1 %v8676_v53  ;;  %v8630_v53 = vpack.c.bf16 %v4851_v25, %v4845_v39  ;;  %v8694_v1 = vpack.c.bf16 %v5295_v3, %v5289_v40  ;;  %v8696_v41 = vpack.c.bf16 %v5118_v32, %v5112_v31  ;;  %v5166_v39 = vld [vmem:[#allocation18 + $0x1c8] sm:$0xff]  ;;  %v5168_v40 = vld [vmem:[#allocation18 + $0x1d8] sm:$0xff]  ;;  %v5159_v32 = vld [vmem:[#allocation18 + $0x190] sm:$0xff] }
 0x64f   :  { %v5162_v25 = vld [vmem:[#allocation18 + $0x1a8] sm:$0xff] }
 0x650   :  { %8615 = vmatpush1.bf16.msra.mxu0 %v8614_v43  ;;  %v8760_v43 = vpack.c.bf16 %v5120_v50, %v5114_v37  ;;  %v5165_v37 = vld [vmem:[#allocation18 + $0x1c0] sm:$0xff] }
 0x651   :  { %8679 = vmatpush1.bf16.msra.mxu1 %v8678_v48  ;;  %8617 = vmatprep.subr.bf16.mxu0 %v8616_v29  ;;  %v5119_v48 = vld [vmem:[#allocation18 + $0x50] sm:$0xff]  ;;  %v5124_v29 = vld [vmem:[#allocation18 + $0x78] sm:$0xff]  ;;  %v5161_v50 = vld [vmem:[#allocation18 + $0x1a0] sm:$0xff] }
 0x652   :  { %8681 = vmatprep.subr.bf16.mxu1 %v8680_v54  ;;  %v8698_v54 = vpack.c.bf16 %v5117_v47, %v5111_v44  ;;  %v8762_v55 = vpack.c.bf16 %v5119_v48, %v5113_v38  ;;  %v8700_v57 = vpack.c.bf16 %v5130_v49, %v5124_v29  ;;  %v5178_v44 = vld [vmem:[#allocation18 + $0x228] sm:$0xff]  ;;  %v5180_v38 = vld [vmem:[#allocation18 + $0x238] sm:$0xff]  ;;  %v5171_v49 = vld [vmem:[#allocation18 + $0x1f0] sm:$0xff] }
 0x653   :  { %v5174_v47 = vld [vmem:[#allocation18 + $0x208] sm:$0xff] }
 0x654   :  { %8619 = vmatpush1.bf16.msra.mxu0 %v8618_v58  ;;  %v8764_v58 = vpack.c.bf16 %v5132_v11, %v5126_v33  ;;  %v5177_v33 = vld [vmem:[#allocation18 + $0x220] sm:$0xff] }
 0x655   :  { %8683 = vmatpush1.bf16.msra.mxu1 %v8682_v62  ;;  %8621 = vmatprep.subr.bf16.mxu0 %v8620_v2  ;;  %v5131_v62 = vld [vmem:[#allocation18 + $0xb0] sm:$0xff]  ;;  %v5136_v2 = vld [vmem:[#allocation18 + $0xd8] sm:$0xff]  ;;  %v5173_v11 = vld [vmem:[#allocation18 + $0x200] sm:$0xff] }
 0x656   :  { %8685 = vmatprep.subr.bf16.mxu1 %v8684_v51  ;;  %v5144_v51 = vld [vmem:[#allocation18 + $0x118] sm:$0xff]  ;;  %v8766_v8 = vpack.c.bf16 %v5131_v62, %v5125_v60  ;;  %v8704_v10 = vpack.c.bf16 %v5142_v46, %v5136_v2  ;;  %v5183_v46 = vld [vmem:[#allocation18 + $0x250] sm:$0xff] }
 0x657   :  { %v5192_v60 = vld [vmem:[#allocation18 + $0x298] sm:$0xff] }
 0x658   :  { %8623 = vmatpush1.bf16.msra.mxu0 %v8622_v12  ;;  %v5137_v12 = vld [vmem:[#allocation18 + $0xe0] sm:$0xff] }
 0x659   :  { %8687 = vmatpush1.bf16.msra.mxu1 %v8686_v28  ;;  %8625 = vmatprep.subr.bf16.mxu0 %v8624_v59  ;;  %v8768_v28 = vpack.c.bf16 %v5144_v51, %v5138_v35  ;;  %v5143_v59 = vld [vmem:[#allocation18 + $0x110] sm:$0xff]  ;;  %v5185_v35 = vld [vmem:[#allocation18 + $0x260] sm:$0xff]  ;;  %v8784_v51 = vpack.c.bf16 %v5192_v60, %v5186_v17 }
 0x65a   :  { %8689 = vmatprep.subr.bf16.mxu1 %v8688_v16  ;;  %v5156_v16 = vld [vmem:[#allocation18 + $0x178] sm:$0xff]  ;;  %v8770_v18 = vpack.c.bf16 %v5143_v59, %v5137_v12  ;;  %v5233_v17 = vld [vmem:[#allocation18 + $0x3e0] sm:$0xff] }
 0x65c   :  { %8627 = vmatpush1.bf16.msra.mxu0 %v8626_v42  ;;  %v8772_v42 = vpack.c.bf16 %v5156_v16, %v5150_v14  ;;  %v5197_v14 = vld [vmem:[#allocation18 + $0x2c0] sm:$0xff] }
 0x65d   :  { %8691 = vmatpush1.bf16.msra.mxu1 %v8690_v23  ;;  %8629 = vmatprep.subr.bf16.mxu0 %v8628_v24  ;;  %v5155_v23 = vld [vmem:[#allocation18 + $0x170] sm:$0xff]  ;;  %v5160_v24 = vld [vmem:[#allocation18 + $0x198] sm:$0xff] }
 0x65e   :  { %8693 = vmatprep.subr.bf16.mxu1 %v8692_v30  ;;  %v8710_v30 = vpack.c.bf16 %v5153_v15, %v5147_v45  ;;  %v8774_v3 = vpack.c.bf16 %v5155_v23, %v5149_v22  ;;  %v8712_v31 = vpack.c.bf16 %v5166_v39, %v5160_v24  ;;  %v5210_v45 = vld [vmem:[#allocation18 + $0x328] sm:$0xff]  ;;  %v5216_v15 = vld [vmem:[#allocation18 + $0x358] sm:$0xff]  ;;  %v8726_v22 = vpack.c.bf16 %v5201_v36, %v5195_v13  ;;  %v5207_v24 = vld [vmem:[#allocation18 + $0x310] sm:$0xff] }
 0x65f   :  { %v5213_v39 = vld [vmem:[#allocation18 + $0x340] sm:$0xff]  ;;  %v5258_v13 = vld [vmem:[#allocation18 + $0x4a8] sm:$0xff]  ;;  %v5264_v36 = vld [vmem:[#allocation18 + $0x4d8] sm:$0xff] }
 0x660   :  { %8631 = vmatpush1.bf16.msra.mxu0 %v8630_v53  ;;  %v8776_v53 = vpack.c.bf16 %v5168_v40, %v5162_v25  ;;  %v5209_v25 = vld [vmem:[#allocation18 + $0x320] sm:$0xff]  ;;  %v8792_v40 = vpack.c.bf16 %v5216_v15, %v5210_v45  ;;  %v8808_v15 = vpack.c.bf16 %v5264_v36, %v5258_v13  ;;  %v5684_v13 = vld [vmem:[#allocation21 + $0x10] sm:$0xff] }
 0x661   :  { %8695 = vmatpush1.bf16.msra.mxu1 %v8694_v1  ;;  %8697 = vmatprep.subr.bf16.mxu0 %v8696_v41  ;;  %v5167_v1 = vld [vmem:[#allocation18 + $0x1d0] sm:$0xff]  ;;  %v5172_v41 = vld [vmem:[#allocation18 + $0x1f8] sm:$0xff]  ;;  %v5257_v45 = vld [vmem:[#allocation18 + $0x4a0] sm:$0xff] }
 0x662   :  { %8761 = vmatprep.subr.bf16.mxu1 %v8760_v43  ;;  %v8714_v43 = vpack.c.bf16 %v5165_v37, %v5159_v32  ;;  %v8778_v48 = vpack.c.bf16 %v5167_v1, %v5161_v50  ;;  %v8716_v29 = vpack.c.bf16 %v5178_v44, %v5172_v41  ;;  %v5222_v32 = vld [vmem:[#allocation18 + $0x388] sm:$0xff]  ;;  %v5228_v37 = vld [vmem:[#allocation18 + $0x3b8] sm:$0xff]  ;;  %v8730_v50 = vpack.c.bf16 %v5213_v39, %v5207_v24  ;;  %v5219_v41 = vld [vmem:[#allocation18 + $0x370] sm:$0xff] }
 0x663   :  { %5103 = vmatmul.mubr.f32.vlgmr.msra.gmra.mrb[56].mxu0 %v9292_v19  ;;  %v5189_v19 = vld [vmem:[#allocation18 + $0x280] sm:$0xff]  ;;  %v5270_v24 = vld [vmem:[#allocation18 + $0x508] sm:$0xff]  ;;  %v5276_v39 = vld [vmem:[#allocation18 + $0x538] sm:$0xff] }
 0x664   :  { %5409 = vmatmul.mubr.f32.vlgmr.msra.gmra.mrb[44].mxu1 %v11013_v21  ;;  %8699 = vmatpush1.bf16.msra.mxu0 %v8698_v54  ;;  %v8706_v21 = vpack.c.bf16 %v5141_v4, %v5135_v52  ;;  %v8780_v54 = vpack.c.bf16 %v5180_v38, %v5174_v47  ;;  %v5198_v52 = vld [vmem:[#allocation18 + $0x2c8] sm:$0xff]  ;;  %v5204_v4 = vld [vmem:[#allocation18 + $0x2f8] sm:$0xff]  ;;  %v8722_v12 = vpack.c.bf16 %v5189_v19, %v5183_v46  ;;  %v5225_v44 = vld [vmem:[#allocation18 + $0x3a0] sm:$0xff] }
 0x665   :  { %8763 = vmatpush1.bf16.msra.mxu1 %v8762_v55  ;;  %8701 = vmatprep.subr.bf16.mxu0 %v8700_v57  ;;  %v5179_v55 = vld [vmem:[#allocation18 + $0x230] sm:$0xff]  ;;  %v5184_v57 = vld [vmem:[#allocation18 + $0x258] sm:$0xff]  ;;  %v8788_v16 = vpack.c.bf16 %v5204_v4, %v5198_v52  ;;  %v5221_v47 = vld [vmem:[#allocation18 + $0x380] sm:$0xff]  ;;  %v8796_v38 = vpack.c.bf16 %v5228_v37, %v5222_v32  ;;  %v8812_v37 = vpack.c.bf16 %v5276_v39, %v5270_v24 }
 0x666   :  { %8765 = vmatprep.subr.bf16.mxu1 %v8764_v58  ;;  %5479 = vmatprep.mubr.f32.mxu0 %v11018_v61  ;;  %v8718_v58 = vpack.c.bf16 %v5177_v33, %v5171_v49  ;;  %v8782_v62 = vpack.c.bf16 %v5179_v55, %v5173_v11  ;;  %v8720_v2 = vpack.c.bf16 %v5190_v0, %v5184_v57  ;;  %v5234_v49 = vld [vmem:[#allocation18 + $0x3e8] sm:$0xff]  ;;  %v5240_v33 = vld [vmem:[#allocation18 + $0x418] sm:$0xff]  ;;  %v5231_v57 = vld [vmem:[#allocation18 + $0x3d0] sm:$0xff] }
 0x667   :  { %5550 = vmatprep.mubr.f32.mxu1 %v11018_v61  ;;  %v8734_v11 = vpack.c.bf16 %v5225_v44, %v5219_v41  ;;  %v5237_v0 = vld [vmem:[#allocation18 + $0x400] sm:$0xff]  ;;  %v8800_v60 = vpack.c.bf16 %v5240_v33, %v5234_v49  ;;  %v5246_v46 = vld [vmem:[#allocation18 + $0x448] sm:$0xff]  ;;  %v5252_v19 = vld [vmem:[#allocation18 + $0x478] sm:$0xff] }
 0x668   :  { %8703 = vmatpush1.bf16.msra.mxu0 %v8702_v5  ;;  %v5191_v5 = vld [vmem:[#allocation18 + $0x290] sm:$0xff]  ;;  %v5245_v52 = vld [vmem:[#allocation18 + $0x440] sm:$0xff]  ;;  %v8804_v4 = vpack.c.bf16 %v5252_v19, %v5246_v46  ;;  %v5282_v41 = vld [vmem:[#allocation18 + $0x568] sm:$0xff] }
 0x669   :  { %8767 = vmatpush1.bf16.msra.mxu1 %v8766_v8  ;;  %8705 = vmatprep.subr.bf16.mxu0 %v8704_v10  ;;  %v5196_v8 = vld [vmem:[#allocation18 + $0x2b8] sm:$0xff]  ;;  %v5202_v10 = vld [vmem:[#allocation18 + $0x2e8] sm:$0xff]  ;;  %v5269_v32 = vld [vmem:[#allocation18 + $0x500] sm:$0xff] }
 0x66a   :  { %8769 = vmatprep.subr.bf16.mxu1 %v8768_v28  ;;  %v8786_v28 = vpack.c.bf16 %v5191_v5, %v5185_v35  ;;  %v8724_v59 = vpack.c.bf16 %v5202_v10, %v5196_v8  ;;  %v8738_v35 = vpack.c.bf16 %v5237_v0, %v5231_v57  ;;  %v5243_v8 = vld [vmem:[#allocation18 + $0x430] sm:$0xff]  ;;  %v5249_v10 = vld [vmem:[#allocation18 + $0x460] sm:$0xff]  ;;  %v5288_v44 = vld [vmem:[#allocation18 + $0x598] sm:$0xff] }
 0x66b   :  { %v5281_v49 = vld [vmem:[#allocation18 + $0x560] sm:$0xff]  ;;  %v8816_v33 = vpack.c.bf16 %v5288_v44, %v5282_v41  ;;  %v5294_v57 = vld [vmem:[#allocation18 + $0x5c8] sm:$0xff]  ;;  %v5300_v0 = vld [vmem:[#allocation18 + $0x5f8] sm:$0xff] }
 0x66c   :  { %8707 = vmatpush1.bf16.msra.mxu0 %v8706_v21  ;;  %v5203_v21 = vld [vmem:[#allocation18 + $0x2f0] sm:$0xff]  ;;  %v5293_v46 = vld [vmem:[#allocation18 + $0x5c0] sm:$0xff]  ;;  %v8820_v19 = vpack.c.bf16 %v5300_v0, %v5294_v57 }
 0x66d   :  { %8771 = vmatpush1.bf16.msra.mxu1 %v8770_v18  ;;  %8709 = vmatprep.subr.bf16.mxu0 %v8708_v20  ;;  %v5208_v18 = vld [vmem:[#allocation18 + $0x318] sm:$0xff]  ;;  %v5214_v20 = vld [vmem:[#allocation18 + $0x348] sm:$0xff] }
 0x66e   :  { %8773 = vmatprep.subr.bf16.mxu1 %v8772_v42  ;;  %v8790_v42 = vpack.c.bf16 %v5203_v21, %v5197_v14  ;;  %v8728_v23 = vpack.c.bf16 %v5214_v20, %v5208_v18  ;;  %v8742_v14 = vpack.c.bf16 %v5249_v10, %v5243_v8  ;;  %v5255_v18 = vld [vmem:[#allocation18 + $0x490] sm:$0xff]  ;;  %v5261_v20 = vld [vmem:[#allocation18 + $0x4c0] sm:$0xff] }
 0x66f   :  { %v5685_v8 = vld [vmem:[#allocation21 + $0x18] sm:$0xff]  ;;  %v5692_v24 = vld [vmem:[#allocation21 + $0x50] sm:$0xff]  ;;  %v5702_v41 = vld [vmem:[#allocation21 + $0xa0] sm:$0xff] }
 0x670   :  { %8711 = vmatpush1.bf16.msra.mxu0 %v8710_v30  ;;  %v5215_v30 = vld [vmem:[#allocation18 + $0x350] sm:$0xff]  ;;  %v5689_v10 = vld [vmem:[#allocation21 + $0x38] sm:$0xff]  ;;  %v5710_v57 = vld [vmem:[#allocation21 + $0xe0] sm:$0xff] }
 0x671   :  { %8775 = vmatpush1.bf16.msra.mxu1 %v8774_v3  ;;  %8713 = vmatprep.subr.bf16.mxu0 %v8712_v31  ;;  %v5220_v3 = vld [vmem:[#allocation18 + $0x378] sm:$0xff]  ;;  %v5226_v31 = vld [vmem:[#allocation18 + $0x3a8] sm:$0xff]  ;;  %v8952_v36 = vpack.c.bf16 %v5689_v10, %v5685_v8 }
 0x672   :  { %8777 = vmatprep.subr.bf16.mxu1 %v8776_v53  ;;  %v8794_v53 = vpack.c.bf16 %v5215_v30, %v5209_v25  ;;  %v8732_v1 = vpack.c.bf16 %v5226_v31, %v5220_v3  ;;  %v8746_v25 = vpack.c.bf16 %v5261_v20, %v5255_v18  ;;  %v5267_v3 = vld [vmem:[#allocation18 + $0x4f0] sm:$0xff]  ;;  %v5273_v31 = vld [vmem:[#allocation18 + $0x520] sm:$0xff] }
 0x673   :  { %v5693_v18 = vld [vmem:[#allocation21 + $0x58] sm:$0xff]  ;;  %v5700_v44 = vld [vmem:[#allocation21 + $0x90] sm:$0xff]  ;;  %v5718_v8 = vld [vmem:[#allocation21 + $0x120] sm:$0xff] }
 0x674   :  { %8715 = vmatpush1.bf16.msra.mxu0 %v8714_v43  ;;  %v5227_v43 = vld [vmem:[#allocation18 + $0x3b0] sm:$0xff]  ;;  %v5697_v20 = vld [vmem:[#allocation21 + $0x78] sm:$0xff] }
 0x675   :  { %8779 = vmatpush1.bf16.msra.mxu1 %v8778_v48  ;;  %8717 = vmatprep.subr.bf16.mxu0 %v8716_v29  ;;  %v5232_v48 = vld [vmem:[#allocation18 + $0x3d8] sm:$0xff]  ;;  %v5238_v29 = vld [vmem:[#allocation18 + $0x408] sm:$0xff]  ;;  %v8956_v39 = vpack.c.bf16 %v5697_v20, %v5693_v18 }
 0x676   :  { %8781 = vmatprep.subr.bf16.mxu1 %v8780_v54  ;;  %v8798_v54 = vpack.c.bf16 %v5227_v43, %v5221_v47  ;;  %v8736_v55 = vpack.c.bf16 %v5238_v29, %v5232_v48  ;;  %v8750_v47 = vpack.c.bf16 %v5273_v31, %v5267_v3  ;;  %v5279_v48 = vld [vmem:[#allocation18 + $0x550] sm:$0xff]  ;;  %v5285_v29 = vld [vmem:[#allocation18 + $0x580] sm:$0xff] }
 0x677   :  { %v9293_v3 = vld.sshfl [vmem:[#allocation4 + $0x4] sm:$0x33 pattern:$0x76325410]  ;;  %v5708_v0 = vld [vmem:[#allocation21 + $0xd0] sm:$0xff] }
 0x678   :  { %8719 = vmatpush1.bf16.msra.mxu0 %v8718_v58  ;;  %v5239_v58 = vld [vmem:[#allocation18 + $0x410] sm:$0xff]  ;;  %v5701_v31 = vld [vmem:[#allocation21 + $0x98] sm:$0xff]  ;;  %v5726_v18 = vld [vmem:[#allocation21 + $0x160] sm:$0xff] }
 0x679   :  { %8783 = vmatpush1.bf16.msra.mxu1 %v8782_v62  ;;  %8721 = vmatprep.subr.bf16.mxu0 %v8720_v2  ;;  %v5244_v62 = vld [vmem:[#allocation18 + $0x438] sm:$0xff]  ;;  %v5250_v2 = vld [vmem:[#allocation18 + $0x468] sm:$0xff] }
 0x67a   :  { %8785 = vmatprep.subr.bf16.mxu1 %v8784_v51  ;;  %v8802_v51 = vpack.c.bf16 %v5239_v58, %v5233_v17  ;;  %v8740_v5 = vpack.c.bf16 %v5250_v2, %v5244_v62  ;;  %v8754_v17 = vpack.c.bf16 %v5285_v29, %v5279_v48  ;;  %v5291_v62 = vld [vmem:[#allocation18 + $0x5b0] sm:$0xff]  ;;  %v5297_v2 = vld [vmem:[#allocation18 + $0x5e0] sm:$0xff] }
 0x67b   :  { %v5711_v48 = vld [vmem:[#allocation21 + $0xe8] sm:$0xff]  ;;  %v5709_v29 = vld [vmem:[#allocation21 + $0xd8] sm:$0xff]  ;;  %v5716_v10 = vld [vmem:[#allocation21 + $0x110] sm:$0xff] }
 0x67c   :  { %8723 = vmatpush1.bf16.msra.mxu0 %v8722_v12  ;;  %v5251_v12 = vld [vmem:[#allocation18 + $0x470] sm:$0xff] }
 0x67d   :  { %8787 = vmatpush1.bf16.msra.mxu1 %v8786_v28  ;;  %8725 = vmatprep.subr.bf16.mxu0 %v8724_v59  ;;  %v5256_v28 = vld [vmem:[#allocation18 + $0x498] sm:$0xff]  ;;  %v5262_v59 = vld [vmem:[#allocation18 + $0x4c8] sm:$0xff] }
 0x67e   :  { %8789 = vmatprep.subr.bf16.mxu1 %v8788_v16  ;;  %v8806_v16 = vpack.c.bf16 %v5251_v12, %v5245_v52  ;;  %v8744_v21 = vpack.c.bf16 %v5262_v59, %v5256_v28  ;;  %v8758_v52 = vpack.c.bf16 %v5297_v2, %v5291_v62  ;;  %v5682_v28 = vld [vmem:[#allocation21] sm:$0xff]  ;;  %v5719_v62 = vld [vmem:[#allocation21 + $0x128] sm:$0xff]  ;;  %v5717_v2 = vld [vmem:[#allocation21 + $0x118] sm:$0xff] }
 0x67f   :  { %v5686_v59 = vld [vmem:[#allocation21 + $0x20] sm:$0xff] }
 0x680   :  { %8727 = vmatpush1.bf16.msra.mxu0 %v8726_v22  ;;  %v5263_v22 = vld [vmem:[#allocation18 + $0x4d0] sm:$0xff] }
 0x681   :  { %8791 = vmatpush1.bf16.msra.mxu1 %v8790_v42  ;;  %8729 = vmatprep.subr.bf16.mxu0 %v8728_v23  ;;  %v5268_v42 = vld [vmem:[#allocation18 + $0x4f8] sm:$0xff]  ;;  %v5274_v23 = vld [vmem:[#allocation18 + $0x528] sm:$0xff] }
 0x682   :  { %8793 = vmatprep.subr.bf16.mxu1 %v8792_v40  ;;  %v8810_v40 = vpack.c.bf16 %v5263_v22, %v5257_v45  ;;  %v8748_v30 = vpack.c.bf16 %v5274_v23, %v5268_v42  ;;  %v8826_v45 = vpack.c.bf16 %v5686_v59, %v5682_v28  ;;  %v5690_v42 = vld [vmem:[#allocation21 + $0x40] sm:$0xff]  ;;  %v5727_v28 = vld [vmem:[#allocation21 + $0x168] sm:$0xff]  ;;  %v5725_v59 = vld [vmem:[#allocation21 + $0x158] sm:$0xff] }
 0x683   :  { %v5694_v23 = vld [vmem:[#allocation21 + $0x60] sm:$0xff] }
 0x684   :  { %8731 = vmatpush1.bf16.msra.mxu0 %v8730_v50  ;;  %v5275_v50 = vld [vmem:[#allocation18 + $0x530] sm:$0xff] }
 0x685   :  { %8795 = vmatpush1.bf16.msra.mxu1 %v8794_v53  ;;  %8733 = vmatprep.subr.bf16.mxu0 %v8732_v1  ;;  %v5280_v53 = vld [vmem:[#allocation18 + $0x558] sm:$0xff]  ;;  %v5286_v1 = vld [vmem:[#allocation18 + $0x588] sm:$0xff] }
 0x686   :  { %8797 = vmatprep.subr.bf16.mxu1 %v8796_v38  ;;  %v8814_v38 = vpack.c.bf16 %v5275_v50, %v5269_v32  ;;  %v8752_v43 = vpack.c.bf16 %v5286_v1, %v5280_v53  ;;  %v5705_v32 = vld [vmem:[#allocation21 + $0xb8] sm:$0xff]  ;;  %v5698_v1 = vld [vmem:[#allocation21 + $0x80] sm:$0xff] }
 0x688   :  { %8735 = vmatpush1.bf16.msra.mxu0 %v8734_v11  ;;  %v5287_v11 = vld [vmem:[#allocation18 + $0x590] sm:$0xff] }
 0x689   :  { %8799 = vmatpush1.bf16.msra.mxu1 %v8798_v54  ;;  %8737 = vmatprep.subr.bf16.mxu0 %v8736_v55  ;;  %v5292_v54 = vld [vmem:[#allocation18 + $0x5b8] sm:$0xff]  ;;  %v5298_v55 = vld [vmem:[#allocation18 + $0x5e8] sm:$0xff] }
 0x68a   :  { %8801 = vmatprep.subr.bf16.mxu1 %v8800_v60  ;;  %v8818_v60 = vpack.c.bf16 %v5287_v11, %v5281_v49  ;;  %v8756_v58 = vpack.c.bf16 %v5298_v55, %v5292_v54  ;;  %v5713_v49 = vld [vmem:[#allocation21 + $0xf8] sm:$0xff]  ;;  %v5706_v55 = vld [vmem:[#allocation21 + $0xc0] sm:$0xff] }
 0x68c   :  { %8739 = vmatpush1.bf16.msra.mxu0 %v8738_v35  ;;  %v5299_v35 = vld [vmem:[#allocation18 + $0x5f0] sm:$0xff] }
 0x68d   :  { %8803 = vmatpush1.bf16.msra.mxu1 %v8802_v51  ;;  %8741 = vmatprep.subr.bf16.mxu0 %v8740_v5  ;;  %v5683_v51 = vld [vmem:[#allocation21 + $0x8] sm:$0xff] }
 0x68e   :  { %8805 = vmatprep.subr.bf16.mxu1 %v8804_v4  ;;  %v5687_v5 = vld [vmem:[#allocation21 + $0x28] sm:$0xff]  ;;  %v8822_v4 = vpack.c.bf16 %v5299_v35, %v5293_v46  ;;  %v5721_v46 = vld [vmem:[#allocation21 + $0x138] sm:$0xff] }
 0x68f   :  { %v8824_v12 = vpack.c.bf16 %v5687_v5, %v5683_v51  ;;  %v5714_v5 = vld [vmem:[#allocation21 + $0x100] sm:$0xff] }
 0x690   :  { %8743 = vmatpush1.bf16.msra.mxu0 %v8742_v14  ;;  %v5688_v14 = vld [vmem:[#allocation21 + $0x30] sm:$0xff] }
 0x691   :  { %8807 = vmatpush1.bf16.msra.mxu1 %v8806_v16  ;;  %8745 = vmatprep.subr.bf16.mxu0 %v8744_v21  ;;  %v5691_v16 = vld [vmem:[#allocation21 + $0x48] sm:$0xff] }
 0x692   :  { %8809 = vmatprep.subr.bf16.mxu1 %v8808_v15  ;;  %v5695_v21 = vld [vmem:[#allocation21 + $0x68] sm:$0xff]  ;;  %v8954_v15 = vpack.c.bf16 %v5688_v14, %v5684_v13  ;;  %v5729_v13 = vld [vmem:[#allocation21 + $0x178] sm:$0xff] }
 0x693   :  { %v8828_v22 = vpack.c.bf16 %v5695_v21, %v5691_v16  ;;  %v5722_v21 = vld [vmem:[#allocation21 + $0x140] sm:$0xff]  ;;  %v8972_v20 = vpack.c.bf16 %v5729_v13, %v5725_v59 }
 0x694   :  { %8747 = vmatpush1.bf16.msra.mxu0 %v8746_v25  ;;  %v5696_v25 = vld [vmem:[#allocation21 + $0x70] sm:$0xff]  ;;  %v5754_v59 = vld [vmem:[#allocation21 + $0x240] sm:$0xff] }
 0x695   :  { %8811 = vmatpush1.bf16.msra.mxu1 %v8810_v40  ;;  %8749 = vmatprep.subr.bf16.mxu0 %v8748_v30  ;;  %v5699_v40 = vld [vmem:[#allocation21 + $0x88] sm:$0xff]  ;;  %v8958_v50 = vpack.c.bf16 %v5696_v25, %v5692_v24  ;;  %v5758_v13 = vld [vmem:[#allocation21 + $0x260] sm:$0xff] }
 0x696   :  { %8813 = vmatprep.subr.bf16.mxu1 %v8812_v37  ;;  %v5703_v30 = vld [vmem:[#allocation21 + $0xa8] sm:$0xff]  ;;  %v8830_v37 = vpack.c.bf16 %v5694_v23, %v5690_v42 }
 0x697   :  { %v8832_v53 = vpack.c.bf16 %v5703_v30, %v5699_v40  ;;  %v5735_v25 = vld [vmem:[#allocation21 + $0x1a8] sm:$0xff]  ;;  %v5733_v40 = vld [vmem:[#allocation21 + $0x198] sm:$0xff] }
 0x698   :  { %8751 = vmatpush1.bf16.msra.mxu0 %v8750_v47  ;;  %v8960_v47 = vpack.c.bf16 %v5705_v32, %v5701_v31  ;;  %v5730_v31 = vld [vmem:[#allocation21 + $0x180] sm:$0xff] }
 0x699   :  { %8815 = vmatpush1.bf16.msra.mxu1 %v8814_v38  ;;  %8753 = vmatprep.subr.bf16.mxu0 %v8752_v43  ;;  %v5704_v38 = vld [vmem:[#allocation21 + $0xb0] sm:$0xff]  ;;  %v5707_v43 = vld [vmem:[#allocation21 + $0xc8] sm:$0xff]  ;;  %v5734_v32 = vld [vmem:[#allocation21 + $0x1a0] sm:$0xff] }
 0x69a   :  { %8817 = vmatprep.subr.bf16.mxu1 %v8816_v33  ;;  %v8834_v33 = vpack.c.bf16 %v5702_v41, %v5698_v1  ;;  %v8962_v11 = vpack.c.bf16 %v5704_v38, %v5700_v44  ;;  %v8836_v54 = vpack.c.bf16 %v5711_v48, %v5707_v43  ;;  %v5736_v1 = vld [vmem:[#allocation21 + $0x1b0] sm:$0xff]  ;;  %v5739_v41 = vld [vmem:[#allocation21 + $0x1c8] sm:$0xff]  ;;  %v5741_v38 = vld [vmem:[#allocation21 + $0x1d8] sm:$0xff] }
 0x69b   :  { %v5745_v43 = vld [vmem:[#allocation21 + $0x1f8] sm:$0xff] }
 0x69c   :  { %8755 = vmatpush1.bf16.msra.mxu0 %v8754_v17  ;;  %v8964_v17 = vpack.c.bf16 %v5713_v49, %v5709_v29  ;;  %v8980_v29 = vpack.c.bf16 %v5745_v43, %v5741_v38  ;;  %v5738_v49 = vld [vmem:[#allocation21 + $0x1c0] sm:$0xff]  ;;  %v5772_v38 = vld [vmem:[#allocation21 + $0x2d0] sm:$0xff] }
 0x69d   :  { %8819 = vmatpush1.bf16.msra.mxu1 %v8818_v60  ;;  %8757 = vmatprep.subr.bf16.mxu0 %v8756_v58  ;;  %v5712_v60 = vld [vmem:[#allocation21 + $0xf0] sm:$0xff]  ;;  %v5715_v58 = vld [vmem:[#allocation21 + $0x108] sm:$0xff] }
 0x69e   :  { %8821 = vmatprep.subr.bf16.mxu1 %v8820_v19  ;;  %v8838_v19 = vpack.c.bf16 %v5710_v57, %v5706_v55  ;;  %v8966_v35 = vpack.c.bf16 %v5712_v60, %v5708_v0  ;;  %v8840_v51 = vpack.c.bf16 %v5719_v62, %v5715_v58  ;;  %v5744_v55 = vld [vmem:[#allocation21 + $0x1f0] sm:$0xff]  ;;  %v5747_v57 = vld [vmem:[#allocation21 + $0x208] sm:$0xff]  ;;  %v5749_v58 = vld [vmem:[#allocation21 + $0x218] sm:$0xff] }
 0x69f   :  { %v5751_v0 = vld [vmem:[#allocation21 + $0x228] sm:$0xff]  ;;  %v5753_v62 = vld [vmem:[#allocation21 + $0x238] sm:$0xff] }
 0x6a0   :  { %8759 = vmatpush1.bf16.msra.mxu0 %v8758_v52  ;;  %v8968_v52 = vpack.c.bf16 %v5721_v46, %v5717_v2  ;;  %v8856_v60 = vpack.c.bf16 %v5751_v0, %v5747_v57  ;;  %v5746_v2 = vld [vmem:[#allocation21 + $0x200] sm:$0xff]  ;;  %v8984_v46 = vpack.c.bf16 %v5753_v62, %v5749_v58  ;;  %v5784_v62 = vld [vmem:[#allocation21 + $0x330] sm:$0xff] }
 0x6a1   :  { %8823 = vmatpush1.bf16.msra.mxu1 %v8822_v4  ;;  %8825 = vmatprep.subr.bf16.mxu0 %v8824_v12  ;;  %v5720_v4 = vld [vmem:[#allocation21 + $0x130] sm:$0xff]  ;;  %v5723_v12 = vld [vmem:[#allocation21 + $0x148] sm:$0xff]  ;;  %v5778_v0 = vld [vmem:[#allocation21 + $0x300] sm:$0xff] }
 0x6a2   :  { %8953 = vmatprep.subr.bf16.mxu1 %v8952_v36  ;;  %v8842_v36 = vpack.c.bf16 %v5718_v8, %v5714_v5  ;;  %v8970_v14 = vpack.c.bf16 %v5720_v4, %v5716_v10  ;;  %v8844_v16 = vpack.c.bf16 %v5727_v28, %v5723_v12  ;;  %v5755_v8 = vld [vmem:[#allocation21 + $0x248] sm:$0xff]  ;;  %v5761_v28 = vld [vmem:[#allocation21 + $0x278] sm:$0xff] }
 0x6a3   :  { %5480 = vmatmul.mubr.f32.vlgmr.msra.gmra.mrb[54].mxu0 %v9293_v3  ;;  %v5759_v10 = vld [vmem:[#allocation21 + $0x268] sm:$0xff] }
 0x6a4   :  { %5551 = vmatmul.mubr.f32.vlgmr.msra.gmra.mrb[48].mxu1 %v9293_v3  ;;  %8827 = vmatpush1.bf16.msra.mxu0 %v8826_v45  ;;  %v5724_v45 = vld [vmem:[#allocation21 + $0x150] sm:$0xff]  ;;  %v5737_v3 = vld [vmem:[#allocation21 + $0x1b8] sm:$0xff]  ;;  %v8860_v12 = vpack.c.bf16 %v5759_v10, %v5755_v8  ;;  %v5786_v10 = vld [vmem:[#allocation21 + $0x340] sm:$0xff] }
 0x6a5   :  { %8955 = vmatpush1.bf16.msra.mxu1 %v8954_v15  ;;  %8829 = vmatprep.subr.bf16.mxu0 %v8828_v22  ;;  %v5728_v15 = vld [vmem:[#allocation21 + $0x170] sm:$0xff]  ;;  %v8846_v22 = vpack.c.bf16 %v5726_v18, %v5722_v21  ;;  %v5763_v21 = vld [vmem:[#allocation21 + $0x288] sm:$0xff] }
 0x6a6   :  { %8957 = vmatprep.subr.bf16.mxu1 %v8956_v39  ;;  %v8974_v42 = vpack.c.bf16 %v5728_v15, %v5724_v45  ;;  %v5731_v39 = vld [vmem:[#allocation21 + $0x188] sm:$0xff]  ;;  %v5769_v45 = vld [vmem:[#allocation21 + $0x2b8] sm:$0xff]  ;;  %v8862_v15 = vpack.c.bf16 %v5758_v13, %v5754_v59 }
 0x6a7   :  { %v8848_v30 = vpack.c.bf16 %v5735_v25, %v5731_v39  ;;  %v5767_v18 = vld [vmem:[#allocation21 + $0x2a8] sm:$0xff]  ;;  %v5762_v39 = vld [vmem:[#allocation21 + $0x280] sm:$0xff] }
 0x6a8   :  { %8831 = vmatpush1.bf16.msra.mxu0 %v8830_v37  ;;  %v8976_v37 = vpack.c.bf16 %v5737_v3, %v5733_v40  ;;  %v5766_v25 = vld [vmem:[#allocation21 + $0x2a0] sm:$0xff]  ;;  %v5764_v40 = vld [vmem:[#allocation21 + $0x290] sm:$0xff]  ;;  %v5795_v59 = vld [vmem:[#allocation21 + $0x388] sm:$0xff] }
 0x6a9   :  { %8959 = vmatpush1.bf16.msra.mxu1 %v8958_v50  ;;  %8833 = vmatprep.subr.bf16.mxu0 %v8832_v53  ;;  %v8850_v50 = vpack.c.bf16 %v5734_v32, %v5730_v31  ;;  %v5732_v53 = vld [vmem:[#allocation21 + $0x190] sm:$0xff]  ;;  %v5771_v31 = vld [vmem:[#allocation21 + $0x2c8] sm:$0xff] }
 0x6aa   :  { %8961 = vmatprep.subr.bf16.mxu1 %v8960_v47  ;;  %v8978_v44 = vpack.c.bf16 %v5736_v1, %v5732_v53  ;;  %v5743_v47 = vld [vmem:[#allocation21 + $0x1e8] sm:$0xff]  ;;  %v5768_v3 = vld [vmem:[#allocation21 + $0x2b0] sm:$0xff]  ;;  %v8866_v53 = vpack.c.bf16 %v5766_v25, %v5762_v39 }
 0x6ab   :  { %v8852_v48 = vpack.c.bf16 %v5743_v47, %v5739_v41  ;;  %v5775_v32 = vld [vmem:[#allocation21 + $0x2e8] sm:$0xff]  ;;  %v8994_v1 = vpack.c.bf16 %v5768_v3, %v5764_v40  ;;  %v5774_v47 = vld [vmem:[#allocation21 + $0x2e0] sm:$0xff]  ;;  %v5805_v40 = vld [vmem:[#allocation21 + $0x3d8] sm:$0xff] }
 0x6ac   :  { %8835 = vmatpush1.bf16.msra.mxu0 %v8834_v33  ;;  %v5742_v33 = vld [vmem:[#allocation21 + $0x1e0] sm:$0xff]  ;;  %v8868_v41 = vpack.c.bf16 %v5775_v32, %v5771_v31  ;;  %v5799_v13 = vld [vmem:[#allocation21 + $0x3a8] sm:$0xff] }
 0x6ad   :  { %8963 = vmatpush1.bf16.msra.mxu1 %v8962_v11  ;;  %8837 = vmatprep.subr.bf16.mxu0 %v8836_v54  ;;  %v5740_v11 = vld [vmem:[#allocation21 + $0x1d0] sm:$0xff]  ;;  %v8854_v54 = vpack.c.bf16 %v5742_v33, %v5738_v49  ;;  %v5783_v49 = vld [vmem:[#allocation21 + $0x328] sm:$0xff]  ;;  %v5781_v33 = vld [vmem:[#allocation21 + $0x318] sm:$0xff] }
 0x6ae   :  { %8965 = vmatprep.subr.bf16.mxu1 %v8964_v17  ;;  %v8982_v17 = vpack.c.bf16 %v5744_v55, %v5740_v11  ;;  %v5785_v11 = vld [vmem:[#allocation21 + $0x338] sm:$0xff]  ;;  %v5803_v39 = vld [vmem:[#allocation21 + $0x3c8] sm:$0xff] }
 0x6af   :  { %v9000_v58 = vpack.c.bf16 %v5785_v11, %v5781_v33  ;;  %v5807_v25 = vld [vmem:[#allocation21 + $0x3e8] sm:$0xff] }
 0x6b0   :  { %8839 = vmatpush1.bf16.msra.mxu0 %v8838_v19  ;;  %v5750_v19 = vld [vmem:[#allocation21 + $0x220] sm:$0xff]  ;;  %v8884_v32 = vpack.c.bf16 %v5807_v25, %v5803_v39  ;;  %v11049_v25 = vsub.s32 4, %v10887_v63 }
 0x6b1   :  { %8967 = vmatpush1.bf16.msra.mxu1 %v8966_v35  ;;  %8841 = vmatprep.subr.bf16.mxu0 %v8840_v51  ;;  %v5748_v35 = vld [vmem:[#allocation21 + $0x210] sm:$0xff]  ;;  %v8858_v5 = vpack.c.bf16 %v5750_v19, %v5746_v2  ;;  %v5787_v2 = vld [vmem:[#allocation21 + $0x348] sm:$0xff]  ;;  %v5789_v19 = vld [vmem:[#allocation21 + $0x358] sm:$0xff] }
 0x6b2   :  { %8969 = vmatprep.subr.bf16.mxu1 %v8968_v52  ;;  %v5752_v51 = vld [vmem:[#allocation21 + $0x230] sm:$0xff]  ;;  %v5757_v52 = vld [vmem:[#allocation21 + $0x258] sm:$0xff] }
 0x6b3   :  { %v8986_v4 = vpack.c.bf16 %v5752_v51, %v5748_v35  ;;  %v5793_v35 = vld [vmem:[#allocation21 + $0x378] sm:$0xff] }
 0x6b4   :  { %8843 = vmatpush1.bf16.msra.mxu0 %v8842_v36  ;;  %v8988_v36 = vpack.c.bf16 %v5761_v28, %v5757_v52  ;;  %v5790_v52 = vld [vmem:[#allocation21 + $0x360] sm:$0xff]  ;;  %v5792_v28 = vld [vmem:[#allocation21 + $0x370] sm:$0xff] }
 0x6b5   :  { %8971 = vmatpush1.bf16.msra.mxu1 %v8970_v14  ;;  %8845 = vmatprep.subr.bf16.mxu0 %v8844_v16  ;;  %v5756_v14 = vld [vmem:[#allocation21 + $0x250] sm:$0xff] }
 0x6b6   :  { %8973 = vmatprep.subr.bf16.mxu1 %v8972_v20  ;;  %v5760_v16 = vld [vmem:[#allocation21 + $0x270] sm:$0xff]  ;;  %v5765_v20 = vld [vmem:[#allocation21 + $0x298] sm:$0xff] }
 0x6b7   :  { %v11030_v23 = vpop.f32.mrb[46].mxu1 }
 0x6b8   :  { %v11032_v24 = vpop.f32.mrb[47].mxu1  ;;  %8847 = vmatpush1.bf16.msra.mxu0 %v8846_v22  ;;  %v8990_v22 = vpack.c.bf16 %v5760_v16, %v5756_v14  ;;  %v5801_v14 = vld [vmem:[#allocation21 + $0x3b8] sm:$0xff]  ;;  %v8878_v16 = vpack.c.bf16 %v5790_v52, %v5786_v10 }
 0x6b9   :  { %8975 = vmatpush1.bf16.msra.mxu1 %v8974_v42  ;;  %8849 = vmatprep.subr.bf16.mxu0 %v8848_v30  ;;  %v8864_v42 = vpack.c.bf16 %v5767_v18, %v5763_v21  ;;  %v8992_v30 = vpack.c.bf16 %v5769_v45, %v5765_v20  ;;  %v8880_v18 = vpack.c.bf16 %v5799_v13, %v5795_v59  ;;  %v5794_v20 = vld [vmem:[#allocation21 + $0x380] sm:$0xff] }
 0x6ba   :  { %8977 = vmatprep.subr.bf16.mxu1 %v8976_v37  ;;  %v5773_v37 = vld [vmem:[#allocation21 + $0x2d8] sm:$0xff]  ;;  %v5798_v45 = vld [vmem:[#allocation21 + $0x3a0] sm:$0xff] }
 0x6bb   :  { %v8882_v3 = vpack.c.bf16 %v5798_v45, %v5794_v20 }
 0x6bc   :  { %8851 = vmatpush1.bf16.msra.mxu0 %v8850_v50  ;;  %v5777_v50 = vld [vmem:[#allocation21 + $0x2f8] sm:$0xff] }
 0x6bd   :  { %8979 = vmatpush1.bf16.msra.mxu1 %v8978_v44  ;;  %8853 = vmatprep.subr.bf16.mxu0 %v8852_v48  ;;  %v5770_v44 = vld [vmem:[#allocation21 + $0x2c0] sm:$0xff]  ;;  %v8996_v43 = vpack.c.bf16 %v5777_v50, %v5773_v37  ;;  %v5776_v48 = vld [vmem:[#allocation21 + $0x2f0] sm:$0xff] }
 0x6be   :  { %8981 = vmatprep.subr.bf16.mxu1 %v8980_v29  ;;  %v5779_v29 = vld [vmem:[#allocation21 + $0x308] sm:$0xff]  ;;  %v8998_v55 = vpack.c.bf16 %v5776_v48, %v5772_v38  ;;  %v5802_v37 = vld [vmem:[#allocation21 + $0x3c0] sm:$0xff]  ;;  %v5813_v38 = vld [vmem:[#allocation21 + $0x418] sm:$0xff] }
 0x6bf   :  { %v8872_v57 = vpack.c.bf16 %v5783_v49, %v5779_v29  ;;  %v5806_v50 = vld [vmem:[#allocation21 + $0x3e0] sm:$0xff] }
 0x6c0   :  { %8855 = vmatpush1.bf16.msra.mxu0 %v8854_v54  ;;  %v8870_v54 = vpack.c.bf16 %v5774_v47, %v5770_v44  ;;  %v5811_v44 = vld [vmem:[#allocation21 + $0x408] sm:$0xff]  ;;  %v8886_v48 = vpack.c.bf16 %v5806_v50, %v5802_v37 }
 0x6c1   :  { %8983 = vmatpush1.bf16.msra.mxu1 %v8982_v17  ;;  %8857 = vmatprep.subr.bf16.mxu0 %v8856_v60  ;;  %v5782_v17 = vld [vmem:[#allocation21 + $0x320] sm:$0xff]  ;;  %v5780_v60 = vld [vmem:[#allocation21 + $0x310] sm:$0xff]  ;;  %v5815_v47 = vld [vmem:[#allocation21 + $0x428] sm:$0xff] }
 0x6c2   :  { %8985 = vmatprep.subr.bf16.mxu1 %v8984_v46  ;;  %v5791_v46 = vld [vmem:[#allocation21 + $0x368] sm:$0xff]  ;;  %v8874_v51 = vpack.c.bf16 %v5782_v17, %v5778_v0  ;;  %v8888_v49 = vpack.c.bf16 %v5815_v47, %v5811_v44  ;;  %v4853_v0 = vld [vmem:[#allocation16] sm:$0x3f] }
 0x6c3   :  { %v8876_v8 = vpack.c.bf16 %v5791_v46, %v5787_v2  ;;  %v11034_v17 = vld [vmem:[#allocation13] sm:$0xff]  ;;  %v4862_v2 = vrot.slane %v4853_v0, %v10949_v6 }
 0x6c4   :  { %8859 = vmatpush1.bf16.msra.mxu0 %v8858_v5  ;;  %v9002_v5 = vpack.c.bf16 %v5784_v62, %v5780_v60  ;;  %v3749_v60 = vrot.slane %v11034_v17, %v10944_v27  ;;  %v3753_v62 = vrot.slane %v11034_v17, %v10949_v6  ;;  %v3765_v37 = vrot.slane %v11034_v17, %v11049_v25 }
 0x6c5   :  { %8987 = vmatpush1.bf16.msra.mxu1 %v8986_v4  ;;  %8861 = vmatprep.subr.bf16.mxu0 %v8860_v12  ;;  %v5788_v4 = vld [vmem:[#allocation21 + $0x350] sm:$0xff]  ;;  %v9004_v12 = vpack.c.bf16 %v5793_v35, %v5789_v19 }
 0x6c6   :  { %8989 = vmatprep.subr.bf16.mxu1 %v8988_v36  ;;  %v5797_v36 = vld [vmem:[#allocation21 + $0x398] sm:$0xff]  ;;  %v9006_v21 = vpack.c.bf16 %v5792_v28, %v5788_v4  ;;  %v9150_v19 = vadd.f32 %v4862_v2, %v3753_v62  ;;  %v3761_v4 = vrot.slane %v11034_v17, %v10952_v7  ;;  %v3772_v62 = vsub.s32 6, %v10887_v63 }
 0x6c7   :  { %v11063_v2 = vld [vmem:[#allocation19] sm:$0x3f] }
 0x6c8   :  { %8863 = vmatpush1.bf16.msra.mxu0 %v8862_v15  ;;  %v5796_v15 = vld [vmem:[#allocation21 + $0x390] sm:$0xff] }
 0x6c9   :  { %8991 = vmatpush1.bf16.msra.mxu1 %v8990_v22  ;;  %8865 = vmatprep.subr.bf16.mxu0 %v8864_v42  ;;  %v9008_v22 = vpack.c.bf16 %v5801_v14, %v5797_v36  ;;  %v5800_v42 = vld [vmem:[#allocation21 + $0x3b0] sm:$0xff] }
 0x6ca   :  { %8993 = vmatprep.subr.bf16.mxu1 %v8992_v30  ;;  %v5809_v30 = vld [vmem:[#allocation21 + $0x3f8] sm:$0xff]  ;;  %v9010_v31 = vpack.c.bf16 %v5800_v42, %v5796_v15 }
 0x6cc   :  { %8867 = vmatpush1.bf16.msra.mxu0 %v8866_v53  ;;  %v5804_v53 = vld [vmem:[#allocation21 + $0x3d0] sm:$0xff] }
 0x6cd   :  { %8995 = vmatpush1.bf16.msra.mxu1 %v8994_v1  ;;  %8869 = vmatprep.subr.bf16.mxu0 %v8868_v41  ;;  %v9012_v1 = vpack.c.bf16 %v5809_v30, %v5805_v40  ;;  %v5808_v41 = vld [vmem:[#allocation21 + $0x3f0] sm:$0xff]  ;;  %v11052_v30 = vsub.s32 5, %v10887_v63 }
 0x6ce   :  { %8997 = vmatprep.subr.bf16.mxu1 %v8996_v43  ;;  %v5817_v43 = vld [vmem:[#allocation21 + $0x438] sm:$0xff]  ;;  %v9014_v29 = vpack.c.bf16 %v5808_v41, %v5804_v53 }
 0x6cf   :  { %v9016_v33 = vpack.c.bf16 %v5817_v43, %v5813_v38  ;;  %v3769_v53 = vrot.slane %v11034_v17, %v11052_v30 }
 0x6d0   :  { %8871 = vmatpush1.bf16.msra.mxu0 %v8870_v54 }
 0x6d1   :  { %8999 = vmatpush1.bf16.msra.mxu1 %v8998_v55  ;;  %8873 = vmatprep.subr.bf16.mxu0 %v8872_v57 }
 0x6d2   :  { %9001 = vmatprep.subr.bf16.mxu1 %v9000_v58  ;;  %v4858_v58 = vrot.slane %v4853_v0, %v10944_v27 }
 0x6d4   :  { %8875 = vmatpush1.bf16.msra.mxu0 %v8874_v51  ;;  %v9148_v46 = vadd.f32 %v4858_v58, %v3749_v60 }
 0x6d5   :  { %9003 = vmatpush1.bf16.msra.mxu1 %v9002_v5  ;;  %8877 = vmatprep.subr.bf16.mxu0 %v8876_v8  ;;  %v3757_v5 = vrot.slane %v11034_v17, %v10975_v56  ;;  %v4866_v8 = vrot.slane %v4853_v0, %v10975_v56 }
 0x6d6   :  { %9005 = vmatprep.subr.bf16.mxu1 %v9004_v12  ;;  %v4870_v12 = vrot.slane %v4853_v0, %v10952_v7 }
 0x6d7   :  { %v9152_v28 = vadd.f32 %v4866_v8, %v3757_v5  ;;  %v9294_v5 = vld.sshfl [vmem:[#allocation4] sm:$0x33 pattern:$0x76325410] }
 0x6d8   :  { %8879 = vmatpush1.bf16.msra.mxu0 %v8878_v16  ;;  %v9154_v36 = vadd.f32 %v4870_v12, %v3761_v4 }
 0x6d9   :  { %9007 = vmatpush1.bf16.msra.mxu1 %v9006_v21  ;;  %8881 = vmatprep.subr.bf16.mxu0 %v8880_v18 }
 0x6da   :  { %9009 = vmatprep.subr.bf16.mxu1 %v9008_v22 }
 0x6dc   :  { %8883 = vmatpush1.bf16.msra.mxu0 %v8882_v3  ;;  %v4874_v3 = vrot.slane %v4853_v0, %v11049_v25 }
 0x6dd   :  { %9011 = vmatpush1.bf16.msra.mxu1 %v9010_v31  ;;  %8885 = vmatprep.subr.bf16.mxu0 %v8884_v32  ;;  %v4878_v32 = vrot.slane %v4853_v0, %v11052_v30 }
 0x6de   :  { %9013 = vmatprep.subr.bf16.mxu1 %v9012_v1 }
 0x6e0   :  { %8887 = vmatpush1.bf16.msra.mxu0 %v8886_v48 }
 0x6e1   :  { %9015 = vmatpush1.bf16.msra.mxu1 %v9014_v29  ;;  %8889 = vmatprep.subr.bf16.mxu0 %v8888_v49 }
 0x6e2   :  { %9017 = vmatprep.subr.bf16.mxu1 %v9016_v33  ;;  %v9156_v33 = vadd.f32 %v11023_v26, %v3765_v37  ;;  %v3776_v26 = vsub.s32 7, %v10887_v63  ;;  %v5816_v37 = vld [vmem:[#allocation21 + $0x430] sm:$0xff] }
 0x6f6   :  { %v4962_v11 = vpop.f32.mrb[50].mxu0 }
 0x6f7   :  { %v5033_v54 = vpop.f32.mrb[42].mxu1  ;;  %v4964_v55 = vpop.f32.mrb[51].mxu0  ;;  %v9149_v35 = vadd.f32 %v9148_v46, %v4962_v11 }
 0x6f8   :  { %v5035_v57 = vpop.f32.mrb[43].mxu1  ;;  %v9151_v51 = vadd.f32 %v9150_v19, %v4964_v55  ;;  %v9153_v14 = vadd.f32 %v9152_v28, %v5033_v54  ;;  %v9157_v54 = vadd.f32 %v11025_v34, %v3769_v53  ;;  %v5823_v53 = vld [vmem:[#allocation21 + $0x468] sm:$0xff] }
 0x6f9   :  { %v5559_v10 = vsub.f32 0.0, %v9149_v35  ;;  %v9155_v16 = vadd.f32 %v9154_v36, %v5035_v57 }
 0x6fa   :  { %v5560_v52 = vsub.f32 0.0, %v9151_v51  ;;  %v5571_v21 = vsub.f32 0.0, %v9153_v14 }
 0x6fb   :  { %v5561_v59 = vmul.f32 1.442695, %v5559_v10  ;;  %v5572_v18 = vsub.f32 0.0, %v9155_v16  ;;  %v5306_v10 = vrot.slane %v11063_v2, %v10944_v27 }
 0x6fc   :  { %v5563_v13 = vmul.f32 1.442695, %v5560_v52  ;;  %v5573_v20 = vmul.f32 1.442695, %v5571_v21  ;;  %v3773_v52 = vrot.slane %v11034_v17, %v3772_v62  ;;  %v5829_v62 = vld [vmem:[#allocation21 + $0x498] sm:$0xff] }
 0x6fd   :  { %9244 = vpow2.f32 %v5561_v59  ;;  %v5575_v45 = vmul.f32 1.442695, %v5572_v18  ;;  %v3777_v59 = vrot.slane %v11034_v17, %v3776_v26 }
 0x6fe   :  { %9246 = vpow2.f32 %v5563_v13  ;;  %v5310_v13 = vrot.slane %v11063_v2, %v10949_v6  ;;  %v9158_v14 = vadd.f32 %v5306_v10, %v3773_v52  ;;  %v5832_v10 = vld [vmem:[#allocation21 + $0x4b0] sm:$0xff]  ;;  %v5835_v52 = vld [vmem:[#allocation21 + $0x4c8] sm:$0xff] }
 0x6ff   :  { %9248 = vpow2.f32 %v5573_v20 }
 0x700   :  { %9250 = vpow2.f32 %v5575_v45  ;;  %v9160_v20 = vadd.f32 %v5310_v13, %v3777_v59 }
 0x707   :  { %v9245_v15 = vpop.eup %9244 }
 0x708   :  { %v9247_v22 = vpop.eup %9246  ;;  %v5565_v42 = vadd.f32 1.0, %v9245_v15 }
 0x709   :  { %v5566_v39 = vadd.f32 1.0, %v9247_v22  ;;  %v9249_v40 = vpop.eup %9248 }
 0x70a   :  { %9252 = vrcp.f32 %v5565_v42  ;;  %v9251_v31 = vpop.eup %9250  ;;  %v5577_v50 = vadd.f32 1.0, %v9249_v40  ;;  %v5810_v40 = vld [vmem:[#allocation21 + $0x400] sm:$0xff] }
 0x70b   :  { %9254 = vrcp.f32 %v5566_v39  ;;  %v5578_v41 = vadd.f32 1.0, %v9251_v31  ;;  %v5812_v31 = vld [vmem:[#allocation21 + $0x410] sm:$0xff] }
 0x70c   :  { %9256 = vrcp.f32 %v5577_v50  ;;  %v5819_v50 = vld [vmem:[#allocation21 + $0x448] sm:$0xff] }
 0x70d   :  { %9258 = vrcp.f32 %v5578_v41 }
 0x714   :  { %v9253_v43 = vpop.eup %9252 }
 0x715   :  { %v9255_v49 = vpop.eup %9254 }
 0x716   :  { %v9257_v60 = vpop.eup %9256 }
 0x717   :  { %v9259_v58 = vpop.eup %9258  ;;  %v5587_v46 = vsub.f32 1.0, %v9257_v60  ;;  %v5591_v34 = vmul.f32 %v9294_v5, %v9257_v60 }
 0x718   :  { %v5588_v35 = vsub.f32 1.0, %v9259_v58  ;;  %v5592_v12 = vmul.f32 %v9259_v58, %v11007_v9  ;;  %v5831_v58 = vld [vmem:[#allocation21 + $0x4a8] sm:$0xff] }
 0x736   :  { %v5104_v1 = vpop.f32.mrb[56].mxu0 }
 0x737   :  { %v5105_v44 = vadd.f32 %v5104_v1, %v4874_v3  ;;  %v5410_v47 = vpop.f32.mrb[44].mxu1  ;;  %v5106_v38 = vpop.f32.mrb[57].mxu0  ;;  %v5814_v3 = vld [vmem:[#allocation21 + $0x420] sm:$0xff] }
 0x738   :  { %v5107_v48 = vadd.f32 %v5106_v38, %v4878_v32  ;;  %v5412_v29 = vpop.f32.mrb[45].mxu1  ;;  %v9159_v15 = vadd.f32 %v9158_v14, %v5410_v47  ;;  %v5825_v38 = vld [vmem:[#allocation21 + $0x478] sm:$0xff]  ;;  %v9018_v47 = vpack.c.bf16 %v5816_v37, %v5812_v31 }
 0x739   :  { %v5581_v11 = vmul.f32 %v9253_v43, %v5105_v44  ;;  %v9161_v22 = vadd.f32 %v9160_v20, %v5412_v29  ;;  %v5821_v44 = vld [vmem:[#allocation21 + $0x458] sm:$0xff]  ;;  %v8892_v29 = vpack.c.bf16 %v5823_v53, %v5819_v50  ;;  %v5843_v20 = vld [vmem:[#allocation21 + $0x508] sm:$0xff]  ;;  %v5844_v50 = vld [vmem:[#allocation21 + $0x510] sm:$0xff] }
 0x73a   :  { %v5582_v55 = vmul.f32 %v9255_v49, %v5107_v48  ;;  %v5597_v9 = vsub.f32 0.0, %v9159_v15  ;;  %v8890_v48 = vpack.c.bf16 %v5814_v3, %v5810_v40  ;;  %v5818_v49 = vld [vmem:[#allocation21 + $0x440] sm:$0xff]  ;;  %v5847_v15 = vld [vmem:[#allocation21 + $0x528] sm:$0xff]  ;;  %v5848_v53 = vld [vmem:[#allocation21 + $0x530] sm:$0xff] }
 0x73b   :  { %v5583_v57 = vadd.f32 %v9156_v33, %v5581_v11  ;;  %v5598_v42 = vsub.f32 0.0, %v9161_v22  ;;  %v5822_v33 = vld [vmem:[#allocation21 + $0x460] sm:$0xff]  ;;  %v5845_v22 = vld [vmem:[#allocation21 + $0x518] sm:$0xff] }
 0x73c   :  { %v5584_v0 = vadd.f32 %v9157_v54, %v5582_v55  ;;  %v5599_v17 = vmul.f32 1.442695, %v5597_v9  ;;  %v9020_v54 = vpack.c.bf16 %v5825_v38, %v5821_v44  ;;  %v5820_v55 = vld [vmem:[#allocation21 + $0x450] sm:$0xff]  ;;  %v5849_v9 = vld [vmem:[#allocation21 + $0x538] sm:$0xff]  ;;  %v5842_v40 = vld [vmem:[#allocation21 + $0x500] sm:$0xff] }
 0x73d   :  { %9260 = vtanh.f32 %v5583_v57  ;;  %v5601_v32 = vmul.f32 1.442695, %v5598_v42  ;;  %v5824_v57 = vld [vmem:[#allocation21 + $0x470] sm:$0xff]  ;;  %v5846_v3 = vld [vmem:[#allocation21 + $0x520] sm:$0xff]  ;;  %v9032_v37 = vpack.c.bf16 %v5849_v9, %v5845_v22  ;;  %v5855_v44 = vld [vmem:[#allocation21 + $0x568] sm:$0xff] }
 0x73e   :  { %9262 = vtanh.f32 %v5584_v0  ;;  %v5827_v0 = vld [vmem:[#allocation21 + $0x488] sm:$0xff]  ;;  %v9022_v26 = vpack.c.bf16 %v5824_v57, %v5820_v55  ;;  %v5853_v38 = vld [vmem:[#allocation21 + $0x558] sm:$0xff]  ;;  %v5866_v9 = vld [vmem:[#allocation21 + $0x5c0] sm:$0xff] }
 0x73f   :  { %v8896_v5 = vpack.c.bf16 %v5831_v58, %v5827_v0  ;;  %v5852_v0 = vld [vmem:[#allocation21 + $0x550] sm:$0xff]  ;;  %v5859_v58 = vld [vmem:[#allocation21 + $0x588] sm:$0xff] }
 0x747   :  { %v9261_v19 = vpop.eup %9260 }
 0x748   :  { %v5589_v51 = vmul.f32 %v9261_v19, %v5587_v46  ;;  %v9263_v8 = vpop.eup %9262  ;;  %v5833_v46 = vld [vmem:[#allocation21 + $0x4b8] sm:$0xff]  ;;  %v8894_v19 = vpack.c.bf16 %v5822_v33, %v5818_v49  ;;  %v9034_v49 = vpack.c.bf16 %v5848_v53, %v5844_v50  ;;  %v5850_v33 = vld [vmem:[#allocation21 + $0x540] sm:$0xff] }
 0x749   :  { %v5590_v4 = vmul.f32 %v9263_v8, %v5588_v35  ;;  %v5826_v35 = vld [vmem:[#allocation21 + $0x480] sm:$0xff]  ;;  %v5828_v8 = vld [vmem:[#allocation21 + $0x490] sm:$0xff] }
 0x74a   :  { %v5593_v28 = vadd.f32 %v5591_v34, %v5589_v51  ;;  %v5830_v51 = vld [vmem:[#allocation21 + $0x4a0] sm:$0xff]  ;;  %v9024_v34 = vpack.c.bf16 %v5833_v46, %v5829_v62  ;;  %v9026_v13 = vpack.c.bf16 %v5832_v10, %v5828_v8  ;;  %v5318_v46 = vrot.slane %v11063_v2, %v10952_v7 }
 0x74b   :  { %v5594_v63 = vadd.f32 %v5592_v12, %v5590_v4  ;;  %v5839_v4 = vld [vmem:[#allocation21 + $0x4e8] sm:$0xff]  ;;  %v5837_v12 = vld [vmem:[#allocation21 + $0x4d8] sm:$0xff]  ;;  %v8898_v59 = vpack.c.bf16 %v5830_v51, %v5826_v35  ;;  %v5862_v8 = vld [vmem:[#allocation21 + $0x5a0] sm:$0xff] }
 0x74c   :  { %v5662_v36 = vmin.f32 %v5593_v28, 0.0  ;;  %vm5658_vm10 = vcmp.gt.f32.partialorder %v5593_v28, 0.0  ;;  %v8900_v14 = vpack.c.bf16 %v5839_v4, %v5835_v52  ;;  %v5865_v35 = vld [vmem:[#allocation21 + $0x5b8] sm:$0xff] }
 0x74d   :  { %v5663_v16 = vmin.f32 %v5594_v63, 0.0  ;;  %v5635_v18 = vcombine.low %v5593_v28, %v5594_v63  ;;  %vm5659_vm9 = vcmp.gt.f32.partialorder %v5594_v63, 0.0 }
 0x74e   :  { %v5666_v21 = vmul.f32 1.442695, %v5662_v36  ;;  %v5838_v36 = vld [vmem:[#allocation21 + $0x4e0] sm:$0xff] }
 0x74f   :  { %v5668_v45 = vmul.f32 1.442695, %v5663_v16  ;;  %6543 = vst.sshfl [vmem:[#allocation27] sm:$0x33 pattern:$0x76325410] %v5635_v18 }
 0x750   :  { %9264 = vpow2.f32 %v5666_v21  ;;  %v5836_v21 = vld [vmem:[#allocation21 + $0x4d0] sm:$0xff] }
 0x751   :  { %9266 = vpow2.f32 %v5668_v45  ;;  %v5840_v18 = vld [vmem:[#allocation21 + $0x4f0] sm:$0xff] }
 0x752   :  { %9268 = vpow2.f32 %v5599_v17  ;;  %v9030_v17 = vpack.c.bf16 %v5840_v18, %v5836_v21 }
 0x753   :  { %9270 = vpow2.f32 %v5601_v32  ;;  %v8904_v32 = vpack.c.bf16 %v5847_v15, %v5843_v20  ;;  %v5326_v20 = vrot.slane %v11063_v2, %v11052_v30 }
 0x75a   :  { %v9265_v39 = vpop.eup %9264 }
 0x75b   :  { %v9267_v1 = vpop.eup %9266  ;;  %v6545_v41 = vadd.f32 -1.0, %v9265_v39 }
 0x75c   :  { %v6546_v43 = vadd.f32 -1.0, %v9267_v1  ;;  %v9269_v45 = vpop.eup %9268  ;;  %v5851_v1 = vld [vmem:[#allocation21 + $0x548] sm:$0xff] }
 0x75d   :  { %v5678_v60 = vsel %vm5658_vm10, %v5593_v28, %v6545_v41  ;;  %v5841_v28 = vld [vmem:[#allocation21 + $0x4f8] sm:$0xff]  ;;  %v9271_v42 = vpop.eup %9270  ;;  %v5603_v31 = vadd.f32 1.0, %v9269_v45  ;;  %v8908_v55 = vpack.c.bf16 %v5855_v44, %v5851_v1 }
 0x75e   :  { %v5679_v11 = vsel %vm5659_vm9, %v5594_v63, %v6546_v43  ;;  %v5834_v63 = vld [vmem:[#allocation21 + $0x4c0] sm:$0xff]  ;;  %v9028_v16 = vpack.c.bf16 %v5841_v28, %v5837_v12  ;;  %v5604_v41 = vadd.f32 1.0, %v9271_v42  ;;  %v5857_v43 = vld [vmem:[#allocation21 + $0x578] sm:$0xff]  ;;  %v5860_v12 = vld [vmem:[#allocation21 + $0x590] sm:$0xff] }
 0x75f   :  { %6024 = vmatprep.mubr.f32.mxu0 %v5679_v11  ;;  %6166 = vmatprep.mubr.f32.mxu1 %v5679_v11  ;;  %v8902_v39 = vpack.c.bf16 %v5838_v36, %v5834_v63  ;;  %v5854_v11 = vld [vmem:[#allocation21 + $0x560] sm:$0xff]  ;;  %9272 = vrcp.f32 %v5603_v31  ;;  %v9036_v57 = vpack.c.bf16 %v5857_v43, %v5853_v38  ;;  %v5864_v28 = vld [vmem:[#allocation21 + $0x5b0] sm:$0xff]  ;;  %v5871_v36 = vld [vmem:[#allocation21 + $0x5e8] sm:$0xff] }
 0x760   :  { %6025 = vmatmul.mubr.f32.vlgmr.msra.gmra.mrb[58].mxu0 %v5678_v60  ;;  %6167 = vmatmul.mubr.f32.vlgmr.msra.gmra.mrb[50].mxu1 %v5678_v60  ;;  %v5856_v60 = vld [vmem:[#allocation21 + $0x570] sm:$0xff]  ;;  %9274 = vrcp.f32 %v5604_v41  ;;  %v8910_v51 = vpack.c.bf16 %v5854_v11, %v5850_v33  ;;  %v9042_v22 = vpack.c.bf16 %v5864_v28, %v5860_v12  ;;  %v5877_v1 = vld [vmem:[#allocation21 + $0x618] sm:$0xff] }
 0x761   :  { %8891 = vmatpush1.bf16.msra.mxu0 %v8890_v48  ;;  %9019 = vmatpush1.bf16.msra.mxu1 %v9018_v47  ;;  %v11073_v48 = vld [vmem:[#allocation13 + $0x8] sm:$0xf]  ;;  %v5881_v41 = vld [vmem:[#allocation21 + $0x638] sm:$0xff] }
 0x762   :  { %8893 = vmatprep.subr.bf16.mxu0 %v8892_v29  ;;  %9021 = vmatprep.subr.bf16.mxu1 %v9020_v54  ;;  %v3781_v47 = vrot.slane %v11073_v48, %v10944_v27  ;;  %v8906_v29 = vpack.c.bf16 %v5846_v3, %v5842_v40  ;;  %v5314_v54 = vrot.slane %v11063_v2, %v10975_v56  ;;  %v5868_v31 = vld [vmem:[#allocation21 + $0x5d0] sm:$0xff] }
 0x763   :  { %v3785_v62 = vrot.slane %v11073_v48, %v10949_v6  ;;  %v3789_v21 = vrot.slane %v11073_v48, %v10975_v56  ;;  %v3793_v18 = vrot.slane %v11073_v48, %v10952_v7 }
 0x764   :  { %v9162_v10 = vadd.f32 %v5314_v54, %v3781_v47 }
 0x765   :  { %8895 = vmatpush1.bf16.msra.mxu0 %v8894_v19  ;;  %9023 = vmatpush1.bf16.msra.mxu1 %v9022_v26  ;;  %v5863_v19 = vld [vmem:[#allocation21 + $0x5a8] sm:$0xff]  ;;  %v5861_v26 = vld [vmem:[#allocation21 + $0x598] sm:$0xff]  ;;  %v9164_v63 = vadd.f32 %v5318_v46, %v3785_v62  ;;  %v9166_v38 = vadd.f32 %v11030_v23, %v3789_v21  ;;  %v9167_v43 = vadd.f32 %v11032_v24, %v3793_v18  ;;  %v5876_v23 = vld [vmem:[#allocation21 + $0x610] sm:$0xff] }
 0x766   :  { %8897 = vmatprep.subr.bf16.mxu0 %v8896_v5  ;;  %9025 = vmatprep.subr.bf16.mxu1 %v9024_v34  ;;  %v9038_v5 = vpack.c.bf16 %v5856_v60, %v5852_v0  ;;  %v5858_v34 = vld [vmem:[#allocation21 + $0x580] sm:$0xff]  ;;  %v8912_v52 = vpack.c.bf16 %v5863_v19, %v5859_v58  ;;  %v9040_v4 = vpack.c.bf16 %v5865_v35, %v5861_v26  ;;  %v5880_v46 = vld [vmem:[#allocation21 + $0x630] sm:$0xff]  ;;  %v5883_v24 = vld [vmem:[#allocation21 + $0x648] sm:$0xff] }
 0x767   :  { %v8914_v15 = vpack.c.bf16 %v5862_v8, %v5858_v34  ;;  %v9048_v62 = vpack.c.bf16 %v5881_v41, %v5877_v1  ;;  %v5887_v35 = vld [vmem:[#allocation21 + $0x668] sm:$0xff]  ;;  %v5904_v1 = vld [vmem:[#allocation21 + $0x6f0] sm:$0xff] }
 0x768   :  { %v8924_v12 = vpack.c.bf16 %v5887_v35, %v5883_v24  ;;  %v5907_v41 = vld [vmem:[#allocation21 + $0x708] sm:$0xff]  ;;  %v5914_v35 = vld [vmem:[#allocation21 + $0x740] sm:$0xff] }
 0x769   :  { %8899 = vmatpush1.bf16.msra.mxu0 %v8898_v59  ;;  %9027 = vmatpush1.bf16.msra.mxu1 %v9026_v13  ;;  %v5867_v59 = vld [vmem:[#allocation21 + $0x5c8] sm:$0xff]  ;;  %v5322_v13 = vrot.slane %v11063_v2, %v11049_v25  ;;  %v5870_v25 = vld [vmem:[#allocation21 + $0x5e0] sm:$0xff]  ;;  %v9273_v44 = vpop.eup %9272 }
 0x76a   :  { %8901 = vmatprep.subr.bf16.mxu0 %v8900_v14  ;;  %9029 = vmatprep.subr.bf16.mxu1 %v9028_v16  ;;  %v5869_v14 = vld [vmem:[#allocation21 + $0x5d8] sm:$0xff]  ;;  %v8916_v40 = vpack.c.bf16 %v5871_v36, %v5867_v59  ;;  %v5879_v2 = vld [vmem:[#allocation21 + $0x628] sm:$0xff]  ;;  %v8918_v11 = vpack.c.bf16 %v5870_v25, %v5866_v9  ;;  %v5884_v59 = vld [vmem:[#allocation21 + $0x650] sm:$0xff] }
 0x76b   :  { %v5873_v16 = vld [vmem:[#allocation21 + $0x5f8] sm:$0xff]  ;;  %v5895_v36 = vld [vmem:[#allocation21 + $0x6a8] sm:$0xff]  ;;  %v5892_v9 = vld [vmem:[#allocation21 + $0x690] sm:$0xff] }
 0x76c   :  { %v9044_v3 = vpack.c.bf16 %v5873_v16, %v5869_v14  ;;  %v5893_v14 = vld [vmem:[#allocation21 + $0x698] sm:$0xff]  ;;  %v5896_v25 = vld [vmem:[#allocation21 + $0x6b0] sm:$0xff] }
 0x76d   :  { %8903 = vmatpush1.bf16.msra.mxu0 %v8902_v39  ;;  %9031 = vmatpush1.bf16.msra.mxu1 %v9030_v17  ;;  %v5897_v16 = vld [vmem:[#allocation21 + $0x6b8] sm:$0xff] }
 0x76e   :  { %8905 = vmatprep.subr.bf16.mxu0 %v8904_v32  ;;  %9033 = vmatprep.subr.bf16.mxu1 %v9032_v37  ;;  %v5872_v32 = vld [vmem:[#allocation21 + $0x5f0] sm:$0xff]  ;;  %v5875_v37 = vld [vmem:[#allocation21 + $0x608] sm:$0xff] }
 0x76f   :  { %v9046_v54 = vpack.c.bf16 %v5872_v32, %v5868_v31  ;;  %v8920_v58 = vpack.c.bf16 %v5879_v2, %v5875_v37  ;;  %v9058_v31 = vpack.c.bf16 %v5896_v25, %v5892_v9  ;;  %v5898_v32 = vld [vmem:[#allocation21 + $0x6c0] sm:$0xff]  ;;  %v5900_v2 = vld [vmem:[#allocation21 + $0x6d0] sm:$0xff] }
 0x770   :  { %v5902_v37 = vld [vmem:[#allocation21 + $0x6e0] sm:$0xff] }
 0x771   :  { %8907 = vmatpush1.bf16.msra.mxu0 %v8906_v29  ;;  %9035 = vmatpush1.bf16.msra.mxu1 %v9034_v49  ;;  %v9275_v29 = vpop.eup %9274 }
 0x772   :  { %8909 = vmatprep.subr.bf16.mxu0 %v8908_v55  ;;  %9037 = vmatprep.subr.bf16.mxu1 %v9036_v57  ;;  %v5874_v55 = vld [vmem:[#allocation21 + $0x600] sm:$0xff] }
 0x773   :  { %v5878_v57 = vld [vmem:[#allocation21 + $0x620] sm:$0xff] }
 0x774   :  { %v8922_v8 = vpack.c.bf16 %v5878_v57, %v5874_v55 }
 0x775   :  { %8911 = vmatpush1.bf16.msra.mxu0 %v8910_v51  ;;  %9039 = vmatpush1.bf16.msra.mxu1 %v9038_v5  ;;  %v5885_v51 = vld [vmem:[#allocation21 + $0x658] sm:$0xff] }
 0x776   :  { %v5481_v45 = vpop.f32.mrb[54].mxu0  ;;  %8913 = vmatprep.subr.bf16.mxu0 %v8912_v52  ;;  %9041 = vmatprep.subr.bf16.mxu1 %v9040_v4  ;;  %v5889_v5 = vld [vmem:[#allocation21 + $0x678] sm:$0xff]  ;;  %v5882_v52 = vld [vmem:[#allocation21 + $0x640] sm:$0xff] }
 0x777   :  { %v9163_v42 = vadd.f32 %v9162_v10, %v5481_v45  ;;  %v5552_v39 = vpop.f32.mrb[48].mxu1  ;;  %v5483_v17 = vpop.f32.mrb[55].mxu0  ;;  %v9050_v10 = vpack.c.bf16 %v5880_v46, %v5876_v23  ;;  %v5886_v4 = vld [vmem:[#allocation21 + $0x660] sm:$0xff]  ;;  %v9052_v28 = vpack.c.bf16 %v5889_v5, %v5885_v51  ;;  %v5917_v23 = vld [vmem:[#allocation21 + $0x758] sm:$0xff] }
 0x778   :  { %v5553_v50 = vadd.f32 %v5552_v39, %v5322_v13  ;;  %v9165_v53 = vadd.f32 %v9164_v63, %v5483_v17  ;;  %v5554_v30 = vpop.f32.mrb[49].mxu1  ;;  %v5888_v13 = vld [vmem:[#allocation21 + $0x670] sm:$0xff]  ;;  %v5891_v63 = vld [vmem:[#allocation21 + $0x688] sm:$0xff]  ;;  %v8926_v21 = vpack.c.bf16 %v5886_v4, %v5882_v52  ;;  %v5894_v45 = vld [vmem:[#allocation21 + $0x6a0] sm:$0xff] }
 0x779   :  { %v5609_v48 = vsub.f32 0.0, %v9163_v42  ;;  %v5555_v47 = vadd.f32 %v5554_v30, %v5326_v20  ;;  %8915 = vmatpush1.bf16.msra.mxu0 %v8914_v15  ;;  %9043 = vmatpush1.bf16.msra.mxu1 %v9042_v22  ;;  %v9054_v18 = vpack.c.bf16 %v5888_v13, %v5884_v59  ;;  %v5890_v20 = vld [vmem:[#allocation21 + $0x680] sm:$0xff]  ;;  %v8928_v15 = vpack.c.bf16 %v5895_v36, %v5891_v63  ;;  %v5899_v42 = vld [vmem:[#allocation21 + $0x6c8] sm:$0xff]  ;;  %v5901_v17 = vld [vmem:[#allocation21 + $0x6d8] sm:$0xff] }
 0x77a   :  { %v5619_v49 = vmul.f32 %v9273_v44, %v5553_v50  ;;  %v5610_v33 = vsub.f32 0.0, %v9165_v53  ;;  %8917 = vmatprep.subr.bf16.mxu0 %v8916_v40  ;;  %9045 = vmatprep.subr.bf16.mxu1 %v9044_v3  ;;  %v9056_v22 = vpack.c.bf16 %v5897_v16, %v5893_v14  ;;  %v5903_v39 = vld [vmem:[#allocation21 + $0x6e8] sm:$0xff]  ;;  %v5905_v40 = vld [vmem:[#allocation21 + $0x6f8] sm:$0xff]  ;;  %v8930_v3 = vpack.c.bf16 %v5894_v45, %v5890_v20  ;;  %v5918_v51 = vld [vmem:[#allocation21 + $0x760] sm:$0xff] }
 0x77b   :  { %v5611_v0 = vmul.f32 1.442695, %v5609_v48  ;;  %v5620_v60 = vmul.f32 %v9275_v29, %v5555_v47  ;;  %v8932_v53 = vpack.c.bf16 %v5903_v39, %v5899_v42  ;;  %v9060_v30 = vpack.c.bf16 %v5905_v40, %v5901_v17  ;;  %v5913_v48 = vld [vmem:[#allocation21 + $0x738] sm:$0xff]  ;;  %v5923_v52 = vld [vmem:[#allocation21 + $0x788] sm:$0xff]  ;;  %v5922_v13 = vld [vmem:[#allocation21 + $0x780] sm:$0xff] }
 0x77c   :  { %v11093_v19 = vadd.f32 %v9166_v38, %v5619_v49  ;;  %v5613_v26 = vmul.f32 1.442695, %v5610_v33  ;;  %v5911_v38 = vld [vmem:[#allocation21 + $0x728] sm:$0xff]  ;;  %v8934_v49 = vpack.c.bf16 %v5902_v37, %v5898_v32  ;;  %v9062_v33 = vpack.c.bf16 %v5904_v1, %v5900_v2  ;;  %v5921_v46 = vld [vmem:[#allocation21 + $0x778] sm:$0xff]  ;;  %v5926_v63 = vld [vmem:[#allocation21 + $0x7a0] sm:$0xff] }
 0x77d   :  { %9276 = vpow2.f32 %v5611_v0  ;;  %v11095_v34 = vadd.f32 %v9167_v43, %v5620_v60  ;;  %8919 = vmatpush1.bf16.msra.mxu0 %v8918_v11  ;;  %9047 = vmatpush1.bf16.msra.mxu1 %v9046_v54  ;;  %v5909_v43 = vld [vmem:[#allocation21 + $0x718] sm:$0xff]  ;;  %v5906_v11 = vld [vmem:[#allocation21 + $0x700] sm:$0xff]  ;;  %v8936_v55 = vpack.c.bf16 %v5911_v38, %v5907_v41  ;;  %v5908_v0 = vld [vmem:[#allocation21 + $0x710] sm:$0xff]  ;;  %v9068_v5 = vpack.c.bf16 %v5921_v46, %v5917_v23 }
 0x77e   :  { %9278 = vpow2.f32 %v5613_v26  ;;  %8921 = vmatprep.subr.bf16.mxu0 %v8920_v58  ;;  %9049 = vmatprep.subr.bf16.mxu1 %v9048_v62  ;;  %v5910_v54 = vld [vmem:[#allocation21 + $0x720] sm:$0xff]  ;;  %v9064_v57 = vpack.c.bf16 %v5913_v48, %v5909_v43  ;;  %v5912_v60 = vld [vmem:[#allocation21 + $0x730] sm:$0xff]  ;;  %v5915_v58 = vld [vmem:[#allocation21 + $0x748] sm:$0xff]  ;;  %v8942_v59 = vpack.c.bf16 %v5918_v51, %v5914_v35  ;;  %v8946_v39 = vpack.c.bf16 %v5926_v63, %v5922_v13 }
 0x77f   :  { %v5919_v62 = vld [vmem:[#allocation21 + $0x768] sm:$0xff]  ;;  %v8938_v24 = vpack.c.bf16 %v5910_v54, %v5906_v11  ;;  %v9066_v26 = vpack.c.bf16 %v5912_v60, %v5908_v0  ;;  %v5924_v36 = vld [vmem:[#allocation21 + $0x790] sm:$0xff]  ;;  %v9295_v2 = vld.sshfl [vmem:[#allocation4 + $0x4] sm:$0x33 pattern:$0x76325410] }
 0x780   :  { %v5927_v4 = vld [vmem:[#allocation21 + $0x7a8] sm:$0xff]  ;;  %v5932_v37 = vld [vmem:[#allocation21 + $0x7d0] sm:$0xff] }
 0x781   :  { %8923 = vmatpush1.bf16.msra.mxu0 %v8922_v8  ;;  %9051 = vmatpush1.bf16.msra.mxu1 %v9050_v10  ;;  %v5916_v8 = vld [vmem:[#allocation21 + $0x750] sm:$0xff]  ;;  %v8944_v14 = vpack.c.bf16 %v5927_v4, %v5923_v52  ;;  %v5935_v20 = vld [vmem:[#allocation21 + $0x7e8] sm:$0xff]  ;;  %v6299_v52 = vld [vmem:[#allocation24 + $0x198] sm:$0xff] }
 0x782   :  { %8925 = vmatprep.subr.bf16.mxu0 %v8924_v12  ;;  %9053 = vmatprep.subr.bf16.mxu1 %v9052_v28  ;;  %v5920_v10 = vld [vmem:[#allocation21 + $0x770] sm:$0xff]  ;;  %v5925_v12 = vld [vmem:[#allocation21 + $0x798] sm:$0xff]  ;;  %v6264_v41 = vld [vmem:[#allocation24 + $0x80] sm:$0xff] }
 0x783   :  { %v5929_v28 = vld [vmem:[#allocation21 + $0x7b8] sm:$0xff]  ;;  %v6265_v38 = vld [vmem:[#allocation24 + $0x88] sm:$0xff]  ;;  %v6296_v43 = vld [vmem:[#allocation24 + $0x180] sm:$0xff] }
 0x784   :  { %v9072_v16 = vpack.c.bf16 %v5929_v28, %v5925_v12  ;;  %v6297_v48 = vld [vmem:[#allocation24 + $0x188] sm:$0xff]  ;;  %v6248_v46 = vld [vmem:[#allocation24] sm:$0xff]  ;;  %v6266_v51 = vld [vmem:[#allocation24 + $0x90] sm:$0xff] }
 0x785   :  { %8927 = vmatpush1.bf16.msra.mxu0 %v8926_v21  ;;  %9055 = vmatpush1.bf16.msra.mxu1 %v9054_v18  ;;  %v5928_v21 = vld [vmem:[#allocation21 + $0x7b0] sm:$0xff]  ;;  %v5931_v18 = vld [vmem:[#allocation21 + $0x7c8] sm:$0xff]  ;;  %v9112_v0 = vpack.c.bf16 %v6297_v48, %v6296_v43  ;;  %v6287_v43 = vld [vmem:[#allocation24 + $0x138] sm:$0xff] }
 0x786   :  { %8929 = vmatprep.subr.bf16.mxu0 %v8928_v15  ;;  %9057 = vmatprep.subr.bf16.mxu1 %v9056_v22  ;;  %v5933_v15 = vld [vmem:[#allocation21 + $0x7d8] sm:$0xff]  ;;  %v9074_v17 = vpack.c.bf16 %v5928_v21, %v5924_v36  ;;  %v8948_v40 = vpack.c.bf16 %v5935_v20, %v5931_v18  ;;  %v6281_v35 = vld [vmem:[#allocation24 + $0x108] sm:$0xff]  ;;  %v6268_v21 = vld [vmem:[#allocation24 + $0xa0] sm:$0xff] }
 0x787   :  { %v9277_v50 = vpop.eup %9276  ;;  %v5937_v22 = vld [vmem:[#allocation21 + $0x7f8] sm:$0xff]  ;;  %v6269_v20 = vld [vmem:[#allocation24 + $0xa8] sm:$0xff]  ;;  %v6272_v48 = vld [vmem:[#allocation24 + $0xc0] sm:$0xff] }
 0x788   :  { %v5615_v44 = vadd.f32 1.0, %v9277_v50  ;;  %v9279_v47 = vpop.eup %9278  ;;  %v9076_v32 = vpack.c.bf16 %v5937_v22, %v5933_v15  ;;  %v5936_v50 = vld [vmem:[#allocation21 + $0x7f0] sm:$0xff] }
 0x789   :  { %v5616_v29 = vadd.f32 1.0, %v9279_v47  ;;  %8931 = vmatpush1.bf16.msra.mxu0 %v8930_v3  ;;  %9059 = vmatpush1.bf16.msra.mxu1 %v9058_v31  ;;  %v5930_v3 = vld [vmem:[#allocation21 + $0x7c0] sm:$0xff]  ;;  %v9078_v11 = vpack.c.bf16 %v5936_v50, %v5932_v37  ;;  %v6301_v15 = vld [vmem:[#allocation24 + $0x1a8] sm:$0xff]  ;;  %v6302_v37 = vld [vmem:[#allocation24 + $0x1b0] sm:$0xff] }
 0x78a   :  { %9280 = vrcp.f32 %v5615_v44  ;;  %8933 = vmatprep.subr.bf16.mxu0 %v8932_v53  ;;  %9061 = vmatprep.subr.bf16.mxu1 %v9060_v30  ;;  %v5934_v31 = vld [vmem:[#allocation21 + $0x7e0] sm:$0xff] }
 0x78b   :  { %9282 = vtanh.f32 %v11093_v19  ;;  %v8940_v19 = vpack.c.bf16 %v5919_v62, %v5915_v58  ;;  %v6303_v50 = vld [vmem:[#allocation24 + $0x1b8] sm:$0xff] }
 0x78c   :  { %9284 = vrcp.f32 %v5616_v29 }
 0x78d   :  { %9286 = vtanh.f32 %v11095_v34  ;;  %8935 = vmatpush1.bf16.msra.mxu0 %v8934_v49  ;;  %9063 = vmatpush1.bf16.msra.mxu1 %v9062_v33  ;;  %v9070_v34 = vpack.c.bf16 %v5920_v10, %v5916_v8  ;;  %v8950_v33 = vpack.c.bf16 %v5934_v31, %v5930_v3  ;;  %v6267_v8 = vld [vmem:[#allocation24 + $0x98] sm:$0xff]  ;;  %v6298_v10 = vld [vmem:[#allocation24 + $0x190] sm:$0xff]  ;;  %v6285_v3 = vld [vmem:[#allocation24 + $0x128] sm:$0xff] }
 0x78e   :  { %8937 = vmatprep.subr.bf16.mxu0 %v8936_v55  ;;  %9065 = vmatprep.subr.bf16.mxu1 %v9064_v57  ;;  %v9080_v57 = vpack.c.bf16 %v6265_v38, %v6264_v41  ;;  %v9084_v63 = vpack.c.bf16 %v6267_v8, %v6266_v51  ;;  %v9116_v36 = vpack.c.bf16 %v6299_v52, %v6298_v10  ;;  %v6270_v31 = vld [vmem:[#allocation24 + $0xb0] sm:$0xff]  ;;  %v6259_v51 = vld [vmem:[#allocation24 + $0x58] sm:$0xff]  ;;  %v6276_v52 = vld [vmem:[#allocation24 + $0xe0] sm:$0xff] }
 0x78f   :  { %v6286_v38 = vld [vmem:[#allocation24 + $0x130] sm:$0xff]  ;;  %v6291_v10 = vld [vmem:[#allocation24 + $0x158] sm:$0xff] }
 0x790   :  { %v6290_v8 = vld [vmem:[#allocation24 + $0x150] sm:$0xff] }
 0x791   :  { %8939 = vmatpush1.bf16.msra.mxu0 %v8938_v24  ;;  %9067 = vmatpush1.bf16.msra.mxu1 %v9066_v26  ;;  %v6249_v24 = vld [vmem:[#allocation24 + $0x8] sm:$0xff]  ;;  %v6280_v26 = vld [vmem:[#allocation24 + $0x100] sm:$0xff] }
 0x792   :  { %8941 = vmatprep.subr.bf16.mxu0 %v8940_v19  ;;  %9069 = vmatprep.subr.bf16.mxu1 %v9068_v5  ;;  %v9082_v12 = vpack.c.bf16 %v6249_v24, %v6248_v46  ;;  %v9114_v28 = vpack.c.bf16 %v6281_v35, %v6280_v26  ;;  %v6307_v46 = vld [vmem:[#allocation24 + $0x1d8] sm:$0xff]  ;;  %v6258_v35 = vld [vmem:[#allocation24 + $0x50] sm:$0xff] }
 0x794   :  { %v9281_v45 = vpop.eup %9280 }
 0x795   :  { %v9283_v9 = vpop.eup %9282  ;;  %v5625_v25 = vsub.f32 1.0, %v9281_v45  ;;  %8943 = vmatpush1.bf16.msra.mxu0 %v8942_v59  ;;  %9071 = vmatpush1.bf16.msra.mxu1 %v9070_v34  ;;  %v5629_v1 = vmul.f32 %v9295_v2, %v9281_v45  ;;  %v6250_v59 = vld [vmem:[#allocation24 + $0x10] sm:$0xff]  ;;  %v6251_v34 = vld [vmem:[#allocation24 + $0x18] sm:$0xff]  ;;  %v6300_v45 = vld [vmem:[#allocation24 + $0x1a0] sm:$0xff] }
 0x796   :  { %v9285_v42 = vpop.eup %9284  ;;  %8945 = vmatprep.subr.bf16.mxu0 %v8944_v14  ;;  %9073 = vmatprep.subr.bf16.mxu1 %v9072_v16  ;;  %v6282_v14 = vld [vmem:[#allocation24 + $0x110] sm:$0xff]  ;;  %v6283_v16 = vld [vmem:[#allocation24 + $0x118] sm:$0xff]  ;;  %v9086_v22 = vpack.c.bf16 %v6251_v34, %v6250_v59  ;;  %v9102_v59 = vpack.c.bf16 %v6259_v51, %v6258_v35  ;;  %v9134_v34 = vpack.c.bf16 %v6291_v10, %v6290_v8 }
 0x797   :  { %v5626_v53 = vsub.f32 1.0, %v9285_v42  ;;  %v5627_v30 = vmul.f32 %v9283_v9, %v5625_v25  ;;  %v9287_v44 = vpop.eup %9286  ;;  %v5630_v29 = vmul.f32 %v9285_v42, %v11018_v61  ;;  %v9118_v9 = vpack.c.bf16 %v6283_v16, %v6282_v14  ;;  %v6252_v25 = vld [vmem:[#allocation24 + $0x20] sm:$0xff]  ;;  %v6253_v42 = vld [vmem:[#allocation24 + $0x28] sm:$0xff]  ;;  %v6254_v2 = vld [vmem:[#allocation24 + $0x30] sm:$0xff] }
 0x798   :  { %v6261_v14 = vld [vmem:[#allocation24 + $0x68] sm:$0xff]  ;;  %v6292_v16 = vld [vmem:[#allocation24 + $0x160] sm:$0xff] }
 0x799   :  { %v5628_v47 = vmul.f32 %v9287_v44, %v5626_v53  ;;  %v5631_v49 = vadd.f32 %v5629_v1, %v5627_v30  ;;  %8947 = vmatpush1.bf16.msra.mxu0 %v8946_v39  ;;  %9075 = vmatpush1.bf16.msra.mxu1 %v9074_v17  ;;  %v9088_v39 = vpack.c.bf16 %v6269_v20, %v6268_v21  ;;  %v6255_v1 = vld [vmem:[#allocation24 + $0x38] sm:$0xff]  ;;  %v6278_v20 = vld [vmem:[#allocation24 + $0xf0] sm:$0xff] }
 0x79a   :  { %8949 = vmatprep.subr.bf16.mxu0 %v8948_v40  ;;  %9077 = vmatprep.subr.bf16.mxu1 %v9076_v32  ;;  %v9120_v17 = vpack.c.bf16 %v6301_v15, %v6300_v45  ;;  %v6284_v40 = vld [vmem:[#allocation24 + $0x120] sm:$0xff]  ;;  %v6271_v32 = vld [vmem:[#allocation24 + $0xb8] sm:$0xff]  ;;  %v9090_v53 = vpack.c.bf16 %v6253_v42, %v6252_v25  ;;  %v9124_v44 = vpack.c.bf16 %v6303_v50, %v6302_v37  ;;  %v6262_v42 = vld [vmem:[#allocation24 + $0x70] sm:$0xff] }
 0x79b   :  { %v5632_v54 = vadd.f32 %v5630_v29, %v5628_v47  ;;  %v5664_v55 = vmin.f32 %v5631_v49, 0.0  ;;  %vm5660_vm12 = vcmp.gt.f32.partialorder %v5631_v49, 0.0  ;;  %v9122_v30 = vpack.c.bf16 %v6285_v3, %v6284_v40  ;;  %v6273_v47 = vld [vmem:[#allocation24 + $0xc8] sm:$0xff]  ;;  %v6304_v29 = vld [vmem:[#allocation24 + $0x1c0] sm:$0xff]  ;;  %v6279_v45 = vld [vmem:[#allocation24 + $0xf8] sm:$0xff] }
 0x79c   :  { %v9092_v41 = vpack.c.bf16 %v6271_v32, %v6270_v31  ;;  %v6311_v25 = vld [vmem:[#allocation24 + $0x1f8] sm:$0xff]  ;;  %v6294_v40 = vld [vmem:[#allocation24 + $0x170] sm:$0xff] }
 0x79d   :  { %v5665_v60 = vmin.f32 %v5632_v54, 0.0  ;;  %v5670_v58 = vmul.f32 1.442695, %v5664_v55  ;;  %v5647_v62 = vcombine.low %v5631_v49, %v5632_v54  ;;  %8951 = vmatpush1.bf16.msra.mxu0 %v8950_v33  ;;  %9079 = vmatpush1.bf16.msra.mxu1 %v9078_v11  ;;  %vm5661_vm11 = vcmp.gt.f32.partialorder %v5632_v54, 0.0  ;;  %v6257_v55 = vld [vmem:[#allocation24 + $0x48] sm:$0xff]  ;;  %v6295_v3 = vld [vmem:[#allocation24 + $0x178] sm:$0xff] }
 0x79e   :  { %9081 = vmatprep.subr.bf16.mxu0 %v9080_v57  ;;  %9113 = vmatprep.subr.bf16.mxu1 %v9112_v0  ;;  %v9094_v33 = vpack.c.bf16 %v6255_v1, %v6254_v2  ;;  %v9126_v11 = vpack.c.bf16 %v6287_v43, %v6286_v38  ;;  %v9096_v57 = vpack.c.bf16 %v6273_v47, %v6272_v48  ;;  %v5938_v37 = vld [vmem:[#allocation22] sm:$0xf] }
 0x79f   :  { %v5672_v23 = vmul.f32 1.442695, %v5665_v60  ;;  %9288 = vpow2.f32 %v5670_v58  ;;  %6544 = vst.sshfl [vmem:[#allocation27 + $0x4] sm:$0x33 pattern:$0x76325410] %v5647_v62  ;;  %v9142_v32 = vpack.c.bf16 %v6295_v3, %v6294_v40  ;;  %v5943_v50 = vrot.slane %v5938_v37, %v10944_v27 }
 0x7a0   :  { %v6288_v60 = vld [vmem:[#allocation24 + $0x140] sm:$0xff]  ;;  %v6289_v58 = vld [vmem:[#allocation24 + $0x148] sm:$0xff]  ;;  %v6274_v62 = vld [vmem:[#allocation24 + $0xd0] sm:$0xff]  ;;  %v5955_v2 = vrot.slane %v5938_v37, %v10952_v7 }
 0x7a1   :  { %9290 = vpow2.f32 %v5672_v23  ;;  %v6275_v23 = vld [vmem:[#allocation24 + $0xd8] sm:$0xff]  ;;  %v9130_v26 = vpack.c.bf16 %v6289_v58, %v6288_v60 }
 0x7a9   :  { %v9289_v61 = vpop.eup %9288 }
 0x7aa   :  { %v6547_v5 = vadd.f32 -1.0, %v9289_v61  ;;  %v6306_v61 = vld [vmem:[#allocation24 + $0x1d0] sm:$0xff] }
 0x7ab   :  { %v9291_v19 = vpop.eup %9290 }
 0x7ac   :  { %v6548_v4 = vadd.f32 -1.0, %v9291_v19  ;;  %v5680_v18 = vsel %vm5660_vm12, %v5631_v49, %v6547_v5  ;;  %v6305_v49 = vld [vmem:[#allocation24 + $0x1c8] sm:$0xff]  ;;  %v9100_v19 = vpack.c.bf16 %v6275_v23, %v6274_v62  ;;  %v9132_v5 = vpack.c.bf16 %v6307_v46, %v6306_v61 }
 0x7ad   :  { %v9128_v0 = vpack.c.bf16 %v6305_v49, %v6304_v29 }
 0x7ae   :  { %v5681_v13 = vsel %vm5661_vm11, %v5632_v54, %v6548_v4  ;;  %v6256_v54 = vld [vmem:[#allocation24 + $0x40] sm:$0xff]  ;;  %v6277_v4 = vld [vmem:[#allocation24 + $0xe8] sm:$0xff] }
 0x7af   :  { %6095 = vmatprep.mubr.f32.mxu0 %v5681_v13  ;;  %6237 = vmatprep.mubr.f32.mxu1 %v5681_v13  ;;  %v9098_v24 = vpack.c.bf16 %v6257_v55, %v6256_v54  ;;  %v9104_v13 = vpack.c.bf16 %v6277_v4, %v6276_v52 }
 0x7b0   :  { %6096 = vmatmul.mubr.f32.vlgmr.msra.gmra.mrb[58].mxu0 %v5680_v18  ;;  %6238 = vmatmul.mubr.f32.vlgmr.msra.gmra.mrb[50].mxu1 %v5680_v18  ;;  %v6293_v18 = vld [vmem:[#allocation24 + $0x168] sm:$0xff] }
 0x7b1   :  { %9083 = vmatpush3.bf16.msra.mxu0 %v9082_v12  ;;  %9115 = vmatpush3.bf16.msra.mxu1 %v9114_v28  ;;  %v6308_v12 = vld [vmem:[#allocation24 + $0x1e0] sm:$0xff]  ;;  %v6309_v28 = vld [vmem:[#allocation24 + $0x1e8] sm:$0xff]  ;;  %v9138_v15 = vpack.c.bf16 %v6293_v18, %v6292_v16 }
 0x7b2   :  { %9085 = vmatprep.subr.bf16.mxu0 %v9084_v63  ;;  %9117 = vmatprep.subr.bf16.mxu1 %v9116_v36  ;;  %v9136_v63 = vpack.c.bf16 %v6309_v28, %v6308_v12  ;;  %v6260_v36 = vld [vmem:[#allocation24 + $0x60] sm:$0xff] }
 0x7b3   :  { %v9106_v21 = vpack.c.bf16 %v6261_v14, %v6260_v36 }
 0x7b5   :  { %9087 = vmatpush3.bf16.msra.mxu0 %v9086_v22  ;;  %9119 = vmatpush3.bf16.msra.mxu1 %v9118_v9  ;;  %v9108_v22 = vpack.c.bf16 %v6279_v45, %v6278_v20  ;;  %v6310_v9 = vld [vmem:[#allocation24 + $0x1f0] sm:$0xff] }
 0x7b6   :  { %9089 = vmatprep.subr.bf16.mxu0 %v9088_v39  ;;  %9121 = vmatprep.subr.bf16.mxu1 %v9120_v17  ;;  %v9140_v39 = vpack.c.bf16 %v6311_v25, %v6310_v9  ;;  %v6263_v17 = vld [vmem:[#allocation24 + $0x78] sm:$0xff] }
 0x7b7   :  { %v9110_v31 = vpack.c.bf16 %v6263_v17, %v6262_v42 }
 0x7b9   :  { %9091 = vmatpush3.bf16.msra.mxu0 %v9090_v53  ;;  %9123 = vmatpush3.bf16.msra.mxu1 %v9122_v30  ;;  %v5951_v53 = vrot.slane %v5938_v37, %v10975_v56  ;;  %v5947_v30 = vrot.slane %v5938_v37, %v10949_v6 }
 0x7ba   :  { %9093 = vmatprep.subr.bf16.mxu0 %v9092_v41  ;;  %9125 = vmatprep.subr.bf16.mxu1 %v9124_v44 }
 0x7bd   :  { %9095 = vmatpush3.bf16.msra.mxu0 %v9094_v33  ;;  %9127 = vmatpush3.bf16.msra.mxu1 %v9126_v11 }
 0x7be   :  { %9097 = vmatprep.subr.bf16.mxu0 %v9096_v57  ;;  %9129 = vmatprep.subr.bf16.mxu1 %v9128_v0 }
 0x7c1   :  { %9099 = vmatpush3.bf16.msra.mxu0 %v9098_v24  ;;  %9131 = vmatpush3.bf16.msra.mxu1 %v9130_v26 }
 0x7c2   :  { %9101 = vmatprep.subr.bf16.mxu0 %v9100_v19  ;;  %9133 = vmatprep.subr.bf16.mxu1 %v9132_v5 }
 0x7c5   :  { %9103 = vmatpush3.bf16.msra.mxu0 %v9102_v59  ;;  %9135 = vmatpush3.bf16.msra.mxu1 %v9134_v34 }
 0x7c6   :  { %9105 = vmatprep.subr.bf16.mxu0 %v9104_v13  ;;  %9137 = vmatprep.subr.bf16.mxu1 %v9136_v63 }
 0x7c9   :  { %9107 = vmatpush3.bf16.msra.mxu0 %v9106_v21  ;;  %9139 = vmatpush3.bf16.msra.mxu1 %v9138_v15 }
 0x7ca   :  { %9109 = vmatprep.subr.bf16.mxu0 %v9108_v22  ;;  %9141 = vmatprep.subr.bf16.mxu1 %v9140_v39 }
 0x7cd   :  { %9111 = vmatpush3.bf16.msra.mxu0 %v9110_v31  ;;  %9143 = vmatpush3.bf16.msra.mxu1 %v9142_v32 }
 0x883   :  { %v6097_v1 = vpop.f32.mrb[58].mxu0  ;;  %v6239_v41 = vpop.f32.mrb[50].mxu1 }
 0x884   :  { %v9168_v44 = vadd.f32 %v6097_v1, %v5943_v50  ;;  %v9170_v38 = vadd.f32 %v6239_v41, %v5951_v53  ;;  %v6099_v43 = vpop.f32.mrb[59].mxu0  ;;  %v6241_v48 = vpop.f32.mrb[51].mxu1 }
 0x885   :  { %v9169_v47 = vadd.f32 %v6099_v43, %v5947_v30  ;;  %v9171_v29 = vadd.f32 %v6241_v48, %v5955_v2 }
 0x886   :  { %v6244_v11 = vmax.f32 %v9168_v44, 0.0  ;;  %v6246_v54 = vmax.f32 %v9170_v38, 0.0 }
 0x887   :  { %v6245_v49 = vmax.f32 %v9169_v47, 0.0  ;;  %v6247_v33 = vmax.f32 %v9171_v29, 0.0 }
 0x889   :  { %6383 = vmatprep.mubr.f32.mxu0 %v6245_v49  ;;  %6453 = vmatprep.mubr.f32.mxu1 %v6247_v33 }
 0x88a   :  { %6384 = vmatmul.mubr.f32.vlgmr.msra.gmra.mrb[60].mxu0 %v6244_v11  ;;  %6454 = vmatmul.mubr.f32.vlgmr.msra.gmra.mrb[52].mxu1 %v6246_v54 }
 0x88b   :  { %9615 = shalt.err (!%p9612_p4)
}
 0x88c   :  { %s9616_s6 = scalar_lea.hbm %s11139_s17, 128 }
 0x88d   :  { %p9617_p5 = scmp.ne.s32.totalorder %s11139_s17, %s9616_s6  ;;  %p9620_p6 = scmp.lt.u32.totalorder %s9616_s6, %s11139_s17 }
 0x88f   :  { %p9622_p7 = pnand %p9620_p6, %p9617_p5 }
 0x891   :  { %9625 = shalt.err (!%p9622_p7)
}
 0x892   :  { %6473 = dma.vmem_to_hbm [thread:$0]  %s6468_s28, 128, %s11139_s17, [#allocation6], %s9651_s13, %s9651_s13, %s9652_s30   ;;  %v6549_v7 = vld [vmem:[#allocation25] ss:$0 sm:$0xff] }
 0x95d   :  { %v6886_v27 = vpop.f32.mrb[60].mxu0  ;;  %v6921_v6 = vpop.f32.mrb[52].mxu1 }
 0x95e   :  { %v6887_v56 = vpop.f32.mrb[61].mxu0  ;;  %v6922_v55 = vpop.f32.mrb[53].mxu1 }
 0x95f   :  { %v6888_v57 = vadd.f32 %v6887_v56, %v6886_v27  ;;  %v6923_v0 = vadd.f32 %v6922_v55, %v6921_v6 }
 0x961   :  { %v6386_v60 = vadd.f32 %v6888_v57, %v6549_v7 }
 0x963   :  { %v6456_v58 = vadd.f32 %v6923_v0, %v6386_v60 }
 0x965   :  { %6459 = vst [vmem:[%s11138_s16] sm:$0x3] %v6456_v58 }
 0x966   :  { %9642 = dma.done.wait [#allocation6], 128  }
 0x967   :  { %9643 = vsyncadd [#allocation6], 4294967168 }
 0x968   :  { %6479 = vsyncpa [#allocation5], 1 }
 0x969   :  { %6480 = vsyncpa [#allocation8], 1 }
 0x96a   :  { %6481 = vsyncpa [#allocation11], 1 }
 0x96b   :  { %6482 = vsyncpa [#allocation14], 1 }
 0x96c   :  { %6483 = vsyncpa [#allocation17], 1 }
 0x96d   :  { %6484 = vsyncpa [#allocation20], 1 }
 0x96e   :  { %6485 = vsyncpa [#allocation23], 1 }
 0x96f   :  { %6486 = vsyncpa [#allocation26], 1 }
 0x970   :  { %6487 = vsyncpa [#allocation6], 1 }

</bundles_post_ra>
